<compile_context>
chip_gen: v6e
topology: v6e:2x2x1
jax: 0.10.0
libtpu: 0.0.40
codegen_flags: <defaults>
</compile_context>

<pallas_src>
import functools

import jax
import jax.numpy as jnp
from jax.experimental import pallas as pl
from jax.experimental.pallas import tpu as pltpu


def _round_up(x, m):
    return ((x + m - 1) // m) * m


# ----------------------------------------------------------------------------
# Kernel 1: fused  out = relu(x @ w + b) * scale + shift   (conv-as-im2col + BN)
# bf16 inputs / weights, f32 accumulation + f32 epilogue.  M-tiled, parallel.
# ----------------------------------------------------------------------------
def _mm_relu_bn_kernel(x_ref, w_ref, b_ref, s_ref, t_ref, o_ref):
    y = jnp.dot(x_ref[...], w_ref[...], preferred_element_type=jnp.float32)
    y = jnp.maximum(y + b_ref[...], 0.0)
    o_ref[...] = y * s_ref[...] + t_ref[...]


def mm_relu_bn(x_bf16, w_bf16, b, scale, shift, tm=4096):
    M, K = x_bf16.shape
    N = w_bf16.shape[1]
    # Big row tile (the kernel is otherwise step-overhead bound), but keep at
    # least 2 grid steps when M allows so both v7x TensorCores get work.
    tm_eff = min(tm, _round_up(pl.cdiv(M, 2), 8))
    if tm_eff >= M:
        tm_eff = M
    grid_m = pl.cdiv(M, tm_eff)

    return pl.pallas_call(
        _mm_relu_bn_kernel,
        out_shape=jax.ShapeDtypeStruct((M, N), jnp.float32),
        grid=(grid_m,),
        in_specs=[
            pl.BlockSpec((tm_eff, K), lambda i: (i, 0)),
            pl.BlockSpec((K, N), lambda i: (0, 0)),
            pl.BlockSpec((1, N), lambda i: (0, 0)),
            pl.BlockSpec((1, N), lambda i: (0, 0)),
            pl.BlockSpec((1, N), lambda i: (0, 0)),
        ],
        out_specs=pl.BlockSpec((tm_eff, N), lambda i: (i, 0)),
        compiler_params=pltpu.CompilerParams(dimension_semantics=("parallel",)),
    )(x_bf16, w_bf16, b[None, :], scale[None, :], shift[None, :])


# ----------------------------------------------------------------------------
# Kernel 2: fused g-network + f-network.
# Grid = (mb_pad // BM,).  Each step: all 640 padded pairs for BM batch rows
# -> 4x(Linear+ReLU) at M=BM*640 in bf16 / f32-acc, masked per-batch sum,
# then f_fc1 -> relu -> fc2 -> relu -> fc3 -> log_softmax at M=BM.
# ----------------------------------------------------------------------------
def _gf_kernel(x_ref,
               gw1, gb1, gw2, gb2, gw3, gb3, gw4, gb4,
               fw1, fb1, fw2, fb2, fw3, fb3,
               o_ref, *, num_pairs):
    bf = jnp.bfloat16
    bm, p_pad, f_dim = x_ref.shape

    x = x_ref[...].reshape(bm * p_pad, f_dim)                         # bf16
    h = jnp.dot(x, gw1[...], preferred_element_type=jnp.float32) + gb1[...]
    h = jnp.maximum(h, 0.0)
    h = jnp.dot(h.astype(bf), gw2[...], preferred_element_type=jnp.float32) + gb2[...]
    h = jnp.maximum(h, 0.0)
    h = jnp.dot(h.astype(bf), gw3[...], preferred_element_type=jnp.float32) + gb3[...]
    h = jnp.maximum(h, 0.0)
    h = jnp.dot(h.astype(bf), gw4[...], preferred_element_type=jnp.float32) + gb4[...]
    h = jnp.maximum(h, 0.0)                                           # (bm*p_pad, 256) f32

    # Padded pair rows still give relu(bias-chain) != 0 -> zero them before the sum.
    h = h.reshape(bm, p_pad, h.shape[-1])
    pair_idx = jax.lax.broadcasted_iota(jnp.int32, (bm, p_pad, 1), 1)
    h = jnp.where(pair_idx < num_pairs, h, 0.0)
    xg = jnp.sum(h, axis=1)                                           # (bm, 256) f32

    hf = jnp.dot(xg.astype(bf), fw1[...], preferred_element_type=jnp.float32) + fb1[...]
    hf = jnp.maximum(hf, 0.0)
    hf = jnp.dot(hf.astype(bf), fw2[...], preferred_element_type=jnp.float32) + fb2[...]
    hf = jnp.maximum(hf, 0.0)
    # TODO(synk): F.dropout (p=0.5, training=True by PyTorch default) treated as identity.
    logits = jnp.dot(hf.astype(bf), fw3[...], preferred_element_type=jnp.float32) + fb3[...]
    m = jnp.max(logits, axis=1, keepdims=True)
    s = logits - m
    lse = jnp.log(jnp.sum(jnp.exp(s), axis=1, keepdims=True))
    out = s - lse                                                     # (bm, C) log-probs
    o_ref[...] = out[:, None, :]


def gf_network(x_pairs_bf16, num_pairs, g_params, f_params):
    mb, p_pad, F = x_pairs_bf16.shape
    H = 256
    gw1, gb1, gw2, gb2, gw3, gb3, gw4, gb4 = g_params
    fw1, fb1, fw2, fb2, fw3, fb3 = f_params
    C = fw3.shape[1]
    bf = jnp.bfloat16

    # Match the padded feature dim (63 -> 64) with a zero weight row.
    if gw1.shape[0] != F:
        gw1 = jnp.pad(gw1, ((0, F - gw1.shape[0]), (0, 0)))

    # Batch-block to amortise step overhead and fill the f-MLP rows, but keep
    # >= 2 parallel grid steps when mb allows (v7x dual-TC).
    bm = min(mb, 4)
    if mb >= 2 and pl.cdiv(mb, bm) < 2:
        bm = max(1, mb // 2)
    mb_pad = pl.cdiv(mb, bm) * bm
    if mb_pad != mb:
        x_pairs_bf16 = jnp.pad(x_pairs_bf16, ((0, mb_pad - mb), (0, 0), (0, 0)))

    def const(shape):
        return pl.BlockSpec(shape, lambda b: (0, 0))

    kernel = functools.partial(_gf_kernel, num_pairs=num_pairs)

    out = pl.pallas_call(
        kernel,
        out_shape=jax.ShapeDtypeStruct((mb_pad, 1, C), jnp.float32),
        grid=(mb_pad // bm,),
        in_specs=[
            pl.BlockSpec((bm, p_pad, F), lambda b: (b, 0, 0)),
            const((F, H)), const((1, H)),
            const((H, H)), const((1, H)),
            const((H, H)), const((1, H)),
            const((H, H)), const((1, H)),
            const((H, H)), const((1, H)),
            const((H, H)), const((1, H)),
            const((H, C)), const((1, C)),
        ],
        out_specs=pl.BlockSpec((bm, 1, C), lambda b: (b, 0, 0)),
        compiler_params=pltpu.CompilerParams(
            dimension_semantics=("parallel",),
            vmem_limit_bytes=32 * 1024 * 1024),
    )(
        x_pairs_bf16,
        gw1.astype(bf), gb1[None, :],
        gw2.astype(bf), gb2[None, :],
        gw3.astype(bf), gb3[None, :],
        gw4.astype(bf), gb4[None, :],
        fw1.astype(bf), fb1[None, :],
        fw2.astype(bf), fb2[None, :],
        fw3.astype(bf), fb3[None, :],
    )
    return out[:mb, 0, :]                                             # (mb, C)


# ----------------------------------------------------------------------------
# Plain-JAX glue: NHWC im2col (no transpose), conv layer, init, full forward.
# ----------------------------------------------------------------------------
def im2col_nhwc(x, k=3, stride=2, pad=1):
    N, H, W, C = x.shape
    xp = jnp.pad(x, ((0, 0), (pad, pad), (pad, pad), (0, 0)))
    Ho = (H + 2 * pad - k) // stride + 1
    Wo = (W + 2 * pad - k) // stride + 1
    cols = []
    for di in range(k):
        for dj in range(k):
            cols.append(xp[:, di:di + stride * Ho:stride, dj:dj + stride * Wo:stride, :])
    p = jnp.stack(cols, axis=3)                       # (N, Ho, Wo, k*k, C)  (kh,kw,Cin) order
    p = p.reshape(N * Ho * Wo, k * k * C)             # lane dim = 9*Cin, no transpose
    return p, Ho, Wo


def conv_bn_relu(x_nhwc, w, b, gamma, beta, rmean, rvar, eps=1e-5):
    # conv(stride=2, pad=1) -> relu -> batchnorm(eval), NHWC in / NHWC out.
    # TODO(synk): im2col stays in XLA (fusing it into the matmul kernel would
    # avoid the 9x-expanded patches HBM round trip); bf16 patches halve it.
    N = x_nhwc.shape[0]
    Cout = w.shape[0]
    patches, Ho, Wo = im2col_nhwc(x_nhwc.astype(jnp.bfloat16))
    wm = jnp.transpose(w, (2, 3, 1, 0)).reshape(-1, Cout).astype(jnp.bfloat16)
    scale = gamma / jnp.sqrt(rvar + eps)
    shift = beta - rmean * scale
    y = mm_relu_bn(patches, wm, b, scale, shift)            # (N*Ho*Wo, Cout) f32
    return y.reshape(N, Ho, Wo, Cout)                       # free reshape


def init_params(key):
    ks = list(jax.random.split(key, 16))
    kit = iter(ks)

    def lin(kin, kout, k):
        w = jax.random.normal(k, (kin, kout), jnp.float32) * (1.0 / jnp.sqrt(kin))
        b = jnp.zeros((kout,), jnp.float32)
        return w, b

    conv = []
    cin = 3
    for _ in range(4):
        w = jax.random.normal(next(kit), (24, cin, 3, 3), jnp.float32) * (1.0 / jnp.sqrt(cin * 9))
        b = jnp.zeros((24,), jnp.float32)
        gamma = jnp.ones((24,), jnp.float32)
        beta = jnp.zeros((24,), jnp.float32)
        rmean = jnp.zeros((24,), jnp.float32)
        rvar = jnp.ones((24,), jnp.float32)
        conv.append((w, b, gamma, beta, rmean, rvar))
        cin = 24

    g = []
    w, b = lin(63, 256, next(kit)); g += [w, b]
    for _ in range(3):
        w, b = lin(256, 256, next(kit)); g += [w, b]

    f_fc1 = lin(256, 256, next(kit))
    fc2 = lin(256, 256, next(kit))
    fc3 = lin(256, 10, next(kit))

    # cvt_coord(i) = [(i/5 - 2)/2, (i%5 - 2)/2]  (true division, as in the reference)
    coord = jnp.array([[(i / 5 - 2) / 2.0, (i % 5 - 2) / 2.0] for i in range(25)], jnp.float32)

    return {
        "conv": conv,
        "g": tuple(g),
        "f": (f_fc1[0], f_fc1[1], fc2[0], fc2[1], fc3[0], fc3[1]),
        "coord": coord,
    }


def rn_forward(params, img_nchw, qst):
    # Accept NCHW like the PyTorch module; convert once to NHWC for the conv stack.
    x = jnp.transpose(img_nchw, (0, 2, 3, 1))
    for layer in params["conv"]:
        x = conv_bn_relu(x, *layer)                                   # -> (mb, 5, 5, 24)

    mb, d, _, nc = x.shape
    n_obj = d * d
    x_flat = x.reshape(mb, n_obj, nc)                                  # (mb, 25, 24) NHWC = free
    coord = jnp.broadcast_to(params["coord"][None], (mb, n_obj, 2))
    x_flat = jnp.concatenate([x_flat, coord], axis=2)                  # (mb, 25, 26)

    # pair features: [x_i (varies over axis 2), x_j (varies over axis 1), qst]
    o_i = jnp.broadcast_to(x_flat[:, None, :, :], (mb, n_obj, n_obj, nc + 2))
    o_j = jnp.broadcast_to(x_flat[:, :, None, :], (mb, n_obj, n_obj, nc + 2))
    q = jnp.broadcast_to(qst[:, None, None, :], (mb, n_obj, n_obj, qst.shape[-1]))
    x_full = jnp.concatenate([o_i, o_j, q], axis=3).reshape(mb, n_obj * n_obj, -1)

    num_pairs = n_obj * n_obj                                          # 625
    feat = x_full.shape[-1]                                            # 63
    p_pad = _round_up(num_pairs, 128)                                  # 640
    f_pad = _round_up(feat, 64)                                        # 64 (lane-aligned bf16 rows)
    x_full = x_full.astype(jnp.bfloat16)
    x_full = jnp.pad(x_full, ((0, 0), (0, p_pad - num_pairs), (0, f_pad - feat)))

    # (.squeeze() of x_g in the reference is a no-op for mb > 1)
    return gf_network(x_full, num_pairs, params["g"], params["f"])     # (mb, 10) log-probs


if __name__ == "__main__":
    key = jax.random.PRNGKey(0)
    kimg, kqst, kp = jax.random.split(key, 3)
    mb = 2
    img = jax.random.normal(kimg, (mb, 3, 75, 75), dtype=jnp.float32)   # NCHW, -> d=5
    qst = jax.random.normal(kqst, (mb, 11), dtype=jnp.float32)
    params = init_params(kp)

    fwd = jax.jit(rn_forward)
    out = fwd(params, img, qst)
    out = jax.block_until_ready(out)

    assert out.shape == (mb, 10), out.shape
    assert bool(jnp.all(jnp.isfinite(out)))
    # log_softmax rows should exponentiate-sum to ~1
    assert bool(jnp.allclose(jnp.sum(jnp.exp(out), axis=1), 1.0, atol=1e-3))
    print("KERNEL_OK")
</pallas_src>

<mosaic_0001>
module attributes {stable_mosaic.version = 11 : i64} {
  func.func @_mm_relu_bn_kernel(%arg0: i32, %arg1: memref<1448x27xbf16, #tpu.memory_space<vmem>>, %arg2: memref<27x24xbf16, #tpu.memory_space<vmem>>, %arg3: memref<1x24xf32, #tpu.memory_space<vmem>>, %arg4: memref<1x24xf32, #tpu.memory_space<vmem>>, %arg5: memref<1x24xf32, #tpu.memory_space<vmem>>, %arg6: memref<1448x24xf32, #tpu.memory_space<vmem>>) attributes {dimension_semantics = [#tpu.dimension_semantics<parallel>], iteration_bounds = array<i64: 2>, scalar_prefetch = 0 : i64, scratch_operands = 0 : i64, tpu.core_type = #tpu.core_type<tc>, window_params = [{transform_indices = @transform_0, window_bounds = array<i64: 1448, 27>}, {pipeline_mode = #tpu.pipeline_mode<synchronous>, transform_indices = @transform_1, window_bounds = array<i64: 27, 24>}, {pipeline_mode = #tpu.pipeline_mode<synchronous>, transform_indices = @transform_2, window_bounds = array<i64: 1, 24>}, {pipeline_mode = #tpu.pipeline_mode<synchronous>, transform_indices = @transform_3, window_bounds = array<i64: 1, 24>}, {pipeline_mode = #tpu.pipeline_mode<synchronous>, transform_indices = @transform_4, window_bounds = array<i64: 1, 24>}, {transform_indices = @transform_5, window_bounds = array<i64: 1448, 24>}]} {
    %c0 = arith.constant 0 : index
    %c0_0 = arith.constant 0 : index
    %0 = vector.load %arg1[%c0, %c0_0] : memref<1448x27xbf16, #tpu.memory_space<vmem>>, vector<1448x27xbf16>
    %c0_1 = arith.constant 0 : index
    %c0_2 = arith.constant 0 : index
    %1 = vector.load %arg2[%c0_1, %c0_2] : memref<27x24xbf16, #tpu.memory_space<vmem>>, vector<27x24xbf16>
    %cst = arith.constant dense<0.000000e+00> : vector<1448x24xf32>
    %2 = tpu.matmul %0, %1, %cst {dimension_numbers = #tpu.dot_dimension_numbers<[1], [0], [0], [1], [0, 0, 1, 1], [], []>} : vector<1448x27xbf16>, vector<27x24xbf16>, vector<1448x24xf32> -> vector<1448x24xf32>
    %c0_3 = arith.constant 0 : index
    %c0_4 = arith.constant 0 : index
    %3 = vector.load %arg3[%c0_3, %c0_4] : memref<1x24xf32, #tpu.memory_space<vmem>>, vector<1x24xf32>
    %4 = vector.broadcast %3 : vector<1x24xf32> to vector<1448x24xf32>
    %5 = arith.addf %2, %4 : vector<1448x24xf32>
    %cst_5 = arith.constant 0.000000e+00 : f32
    %6 = vector.broadcast %cst_5 : f32 to vector<1448x24xf32>
    %7 = arith.maximumf %5, %6 : vector<1448x24xf32>
    %c0_6 = arith.constant 0 : index
    %c0_7 = arith.constant 0 : index
    %8 = vector.load %arg4[%c0_6, %c0_7] : memref<1x24xf32, #tpu.memory_space<vmem>>, vector<1x24xf32>
    %9 = vector.broadcast %8 : vector<1x24xf32> to vector<1448x24xf32>
    %10 = arith.mulf %7, %9 : vector<1448x24xf32>
    %c0_8 = arith.constant 0 : index
    %c0_9 = arith.constant 0 : index
    %11 = vector.load %arg5[%c0_8, %c0_9] : memref<1x24xf32, #tpu.memory_space<vmem>>, vector<1x24xf32>
    %12 = vector.broadcast %11 : vector<1x24xf32> to vector<1448x24xf32>
    %13 = arith.addf %10, %12 : vector<1448x24xf32>
    %c0_10 = arith.constant 0 : index
    %c0_11 = arith.constant 0 : index
    %14 = vector.load %arg6[%c0_10, %c0_11] : memref<1448x24xf32, #tpu.memory_space<vmem>>, vector<1448x24xf32>
    tpu.vector_store %arg6[%c0_10, %c0_11], %13 {strides = array<i32>} : memref<1448x24xf32, #tpu.memory_space<vmem>>, vector<1448x24xf32>,
    return
  }
  func.func @transform_0(%arg0: i32) -> (i32, i32) {
    %c0_i32 = arith.constant 0 : i32
    %c0_i32_0 = arith.constant 0 : i32
    return %arg0, %c0_i32 : i32, i32
  }
  func.func @transform_1(%arg0: i32) -> (i32, i32) {
    %c0_i32 = arith.constant 0 : i32
    %c0_i32_0 = arith.constant 0 : i32
    %c0_i32_1 = arith.constant 0 : i32
    return %c0_i32, %c0_i32_0 : i32, i32
  }
  func.func @transform_2(%arg0: i32) -> (i32, i32) {
    %c0_i32 = arith.constant 0 : i32
    %c0_i32_0 = arith.constant 0 : i32
    %c0_i32_1 = arith.constant 0 : i32
    return %c0_i32, %c0_i32_0 : i32, i32
  }
  func.func @transform_3(%arg0: i32) -> (i32, i32) {
    %c0_i32 = arith.constant 0 : i32
    %c0_i32_0 = arith.constant 0 : i32
    %c0_i32_1 = arith.constant 0 : i32
    return %c0_i32, %c0_i32_0 : i32, i32
  }
  func.func @transform_4(%arg0: i32) -> (i32, i32) {
    %c0_i32 = arith.constant 0 : i32
    %c0_i32_0 = arith.constant 0 : i32
    %c0_i32_1 = arith.constant 0 : i32
    return %c0_i32, %c0_i32_0 : i32, i32
  }
  func.func @transform_5(%arg0: i32) -> (i32, i32) {
    %c0_i32 = arith.constant 0 : i32
    %c0_i32_0 = arith.constant 0 : i32
    return %arg0, %c0_i32 : i32, i32
  }
}

module attributes {stable_mosaic.version = 11 : i64} {
  func.func @_mm_relu_bn_kernel(%arg0: i32, %arg1: memref<368x216xbf16, #tpu.memory_space<vmem>>, %arg2: memref<216x24xbf16, #tpu.memory_space<vmem>>, %arg3: memref<1x24xf32, #tpu.memory_space<vmem>>, %arg4: memref<1x24xf32, #tpu.memory_space<vmem>>, %arg5: memref<1x24xf32, #tpu.memory_space<vmem>>, %arg6: memref<368x24xf32, #tpu.memory_space<vmem>>) attributes {dimension_semantics = [#tpu.dimension_semantics<parallel>], iteration_bounds = array<i64: 2>, scalar_prefetch = 0 : i64, scratch_operands = 0 : i64, tpu.core_type = #tpu.core_type<tc>, window_params = [{transform_indices = @transform_0, window_bounds = array<i64: 368, 216>}, {pipeline_mode = #tpu.pipeline_mode<synchronous>, transform_indices = @transform_1, window_bounds = array<i64: 216, 24>}, {pipeline_mode = #tpu.pipeline_mode<synchronous>, transform_indices = @transform_2, window_bounds = array<i64: 1, 24>}, {pipeline_mode = #tpu.pipeline_mode<synchronous>, transform_indices = @transform_3, window_bounds = array<i64: 1, 24>}, {pipeline_mode = #tpu.pipeline_mode<synchronous>, transform_indices = @transform_4, window_bounds = array<i64: 1, 24>}, {transform_indices = @transform_5, window_bounds = array<i64: 368, 24>}]} {
    %c0 = arith.constant 0 : index
    %c0_0 = arith.constant 0 : index
    %0 = vector.load %arg1[%c0, %c0_0] : memref<368x216xbf16, #tpu.memory_space<vmem>>, vector<368x216xbf16>
    %c0_1 = arith.constant 0 : index
    %c0_2 = arith.constant 0 : index
    %1 = vector.load %arg2[%c0_1, %c0_2] : memref<216x24xbf16, #tpu.memory_space<vmem>>, vector<216x24xbf16>
    %cst = arith.constant dense<0.000000e+00> : vector<368x24xf32>
    %2 = tpu.matmul %0, %1, %cst {dimension_numbers = #tpu.dot_dimension_numbers<[1], [0], [0], [1], [0, 0, 1, 1], [], []>} : vector<368x216xbf16>, vector<216x24xbf16>, vector<368x24xf32> -> vector<368x24xf32>
    %c0_3 = arith.constant 0 : index
    %c0_4 = arith.constant 0 : index
    %3 = vector.load %arg3[%c0_3, %c0_4] : memref<1x24xf32, #tpu.memory_space<vmem>>, vector<1x24xf32>
    %4 = vector.broadcast %3 : vector<1x24xf32> to vector<368x24xf32>
    %5 = arith.addf %2, %4 : vector<368x24xf32>
    %cst_5 = arith.constant 0.000000e+00 : f32
    %6 = vector.broadcast %cst_5 : f32 to vector<368x24xf32>
    %7 = arith.maximumf %5, %6 : vector<368x24xf32>
    %c0_6 = arith.constant 0 : index
    %c0_7 = arith.constant 0 : index
    %8 = vector.load %arg4[%c0_6, %c0_7] : memref<1x24xf32, #tpu.memory_space<vmem>>, vector<1x24xf32>
    %9 = vector.broadcast %8 : vector<1x24xf32> to vector<368x24xf32>
    %10 = arith.mulf %7, %9 : vector<368x24xf32>
    %c0_8 = arith.constant 0 : index
    %c0_9 = arith.constant 0 : index
    %11 = vector.load %arg5[%c0_8, %c0_9] : memref<1x24xf32, #tpu.memory_space<vmem>>, vector<1x24xf32>
    %12 = vector.broadcast %11 : vector<1x24xf32> to vector<368x24xf32>
    %13 = arith.addf %10, %12 : vector<368x24xf32>
    %c0_10 = arith.constant 0 : index
    %c0_11 = arith.constant 0 : index
    %14 = vector.load %arg6[%c0_10, %c0_11] : memref<368x24xf32, #tpu.memory_space<vmem>>, vector<368x24xf32>
    tpu.vector_store %arg6[%c0_10, %c0_11], %13 {strides = array<i32>} : memref<368x24xf32, #tpu.memory_space<vmem>>, vector<368x24xf32>,
    return
  }
  func.func @transform_0(%arg0: i32) -> (i32, i32) {
    %c0_i32 = arith.constant 0 : i32
    %c0_i32_0 = arith.constant 0 : i32
    return %arg0, %c0_i32 : i32, i32
  }
  func.func @transform_1(%arg0: i32) -> (i32, i32) {
    %c0_i32 = arith.constant 0 : i32
    %c0_i32_0 = arith.constant 0 : i32
    %c0_i32_1 = arith.constant 0 : i32
    return %c0_i32, %c0_i32_0 : i32, i32
  }
  func.func @transform_2(%arg0: i32) -> (i32, i32) {
    %c0_i32 = arith.constant 0 : i32
    %c0_i32_0 = arith.constant 0 : i32
    %c0_i32_1 = arith.constant 0 : i32
    return %c0_i32, %c0_i32_0 : i32, i32
  }
  func.func @transform_3(%arg0: i32) -> (i32, i32) {
    %c0_i32 = arith.constant 0 : i32
    %c0_i32_0 = arith.constant 0 : i32
    %c0_i32_1 = arith.constant 0 : i32
    return %c0_i32, %c0_i32_0 : i32, i32
  }
  func.func @transform_4(%arg0: i32) -> (i32, i32) {
    %c0_i32 = arith.constant 0 : i32
    %c0_i32_0 = arith.constant 0 : i32
    %c0_i32_1 = arith.constant 0 : i32
    return %c0_i32, %c0_i32_0 : i32, i32
  }
  func.func @transform_5(%arg0: i32) -> (i32, i32) {
    %c0_i32 = arith.constant 0 : i32
    %c0_i32_0 = arith.constant 0 : i32
    return %arg0, %c0_i32 : i32, i32
  }
}

module attributes {stable_mosaic.version = 11 : i64} {
  func.func @_mm_relu_bn_kernel(%arg0: i32, %arg1: memref<104x216xbf16, #tpu.memory_space<vmem>>, %arg2: memref<216x24xbf16, #tpu.memory_space<vmem>>, %arg3: memref<1x24xf32, #tpu.memory_space<vmem>>, %arg4: memref<1x24xf32, #tpu.memory_space<vmem>>, %arg5: memref<1x24xf32, #tpu.memory_space<vmem>>, %arg6: memref<104x24xf32, #tpu.memory_space<vmem>>) attributes {dimension_semantics = [#tpu.dimension_semantics<parallel>], iteration_bounds = array<i64: 2>, scalar_prefetch = 0 : i64, scratch_operands = 0 : i64, tpu.core_type = #tpu.core_type<tc>, window_params = [{transform_indices = @transform_0, window_bounds = array<i64: 104, 216>}, {pipeline_mode = #tpu.pipeline_mode<synchronous>, transform_indices = @transform_1, window_bounds = array<i64: 216, 24>}, {pipeline_mode = #tpu.pipeline_mode<synchronous>, transform_indices = @transform_2, window_bounds = array<i64: 1, 24>}, {pipeline_mode = #tpu.pipeline_mode<synchronous>, transform_indices = @transform_3, window_bounds = array<i64: 1, 24>}, {pipeline_mode = #tpu.pipeline_mode<synchronous>, transform_indices = @transform_4, window_bounds = array<i64: 1, 24>}, {transform_indices = @transform_5, window_bounds = array<i64: 104, 24>}]} {
    %c0 = arith.constant 0 : index
    %c0_0 = arith.constant 0 : index
    %0 = vector.load %arg1[%c0, %c0_0] : memref<104x216xbf16, #tpu.memory_space<vmem>>, vector<104x216xbf16>
    %c0_1 = arith.constant 0 : index
    %c0_2 = arith.constant 0 : index
    %1 = vector.load %arg2[%c0_1, %c0_2] : memref<216x24xbf16, #tpu.memory_space<vmem>>, vector<216x24xbf16>
    %cst = arith.constant dense<0.000000e+00> : vector<104x24xf32>
    %2 = tpu.matmul %0, %1, %cst {dimension_numbers = #tpu.dot_dimension_numbers<[1], [0], [0], [1], [0, 0, 1, 1], [], []>} : vector<104x216xbf16>, vector<216x24xbf16>, vector<104x24xf32> -> vector<104x24xf32>
    %c0_3 = arith.constant 0 : index
    %c0_4 = arith.constant 0 : index
    %3 = vector.load %arg3[%c0_3, %c0_4] : memref<1x24xf32, #tpu.memory_space<vmem>>, vector<1x24xf32>
    %4 = vector.broadcast %3 : vector<1x24xf32> to vector<104x24xf32>
    %5 = arith.addf %2, %4 : vector<104x24xf32>
    %cst_5 = arith.constant 0.000000e+00 : f32
    %6 = vector.broadcast %cst_5 : f32 to vector<104x24xf32>
    %7 = arith.maximumf %5, %6 : vector<104x24xf32>
    %c0_6 = arith.constant 0 : index
    %c0_7 = arith.constant 0 : index
    %8 = vector.load %arg4[%c0_6, %c0_7] : memref<1x24xf32, #tpu.memory_space<vmem>>, vector<1x24xf32>
    %9 = vector.broadcast %8 : vector<1x24xf32> to vector<104x24xf32>
    %10 = arith.mulf %7, %9 : vector<104x24xf32>
    %c0_8 = arith.constant 0 : index
    %c0_9 = arith.constant 0 : index
    %11 = vector.load %arg5[%c0_8, %c0_9] : memref<1x24xf32, #tpu.memory_space<vmem>>, vector<1x24xf32>
    %12 = vector.broadcast %11 : vector<1x24xf32> to vector<104x24xf32>
    %13 = arith.addf %10, %12 : vector<104x24xf32>
    %c0_10 = arith.constant 0 : index
    %c0_11 = arith.constant 0 : index
    %14 = vector.load %arg6[%c0_10, %c0_11] : memref<104x24xf32, #tpu.memory_space<vmem>>, vector<104x24xf32>
    tpu.vector_store %arg6[%c0_10, %c0_11], %13 {strides = array<i32>} : memref<104x24xf32, #tpu.memory_space<vmem>>, vector<104x24xf32>,
    return
  }
  func.func @transform_0(%arg0: i32) -> (i32, i32) {
    %c0_i32 = arith.constant 0 : i32
    %c0_i32_0 = arith.constant 0 : i32
    return %arg0, %c0_i32 : i32, i32
  }
  func.func @transform_1(%arg0: i32) -> (i32, i32) {
    %c0_i32 = arith.constant 0 : i32
    %c0_i32_0 = arith.constant 0 : i32
    %c0_i32_1 = arith.constant 0 : i32
    return %c0_i32, %c0_i32_0 : i32, i32
  }
  func.func @transform_2(%arg0: i32) -> (i32, i32) {
    %c0_i32 = arith.constant 0 : i32
    %c0_i32_0 = arith.constant 0 : i32
    %c0_i32_1 = arith.constant 0 : i32
    return %c0_i32, %c0_i32_0 : i32, i32
  }
  func.func @transform_3(%arg0: i32) -> (i32, i32) {
    %c0_i32 = arith.constant 0 : i32
    %c0_i32_0 = arith.constant 0 : i32
    %c0_i32_1 = arith.constant 0 : i32
    return %c0_i32, %c0_i32_0 : i32, i32
  }
  func.func @transform_4(%arg0: i32) -> (i32, i32) {
    %c0_i32 = arith.constant 0 : i32
    %c0_i32_0 = arith.constant 0 : i32
    %c0_i32_1 = arith.constant 0 : i32
    return %c0_i32, %c0_i32_0 : i32, i32
  }
  func.func @transform_5(%arg0: i32) -> (i32, i32) {
    %c0_i32 = arith.constant 0 : i32
    %c0_i32_0 = arith.constant 0 : i32
    return %arg0, %c0_i32 : i32, i32
  }
}

module attributes {stable_mosaic.version = 11 : i64} {
  func.func @_mm_relu_bn_kernel(%arg0: i32, %arg1: memref<32x216xbf16, #tpu.memory_space<vmem>>, %arg2: memref<216x24xbf16, #tpu.memory_space<vmem>>, %arg3: memref<1x24xf32, #tpu.memory_space<vmem>>, %arg4: memref<1x24xf32, #tpu.memory_space<vmem>>, %arg5: memref<1x24xf32, #tpu.memory_space<vmem>>, %arg6: memref<32x24xf32, #tpu.memory_space<vmem>>) attributes {dimension_semantics = [#tpu.dimension_semantics<parallel>], iteration_bounds = array<i64: 2>, scalar_prefetch = 0 : i64, scratch_operands = 0 : i64, tpu.core_type = #tpu.core_type<tc>, window_params = [{transform_indices = @transform_0, window_bounds = array<i64: 32, 216>}, {pipeline_mode = #tpu.pipeline_mode<synchronous>, transform_indices = @transform_1, window_bounds = array<i64: 216, 24>}, {pipeline_mode = #tpu.pipeline_mode<synchronous>, transform_indices = @transform_2, window_bounds = array<i64: 1, 24>}, {pipeline_mode = #tpu.pipeline_mode<synchronous>, transform_indices = @transform_3, window_bounds = array<i64: 1, 24>}, {pipeline_mode = #tpu.pipeline_mode<synchronous>, transform_indices = @transform_4, window_bounds = array<i64: 1, 24>}, {transform_indices = @transform_5, window_bounds = array<i64: 32, 24>}]} {
    %c0 = arith.constant 0 : index
    %c0_0 = arith.constant 0 : index
    %0 = vector.load %arg1[%c0, %c0_0] : memref<32x216xbf16, #tpu.memory_space<vmem>>, vector<32x216xbf16>
    %c0_1 = arith.constant 0 : index
    %c0_2 = arith.constant 0 : index
    %1 = vector.load %arg2[%c0_1, %c0_2] : memref<216x24xbf16, #tpu.memory_space<vmem>>, vector<216x24xbf16>
    %cst = arith.constant dense<0.000000e+00> : vector<32x24xf32>
    %2 = tpu.matmul %0, %1, %cst {dimension_numbers = #tpu.dot_dimension_numbers<[1], [0], [0], [1], [0, 0, 1, 1], [], []>} : vector<32x216xbf16>, vector<216x24xbf16>, vector<32x24xf32> -> vector<32x24xf32>
    %c0_3 = arith.constant 0 : index
    %c0_4 = arith.constant 0 : index
    %3 = vector.load %arg3[%c0_3, %c0_4] : memref<1x24xf32, #tpu.memory_space<vmem>>, vector<1x24xf32>
    %4 = vector.broadcast %3 : vector<1x24xf32> to vector<32x24xf32>
    %5 = arith.addf %2, %4 : vector<32x24xf32>
    %cst_5 = arith.constant 0.000000e+00 : f32
    %6 = vector.broadcast %cst_5 : f32 to vector<32x24xf32>
    %7 = arith.maximumf %5, %6 : vector<32x24xf32>
    %c0_6 = arith.constant 0 : index
    %c0_7 = arith.constant 0 : index
    %8 = vector.load %arg4[%c0_6, %c0_7] : memref<1x24xf32, #tpu.memory_space<vmem>>, vector<1x24xf32>
    %9 = vector.broadcast %8 : vector<1x24xf32> to vector<32x24xf32>
    %10 = arith.mulf %7, %9 : vector<32x24xf32>
    %c0_8 = arith.constant 0 : index
    %c0_9 = arith.constant 0 : index
    %11 = vector.load %arg5[%c0_8, %c0_9] : memref<1x24xf32, #tpu.memory_space<vmem>>, vector<1x24xf32>
    %12 = vector.broadcast %11 : vector<1x24xf32> to vector<32x24xf32>
    %13 = arith.addf %10, %12 : vector<32x24xf32>
    %c0_10 = arith.constant 0 : index
    %c0_11 = arith.constant 0 : index
    %14 = vector.load %arg6[%c0_10, %c0_11] : memref<32x24xf32, #tpu.memory_space<vmem>>, vector<32x24xf32>
    tpu.vector_store %arg6[%c0_10, %c0_11], %13 {strides = array<i32>} : memref<32x24xf32, #tpu.memory_space<vmem>>, vector<32x24xf32>,
    return
  }
  func.func @transform_0(%arg0: i32) -> (i32, i32) {
    %c0_i32 = arith.constant 0 : i32
    %c0_i32_0 = arith.constant 0 : i32
    return %arg0, %c0_i32 : i32, i32
  }
  func.func @transform_1(%arg0: i32) -> (i32, i32) {
    %c0_i32 = arith.constant 0 : i32
    %c0_i32_0 = arith.constant 0 : i32
    %c0_i32_1 = arith.constant 0 : i32
    return %c0_i32, %c0_i32_0 : i32, i32
  }
  func.func @transform_2(%arg0: i32) -> (i32, i32) {
    %c0_i32 = arith.constant 0 : i32
    %c0_i32_0 = arith.constant 0 : i32
    %c0_i32_1 = arith.constant 0 : i32
    return %c0_i32, %c0_i32_0 : i32, i32
  }
  func.func @transform_3(%arg0: i32) -> (i32, i32) {
    %c0_i32 = arith.constant 0 : i32
    %c0_i32_0 = arith.constant 0 : i32
    %c0_i32_1 = arith.constant 0 : i32
    return %c0_i32, %c0_i32_0 : i32, i32
  }
  func.func @transform_4(%arg0: i32) -> (i32, i32) {
    %c0_i32 = arith.constant 0 : i32
    %c0_i32_0 = arith.constant 0 : i32
    %c0_i32_1 = arith.constant 0 : i32
    return %c0_i32, %c0_i32_0 : i32, i32
  }
  func.func @transform_5(%arg0: i32) -> (i32, i32) {
    %c0_i32 = arith.constant 0 : i32
    %c0_i32_0 = arith.constant 0 : i32
    return %arg0, %c0_i32 : i32, i32
  }
}

module attributes {stable_mosaic.version = 11 : i64} {
  func.func @_gf_kernel(%arg0: i32, %arg1: memref<1x640x64xbf16, #tpu.memory_space<vmem>>, %arg2: memref<64x256xbf16, #tpu.memory_space<vmem>>, %arg3: memref<1x256xf32, #tpu.memory_space<vmem>>, %arg4: memref<256x256xbf16, #tpu.memory_space<vmem>>, %arg5: memref<1x256xf32, #tpu.memory_space<vmem>>, %arg6: memref<256x256xbf16, #tpu.memory_space<vmem>>, %arg7: memref<1x256xf32, #tpu.memory_space<vmem>>, %arg8: memref<256x256xbf16, #tpu.memory_space<vmem>>, %arg9: memref<1x256xf32, #tpu.memory_space<vmem>>, %arg10: memref<256x256xbf16, #tpu.memory_space<vmem>>, %arg11: memref<1x256xf32, #tpu.memory_space<vmem>>, %arg12: memref<256x256xbf16, #tpu.memory_space<vmem>>, %arg13: memref<1x256xf32, #tpu.memory_space<vmem>>, %arg14: memref<256x10xbf16, #tpu.memory_space<vmem>>, %arg15: memref<1x10xf32, #tpu.memory_space<vmem>>, %arg16: memref<1x1x10xf32, #tpu.memory_space<vmem>>) attributes {dimension_semantics = [#tpu.dimension_semantics<parallel>], iteration_bounds = array<i64: 2>, scalar_prefetch = 0 : i64, scratch_operands = 0 : i64, tpu.core_type = #tpu.core_type<tc>, window_params = [{transform_indices = @transform_0, window_bounds = array<i64: 1, 640, 64>}, {pipeline_mode = #tpu.pipeline_mode<synchronous>, transform_indices = @transform_1, window_bounds = array<i64: 64, 256>}, {pipeline_mode = #tpu.pipeline_mode<synchronous>, transform_indices = @transform_2, window_bounds = array<i64: 1, 256>}, {pipeline_mode = #tpu.pipeline_mode<synchronous>, transform_indices = @transform_3, window_bounds = array<i64: 256, 256>}, {pipeline_mode = #tpu.pipeline_mode<synchronous>, transform_indices = @transform_4, window_bounds = array<i64: 1, 256>}, {pipeline_mode = #tpu.pipeline_mode<synchronous>, transform_indices = @transform_5, window_bounds = array<i64: 256, 256>}, {pipeline_mode = #tpu.pipeline_mode<synchronous>, transform_indices = @transform_6, window_bounds = array<i64: 1, 256>}, {pipeline_mode = #tpu.pipeline_mode<synchronous>, transform_indices = @transform_7, window_bounds = array<i64: 256, 256>}, {pipeline_mode = #tpu.pipeline_mode<synchronous>, transform_indices = @transform_8, window_bounds = array<i64: 1, 256>}, {pipeline_mode = #tpu.pipeline_mode<synchronous>, transform_indices = @transform_9, window_bounds = array<i64: 256, 256>}, {pipeline_mode = #tpu.pipeline_mode<synchronous>, transform_indices = @transform_10, window_bounds = array<i64: 1, 256>}, {pipeline_mode = #tpu.pipeline_mode<synchronous>, transform_indices = @transform_11, window_bounds = array<i64: 256, 256>}, {pipeline_mode = #tpu.pipeline_mode<synchronous>, transform_indices = @transform_12, window_bounds = array<i64: 1, 256>}, {pipeline_mode = #tpu.pipeline_mode<synchronous>, transform_indices = @transform_13, window_bounds = array<i64: 256, 10>}, {pipeline_mode = #tpu.pipeline_mode<synchronous>, transform_indices = @transform_14, window_bounds = array<i64: 1, 10>}, {transform_indices = @transform_15, window_bounds = array<i64: 1, 1, 10>}]} {
    %c0 = arith.constant 0 : index
    %c0_0 = arith.constant 0 : index
    %c0_1 = arith.constant 0 : index
    %0 = vector.load %arg1[%c0, %c0_0, %c0_1] : memref<1x640x64xbf16, #tpu.memory_space<vmem>>, vector<1x640x64xbf16>
    %1 = vector.shape_cast %0 : vector<1x640x64xbf16> to vector<640x64xbf16>
    %c0_2 = arith.constant 0 : index
    %c0_3 = arith.constant 0 : index
    %2 = vector.load %arg2[%c0_2, %c0_3] : memref<64x256xbf16, #tpu.memory_space<vmem>>, vector<64x256xbf16>
    %cst = arith.constant dense<0.000000e+00> : vector<640x256xf32>
    %3 = tpu.matmul %1, %2, %cst {dimension_numbers = #tpu.dot_dimension_numbers<[1], [0], [0], [1], [0, 0, 1, 1], [], []>} : vector<640x64xbf16>, vector<64x256xbf16>, vector<640x256xf32> -> vector<640x256xf32>
    %c0_4 = arith.constant 0 : index
    %c0_5 = arith.constant 0 : index
    %4 = vector.load %arg3[%c0_4, %c0_5] : memref<1x256xf32, #tpu.memory_space<vmem>>, vector<1x256xf32>
    %5 = vector.broadcast %4 : vector<1x256xf32> to vector<640x256xf32>
    %6 = arith.addf %3, %5 : vector<640x256xf32>
    %cst_6 = arith.constant 0.000000e+00 : f32
    %7 = vector.broadcast %cst_6 : f32 to vector<640x256xf32>
    %8 = arith.maximumf %6, %7 : vector<640x256xf32>
    %9 = arith.truncf %8 : vector<640x256xf32> to vector<640x256xbf16>
    %c0_7 = arith.constant 0 : index
    %c0_8 = arith.constant 0 : index
    %10 = vector.load %arg4[%c0_7, %c0_8] : memref<256x256xbf16, #tpu.memory_space<vmem>>, vector<256x256xbf16>
    %cst_9 = arith.constant dense<0.000000e+00> : vector<640x256xf32>
    %11 = tpu.matmul %9, %10, %cst_9 {dimension_numbers = #tpu.dot_dimension_numbers<[1], [0], [0], [1], [0, 0, 1, 1], [], []>} : vector<640x256xbf16>, vector<256x256xbf16>, vector<640x256xf32> -> vector<640x256xf32>
    %c0_10 = arith.constant 0 : index
    %c0_11 = arith.constant 0 : index
    %12 = vector.load %arg5[%c0_10, %c0_11] : memref<1x256xf32, #tpu.memory_space<vmem>>, vector<1x256xf32>
    %13 = vector.broadcast %12 : vector<1x256xf32> to vector<640x256xf32>
    %14 = arith.addf %11, %13 : vector<640x256xf32>
    %cst_12 = arith.constant 0.000000e+00 : f32
    %15 = vector.broadcast %cst_12 : f32 to vector<640x256xf32>
    %16 = arith.maximumf %14, %15 : vector<640x256xf32>
    %17 = arith.truncf %16 : vector<640x256xf32> to vector<640x256xbf16>
    %c0_13 = arith.constant 0 : index
    %c0_14 = arith.constant 0 : index
    %18 = vector.load %arg6[%c0_13, %c0_14] : memref<256x256xbf16, #tpu.memory_space<vmem>>, vector<256x256xbf16>
    %cst_15 = arith.constant dense<0.000000e+00> : vector<640x256xf32>
    %19 = tpu.matmul %17, %18, %cst_15 {dimension_numbers = #tpu.dot_dimension_numbers<[1], [0], [0], [1], [0, 0, 1, 1], [], []>} : vector<640x256xbf16>, vector<256x256xbf16>, vector<640x256xf32> -> vector<640x256xf32>
    %c0_16 = arith.constant 0 : index
    %c0_17 = arith.constant 0 : index
    %20 = vector.load %arg7[%c0_16, %c0_17] : memref<1x256xf32, #tpu.memory_space<vmem>>, vector<1x256xf32>
    %21 = vector.broadcast %20 : vector<1x256xf32> to vector<640x256xf32>
    %22 = arith.addf %19, %21 : vector<640x256xf32>
    %cst_18 = arith.constant 0.000000e+00 : f32
    %23 = vector.broadcast %cst_18 : f32 to vector<640x256xf32>
    %24 = arith.maximumf %22, %23 : vector<640x256xf32>
    %25 = arith.truncf %24 : vector<640x256xf32> to vector<640x256xbf16>
    %c0_19 = arith.constant 0 : index
    %c0_20 = arith.constant 0 : index
    %26 = vector.load %arg8[%c0_19, %c0_20] : memref<256x256xbf16, #tpu.memory_space<vmem>>, vector<256x256xbf16>
    %cst_21 = arith.constant dense<0.000000e+00> : vector<640x256xf32>
    %27 = tpu.matmul %25, %26, %cst_21 {dimension_numbers = #tpu.dot_dimension_numbers<[1], [0], [0], [1], [0, 0, 1, 1], [], []>} : vector<640x256xbf16>, vector<256x256xbf16>, vector<640x256xf32> -> vector<640x256xf32>
    %c0_22 = arith.constant 0 : index
    %c0_23 = arith.constant 0 : index
    %28 = vector.load %arg9[%c0_22, %c0_23] : memref<1x256xf32, #tpu.memory_space<vmem>>, vector<1x256xf32>
    %29 = vector.broadcast %28 : vector<1x256xf32> to vector<640x256xf32>
    %30 = arith.addf %27, %29 : vector<640x256xf32>
    %cst_24 = arith.constant 0.000000e+00 : f32
    %31 = vector.broadcast %cst_24 : f32 to vector<640x256xf32>
    %32 = arith.maximumf %30, %31 : vector<640x256xf32>
    %33 = vector.shape_cast %32 : vector<640x256xf32> to vector<1x640x256xf32>
    %34 = tpu.iota {dimensions = array<i32: 1>} : vector<1x640x1xi32>
    %c625_i32 = arith.constant 625 : i32
    %35 = vector.broadcast %c625_i32 : i32 to vector<1x640x1xi32>
    %36 = arith.cmpi slt, %34, %35 : vector<1x640x1xi32>
    %cst_25 = arith.constant 0.000000e+00 : f32
    %37 = vector.shape_cast %36 : vector<1x640x1xi1> to vector<1x640x1xi1>
    %38 = vector.broadcast %37 : vector<1x640x1xi1> to vector<1x640x256xi1>
    %39 = vector.broadcast %cst_25 : f32 to vector<1x640x256xf32>
    %40 = arith.select %38, %33, %39 : vector<1x640x256xi1>, vector<1x640x256xf32>
    %cst_26 = arith.constant dense<0.000000e+00> : vector<1x256xf32>
    %41 = vector.multi_reduction <add>, %40, %cst_26 [1] : vector<1x640x256xf32> to vector<1x256xf32>
    %42 = arith.truncf %41 : vector<1x256xf32> to vector<1x256xbf16>
    %c0_27 = arith.constant 0 : index
    %c0_28 = arith.constant 0 : index
    %43 = vector.load %arg10[%c0_27, %c0_28] : memref<256x256xbf16, #tpu.memory_space<vmem>>, vector<256x256xbf16>
    %cst_29 = arith.constant dense<0.000000e+00> : vector<1x256xf32>
    %44 = tpu.matmul %42, %43, %cst_29 {dimension_numbers = #tpu.dot_dimension_numbers<[1], [0], [0], [1], [0, 0, 1, 1], [], []>} : vector<1x256xbf16>, vector<256x256xbf16>, vector<1x256xf32> -> vector<1x256xf32>
    %c0_30 = arith.constant 0 : index
    %c0_31 = arith.constant 0 : index
    %45 = vector.load %arg11[%c0_30, %c0_31] : memref<1x256xf32, #tpu.memory_space<vmem>>, vector<1x256xf32>
    %46 = arith.addf %44, %45 : vector<1x256xf32>
    %cst_32 = arith.constant 0.000000e+00 : f32
    %47 = vector.broadcast %cst_32 : f32 to vector<1x256xf32>
    %48 = arith.maximumf %46, %47 : vector<1x256xf32>
    %49 = arith.truncf %48 : vector<1x256xf32> to vector<1x256xbf16>
    %c0_33 = arith.constant 0 : index
    %c0_34 = arith.constant 0 : index
    %50 = vector.load %arg12[%c0_33, %c0_34] : memref<256x256xbf16, #tpu.memory_space<vmem>>, vector<256x256xbf16>
    %cst_35 = arith.constant dense<0.000000e+00> : vector<1x256xf32>
    %51 = tpu.matmul %49, %50, %cst_35 {dimension_numbers = #tpu.dot_dimension_numbers<[1], [0], [0], [1], [0, 0, 1, 1], [], []>} : vector<1x256xbf16>, vector<256x256xbf16>, vector<1x256xf32> -> vector<1x256xf32>
    %c0_36 = arith.constant 0 : index
    %c0_37 = arith.constant 0 : index
    %52 = vector.load %arg13[%c0_36, %c0_37] : memref<1x256xf32, #tpu.memory_space<vmem>>, vector<1x256xf32>
    %53 = arith.addf %51, %52 : vector<1x256xf32>
    %cst_38 = arith.constant 0.000000e+00 : f32
    %54 = vector.broadcast %cst_38 : f32 to vector<1x256xf32>
    %55 = arith.maximumf %53, %54 : vector<1x256xf32>
    %56 = arith.truncf %55 : vector<1x256xf32> to vector<1x256xbf16>
    %c0_39 = arith.constant 0 : index
    %c0_40 = arith.constant 0 : index
    %57 = vector.load %arg14[%c0_39, %c0_40] : memref<256x10xbf16, #tpu.memory_space<vmem>>, vector<256x10xbf16>
    %cst_41 = arith.constant dense<0.000000e+00> : vector<1x10xf32>
    %58 = tpu.matmul %56, %57, %cst_41 {dimension_numbers = #tpu.dot_dimension_numbers<[1], [0], [0], [1], [0, 0, 1, 1], [], []>} : vector<1x256xbf16>, vector<256x10xbf16>, vector<1x10xf32> -> vector<1x10xf32>
    %c0_42 = arith.constant 0 : index
    %c0_43 = arith.constant 0 : index
    %59 = vector.load %arg15[%c0_42, %c0_43] : memref<1x10xf32, #tpu.memory_space<vmem>>, vector<1x10xf32>
    %60 = arith.addf %58, %59 : vector<1x10xf32>
    %cst_44 = arith.constant dense<0xFF800000> : vector<1xf32>
    %61 = vector.multi_reduction <maximumf>, %60, %cst_44 [1] : vector<1x10xf32> to vector<1xf32>
    %62 = vector.shape_cast %61 : vector<1xf32> to vector<1x1xf32>
    %63 = vector.broadcast %62 : vector<1x1xf32> to vector<1x10xf32>
    %64 = arith.subf %60, %63 : vector<1x10xf32>
    %65 = math.exp %64 : vector<1x10xf32>
    %cst_45 = arith.constant dense<0.000000e+00> : vector<1xf32>
    %66 = vector.multi_reduction <add>, %65, %cst_45 [1] : vector<1x10xf32> to vector<1xf32>
    %67 = vector.shape_cast %66 : vector<1xf32> to vector<1x1xf32>
    %68 = math.log %67 : vector<1x1xf32>
    %69 = vector.broadcast %68 : vector<1x1xf32> to vector<1x10xf32>
    %70 = arith.subf %64, %69 : vector<1x10xf32>
    %71 = vector.shape_cast %70 : vector<1x10xf32> to vector<1x1x10xf32>
    %c0_46 = arith.constant 0 : index
    %c0_47 = arith.constant 0 : index
    %c0_48 = arith.constant 0 : index
    %72 = vector.load %arg16[%c0_46, %c0_47, %c0_48] : memref<1x1x10xf32, #tpu.memory_space<vmem>>, vector<1x1x10xf32>
    tpu.vector_store %arg16[%c0_46, %c0_47, %c0_48], %71 {strides = array<i32>} : memref<1x1x10xf32, #tpu.memory_space<vmem>>, vector<1x1x10xf32>,
    return
  }
  func.func @transform_0(%arg0: i32) -> (i32, i32, i32) {
    %c0_i32 = arith.constant 0 : i32
    %c0_i32_0 = arith.constant 0 : i32
    %c0_i32_1 = arith.constant 0 : i32
    return %arg0, %c0_i32, %c0_i32_0 : i32, i32, i32
  }
  func.func @transform_1(%arg0: i32) -> (i32, i32) {
    %c0_i32 = arith.constant 0 : i32
    %c0_i32_0 = arith.constant 0 : i32
    %c0_i32_1 = arith.constant 0 : i32
    return %c0_i32, %c0_i32_0 : i32, i32
  }
  func.func @transform_2(%arg0: i32) -> (i32, i32) {
    %c0_i32 = arith.constant 0 : i32
    %c0_i32_0 = arith.constant 0 : i32
    %c0_i32_1 = arith.constant 0 : i32
    return %c0_i32, %c0_i32_0 : i32, i32
  }
  func.func @transform_3(%arg0: i32) -> (i32, i32) {
    %c0_i32 = arith.constant 0 : i32
    %c0_i32_0 = arith.constant 0 : i32
    %c0_i32_1 = arith.constant 0 : i32
    return %c0_i32, %c0_i32_0 : i32, i32
  }
  func.func @transform_4(%arg0: i32) -> (i32, i32) {
    %c0_i32 = arith.constant 0 : i32
    %c0_i32_0 = arith.constant 0 : i32
    %c0_i32_1 = arith.constant 0 : i32
    return %c0_i32, %c0_i32_0 : i32, i32
  }
  func.func @transform_5(%arg0: i32) -> (i32, i32) {
    %c0_i32 = arith.constant 0 : i32
    %c0_i32_0 = arith.constant 0 : i32
    %c0_i32_1 = arith.constant 0 : i32
    return %c0_i32, %c0_i32_0 : i32, i32
  }
  func.func @transform_6(%arg0: i32) -> (i32, i32) {
    %c0_i32 = arith.constant 0 : i32
    %c0_i32_0 = arith.constant 0 : i32
    %c0_i32_1 = arith.constant 0 : i32
    return %c0_i32, %c0_i32_0 : i32, i32
  }
  func.func @transform_7(%arg0: i32) -> (i32, i32) {
    %c0_i32 = arith.constant 0 : i32
    %c0_i32_0 = arith.constant 0 : i32
    %c0_i32_1 = arith.constant 0 : i32
    return %c0_i32, %c0_i32_0 : i32, i32
  }
  func.func @transform_8(%arg0: i32) -> (i32, i32) {
    %c0_i32 = arith.constant 0 : i32
    %c0_i32_0 = arith.constant 0 : i32
    %c0_i32_1 = arith.constant 0 : i32
    return %c0_i32, %c0_i32_0 : i32, i32
  }
  func.func @transform_9(%arg0: i32) -> (i32, i32) {
    %c0_i32 = arith.constant 0 : i32
    %c0_i32_0 = arith.constant 0 : i32
    %c0_i32_1 = arith.constant 0 : i32
    return %c0_i32, %c0_i32_0 : i32, i32
  }
  func.func @transform_10(%arg0: i32) -> (i32, i32) {
    %c0_i32 = arith.constant 0 : i32
    %c0_i32_0 = arith.constant 0 : i32
    %c0_i32_1 = arith.constant 0 : i32
    return %c0_i32, %c0_i32_0 : i32, i32
  }
  func.func @transform_11(%arg0: i32) -> (i32, i32) {
    %c0_i32 = arith.constant 0 : i32
    %c0_i32_0 = arith.constant 0 : i32
    %c0_i32_1 = arith.constant 0 : i32
    return %c0_i32, %c0_i32_0 : i32, i32
  }
  func.func @transform_12(%arg0: i32) -> (i32, i32) {
    %c0_i32 = arith.constant 0 : i32
    %c0_i32_0 = arith.constant 0 : i32
    %c0_i32_1 = arith.constant 0 : i32
    return %c0_i32, %c0_i32_0 : i32, i32
  }
  func.func @transform_13(%arg0: i32) -> (i32, i32) {
    %c0_i32 = arith.constant 0 : i32
    %c0_i32_0 = arith.constant 0 : i32
    %c0_i32_1 = arith.constant 0 : i32
    return %c0_i32, %c0_i32_0 : i32, i32
  }
  func.func @transform_14(%arg0: i32) -> (i32, i32) {
    %c0_i32 = arith.constant 0 : i32
    %c0_i32_0 = arith.constant 0 : i32
    %c0_i32_1 = arith.constant 0 : i32
    return %c0_i32, %c0_i32_0 : i32, i32
  }
  func.func @transform_15(%arg0: i32) -> (i32, i32, i32) {
    %c0_i32 = arith.constant 0 : i32
    %c0_i32_0 = arith.constant 0 : i32
    %c0_i32_1 = arith.constant 0 : i32
    return %arg0, %c0_i32, %c0_i32_0 : i32, i32, i32
  }
}

</mosaic_0001>

<bundles_post_ra>
// kernel: rn_forward.5
= control target key start
LH: loop header
LB: loop body
LE: loop exit
PB: predicated region body
PF: predicated region fallthrough
CT: control target
= control target key end

     0   :  { %s4138_s18 = smov 0   ;;  %s4140_s19 = smov 0   ;;  %s5710_s0 = inlined_call_operand.vmem [shape: bf16[2888,27], index: 0, kind: input, shape index: {}]   ;;  %s5711_s1 = inlined_call_operand.vmem [shape: bf16[27,24], index: 1, kind: input, shape index: {}]   ;;  %s5712_s2 = inlined_call_operand.vmem [shape: f32[1,24], index: 2, kind: input, shape index: {}]   ;;  %s5713_s3 = inlined_call_operand.vmem [shape: f32[1,24], index: 3, kind: input, shape index: {}]   ;;  %s5714_s4 = inlined_call_operand.vmem [shape: f32[1,24], index: 4, kind: input, shape index: {}]   ;;  %s5715_s5 = inlined_call_operand.vmem [shape: f32[2888,24], index: 5, kind: output, shape index: {}]  }
   0x1   :  { %s4142_s20 = smov 0  }
   0x2 LB: > { %s4151_s21 = sadd.s32 4294967295, %s4071_s20   ;;  %s4153_s22 = sadd.s32 1, %s4071_s20   ;;  %s4071_s20 = sphi %s4142_s20, %s5724_s20   ;;  %s4067_s19 = sphi %s4140_s19, %s5723_s19   ;;  %s4063_s18 = sphi %s4138_s18, %s5722_s18  }
   0x3   : > { %s129_s23 = ssub.s32 %s4071_s20, %s4153_s22  ;;  %s132_s24 = sadd.s32 1, %s4067_s19 }
   0x4   : > { %p130_p0 = scmp.eq.s32.totalorder %s129_s23, 0  ;;  %p142_p1 = scmp.ne.s32.totalorder %s4067_s19, %s4063_s18 }
   0x5   : > { %p143_p2 = scmp.eq.s32.totalorder %s4151_s21, 1  ;;  %p3154_p3 = scmp.ge.s32.totalorder %s4071_s20, 1 }
   0x6   : > { %s4161_s25 = scalar_select %p130_p0, %s4067_s19, %s132_s24  }
   0x7   : > { %p4163_p4 = por %p143_p2, %p142_p1  ;;  %p196_p5 = scmp.lt.s32.totalorder %s4071_s20, 3 }
   0x9   : > { %p197_p6 = pnand %p3154_p3, %p196_p5 }
   0xa   : > { %s4173_s29 = smul.u32 (!%p197_p6), 181, %s4151_s21  ;;  %s224_s14 = sand.u32 (!%p197_p6), 1, %s4063_s18  }
   0xb   : > { %200 = sbr.rel (%p197_p6) target bundleno = 658 (0x292), region = 40 }
   0xc   : > { %p232_p7 = scmp.lt.s32.totalorder (!%p197_p6), %s4173_s29, 360  ;;  %s3826_s15 = smul.u32 (!%p197_p6), 1448, %s224_s14 }
   0xe   : > { %s4419_s23 = scalar_lea.vmem (!%p197_p6), [#allocation2], %s3826_s15  }
  0x10   : > { %vm1177_vm0 = vcmask 1044480   ;;  %v4105_v0 = vmov 0.0   ;;  %v3918_v1 = vld [vmem:[%s5711_s1 + $0x8] sm:$0x3f]   ;;  %vm1178_vm1 = vcmask 1045504   ;;  %v4106_v2 = vmov 65535  }
  0x11   : > { %3454 = vmatprep.subr.bf16.mxu0 %v4105_v0  ;;  %3822 = vmatprep.subr.bf16.mxu1 %v4105_v0  ;;  %v1179_v3 = vsel %vm1177_vm0, 4294967295, %v4106_v2  ;;  %vm4107_vm2 = vmmov 0   ;;  %v3919_v6 = vld [vmem:[%s5711_s1] sm:$0xff]   ;;  %s233_s7 = scalar_select %p232_p7, %s4173_s29, 360  ;;  %vm903_vm3 = vcmask 220160   ;;  %vm2501_vm4 = vcmask 195584  }
  0x12   : > { %v1180_v4 = vsel %vm1178_vm1, %v1179_v3, 0  ;;  %3458 = vmatprep.mubr.msk.bf16.mxu0 %vm4107_vm2, %v4105_v0  ;;  %3642 = vmatprep.mubr.msk.bf16.mxu1 %vm4107_vm2, %v4105_v0  ;;  %v4388_v57 = vld [vmem:[%s5712_s2] ss:$0 sm:$0xff]  ;;  %s2691_s14 = ssub.s32 (%p4163_p4), 361, %s4173_s29  ;;  %s3358_s15 = smul.u32 (%p4163_p4), 1448, %s4151_s21 }
  0x13   : > { %v1182_v5 = vand.u32 %v3918_v1, %v1180_v4  ;;  %s3155_s8 = sshll.u32 %s233_s7, 2  ;;  %v4402_v62 = vld [vmem:[%s5713_s3] ss:$0 sm:$0xff]  ;;  %p2692_p8 = scmp.lt.s32.totalorder (%p4163_p4), %s2691_s14, 181 }
  0x14   : > { %s4189_s11 = scalar_lea.vmem %s5710_s0, %s3155_s8  ;;  %v4407_v4 = vld [vmem:[%s5714_s4] ss:$0 sm:$0xff]  ;;  %s5511_s18 = scalar_lea.vmem (%p4163_p4), %s5715_s5, %s3358_s15  }
  0x15   : > { %3455 = vmatpush3.bf16.msra.mxu0 %v1182_v5  ;;  %3824 = vmatpush3.bf16.msra.mxu1 %v1182_v5  ;;  %v3920_v7 = vld [vmem:[%s4189_s11] sm:$0xff]   ;;  %v3921_v8 = vld [vmem:[%s4189_s11 + $0x170] sm:$0xff]   ;;  %v3922_v9 = vld [vmem:[%s4189_s11 + $0x8] sm:$0xff]  }
  0x16   : > { %3456 = vmatprep.subr.bf16.mxu0 %v4105_v0  ;;  %3823 = vmatprep.subr.bf16.mxu1 %v4105_v0  ;;  %v3923_v10 = vld [vmem:[%s4189_s11 + $0x178] sm:$0xff]   ;;  %v3924_v11 = vld [vmem:[%s4189_s11 + $0x10] sm:$0xff]   ;;  %v3925_v12 = vld [vmem:[%s4189_s11 + $0x180] sm:$0xff]  }
  0x17   : > { %v3926_v13 = vld [vmem:[%s4189_s11 + $0x18] sm:$0xff]   ;;  %v3927_v14 = vld [vmem:[%s4189_s11 + $0x188] sm:$0xff]   ;;  %v3928_v15 = vld [vmem:[%s4189_s11 + $0x20] sm:$0xff]  }
  0x18   : > { %v3929_v16 = vld [vmem:[%s4189_s11 + $0x190] sm:$0xff]   ;;  %v3930_v17 = vld [vmem:[%s4189_s11 + $0x28] sm:$0xff]   ;;  %v3931_v18 = vld [vmem:[%s4189_s11 + $0x198] sm:$0xff]  }
  0x19   : > { %3457 = vmatpush3.bf16.msra.mxu0 %v3919_v6  ;;  %3825 = vmatpush3.bf16.msra.mxu1 %v3919_v6  ;;  %v3932_v19 = vld [vmem:[%s4189_s11 + $0x30] sm:$0xff]   ;;  %v3933_v20 = vld [vmem:[%s4189_s11 + $0x1a0] sm:$0xff]   ;;  %v3934_v21 = vld [vmem:[%s4189_s11 + $0x38] sm:$0xff]  }
  0x1a   : > { %v3935_v22 = vld [vmem:[%s4189_s11 + $0x1a8] sm:$0xff]   ;;  %v3936_v23 = vld [vmem:[%s4189_s11 + $0x40] sm:$0xff]   ;;  %v3937_v24 = vld [vmem:[%s4189_s11 + $0x1b0] sm:$0xff]  }
  0x1b   : > { %v3938_v25 = vld [vmem:[%s4189_s11 + $0x48] sm:$0xff]   ;;  %v3939_v26 = vld [vmem:[%s4189_s11 + $0x1b8] sm:$0xff]   ;;  %v3940_v27 = vld [vmem:[%s4189_s11 + $0x50] sm:$0xff]  }
  0x1c   : > { %3459 = vmatmul.mubr.msk.bf16.vlgmr.msra.gmra.mxu0 %vm903_vm3, %v3920_v7  ;;  %3643 = vmatmul.mubr.msk.bf16.vlgmr.msra.gmra.mxu1 %vm903_vm3, %v3921_v8  ;;  %v3941_v28 = vld [vmem:[%s4189_s11 + $0x1c0] sm:$0xff]   ;;  %v3942_v29 = vld [vmem:[%s4189_s11 + $0x58] sm:$0xff]   ;;  %v3943_v30 = vld [vmem:[%s4189_s11 + $0x1c8] sm:$0xff]  }
  0x1d   : > { %3462 = vmatprep.mubr.msk.bf16.mxu0 %vm4107_vm2, %v4105_v0  ;;  %3646 = vmatprep.mubr.msk.bf16.mxu1 %vm4107_vm2, %v4105_v0  ;;  %v3944_v31 = vld [vmem:[%s4189_s11 + $0x60] sm:$0xff]   ;;  %v3945_v32 = vld [vmem:[%s4189_s11 + $0x1d0] sm:$0xff]   ;;  %v3946_v33 = vld [vmem:[%s4189_s11 + $0x68] sm:$0xff]  }
  0x1e   : > { %v3947_v34 = vld [vmem:[%s4189_s11 + $0x1d8] sm:$0xff]   ;;  %v3948_v35 = vld [vmem:[%s4189_s11 + $0x70] sm:$0xff]   ;;  %v3949_v36 = vld [vmem:[%s4189_s11 + $0x1e0] sm:$0xff]  }
  0x1f   : > { %v3950_v37 = vld [vmem:[%s4189_s11 + $0x78] sm:$0xff]   ;;  %v3951_v38 = vld [vmem:[%s4189_s11 + $0x1e8] sm:$0xff]   ;;  %v3952_v39 = vld [vmem:[%s4189_s11 + $0x80] sm:$0xff]  }
  0x20   : > { %v3953_v40 = vld [vmem:[%s4189_s11 + $0x1f0] sm:$0xff]   ;;  %v3954_v41 = vld [vmem:[%s4189_s11 + $0x88] sm:$0xff]   ;;  %v3955_v42 = vld [vmem:[%s4189_s11 + $0x1f8] sm:$0xff]  }
  0x21   : > { %v3956_v43 = vld [vmem:[%s4189_s11 + $0x90] sm:$0xff]   ;;  %v3957_v44 = vld [vmem:[%s4189_s11 + $0x200] sm:$0xff]   ;;  %v3958_v45 = vld [vmem:[%s4189_s11 + $0x98] sm:$0xff]  }
  0x22   : > { %v3959_v46 = vld [vmem:[%s4189_s11 + $0x208] sm:$0xff]   ;;  %v3960_v47 = vld [vmem:[%s4189_s11 + $0xa0] sm:$0xff]   ;;  %v3961_v48 = vld [vmem:[%s4189_s11 + $0x210] sm:$0xff]  }
  0x23   : > { %v3962_v49 = vld [vmem:[%s4189_s11 + $0xa8] sm:$0xff]   ;;  %v3963_v50 = vld [vmem:[%s4189_s11 + $0x218] sm:$0xff]   ;;  %v3964_v51 = vld [vmem:[%s4189_s11 + $0xb0] sm:$0xff]  }
  0x24   : > { %3463 = vmatmul.mubr.msk.bf16.gmra.mxu0 %vm903_vm3, %v3922_v9  ;;  %3647 = vmatmul.mubr.msk.bf16.gmra.mxu1 %vm903_vm3, %v3923_v10  ;;  %v3965_v52 = vld [vmem:[%s4189_s11 + $0x220] sm:$0xff]   ;;  %v3966_v53 = vld [vmem:[%s4189_s11 + $0xb8] sm:$0xff]   ;;  %v3967_v54 = vld [vmem:[%s4189_s11 + $0x228] sm:$0xff]  }
  0x25   : > { %3466 = vmatprep.mubr.msk.bf16.mxu0 %vm4107_vm2, %v4105_v0  ;;  %3650 = vmatprep.mubr.msk.bf16.mxu1 %vm4107_vm2, %v4105_v0  ;;  %v3968_v55 = vld [vmem:[%s4189_s11 + $0xc0] sm:$0xff]   ;;  %v3969_v56 = vld [vmem:[%s4189_s11 + $0x230] sm:$0xff]   ;;  %v3970_v6 = vld [vmem:[%s4189_s11 + $0xc8] sm:$0xff]  }
  0x26   : > { %v3971_v8 = vld [vmem:[%s4189_s11 + $0x238] sm:$0xff]  }
  0x2c   : > { %3467 = vmatmul.mubr.msk.bf16.gmra.mxu0 %vm903_vm3, %v3924_v11  ;;  %3651 = vmatmul.mubr.msk.bf16.gmra.mxu1 %vm903_vm3, %v3925_v12 }
  0x2d   : > { %3470 = vmatprep.mubr.msk.bf16.mxu0 %vm4107_vm2, %v4105_v0  ;;  %3654 = vmatprep.mubr.msk.bf16.mxu1 %vm4107_vm2, %v4105_v0 }
  0x34   : > { %3471 = vmatmul.mubr.msk.bf16.gmra.mxu0 %vm903_vm3, %v3926_v13  ;;  %3655 = vmatmul.mubr.msk.bf16.gmra.mxu1 %vm903_vm3, %v3927_v14 }
  0x35   : > { %3474 = vmatprep.mubr.msk.bf16.mxu0 %vm4107_vm2, %v4105_v0  ;;  %3658 = vmatprep.mubr.msk.bf16.mxu1 %vm4107_vm2, %v4105_v0 }
  0x3c   : > { %3475 = vmatmul.mubr.msk.bf16.gmra.mxu0 %vm903_vm3, %v3928_v15  ;;  %3659 = vmatmul.mubr.msk.bf16.gmra.mxu1 %vm903_vm3, %v3929_v16 }
  0x3d   : > { %3478 = vmatprep.mubr.msk.bf16.mxu0 %vm4107_vm2, %v4105_v0  ;;  %3662 = vmatprep.mubr.msk.bf16.mxu1 %vm4107_vm2, %v4105_v0 }
  0x44   : > { %3479 = vmatmul.mubr.msk.bf16.gmra.mxu0 %vm903_vm3, %v3930_v17  ;;  %3663 = vmatmul.mubr.msk.bf16.gmra.mxu1 %vm903_vm3, %v3931_v18 }
  0x45   : > { %3482 = vmatprep.mubr.msk.bf16.mxu0 %vm4107_vm2, %v4105_v0  ;;  %3666 = vmatprep.mubr.msk.bf16.mxu1 %vm4107_vm2, %v4105_v0 }
  0x4c   : > { %3483 = vmatmul.mubr.msk.bf16.gmra.mxu0 %vm903_vm3, %v3932_v19  ;;  %3667 = vmatmul.mubr.msk.bf16.gmra.mxu1 %vm903_vm3, %v3933_v20 }
  0x4d   : > { %3486 = vmatprep.mubr.msk.bf16.mxu0 %vm4107_vm2, %v4105_v0  ;;  %3670 = vmatprep.mubr.msk.bf16.mxu1 %vm4107_vm2, %v4105_v0 }
  0x54   : > { %3487 = vmatmul.mubr.msk.bf16.gmra.mxu0 %vm903_vm3, %v3934_v21  ;;  %3671 = vmatmul.mubr.msk.bf16.gmra.mxu1 %vm903_vm3, %v3935_v22 }
  0x55   : > { %3490 = vmatprep.mubr.msk.bf16.mxu0 %vm4107_vm2, %v4105_v0  ;;  %3674 = vmatprep.mubr.msk.bf16.mxu1 %vm4107_vm2, %v4105_v0 }
  0x5c   : > { %3491 = vmatmul.mubr.msk.bf16.gmra.mxu0 %vm903_vm3, %v3936_v23  ;;  %3675 = vmatmul.mubr.msk.bf16.gmra.mxu1 %vm903_vm3, %v3937_v24 }
  0x5d   : > { %3494 = vmatprep.mubr.msk.bf16.mxu0 %vm4107_vm2, %v4105_v0  ;;  %3678 = vmatprep.mubr.msk.bf16.mxu1 %vm4107_vm2, %v4105_v0 }
  0x64   : > { %3495 = vmatmul.mubr.msk.bf16.gmra.mxu0 %vm903_vm3, %v3938_v25  ;;  %3679 = vmatmul.mubr.msk.bf16.gmra.mxu1 %vm903_vm3, %v3939_v26 }
  0x65   : > { %3498 = vmatprep.mubr.msk.bf16.mxu0 %vm4107_vm2, %v4105_v0  ;;  %3682 = vmatprep.mubr.msk.bf16.mxu1 %vm4107_vm2, %v4105_v0 }
  0x6c   : > { %3499 = vmatmul.mubr.msk.bf16.gmra.mxu0 %vm903_vm3, %v3940_v27  ;;  %3683 = vmatmul.mubr.msk.bf16.gmra.mxu1 %vm903_vm3, %v3941_v28 }
  0x6d   : > { %3502 = vmatprep.mubr.msk.bf16.mxu0 %vm4107_vm2, %v4105_v0  ;;  %3686 = vmatprep.mubr.msk.bf16.mxu1 %vm4107_vm2, %v4105_v0 }
  0x74   : > { %3503 = vmatmul.mubr.msk.bf16.gmra.mxu0 %vm903_vm3, %v3942_v29  ;;  %3687 = vmatmul.mubr.msk.bf16.gmra.mxu1 %vm903_vm3, %v3943_v30 }
  0x75   : > { %3506 = vmatprep.mubr.msk.bf16.mxu0 %vm4107_vm2, %v4105_v0  ;;  %3690 = vmatprep.mubr.msk.bf16.mxu1 %vm4107_vm2, %v4105_v0 }
  0x7c   : > { %3507 = vmatmul.mubr.msk.bf16.gmra.mxu0 %vm903_vm3, %v3944_v31  ;;  %3691 = vmatmul.mubr.msk.bf16.gmra.mxu1 %vm903_vm3, %v3945_v32  ;;  %v3972_v32 = vld [vmem:[%s4189_s11 + $0xd0] sm:$0xff]  }
  0x7d   : > { %3510 = vmatprep.mubr.msk.bf16.mxu0 %vm4107_vm2, %v4105_v0  ;;  %3694 = vmatprep.mubr.msk.bf16.mxu1 %vm4107_vm2, %v4105_v0 }
  0x84   : > { %3511 = vmatmul.mubr.msk.bf16.gmra.mxu0 %vm903_vm3, %v3946_v33  ;;  %3695 = vmatmul.mubr.msk.bf16.gmra.mxu1 %vm903_vm3, %v3947_v34  ;;  %v3973_v34 = vld [vmem:[%s4189_s11 + $0x240] sm:$0xff]  }
  0x85   : > { %3514 = vmatprep.mubr.msk.bf16.mxu0 %vm4107_vm2, %v4105_v0  ;;  %3698 = vmatprep.mubr.msk.bf16.mxu1 %vm4107_vm2, %v4105_v0 }
  0x8c   : > { %3515 = vmatmul.mubr.msk.bf16.gmra.mxu0 %vm903_vm3, %v3948_v35  ;;  %3699 = vmatmul.mubr.msk.bf16.gmra.mxu1 %vm903_vm3, %v3949_v36 }
  0x8d   : > { %3518 = vmatprep.mubr.msk.bf16.mxu0 %vm4107_vm2, %v4105_v0  ;;  %3702 = vmatprep.mubr.msk.bf16.mxu1 %vm4107_vm2, %v4105_v0 }
  0x94   : > { %3519 = vmatmul.mubr.msk.bf16.gmra.mxu0 %vm903_vm3, %v3950_v37  ;;  %3703 = vmatmul.mubr.msk.bf16.gmra.mxu1 %vm903_vm3, %v3951_v38 }
  0x95   : > { %3522 = vmatprep.mubr.msk.bf16.mxu0 %vm4107_vm2, %v4105_v0  ;;  %3706 = vmatprep.mubr.msk.bf16.mxu1 %vm4107_vm2, %v4105_v0 }
  0x9c   : > { %3523 = vmatmul.mubr.msk.bf16.gmra.mxu0 %vm903_vm3, %v3952_v39  ;;  %3707 = vmatmul.mubr.msk.bf16.gmra.mxu1 %vm903_vm3, %v3953_v40 }
  0x9d   : > { %3526 = vmatprep.mubr.msk.bf16.mxu0 %vm4107_vm2, %v4105_v0  ;;  %3710 = vmatprep.mubr.msk.bf16.mxu1 %vm4107_vm2, %v4105_v0 }
  0xa4   : > { %3527 = vmatmul.mubr.msk.bf16.gmra.mxu0 %vm903_vm3, %v3954_v41  ;;  %3711 = vmatmul.mubr.msk.bf16.gmra.mxu1 %vm903_vm3, %v3955_v42 }
  0xa5   : > { %3530 = vmatprep.mubr.msk.bf16.mxu0 %vm4107_vm2, %v4105_v0  ;;  %3714 = vmatprep.mubr.msk.bf16.mxu1 %vm4107_vm2, %v4105_v0 }
  0xac   : > { %3531 = vmatmul.mubr.msk.bf16.gmra.mxu0 %vm903_vm3, %v3956_v43  ;;  %3715 = vmatmul.mubr.msk.bf16.gmra.mxu1 %vm903_vm3, %v3957_v44 }
  0xad   : > { %3534 = vmatprep.mubr.msk.bf16.mxu0 %vm4107_vm2, %v4105_v0  ;;  %3718 = vmatprep.mubr.msk.bf16.mxu1 %vm4107_vm2, %v4105_v0 }
  0xb4   : > { %3535 = vmatmul.mubr.msk.bf16.gmra.mxu0 %vm903_vm3, %v3958_v45  ;;  %3719 = vmatmul.mubr.msk.bf16.gmra.mxu1 %vm903_vm3, %v3959_v46 }
  0xb5   : > { %3538 = vmatprep.mubr.msk.bf16.mxu0 %vm4107_vm2, %v4105_v0  ;;  %3722 = vmatprep.mubr.msk.bf16.mxu1 %vm4107_vm2, %v4105_v0 }
  0xbc   : > { %3539 = vmatmul.mubr.msk.bf16.gmra.mxu0 %vm903_vm3, %v3960_v47  ;;  %3723 = vmatmul.mubr.msk.bf16.gmra.mxu1 %vm903_vm3, %v3961_v48 }
  0xbd   : > { %3542 = vmatprep.mubr.msk.bf16.mxu0 %vm4107_vm2, %v4105_v0  ;;  %3726 = vmatprep.mubr.msk.bf16.mxu1 %vm4107_vm2, %v4105_v0 }
  0xc4   : > { %3543 = vmatmul.mubr.msk.bf16.gmra.mxu0 %vm903_vm3, %v3962_v49  ;;  %3727 = vmatmul.mubr.msk.bf16.gmra.mxu1 %vm903_vm3, %v3963_v50 }
  0xc5   : > { %3546 = vmatprep.mubr.msk.bf16.mxu0 %vm4107_vm2, %v4105_v0  ;;  %3730 = vmatprep.mubr.msk.bf16.mxu1 %vm4107_vm2, %v4105_v0 }
  0xcc   : > { %3547 = vmatmul.mubr.msk.bf16.gmra.mxu0 %vm903_vm3, %v3964_v51  ;;  %3731 = vmatmul.mubr.msk.bf16.gmra.mxu1 %vm903_vm3, %v3965_v52 }
  0xcd   : > { %3550 = vmatprep.mubr.msk.bf16.mxu0 %vm4107_vm2, %v4105_v0  ;;  %3734 = vmatprep.mubr.msk.bf16.mxu1 %vm4107_vm2, %v4105_v0 }
  0xd4   : > { %3551 = vmatmul.mubr.msk.bf16.gmra.mxu0 %vm903_vm3, %v3966_v53  ;;  %3735 = vmatmul.mubr.msk.bf16.gmra.mxu1 %vm903_vm3, %v3967_v54 }
  0xd5   : > { %3554 = vmatprep.mubr.msk.bf16.mxu0 %vm4107_vm2, %v4105_v0  ;;  %3738 = vmatprep.mubr.msk.bf16.mxu1 %vm4107_vm2, %v4105_v0 }
  0xdc   : > { %v1218_v58 = vpop.f32.mrf.mxu0  ;;  %3555 = vmatmul.mubr.msk.bf16.gmra.mxu0 %vm903_vm3, %v3968_v55  ;;  %v1586_v59 = vpop.f32.mrf.mxu1  ;;  %3739 = vmatmul.mubr.msk.bf16.gmra.mxu1 %vm903_vm3, %v3969_v56 }
  0xdd   : > { %v1219_v60 = vadd.f32 %v4388_v57, %v1218_v58  ;;  %v1587_v61 = vadd.f32 %v4388_v57, %v1586_v59  ;;  %3558 = vmatprep.mubr.msk.bf16.mxu0 %vm4107_vm2, %v4105_v0  ;;  %3742 = vmatprep.mubr.msk.bf16.mxu1 %vm4107_vm2, %v4105_v0  ;;  %v3974_v59 = vld [vmem:[%s4189_s11 + $0xd8] sm:$0xff]  }
  0xde   : > { %v3460_v63 = vpop.f32.mrf.mxu0  ;;  %v3644_v1 = vpop.f32.mrf.mxu1 }
  0xdf   : > { %v1944_v2 = vmax.f32 %v1219_v60, 0.0  ;;  %v2036_v3 = vmax.f32 %v1587_v61, 0.0  ;;  %v3975_v61 = vld [vmem:[%s4189_s11 + $0x248] sm:$0xff]  }
  0xe0   : > { %v1221_v5 = vpop.f32.mrf.mxu0  ;;  %v1589_v7 = vpop.f32.mrf.mxu1 }
  0xe1   : > { %v2132_v9 = vmul.f32 %v4402_v62, %v1944_v2  ;;  %v1222_v10 = vadd.f32 %v4388_v57, %v1221_v5  ;;  %v2224_v11 = vmul.f32 %v4402_v62, %v2036_v3  ;;  %v1590_v12 = vadd.f32 %v4388_v57, %v1589_v7 }
  0xe2   : > { %v3461_v13 = vpop.f32.mrf.mxu0  ;;  %v3645_v14 = vpop.f32.mrf.mxu1 }
  0xe3   : > { %v2320_v15 = vadd.f32 %v4407_v4, %v2132_v9  ;;  %v1945_v16 = vmax.f32 %v1222_v10, 0.0  ;;  %v2412_v17 = vadd.f32 %v4407_v4, %v2224_v11  ;;  %v2037_v18 = vmax.f32 %v1590_v12, 0.0 }
  0xe4   : > { %v1226_v19 = vpop.f32.mrf.mxu0  ;;  %3559 = vmatmul.mubr.msk.bf16.gmra.mxu0 %vm903_vm3, %v3970_v6  ;;  %v1594_v20 = vpop.f32.mrf.mxu1  ;;  %3743 = vmatmul.mubr.msk.bf16.gmra.mxu1 %vm903_vm3, %v3971_v8 }
  0xe5   : > { %2502 = vst.msk [vmem:[%s4419_s23] sm:$0xff] %vm2501_vm4, %v2320_v15  ;;  %v2133_v21 = vmul.f32 %v4402_v62, %v1945_v16  ;;  %2594 = vst.msk [vmem:[%s4419_s23 + $0x2e0] sm:$0xff] %vm2501_vm4, %v2412_v17  ;;  %v1227_v22 = vadd.f32 %v4388_v57, %v1226_v19  ;;  %v2225_v23 = vmul.f32 %v4402_v62, %v2037_v18  ;;  %3562 = vmatprep.mubr.msk.bf16.mxu0 %vm4107_vm2, %v4105_v0 }
  0xe6   : > { %v1595_v24 = vadd.f32 %v4388_v57, %v1594_v20  ;;  %v3464_v25 = vpop.f32.mrf.mxu0  ;;  %v3648_v26 = vpop.f32.mrf.mxu1  ;;  %3746 = vmatprep.mubr.msk.bf16.mxu1 %vm4107_vm2, %v4105_v0 }
  0xe7   : > { %v2321_v27 = vadd.f32 %v4407_v4, %v2133_v21  ;;  %v1946_v28 = vmax.f32 %v1227_v22, 0.0  ;;  %v2413_v29 = vadd.f32 %v4407_v4, %v2225_v23  ;;  %v3977_v26 = vld [vmem:[%s4189_s11 + $0x250] sm:$0xff]  }
  0xe8   : > { %v2038_v30 = vmax.f32 %v1595_v24, 0.0  ;;  %v1229_v31 = vpop.f32.mrf.mxu0  ;;  %v1597_v33 = vpop.f32.mrf.mxu1  ;;  %v3976_v24 = vld [vmem:[%s4189_s11 + $0xe0] sm:$0xff]  }
  0xe9   : > { %2503 = vst.msk [vmem:[%s4419_s23 + $0x8] sm:$0xff] %vm2501_vm4, %v2321_v27  ;;  %v2134_v35 = vmul.f32 %v4402_v62, %v1946_v28  ;;  %2595 = vst.msk [vmem:[%s4419_s23 + $0x2e8] sm:$0xff] %vm2501_vm4, %v2413_v29  ;;  %v1230_v36 = vadd.f32 %v4388_v57, %v1229_v31  ;;  %v1598_v38 = vadd.f32 %v4388_v57, %v1597_v33 }
  0xea   : > { %v2226_v37 = vmul.f32 %v4402_v62, %v2038_v30  ;;  %v3465_v39 = vpop.f32.mrf.mxu0  ;;  %v3649_v40 = vpop.f32.mrf.mxu1 }
  0xeb   : > { %v2322_v41 = vadd.f32 %v4407_v4, %v2134_v35  ;;  %v1947_v42 = vmax.f32 %v1230_v36, 0.0  ;;  %v2039_v44 = vmax.f32 %v1598_v38, 0.0 }
  0xec   : > { %v2414_v43 = vadd.f32 %v4407_v4, %v2226_v37  ;;  %v1234_v45 = vpop.f32.mrf.mxu0  ;;  %3563 = vmatmul.mubr.msk.bf16.gmra.mxu0 %vm903_vm3, %v3972_v32  ;;  %v1602_v46 = vpop.f32.mrf.mxu1  ;;  %3747 = vmatmul.mubr.msk.bf16.gmra.mxu1 %vm903_vm3, %v3973_v34 }
  0xed   : > { %2504 = vst.msk [vmem:[%s4419_s23 + $0x10] sm:$0xff] %vm2501_vm4, %v2322_v41  ;;  %v2135_v47 = vmul.f32 %v4402_v62, %v1947_v42  ;;  %v1235_v48 = vadd.f32 %v4388_v57, %v1234_v45  ;;  %v2227_v49 = vmul.f32 %v4402_v62, %v2039_v44  ;;  %v1603_v50 = vadd.f32 %v4388_v57, %v1602_v46 }
  0xee   : > { %2596 = vst.msk [vmem:[%s4419_s23 + $0x2f0] sm:$0xff] %vm2501_vm4, %v2414_v43  ;;  %3566 = vmatprep.mubr.msk.bf16.mxu0 %vm4107_vm2, %v4105_v0  ;;  %v3468_v51 = vpop.f32.mrf.mxu0  ;;  %v3652_v52 = vpop.f32.mrf.mxu1  ;;  %3750 = vmatprep.mubr.msk.bf16.mxu1 %vm4107_vm2, %v4105_v0 }
  0xef   : > { %v2323_v53 = vadd.f32 %v4407_v4, %v2135_v47  ;;  %v1948_v54 = vmax.f32 %v1235_v48, 0.0  ;;  %v2415_v55 = vadd.f32 %v4407_v4, %v2227_v49  ;;  %v2040_v56 = vmax.f32 %v1603_v50, 0.0  ;;  %v3978_v50 = vld [vmem:[%s4189_s11 + $0xe8] sm:$0xff]   ;;  %v3979_v52 = vld [vmem:[%s4189_s11 + $0x258] sm:$0xff]  }
  0xf0   : > { %v1237_v58 = vpop.f32.mrf.mxu0  ;;  %v1605_v60 = vpop.f32.mrf.mxu1 }
  0xf1   : > { %2505 = vst.msk [vmem:[%s4419_s23 + $0x18] sm:$0xff] %vm2501_vm4, %v2323_v53  ;;  %v2136_v63 = vmul.f32 %v4402_v62, %v1948_v54  ;;  %2597 = vst.msk [vmem:[%s4419_s23 + $0x2f8] sm:$0xff] %vm2501_vm4, %v2415_v55  ;;  %v1238_v1 = vadd.f32 %v4388_v57, %v1237_v58  ;;  %v2228_v2 = vmul.f32 %v4402_v62, %v2040_v56 }
  0xf2   : > { %v1606_v3 = vadd.f32 %v4388_v57, %v1605_v60  ;;  %v3469_v5 = vpop.f32.mrf.mxu0  ;;  %v3653_v6 = vpop.f32.mrf.mxu1 }
  0xf3   : > { %v2324_v7 = vadd.f32 %v4407_v4, %v2136_v63  ;;  %v1949_v8 = vmax.f32 %v1238_v1, 0.0  ;;  %v2416_v9 = vadd.f32 %v4407_v4, %v2228_v2 }
  0xf4   : > { %v2041_v10 = vmax.f32 %v1606_v3, 0.0  ;;  %v1242_v11 = vpop.f32.mrf.mxu0  ;;  %3567 = vmatmul.mubr.msk.bf16.gmra.mxu0 %vm903_vm3, %v3974_v59  ;;  %v1610_v12 = vpop.f32.mrf.mxu1  ;;  %3751 = vmatmul.mubr.msk.bf16.gmra.mxu1 %vm903_vm3, %v3975_v61 }
  0xf5   : > { %2506 = vst.msk [vmem:[%s4419_s23 + $0x20] sm:$0xff] %vm2501_vm4, %v2324_v7  ;;  %v2137_v13 = vmul.f32 %v4402_v62, %v1949_v8  ;;  %2598 = vst.msk [vmem:[%s4419_s23 + $0x300] sm:$0xff] %vm2501_vm4, %v2416_v9  ;;  %v1243_v14 = vadd.f32 %v4388_v57, %v1242_v11  ;;  %v1611_v16 = vadd.f32 %v4388_v57, %v1610_v12  ;;  %3570 = vmatprep.mubr.msk.bf16.mxu0 %vm4107_vm2, %v4105_v0 }
  0xf6   : > { %v2229_v15 = vmul.f32 %v4402_v62, %v2041_v10  ;;  %v3472_v17 = vpop.f32.mrf.mxu0  ;;  %v3656_v18 = vpop.f32.mrf.mxu1  ;;  %3754 = vmatprep.mubr.msk.bf16.mxu1 %vm4107_vm2, %v4105_v0 }
  0xf7   : > { %v2325_v19 = vadd.f32 %v4407_v4, %v2137_v13  ;;  %v1950_v20 = vmax.f32 %v1243_v14, 0.0  ;;  %v2042_v22 = vmax.f32 %v1611_v16, 0.0  ;;  %v3980_v16 = vld [vmem:[%s4189_s11 + $0xf0] sm:$0xff]   ;;  %v3981_v18 = vld [vmem:[%s4189_s11 + $0x260] sm:$0xff]  }
  0xf8   : > { %v2417_v21 = vadd.f32 %v4407_v4, %v2229_v15  ;;  %v1245_v23 = vpop.f32.mrf.mxu0  ;;  %v1613_v25 = vpop.f32.mrf.mxu1 }
  0xf9   : > { %2507 = vst.msk [vmem:[%s4419_s23 + $0x28] sm:$0xff] %vm2501_vm4, %v2325_v19  ;;  %v2138_v27 = vmul.f32 %v4402_v62, %v1950_v20  ;;  %v1246_v28 = vadd.f32 %v4388_v57, %v1245_v23  ;;  %v2230_v29 = vmul.f32 %v4402_v62, %v2042_v22  ;;  %v1614_v30 = vadd.f32 %v4388_v57, %v1613_v25 }
  0xfa   : > { %2599 = vst.msk [vmem:[%s4419_s23 + $0x308] sm:$0xff] %vm2501_vm4, %v2417_v21  ;;  %v3473_v31 = vpop.f32.mrf.mxu0  ;;  %v3657_v32 = vpop.f32.mrf.mxu1 }
  0xfb   : > { %v2326_v33 = vadd.f32 %v4407_v4, %v2138_v27  ;;  %v1951_v34 = vmax.f32 %v1246_v28, 0.0  ;;  %v2418_v35 = vadd.f32 %v4407_v4, %v2230_v29  ;;  %v2043_v36 = vmax.f32 %v1614_v30, 0.0 }
  0xfc   : > { %v1250_v37 = vpop.f32.mrf.mxu0  ;;  %3571 = vmatmul.mubr.msk.bf16.gmra.mxu0 %vm903_vm3, %v3976_v24  ;;  %v1618_v38 = vpop.f32.mrf.mxu1  ;;  %3755 = vmatmul.mubr.msk.bf16.gmra.mxu1 %vm903_vm3, %v3977_v26 }
  0xfd   : > { %2508 = vst.msk [vmem:[%s4419_s23 + $0x30] sm:$0xff] %vm2501_vm4, %v2326_v33  ;;  %v2139_v39 = vmul.f32 %v4402_v62, %v1951_v34  ;;  %2600 = vst.msk [vmem:[%s4419_s23 + $0x310] sm:$0xff] %vm2501_vm4, %v2418_v35  ;;  %v1251_v40 = vadd.f32 %v4388_v57, %v1250_v37  ;;  %v2231_v41 = vmul.f32 %v4402_v62, %v2043_v36  ;;  %3574 = vmatprep.mubr.msk.bf16.mxu0 %vm4107_vm2, %v4105_v0 }
  0xfe   : > { %v1619_v42 = vadd.f32 %v4388_v57, %v1618_v38  ;;  %v3476_v43 = vpop.f32.mrf.mxu0  ;;  %v3660_v44 = vpop.f32.mrf.mxu1  ;;  %3758 = vmatprep.mubr.msk.bf16.mxu1 %vm4107_vm2, %v4105_v0 }
  0xff   : > { %v2327_v45 = vadd.f32 %v4407_v4, %v2139_v39  ;;  %v1952_v46 = vmax.f32 %v1251_v40, 0.0  ;;  %v2419_v47 = vadd.f32 %v4407_v4, %v2231_v41  ;;  %v3983_v44 = vld [vmem:[%s4189_s11 + $0x268] sm:$0xff]  }
 0x100   : > { %v2044_v48 = vmax.f32 %v1619_v42, 0.0  ;;  %v1253_v49 = vpop.f32.mrf.mxu0  ;;  %v1621_v51 = vpop.f32.mrf.mxu1  ;;  %v3982_v42 = vld [vmem:[%s4189_s11 + $0xf8] sm:$0xff]  }
 0x101   : > { %2509 = vst.msk [vmem:[%s4419_s23 + $0x38] sm:$0xff] %vm2501_vm4, %v2327_v45  ;;  %v2140_v53 = vmul.f32 %v4402_v62, %v1952_v46  ;;  %2601 = vst.msk [vmem:[%s4419_s23 + $0x318] sm:$0xff] %vm2501_vm4, %v2419_v47  ;;  %v1254_v54 = vadd.f32 %v4388_v57, %v1253_v49  ;;  %v1622_v56 = vadd.f32 %v4388_v57, %v1621_v51 }
 0x102   : > { %v2232_v55 = vmul.f32 %v4402_v62, %v2044_v48  ;;  %v3477_v58 = vpop.f32.mrf.mxu0  ;;  %v3661_v59 = vpop.f32.mrf.mxu1 }
 0x103   : > { %v2328_v60 = vadd.f32 %v4407_v4, %v2140_v53  ;;  %v1953_v61 = vmax.f32 %v1254_v54, 0.0  ;;  %v2045_v1 = vmax.f32 %v1622_v56, 0.0 }
 0x104   : > { %v2420_v63 = vadd.f32 %v4407_v4, %v2232_v55  ;;  %v1258_v2 = vpop.f32.mrf.mxu0  ;;  %3575 = vmatmul.mubr.msk.bf16.gmra.mxu0 %vm903_vm3, %v3978_v50  ;;  %v1626_v3 = vpop.f32.mrf.mxu1  ;;  %3759 = vmatmul.mubr.msk.bf16.gmra.mxu1 %vm903_vm3, %v3979_v52 }
 0x105   : > { %2510 = vst.msk [vmem:[%s4419_s23 + $0x40] sm:$0xff] %vm2501_vm4, %v2328_v60  ;;  %v2141_v5 = vmul.f32 %v4402_v62, %v1953_v61  ;;  %v1259_v6 = vadd.f32 %v4388_v57, %v1258_v2  ;;  %v2233_v7 = vmul.f32 %v4402_v62, %v2045_v1  ;;  %v1627_v8 = vadd.f32 %v4388_v57, %v1626_v3 }
 0x106   : > { %2602 = vst.msk [vmem:[%s4419_s23 + $0x320] sm:$0xff] %vm2501_vm4, %v2420_v63  ;;  %3578 = vmatprep.mubr.msk.bf16.mxu0 %vm4107_vm2, %v4105_v0  ;;  %v3480_v9 = vpop.f32.mrf.mxu0  ;;  %v3664_v10 = vpop.f32.mrf.mxu1  ;;  %3762 = vmatprep.mubr.msk.bf16.mxu1 %vm4107_vm2, %v4105_v0 }
 0x107   : > { %v2329_v11 = vadd.f32 %v4407_v4, %v2141_v5  ;;  %v1954_v12 = vmax.f32 %v1259_v6, 0.0  ;;  %v2421_v13 = vadd.f32 %v4407_v4, %v2233_v7  ;;  %v2046_v14 = vmax.f32 %v1627_v8, 0.0  ;;  %v3984_v8 = vld [vmem:[%s4189_s11 + $0x100] sm:$0xff]   ;;  %v3985_v10 = vld [vmem:[%s4189_s11 + $0x270] sm:$0xff]  }
 0x108   : > { %v1261_v15 = vpop.f32.mrf.mxu0  ;;  %v1629_v17 = vpop.f32.mrf.mxu1 }
 0x109   : > { %2511 = vst.msk [vmem:[%s4419_s23 + $0x48] sm:$0xff] %vm2501_vm4, %v2329_v11  ;;  %v2142_v19 = vmul.f32 %v4402_v62, %v1954_v12  ;;  %2603 = vst.msk [vmem:[%s4419_s23 + $0x328] sm:$0xff] %vm2501_vm4, %v2421_v13  ;;  %v1262_v20 = vadd.f32 %v4388_v57, %v1261_v15  ;;  %v2234_v21 = vmul.f32 %v4402_v62, %v2046_v14 }
 0x10a   : > { %v1630_v22 = vadd.f32 %v4388_v57, %v1629_v17  ;;  %v3481_v23 = vpop.f32.mrf.mxu0  ;;  %v3665_v24 = vpop.f32.mrf.mxu1 }
 0x10b   : > { %v2330_v25 = vadd.f32 %v4407_v4, %v2142_v19  ;;  %v1955_v26 = vmax.f32 %v1262_v20, 0.0  ;;  %v2422_v27 = vadd.f32 %v4407_v4, %v2234_v21 }
 0x10c   : > { %v2047_v28 = vmax.f32 %v1630_v22, 0.0  ;;  %v1266_v29 = vpop.f32.mrf.mxu0  ;;  %3579 = vmatmul.mubr.msk.bf16.gmra.mxu0 %vm903_vm3, %v3980_v16  ;;  %v1634_v30 = vpop.f32.mrf.mxu1  ;;  %3763 = vmatmul.mubr.msk.bf16.gmra.mxu1 %vm903_vm3, %v3981_v18 }
 0x10d   : > { %2512 = vst.msk [vmem:[%s4419_s23 + $0x50] sm:$0xff] %vm2501_vm4, %v2330_v25  ;;  %v2143_v31 = vmul.f32 %v4402_v62, %v1955_v26  ;;  %2604 = vst.msk [vmem:[%s4419_s23 + $0x330] sm:$0xff] %vm2501_vm4, %v2422_v27  ;;  %v1267_v32 = vadd.f32 %v4388_v57, %v1266_v29  ;;  %v1635_v34 = vadd.f32 %v4388_v57, %v1634_v30  ;;  %3582 = vmatprep.mubr.msk.bf16.mxu0 %vm4107_vm2, %v4105_v0 }
 0x10e   : > { %v2235_v33 = vmul.f32 %v4402_v62, %v2047_v28  ;;  %v3484_v35 = vpop.f32.mrf.mxu0  ;;  %v3668_v36 = vpop.f32.mrf.mxu1  ;;  %3766 = vmatprep.mubr.msk.bf16.mxu1 %vm4107_vm2, %v4105_v0 }
 0x10f   : > { %v2331_v37 = vadd.f32 %v4407_v4, %v2143_v31  ;;  %v1956_v38 = vmax.f32 %v1267_v32, 0.0  ;;  %v2048_v40 = vmax.f32 %v1635_v34, 0.0  ;;  %v3986_v34 = vld [vmem:[%s4189_s11 + $0x108] sm:$0xff]   ;;  %v3987_v36 = vld [vmem:[%s4189_s11 + $0x278] sm:$0xff]  }
 0x110   : > { %v2423_v39 = vadd.f32 %v4407_v4, %v2235_v33  ;;  %v1269_v41 = vpop.f32.mrf.mxu0  ;;  %v1637_v43 = vpop.f32.mrf.mxu1 }
 0x111   : > { %2513 = vst.msk [vmem:[%s4419_s23 + $0x58] sm:$0xff] %vm2501_vm4, %v2331_v37  ;;  %v2144_v45 = vmul.f32 %v4402_v62, %v1956_v38  ;;  %v1270_v46 = vadd.f32 %v4388_v57, %v1269_v41  ;;  %v2236_v47 = vmul.f32 %v4402_v62, %v2048_v40  ;;  %v1638_v48 = vadd.f32 %v4388_v57, %v1637_v43 }
 0x112   : > { %2605 = vst.msk [vmem:[%s4419_s23 + $0x338] sm:$0xff] %vm2501_vm4, %v2423_v39  ;;  %v3485_v49 = vpop.f32.mrf.mxu0  ;;  %v3669_v50 = vpop.f32.mrf.mxu1 }
 0x113   : > { %v2332_v51 = vadd.f32 %v4407_v4, %v2144_v45  ;;  %v1957_v52 = vmax.f32 %v1270_v46, 0.0  ;;  %v2424_v53 = vadd.f32 %v4407_v4, %v2236_v47  ;;  %v2049_v54 = vmax.f32 %v1638_v48, 0.0 }
 0x114   : > { %v1274_v55 = vpop.f32.mrf.mxu0  ;;  %3583 = vmatmul.mubr.msk.bf16.gmra.mxu0 %vm903_vm3, %v3982_v42  ;;  %v1642_v56 = vpop.f32.mrf.mxu1  ;;  %3767 = vmatmul.mubr.msk.bf16.gmra.mxu1 %vm903_vm3, %v3983_v44 }
 0x115   : > { %2514 = vst.msk [vmem:[%s4419_s23 + $0x60] sm:$0xff] %vm2501_vm4, %v2332_v51  ;;  %v2145_v58 = vmul.f32 %v4402_v62, %v1957_v52  ;;  %2606 = vst.msk [vmem:[%s4419_s23 + $0x340] sm:$0xff] %vm2501_vm4, %v2424_v53  ;;  %v1275_v59 = vadd.f32 %v4388_v57, %v1274_v55  ;;  %v2237_v60 = vmul.f32 %v4402_v62, %v2049_v54  ;;  %3586 = vmatprep.mubr.msk.bf16.mxu0 %vm4107_vm2, %v4105_v0 }
 0x116   : > { %v1643_v61 = vadd.f32 %v4388_v57, %v1642_v56  ;;  %v3488_v63 = vpop.f32.mrf.mxu0  ;;  %v3672_v1 = vpop.f32.mrf.mxu1  ;;  %3770 = vmatprep.mubr.msk.bf16.mxu1 %vm4107_vm2, %v4105_v0 }
 0x117   : > { %v2333_v2 = vadd.f32 %v4407_v4, %v2145_v58  ;;  %v1958_v3 = vmax.f32 %v1275_v59, 0.0  ;;  %v2425_v5 = vadd.f32 %v4407_v4, %v2237_v60  ;;  %v3989_v1 = vld [vmem:[%s4189_s11 + $0x280] sm:$0xff]  }
 0x118   : > { %v2050_v6 = vmax.f32 %v1643_v61, 0.0  ;;  %v1277_v7 = vpop.f32.mrf.mxu0  ;;  %v1645_v9 = vpop.f32.mrf.mxu1  ;;  %v3988_v61 = vld [vmem:[%s4189_s11 + $0x110] sm:$0xff]  }
 0x119   : > { %2515 = vst.msk [vmem:[%s4419_s23 + $0x68] sm:$0xff] %vm2501_vm4, %v2333_v2  ;;  %v2146_v11 = vmul.f32 %v4402_v62, %v1958_v3  ;;  %2607 = vst.msk [vmem:[%s4419_s23 + $0x348] sm:$0xff] %vm2501_vm4, %v2425_v5  ;;  %v1278_v12 = vadd.f32 %v4388_v57, %v1277_v7  ;;  %v1646_v14 = vadd.f32 %v4388_v57, %v1645_v9 }
 0x11a   : > { %v2238_v13 = vmul.f32 %v4402_v62, %v2050_v6  ;;  %v3489_v15 = vpop.f32.mrf.mxu0  ;;  %v3673_v16 = vpop.f32.mrf.mxu1 }
 0x11b   : > { %v2334_v17 = vadd.f32 %v4407_v4, %v2146_v11  ;;  %v1959_v18 = vmax.f32 %v1278_v12, 0.0  ;;  %v2051_v20 = vmax.f32 %v1646_v14, 0.0 }
 0x11c   : > { %v2426_v19 = vadd.f32 %v4407_v4, %v2238_v13  ;;  %v1282_v21 = vpop.f32.mrf.mxu0  ;;  %3587 = vmatmul.mubr.msk.bf16.gmra.mxu0 %vm903_vm3, %v3984_v8  ;;  %v1650_v22 = vpop.f32.mrf.mxu1  ;;  %3771 = vmatmul.mubr.msk.bf16.gmra.mxu1 %vm903_vm3, %v3985_v10 }
 0x11d   : > { %2516 = vst.msk [vmem:[%s4419_s23 + $0x70] sm:$0xff] %vm2501_vm4, %v2334_v17  ;;  %v2147_v23 = vmul.f32 %v4402_v62, %v1959_v18  ;;  %v1283_v24 = vadd.f32 %v4388_v57, %v1282_v21  ;;  %v2239_v25 = vmul.f32 %v4402_v62, %v2051_v20  ;;  %v1651_v26 = vadd.f32 %v4388_v57, %v1650_v22 }
 0x11e   : > { %2608 = vst.msk [vmem:[%s4419_s23 + $0x350] sm:$0xff] %vm2501_vm4, %v2426_v19  ;;  %3590 = vmatprep.mubr.msk.bf16.mxu0 %vm4107_vm2, %v4105_v0  ;;  %v3492_v27 = vpop.f32.mrf.mxu0  ;;  %v3676_v28 = vpop.f32.mrf.mxu1  ;;  %3774 = vmatprep.mubr.msk.bf16.mxu1 %vm4107_vm2, %v4105_v0 }
 0x11f   : > { %v2335_v29 = vadd.f32 %v4407_v4, %v2147_v23  ;;  %v1960_v30 = vmax.f32 %v1283_v24, 0.0  ;;  %v2427_v31 = vadd.f32 %v4407_v4, %v2239_v25  ;;  %v2052_v32 = vmax.f32 %v1651_v26, 0.0  ;;  %v3990_v26 = vld [vmem:[%s4189_s11 + $0x118] sm:$0xff]   ;;  %v3991_v28 = vld [vmem:[%s4189_s11 + $0x288] sm:$0xff]  }
 0x120   : > { %v1285_v33 = vpop.f32.mrf.mxu0  ;;  %v1653_v35 = vpop.f32.mrf.mxu1 }
 0x121   : > { %2517 = vst.msk [vmem:[%s4419_s23 + $0x78] sm:$0xff] %vm2501_vm4, %v2335_v29  ;;  %v2148_v37 = vmul.f32 %v4402_v62, %v1960_v30  ;;  %2609 = vst.msk [vmem:[%s4419_s23 + $0x358] sm:$0xff] %vm2501_vm4, %v2427_v31  ;;  %v1286_v38 = vadd.f32 %v4388_v57, %v1285_v33  ;;  %v2240_v39 = vmul.f32 %v4402_v62, %v2052_v32 }
 0x122   : > { %v1654_v40 = vadd.f32 %v4388_v57, %v1653_v35  ;;  %v3493_v41 = vpop.f32.mrf.mxu0  ;;  %v3677_v42 = vpop.f32.mrf.mxu1 }
 0x123   : > { %v2336_v43 = vadd.f32 %v4407_v4, %v2148_v37  ;;  %v1961_v44 = vmax.f32 %v1286_v38, 0.0  ;;  %v2428_v45 = vadd.f32 %v4407_v4, %v2240_v39 }
 0x124   : > { %v2053_v46 = vmax.f32 %v1654_v40, 0.0  ;;  %v1290_v47 = vpop.f32.mrf.mxu0  ;;  %3591 = vmatmul.mubr.msk.bf16.gmra.mxu0 %vm903_vm3, %v3986_v34  ;;  %v1658_v48 = vpop.f32.mrf.mxu1  ;;  %3775 = vmatmul.mubr.msk.bf16.gmra.mxu1 %vm903_vm3, %v3987_v36 }
 0x125   : > { %2518 = vst.msk [vmem:[%s4419_s23 + $0x80] sm:$0xff] %vm2501_vm4, %v2336_v43  ;;  %v2149_v49 = vmul.f32 %v4402_v62, %v1961_v44  ;;  %2610 = vst.msk [vmem:[%s4419_s23 + $0x360] sm:$0xff] %vm2501_vm4, %v2428_v45  ;;  %v1291_v50 = vadd.f32 %v4388_v57, %v1290_v47  ;;  %v1659_v52 = vadd.f32 %v4388_v57, %v1658_v48  ;;  %3594 = vmatprep.mubr.msk.bf16.mxu0 %vm4107_vm2, %v4105_v0 }
 0x126   : > { %v2241_v51 = vmul.f32 %v4402_v62, %v2053_v46  ;;  %v3496_v53 = vpop.f32.mrf.mxu0  ;;  %v3680_v54 = vpop.f32.mrf.mxu1  ;;  %3778 = vmatprep.mubr.msk.bf16.mxu1 %vm4107_vm2, %v4105_v0 }
 0x127   : > { %v2337_v55 = vadd.f32 %v4407_v4, %v2149_v49  ;;  %v1962_v56 = vmax.f32 %v1291_v50, 0.0  ;;  %v2054_v59 = vmax.f32 %v1659_v52, 0.0  ;;  %v3992_v52 = vld [vmem:[%s4189_s11 + $0x120] sm:$0xff]   ;;  %v3993_v54 = vld [vmem:[%s4189_s11 + $0x290] sm:$0xff]  }
 0x128   : > { %v2429_v58 = vadd.f32 %v4407_v4, %v2241_v51  ;;  %v1293_v60 = vpop.f32.mrf.mxu0  ;;  %v1661_v63 = vpop.f32.mrf.mxu1 }
 0x129   : > { %2519 = vst.msk [vmem:[%s4419_s23 + $0x88] sm:$0xff] %vm2501_vm4, %v2337_v55  ;;  %v2150_v2 = vmul.f32 %v4402_v62, %v1962_v56  ;;  %v1294_v3 = vadd.f32 %v4388_v57, %v1293_v60  ;;  %v2242_v5 = vmul.f32 %v4402_v62, %v2054_v59  ;;  %v1662_v6 = vadd.f32 %v4388_v57, %v1661_v63 }
 0x12a   : > { %2611 = vst.msk [vmem:[%s4419_s23 + $0x368] sm:$0xff] %vm2501_vm4, %v2429_v58  ;;  %v3497_v7 = vpop.f32.mrf.mxu0  ;;  %v3681_v8 = vpop.f32.mrf.mxu1 }
 0x12b   : > { %v2338_v9 = vadd.f32 %v4407_v4, %v2150_v2  ;;  %v1963_v10 = vmax.f32 %v1294_v3, 0.0  ;;  %v2430_v11 = vadd.f32 %v4407_v4, %v2242_v5  ;;  %v2055_v12 = vmax.f32 %v1662_v6, 0.0 }
 0x12c   : > { %v1298_v13 = vpop.f32.mrf.mxu0  ;;  %3595 = vmatmul.mubr.msk.bf16.gmra.mxu0 %vm903_vm3, %v3988_v61  ;;  %v1666_v14 = vpop.f32.mrf.mxu1  ;;  %3779 = vmatmul.mubr.msk.bf16.gmra.mxu1 %vm903_vm3, %v3989_v1 }
 0x12d   : > { %2520 = vst.msk [vmem:[%s4419_s23 + $0x90] sm:$0xff] %vm2501_vm4, %v2338_v9  ;;  %v2151_v15 = vmul.f32 %v4402_v62, %v1963_v10  ;;  %2612 = vst.msk [vmem:[%s4419_s23 + $0x370] sm:$0xff] %vm2501_vm4, %v2430_v11  ;;  %v1299_v16 = vadd.f32 %v4388_v57, %v1298_v13  ;;  %v2243_v17 = vmul.f32 %v4402_v62, %v2055_v12  ;;  %3598 = vmatprep.mubr.msk.bf16.mxu0 %vm4107_vm2, %v4105_v0 }
 0x12e   : > { %v1667_v18 = vadd.f32 %v4388_v57, %v1666_v14  ;;  %v3500_v19 = vpop.f32.mrf.mxu0  ;;  %v3684_v20 = vpop.f32.mrf.mxu1  ;;  %3782 = vmatprep.mubr.msk.bf16.mxu1 %vm4107_vm2, %v4105_v0 }
 0x12f   : > { %v2339_v21 = vadd.f32 %v4407_v4, %v2151_v15  ;;  %v1964_v22 = vmax.f32 %v1299_v16, 0.0  ;;  %v2431_v23 = vadd.f32 %v4407_v4, %v2243_v17  ;;  %v3995_v20 = vld [vmem:[%s4189_s11 + $0x298] sm:$0xff]  }
 0x130   : > { %v2056_v24 = vmax.f32 %v1667_v18, 0.0  ;;  %v1301_v25 = vpop.f32.mrf.mxu0  ;;  %v1669_v27 = vpop.f32.mrf.mxu1  ;;  %v3994_v18 = vld [vmem:[%s4189_s11 + $0x128] sm:$0xff]  }
 0x131   : > { %2521 = vst.msk [vmem:[%s4419_s23 + $0x98] sm:$0xff] %vm2501_vm4, %v2339_v21  ;;  %v2152_v29 = vmul.f32 %v4402_v62, %v1964_v22  ;;  %2613 = vst.msk [vmem:[%s4419_s23 + $0x378] sm:$0xff] %vm2501_vm4, %v2431_v23  ;;  %v1302_v30 = vadd.f32 %v4388_v57, %v1301_v25  ;;  %v1670_v32 = vadd.f32 %v4388_v57, %v1669_v27 }
 0x132   : > { %v2244_v31 = vmul.f32 %v4402_v62, %v2056_v24  ;;  %v3501_v33 = vpop.f32.mrf.mxu0  ;;  %v3685_v34 = vpop.f32.mrf.mxu1 }
 0x133   : > { %v2340_v35 = vadd.f32 %v4407_v4, %v2152_v29  ;;  %v1965_v36 = vmax.f32 %v1302_v30, 0.0  ;;  %v2057_v38 = vmax.f32 %v1670_v32, 0.0 }
 0x134   : > { %v2432_v37 = vadd.f32 %v4407_v4, %v2244_v31  ;;  %v1306_v39 = vpop.f32.mrf.mxu0  ;;  %3599 = vmatmul.mubr.msk.bf16.gmra.mxu0 %vm903_vm3, %v3990_v26  ;;  %v1674_v40 = vpop.f32.mrf.mxu1  ;;  %3783 = vmatmul.mubr.msk.bf16.gmra.mxu1 %vm903_vm3, %v3991_v28 }
 0x135   : > { %2522 = vst.msk [vmem:[%s4419_s23 + $0xa0] sm:$0xff] %vm2501_vm4, %v2340_v35  ;;  %v2153_v41 = vmul.f32 %v4402_v62, %v1965_v36  ;;  %v1307_v42 = vadd.f32 %v4388_v57, %v1306_v39  ;;  %v2245_v43 = vmul.f32 %v4402_v62, %v2057_v38  ;;  %v1675_v44 = vadd.f32 %v4388_v57, %v1674_v40 }
 0x136   : > { %2614 = vst.msk [vmem:[%s4419_s23 + $0x380] sm:$0xff] %vm2501_vm4, %v2432_v37  ;;  %3602 = vmatprep.mubr.msk.bf16.mxu0 %vm4107_vm2, %v4105_v0  ;;  %v3504_v45 = vpop.f32.mrf.mxu0  ;;  %v3688_v46 = vpop.f32.mrf.mxu1  ;;  %3786 = vmatprep.mubr.msk.bf16.mxu1 %vm4107_vm2, %v4105_v0 }
 0x137   : > { %v2341_v47 = vadd.f32 %v4407_v4, %v2153_v41  ;;  %v1966_v48 = vmax.f32 %v1307_v42, 0.0  ;;  %v2433_v49 = vadd.f32 %v4407_v4, %v2245_v43  ;;  %v2058_v50 = vmax.f32 %v1675_v44, 0.0  ;;  %v3996_v44 = vld [vmem:[%s4189_s11 + $0x130] sm:$0xff]   ;;  %v3997_v46 = vld [vmem:[%s4189_s11 + $0x2a0] sm:$0xff]  }
 0x138   : > { %v1309_v51 = vpop.f32.mrf.mxu0  ;;  %v1677_v53 = vpop.f32.mrf.mxu1 }
 0x139   : > { %2523 = vst.msk [vmem:[%s4419_s23 + $0xa8] sm:$0xff] %vm2501_vm4, %v2341_v47  ;;  %v2154_v55 = vmul.f32 %v4402_v62, %v1966_v48  ;;  %2615 = vst.msk [vmem:[%s4419_s23 + $0x388] sm:$0xff] %vm2501_vm4, %v2433_v49  ;;  %v1310_v56 = vadd.f32 %v4388_v57, %v1309_v51  ;;  %v2246_v58 = vmul.f32 %v4402_v62, %v2058_v50 }
 0x13a   : > { %v1678_v59 = vadd.f32 %v4388_v57, %v1677_v53  ;;  %v3505_v60 = vpop.f32.mrf.mxu0  ;;  %v3689_v61 = vpop.f32.mrf.mxu1 }
 0x13b   : > { %v2342_v63 = vadd.f32 %v4407_v4, %v2154_v55  ;;  %v1967_v1 = vmax.f32 %v1310_v56, 0.0  ;;  %v2434_v2 = vadd.f32 %v4407_v4, %v2246_v58 }
 0x13c   : > { %v2059_v3 = vmax.f32 %v1678_v59, 0.0  ;;  %v1314_v5 = vpop.f32.mrf.mxu0  ;;  %3603 = vmatmul.mubr.msk.bf16.gmra.mxu0 %vm903_vm3, %v3992_v52  ;;  %v1682_v6 = vpop.f32.mrf.mxu1  ;;  %3787 = vmatmul.mubr.msk.bf16.gmra.mxu1 %vm903_vm3, %v3993_v54 }
 0x13d   : > { %2524 = vst.msk [vmem:[%s4419_s23 + $0xb0] sm:$0xff] %vm2501_vm4, %v2342_v63  ;;  %v2155_v7 = vmul.f32 %v4402_v62, %v1967_v1  ;;  %2616 = vst.msk [vmem:[%s4419_s23 + $0x390] sm:$0xff] %vm2501_vm4, %v2434_v2  ;;  %v1315_v8 = vadd.f32 %v4388_v57, %v1314_v5  ;;  %v1683_v10 = vadd.f32 %v4388_v57, %v1682_v6  ;;  %3606 = vmatprep.mubr.msk.bf16.mxu0 %vm4107_vm2, %v4105_v0 }
 0x13e   : > { %v2247_v9 = vmul.f32 %v4402_v62, %v2059_v3  ;;  %v3508_v11 = vpop.f32.mrf.mxu0  ;;  %v3692_v12 = vpop.f32.mrf.mxu1  ;;  %3790 = vmatprep.mubr.msk.bf16.mxu1 %vm4107_vm2, %v4105_v0 }
 0x13f   : > { %v2343_v13 = vadd.f32 %v4407_v4, %v2155_v7  ;;  %v1968_v14 = vmax.f32 %v1315_v8, 0.0  ;;  %v2060_v16 = vmax.f32 %v1683_v10, 0.0  ;;  %v3998_v10 = vld [vmem:[%s4189_s11 + $0x138] sm:$0xff]   ;;  %v3999_v12 = vld [vmem:[%s4189_s11 + $0x2a8] sm:$0xff]  }
 0x140   : > { %v2435_v15 = vadd.f32 %v4407_v4, %v2247_v9  ;;  %v1317_v17 = vpop.f32.mrf.mxu0  ;;  %v1685_v19 = vpop.f32.mrf.mxu1 }
 0x141   : > { %2525 = vst.msk [vmem:[%s4419_s23 + $0xb8] sm:$0xff] %vm2501_vm4, %v2343_v13  ;;  %v2156_v21 = vmul.f32 %v4402_v62, %v1968_v14  ;;  %v1318_v22 = vadd.f32 %v4388_v57, %v1317_v17  ;;  %v2248_v23 = vmul.f32 %v4402_v62, %v2060_v16  ;;  %v1686_v24 = vadd.f32 %v4388_v57, %v1685_v19 }
 0x142   : > { %2617 = vst.msk [vmem:[%s4419_s23 + $0x398] sm:$0xff] %vm2501_vm4, %v2435_v15  ;;  %v3509_v25 = vpop.f32.mrf.mxu0  ;;  %v3693_v26 = vpop.f32.mrf.mxu1 }
 0x143   : > { %v2344_v27 = vadd.f32 %v4407_v4, %v2156_v21  ;;  %v1969_v28 = vmax.f32 %v1318_v22, 0.0  ;;  %v2436_v29 = vadd.f32 %v4407_v4, %v2248_v23  ;;  %v2061_v30 = vmax.f32 %v1686_v24, 0.0 }
 0x144   : > { %v1322_v31 = vpop.f32.mrf.mxu0  ;;  %3607 = vmatmul.mubr.msk.bf16.gmra.mxu0 %vm903_vm3, %v3994_v18  ;;  %v1690_v32 = vpop.f32.mrf.mxu1  ;;  %3791 = vmatmul.mubr.msk.bf16.gmra.mxu1 %vm903_vm3, %v3995_v20 }
 0x145   : > { %2526 = vst.msk [vmem:[%s4419_s23 + $0xc0] sm:$0xff] %vm2501_vm4, %v2344_v27  ;;  %v2157_v33 = vmul.f32 %v4402_v62, %v1969_v28  ;;  %2618 = vst.msk [vmem:[%s4419_s23 + $0x3a0] sm:$0xff] %vm2501_vm4, %v2436_v29  ;;  %v1323_v34 = vadd.f32 %v4388_v57, %v1322_v31  ;;  %v2249_v35 = vmul.f32 %v4402_v62, %v2061_v30  ;;  %3610 = vmatprep.mubr.msk.bf16.mxu0 %vm4107_vm2, %v4105_v0 }
 0x146   : > { %v1691_v36 = vadd.f32 %v4388_v57, %v1690_v32  ;;  %v3512_v37 = vpop.f32.mrf.mxu0  ;;  %v3696_v38 = vpop.f32.mrf.mxu1  ;;  %3794 = vmatprep.mubr.msk.bf16.mxu1 %vm4107_vm2, %v4105_v0 }
 0x147   : > { %v2345_v39 = vadd.f32 %v4407_v4, %v2157_v33  ;;  %v1970_v40 = vmax.f32 %v1323_v34, 0.0  ;;  %v2437_v41 = vadd.f32 %v4407_v4, %v2249_v35  ;;  %v4001_v37 = vld [vmem:[%s4189_s11 + $0x2b0] sm:$0xff]   ;;  %v4839_v38 = vld [vmem:[%s5713_s3] ss:$0 sm:$0xff] }
 0x148   : > { %v2062_v42 = vmax.f32 %v1691_v36, 0.0  ;;  %v1325_v43 = vpop.f32.mrf.mxu0  ;;  %v1693_v45 = vpop.f32.mrf.mxu1  ;;  %v4000_v36 = vld [vmem:[%s4189_s11 + $0x140] sm:$0xff]  }
 0x149   : > { %2527 = vst.msk [vmem:[%s4419_s23 + $0xc8] sm:$0xff] %vm2501_vm4, %v2345_v39  ;;  %v2158_v47 = vmul.f32 %v4402_v62, %v1970_v40  ;;  %2619 = vst.msk [vmem:[%s4419_s23 + $0x3a8] sm:$0xff] %vm2501_vm4, %v2437_v41  ;;  %v1326_v48 = vadd.f32 %v4388_v57, %v1325_v43  ;;  %v1694_v50 = vadd.f32 %v4388_v57, %v1693_v45 }
 0x14a   : > { %v2250_v49 = vmul.f32 %v4402_v62, %v2062_v42  ;;  %v3513_v51 = vpop.f32.mrf.mxu0  ;;  %v3697_v52 = vpop.f32.mrf.mxu1 }
 0x14b   : > { %v2346_v53 = vadd.f32 %v4407_v4, %v2158_v47  ;;  %v1971_v54 = vmax.f32 %v1326_v48, 0.0  ;;  %v2063_v56 = vmax.f32 %v1694_v50, 0.0 }
 0x14c   : > { %v2438_v55 = vadd.f32 %v4407_v4, %v2250_v49  ;;  %v1330_v58 = vpop.f32.mrf.mxu0  ;;  %3611 = vmatmul.mubr.msk.bf16.gmra.mxu0 %vm903_vm3, %v3996_v44  ;;  %v1698_v59 = vpop.f32.mrf.mxu1  ;;  %3795 = vmatmul.mubr.msk.bf16.gmra.mxu1 %vm903_vm3, %v3997_v46  ;;  %v4850_v44 = vld [vmem:[%s5714_s4] ss:$0 sm:$0xff] }
 0x14d   : > { %2528 = vst.msk [vmem:[%s4419_s23 + $0xd0] sm:$0xff] %vm2501_vm4, %v2346_v53  ;;  %v2159_v60 = vmul.f32 %v4402_v62, %v1971_v54  ;;  %v1331_v61 = vadd.f32 %v4388_v57, %v1330_v58  ;;  %v2251_v63 = vmul.f32 %v4402_v62, %v2063_v56  ;;  %v1699_v1 = vadd.f32 %v4388_v57, %v1698_v59 }
 0x14e   : > { %2620 = vst.msk [vmem:[%s4419_s23 + $0x3b0] sm:$0xff] %vm2501_vm4, %v2438_v55  ;;  %3614 = vmatprep.mubr.msk.bf16.mxu0 %vm4107_vm2, %v4105_v0  ;;  %v3516_v2 = vpop.f32.mrf.mxu0  ;;  %v3700_v3 = vpop.f32.mrf.mxu1  ;;  %3798 = vmatprep.mubr.msk.bf16.mxu1 %vm4107_vm2, %v4105_v0 }
 0x14f   : > { %v2347_v5 = vadd.f32 %v4407_v4, %v2159_v60  ;;  %v1972_v6 = vmax.f32 %v1331_v61, 0.0  ;;  %v2439_v7 = vadd.f32 %v4407_v4, %v2251_v63  ;;  %v2064_v8 = vmax.f32 %v1699_v1, 0.0  ;;  %v4002_v1 = vld [vmem:[%s4189_s11 + $0x148] sm:$0xff]   ;;  %v4003_v3 = vld [vmem:[%s4189_s11 + $0x2b8] sm:$0xff]  }
 0x150   : > { %v1333_v9 = vpop.f32.mrf.mxu0  ;;  %v1701_v11 = vpop.f32.mrf.mxu1 }
 0x151   : > { %2529 = vst.msk [vmem:[%s4419_s23 + $0xd8] sm:$0xff] %vm2501_vm4, %v2347_v5  ;;  %v2160_v13 = vmul.f32 %v4402_v62, %v1972_v6  ;;  %2621 = vst.msk [vmem:[%s4419_s23 + $0x3b8] sm:$0xff] %vm2501_vm4, %v2439_v7  ;;  %v1334_v14 = vadd.f32 %v4388_v57, %v1333_v9  ;;  %v2252_v15 = vmul.f32 %v4402_v62, %v2064_v8 }
 0x152   : > { %v1702_v16 = vadd.f32 %v4388_v57, %v1701_v11  ;;  %v3517_v17 = vpop.f32.mrf.mxu0  ;;  %v3701_v18 = vpop.f32.mrf.mxu1  ;;  %v4821_v57 = vld [vmem:[%s5712_s2] ss:$0 sm:$0xff] }
 0x153   : > { %v2348_v19 = vadd.f32 %v4407_v4, %v2160_v13  ;;  %v1973_v20 = vmax.f32 %v1334_v14, 0.0  ;;  %v2440_v21 = vadd.f32 %v4407_v4, %v2252_v15 }
 0x154   : > { %v2065_v22 = vmax.f32 %v1702_v16, 0.0  ;;  %v1338_v23 = vpop.f32.mrf.mxu0  ;;  %3615 = vmatmul.mubr.msk.bf16.gmra.mxu0 %vm903_vm3, %v3998_v10  ;;  %v1706_v24 = vpop.f32.mrf.mxu1  ;;  %3799 = vmatmul.mubr.msk.bf16.gmra.mxu1 %vm903_vm3, %v3999_v12 }
 0x155   : > { %2530 = vst.msk [vmem:[%s4419_s23 + $0xe0] sm:$0xff] %vm2501_vm4, %v2348_v19  ;;  %v2161_v25 = vmul.f32 %v4402_v62, %v1973_v20  ;;  %2622 = vst.msk [vmem:[%s4419_s23 + $0x3c0] sm:$0xff] %vm2501_vm4, %v2440_v21  ;;  %v1339_v26 = vadd.f32 %v4821_v57, %v1338_v23  ;;  %v1707_v28 = vadd.f32 %v4821_v57, %v1706_v24  ;;  %3618 = vmatprep.mubr.msk.bf16.mxu0 %vm4107_vm2, %v4105_v0 }
 0x156   : > { %v2253_v27 = vmul.f32 %v4402_v62, %v2065_v22  ;;  %v3520_v29 = vpop.f32.mrf.mxu0  ;;  %v3704_v30 = vpop.f32.mrf.mxu1  ;;  %3802 = vmatprep.mubr.msk.bf16.mxu1 %vm4107_vm2, %v4105_v0 }
 0x157   : > { %v2349_v31 = vadd.f32 %v4407_v4, %v2161_v25  ;;  %v1974_v32 = vmax.f32 %v1339_v26, 0.0  ;;  %v2066_v34 = vmax.f32 %v1707_v28, 0.0  ;;  %v4004_v28 = vld [vmem:[%s4189_s11 + $0x150] sm:$0xff]   ;;  %v4005_v30 = vld [vmem:[%s4189_s11 + $0x2c0] sm:$0xff]  }
 0x158   : > { %v2441_v33 = vadd.f32 %v4407_v4, %v2253_v27  ;;  %v1341_v35 = vpop.f32.mrf.mxu0  ;;  %v1709_v62 = vpop.f32.mrf.mxu1 }
 0x159   : > { %2531 = vst.msk [vmem:[%s4419_s23 + $0xe8] sm:$0xff] %vm2501_vm4, %v2349_v31  ;;  %v2162_v39 = vmul.f32 %v4839_v38, %v1974_v32  ;;  %v1342_v40 = vadd.f32 %v4821_v57, %v1341_v35  ;;  %v2254_v4 = vmul.f32 %v4839_v38, %v2066_v34  ;;  %v1710_v41 = vadd.f32 %v4821_v57, %v1709_v62 }
 0x15a   : > { %2623 = vst.msk [vmem:[%s4419_s23 + $0x3c8] sm:$0xff] %vm2501_vm4, %v2441_v33  ;;  %v3521_v42 = vpop.f32.mrf.mxu0  ;;  %v3705_v43 = vpop.f32.mrf.mxu1 }
 0x15b   : > { %v2350_v45 = vadd.f32 %v4850_v44, %v2162_v39  ;;  %v1975_v46 = vmax.f32 %v1342_v40, 0.0  ;;  %v2442_v47 = vadd.f32 %v4850_v44, %v2254_v4  ;;  %v2067_v48 = vmax.f32 %v1710_v41, 0.0 }
 0x15c   : > { %v1346_v49 = vpop.f32.mrf.mxu0  ;;  %3619 = vmatmul.mubr.msk.bf16.gmra.mxu0 %vm903_vm3, %v4000_v36  ;;  %v1714_v50 = vpop.f32.mrf.mxu1  ;;  %3803 = vmatmul.mubr.msk.bf16.gmra.mxu1 %vm903_vm3, %v4001_v37 }
 0x15d   : > { %2532 = vst.msk [vmem:[%s4419_s23 + $0xf0] sm:$0xff] %vm2501_vm4, %v2350_v45  ;;  %v2163_v51 = vmul.f32 %v4839_v38, %v1975_v46  ;;  %2624 = vst.msk [vmem:[%s4419_s23 + $0x3d0] sm:$0xff] %vm2501_vm4, %v2442_v47  ;;  %v1347_v52 = vadd.f32 %v4821_v57, %v1346_v49  ;;  %v2255_v53 = vmul.f32 %v4839_v38, %v2067_v48  ;;  %3622 = vmatprep.mubr.msk.bf16.mxu0 %vm4107_vm2, %v4105_v0 }
 0x15e   : > { %v1715_v54 = vadd.f32 %v4821_v57, %v1714_v50  ;;  %v3524_v55 = vpop.f32.mrf.mxu0  ;;  %v3708_v56 = vpop.f32.mrf.mxu1  ;;  %3806 = vmatprep.mubr.msk.bf16.mxu1 %vm4107_vm2, %v4105_v0 }
 0x15f   : > { %v2351_v58 = vadd.f32 %v4850_v44, %v2163_v51  ;;  %v1976_v59 = vmax.f32 %v1347_v52, 0.0  ;;  %v2443_v60 = vadd.f32 %v4850_v44, %v2255_v53  ;;  %v4007_v56 = vld [vmem:[%s4189_s11 + $0x2c8] sm:$0xff]  }
 0x160   : > { %v2068_v61 = vmax.f32 %v1715_v54, 0.0  ;;  %v1349_v63 = vpop.f32.mrf.mxu0  ;;  %v1717_v2 = vpop.f32.mrf.mxu1  ;;  %v4006_v54 = vld [vmem:[%s4189_s11 + $0x158] sm:$0xff]  }
 0x161   : > { %2533 = vst.msk [vmem:[%s4419_s23 + $0xf8] sm:$0xff] %vm2501_vm4, %v2351_v58  ;;  %v2164_v5 = vmul.f32 %v4839_v38, %v1976_v59  ;;  %2625 = vst.msk [vmem:[%s4419_s23 + $0x3d8] sm:$0xff] %vm2501_vm4, %v2443_v60  ;;  %v1350_v6 = vadd.f32 %v4821_v57, %v1349_v63  ;;  %v1718_v8 = vadd.f32 %v4821_v57, %v1717_v2 }
 0x162   : > { %v2256_v7 = vmul.f32 %v4839_v38, %v2068_v61  ;;  %v3525_v9 = vpop.f32.mrf.mxu0  ;;  %v3709_v10 = vpop.f32.mrf.mxu1 }
 0x163   : > { %v2352_v11 = vadd.f32 %v4850_v44, %v2164_v5  ;;  %v1977_v12 = vmax.f32 %v1350_v6, 0.0  ;;  %v2069_v14 = vmax.f32 %v1718_v8, 0.0 }
 0x164   : > { %v2444_v13 = vadd.f32 %v4850_v44, %v2256_v7  ;;  %v1354_v15 = vpop.f32.mrf.mxu0  ;;  %3623 = vmatmul.mubr.msk.bf16.gmra.mxu0 %vm903_vm3, %v4002_v1  ;;  %v1722_v16 = vpop.f32.mrf.mxu1  ;;  %3807 = vmatmul.mubr.msk.bf16.gmra.mxu1 %vm903_vm3, %v4003_v3 }
 0x165   : > { %2534 = vst.msk [vmem:[%s4419_s23 + $0x100] sm:$0xff] %vm2501_vm4, %v2352_v11  ;;  %v2165_v17 = vmul.f32 %v4839_v38, %v1977_v12  ;;  %v1355_v18 = vadd.f32 %v4821_v57, %v1354_v15  ;;  %v2257_v19 = vmul.f32 %v4839_v38, %v2069_v14  ;;  %v1723_v20 = vadd.f32 %v4821_v57, %v1722_v16 }
 0x166   : > { %2626 = vst.msk [vmem:[%s4419_s23 + $0x3e0] sm:$0xff] %vm2501_vm4, %v2444_v13  ;;  %3626 = vmatprep.mubr.msk.bf16.mxu0 %vm4107_vm2, %v4105_v0  ;;  %v3528_v21 = vpop.f32.mrf.mxu0  ;;  %v3712_v22 = vpop.f32.mrf.mxu1  ;;  %3810 = vmatprep.mubr.msk.bf16.mxu1 %vm4107_vm2, %v4105_v0 }
 0x167   : > { %v2353_v23 = vadd.f32 %v4850_v44, %v2165_v17  ;;  %v1978_v24 = vmax.f32 %v1355_v18, 0.0  ;;  %v2445_v25 = vadd.f32 %v4850_v44, %v2257_v19  ;;  %v2070_v26 = vmax.f32 %v1723_v20, 0.0  ;;  %v4008_v20 = vld [vmem:[%s4189_s11 + $0x160] sm:$0xff]   ;;  %v4009_v22 = vld [vmem:[%s4189_s11 + $0x2d0] ss:$0 sps:$4 sm:$0xff]  }
 0x168   : > { %v1357_v27 = vpop.f32.mrf.mxu0  ;;  %v1725_v29 = vpop.f32.mrf.mxu1 }
 0x169   : > { %2535 = vst.msk [vmem:[%s4419_s23 + $0x108] sm:$0xff] %vm2501_vm4, %v2353_v23  ;;  %v2166_v31 = vmul.f32 %v4839_v38, %v1978_v24  ;;  %2627 = vst.msk [vmem:[%s4419_s23 + $0x3e8] sm:$0xff] %vm2501_vm4, %v2445_v25  ;;  %v1358_v32 = vadd.f32 %v4821_v57, %v1357_v27  ;;  %v2258_v33 = vmul.f32 %v4839_v38, %v2070_v26 }
 0x16a   : > { %v1726_v34 = vadd.f32 %v4821_v57, %v1725_v29  ;;  %v3529_v35 = vpop.f32.mrf.mxu0  ;;  %v3713_v36 = vpop.f32.mrf.mxu1 }
 0x16b   : > { %v2354_v62 = vadd.f32 %v4850_v44, %v2166_v31  ;;  %v1979_v37 = vmax.f32 %v1358_v32, 0.0  ;;  %v2446_v39 = vadd.f32 %v4850_v44, %v2258_v33 }
 0x16c   : > { %v2071_v40 = vmax.f32 %v1726_v34, 0.0  ;;  %v1362_v4 = vpop.f32.mrf.mxu0  ;;  %3627 = vmatmul.mubr.msk.bf16.gmra.mxu0 %vm903_vm3, %v4004_v28  ;;  %v1730_v41 = vpop.f32.mrf.mxu1  ;;  %3811 = vmatmul.mubr.msk.bf16.gmra.mxu1 %vm903_vm3, %v4005_v30 }
 0x16d   : > { %2536 = vst.msk [vmem:[%s4419_s23 + $0x110] sm:$0xff] %vm2501_vm4, %v2354_v62  ;;  %v2167_v42 = vmul.f32 %v4839_v38, %v1979_v37  ;;  %2628 = vst.msk [vmem:[%s4419_s23 + $0x3f0] sm:$0xff] %vm2501_vm4, %v2446_v39  ;;  %v1363_v43 = vadd.f32 %v4821_v57, %v1362_v4  ;;  %v1731_v46 = vadd.f32 %v4821_v57, %v1730_v41  ;;  %3630 = vmatprep.mubr.msk.bf16.mxu0 %vm4107_vm2, %v4105_v0 }
 0x16e   : > { %v2259_v45 = vmul.f32 %v4839_v38, %v2071_v40  ;;  %v3532_v47 = vpop.f32.mrf.mxu0  ;;  %v3716_v48 = vpop.f32.mrf.mxu1  ;;  %3814 = vmatprep.mubr.msk.bf16.mxu1 %vm4107_vm2, %v4105_v0 }
 0x16f   : > { %v2355_v49 = vadd.f32 %v4850_v44, %v2167_v42  ;;  %v1980_v50 = vmax.f32 %v1363_v43, 0.0  ;;  %v2072_v52 = vmax.f32 %v1731_v46, 0.0  ;;  %v4010_v46 = vld [vmem:[%s4189_s11 + $0x168] sm:$0xff]  }
 0x170   : > { %v2447_v51 = vadd.f32 %v4850_v44, %v2259_v45  ;;  %v1365_v53 = vpop.f32.mrf.mxu0  ;;  %v1733_v55 = vpop.f32.mrf.mxu1 }
 0x171   : > { %2537 = vst.msk [vmem:[%s4419_s23 + $0x118] sm:$0xff] %vm2501_vm4, %v2355_v49  ;;  %v2168_v58 = vmul.f32 %v4839_v38, %v1980_v50  ;;  %v1366_v59 = vadd.f32 %v4821_v57, %v1365_v53  ;;  %v2260_v60 = vmul.f32 %v4839_v38, %v2072_v52  ;;  %v1734_v61 = vadd.f32 %v4821_v57, %v1733_v55 }
 0x172   : > { %2629 = vst.msk [vmem:[%s4419_s23 + $0x3f8] sm:$0xff] %vm2501_vm4, %v2447_v51  ;;  %v3533_v63 = vpop.f32.mrf.mxu0  ;;  %v3717_v1 = vpop.f32.mrf.mxu1 }
 0x173   : > { %v2356_v2 = vadd.f32 %v4850_v44, %v2168_v58  ;;  %v1981_v3 = vmax.f32 %v1366_v59, 0.0  ;;  %v2448_v5 = vadd.f32 %v4850_v44, %v2260_v60  ;;  %v2073_v6 = vmax.f32 %v1734_v61, 0.0 }
 0x174   : > { %v1370_v7 = vpop.f32.mrf.mxu0  ;;  %3631 = vmatmul.mubr.msk.bf16.gmra.mxu0 %vm903_vm3, %v4006_v54  ;;  %v1738_v8 = vpop.f32.mrf.mxu1  ;;  %3815 = vmatmul.mubr.msk.bf16.gmra.mxu1 %vm903_vm3, %v4007_v56 }
 0x175   : > { %2538 = vst.msk [vmem:[%s4419_s23 + $0x120] sm:$0xff] %vm2501_vm4, %v2356_v2  ;;  %v2169_v9 = vmul.f32 %v4839_v38, %v1981_v3  ;;  %2630 = vst.msk [vmem:[%s4419_s23 + $0x400] sm:$0xff] %vm2501_vm4, %v2448_v5  ;;  %v1371_v10 = vadd.f32 %v4821_v57, %v1370_v7  ;;  %v2261_v11 = vmul.f32 %v4839_v38, %v2073_v6  ;;  %3634 = vmatprep.mubr.msk.bf16.mxu0 %vm4107_vm2, %v4105_v0 }
 0x176   : > { %v1739_v12 = vadd.f32 %v4821_v57, %v1738_v8  ;;  %v3536_v13 = vpop.f32.mrf.mxu0  ;;  %v3720_v14 = vpop.f32.mrf.mxu1  ;;  %3818 = vmatprep.mubr.msk.bf16.mxu1 %vm4107_vm2, %v4105_v0 }
 0x177   : > { %v2357_v15 = vadd.f32 %v4850_v44, %v2169_v9  ;;  %v1982_v16 = vmax.f32 %v1371_v10, 0.0  ;;  %v2449_v17 = vadd.f32 %v4850_v44, %v2261_v11 }
 0x178   : > { %v2074_v18 = vmax.f32 %v1739_v12, 0.0  ;;  %v1373_v19 = vpop.f32.mrf.mxu0  ;;  %v1741_v21 = vpop.f32.mrf.mxu1 }
 0x179   : > { %2539 = vst.msk [vmem:[%s4419_s23 + $0x128] sm:$0xff] %vm2501_vm4, %v2357_v15  ;;  %v2170_v23 = vmul.f32 %v4839_v38, %v1982_v16  ;;  %2631 = vst.msk [vmem:[%s4419_s23 + $0x408] sm:$0xff] %vm2501_vm4, %v2449_v17  ;;  %v1374_v24 = vadd.f32 %v4821_v57, %v1373_v19  ;;  %v1742_v26 = vadd.f32 %v4821_v57, %v1741_v21 }
 0x17a   : > { %v2262_v25 = vmul.f32 %v4839_v38, %v2074_v18  ;;  %v3537_v27 = vpop.f32.mrf.mxu0  ;;  %v3721_v28 = vpop.f32.mrf.mxu1 }
 0x17b   : > { %v2358_v29 = vadd.f32 %v4850_v44, %v2170_v23  ;;  %v1983_v30 = vmax.f32 %v1374_v24, 0.0  ;;  %v2075_v32 = vmax.f32 %v1742_v26, 0.0 }
 0x17c   : > { %v2450_v31 = vadd.f32 %v4850_v44, %v2262_v25  ;;  %v1378_v33 = vpop.f32.mrf.mxu0  ;;  %3635 = vmatmul.mubr.msk.bf16.gmra.mxu0 %vm903_vm3, %v4008_v20  ;;  %v1746_v34 = vpop.f32.mrf.mxu1  ;;  %3819 = vmatmul.mubr.msk.bf16.gmra.mxu1 %vm903_vm3, %v4009_v22 }
 0x17d   : > { %2540 = vst.msk [vmem:[%s4419_s23 + $0x130] sm:$0xff] %vm2501_vm4, %v2358_v29  ;;  %v2171_v35 = vmul.f32 %v4839_v38, %v1983_v30  ;;  %v1379_v36 = vadd.f32 %v4821_v57, %v1378_v33  ;;  %v2263_v62 = vmul.f32 %v4839_v38, %v2075_v32  ;;  %v1747_v37 = vadd.f32 %v4821_v57, %v1746_v34 }
 0x17e   : > { %2632 = vst.msk [vmem:[%s4419_s23 + $0x410] sm:$0xff] %vm2501_vm4, %v2450_v31  ;;  %3638 = vmatprep.mubr.msk.bf16.mxu0 %vm4107_vm2, %v4105_v0  ;;  %v3540_v39 = vpop.f32.mrf.mxu0  ;;  %v3724_v40 = vpop.f32.mrf.mxu1 }
 0x17f   : > { %v2359_v4 = vadd.f32 %v4850_v44, %v2171_v35  ;;  %v1984_v41 = vmax.f32 %v1379_v36, 0.0  ;;  %v2451_v42 = vadd.f32 %v4850_v44, %v2263_v62  ;;  %v2076_v43 = vmax.f32 %v1747_v37, 0.0 }
 0x180   : > { %v1381_v45 = vpop.f32.mrf.mxu0  ;;  %v1749_v47 = vpop.f32.mrf.mxu1 }
 0x181   : > { %2541 = vst.msk [vmem:[%s4419_s23 + $0x138] sm:$0xff] %vm2501_vm4, %v2359_v4  ;;  %v2172_v48 = vmul.f32 %v4839_v38, %v1984_v41  ;;  %2633 = vst.msk [vmem:[%s4419_s23 + $0x418] sm:$0xff] %vm2501_vm4, %v2451_v42  ;;  %v1382_v0 = vadd.f32 %v4821_v57, %v1381_v45  ;;  %v2264_v49 = vmul.f32 %v4839_v38, %v2076_v43 }
 0x182   : > { %v1750_v50 = vadd.f32 %v4821_v57, %v1749_v47  ;;  %v3541_v51 = vpop.f32.mrf.mxu0  ;;  %v3725_v52 = vpop.f32.mrf.mxu1 }
 0x183   : > { %v2360_v53 = vadd.f32 %v4850_v44, %v2172_v48  ;;  %v1985_v54 = vmax.f32 %v1382_v0, 0.0  ;;  %v2452_v55 = vadd.f32 %v4850_v44, %v2264_v49 }
 0x184   : > { %v2077_v56 = vmax.f32 %v1750_v50, 0.0  ;;  %v1386_v58 = vpop.f32.mrf.mxu0  ;;  %3639 = vmatmul.mubr.msk.bf16.gmra.mxu0 %vm903_vm3, %v4010_v46  ;;  %v1754_v59 = vpop.f32.mrf.mxu1 }
 0x185   : > { %2542 = vst.msk [vmem:[%s4419_s23 + $0x140] sm:$0xff] %vm2501_vm4, %v2360_v53  ;;  %v2173_v60 = vmul.f32 %v4839_v38, %v1985_v54  ;;  %2634 = vst.msk [vmem:[%s4419_s23 + $0x420] sm:$0xff] %vm2501_vm4, %v2452_v55  ;;  %v1387_v61 = vadd.f32 %v4821_v57, %v1386_v58  ;;  %v1755_v1 = vadd.f32 %v4821_v57, %v1754_v59 }
 0x186   : > { %v2265_v63 = vmul.f32 %v4839_v38, %v2077_v56  ;;  %v3544_v2 = vpop.f32.mrf.mxu0  ;;  %v3728_v3 = vpop.f32.mrf.mxu1 }
 0x187   : > { %v2361_v5 = vadd.f32 %v4850_v44, %v2173_v60  ;;  %v1986_v6 = vmax.f32 %v1387_v61, 0.0  ;;  %v2078_v8 = vmax.f32 %v1755_v1, 0.0 }
 0x188   : > { %v2453_v7 = vadd.f32 %v4850_v44, %v2265_v63  ;;  %v1389_v9 = vpop.f32.mrf.mxu0  ;;  %v1757_v10 = vpop.f32.mrf.mxu1 }
 0x189   : > { %2543 = vst.msk [vmem:[%s4419_s23 + $0x148] sm:$0xff] %vm2501_vm4, %v2361_v5  ;;  %v2174_v11 = vmul.f32 %v4839_v38, %v1986_v6  ;;  %v1390_v12 = vadd.f32 %v4821_v57, %v1389_v9  ;;  %v2266_v13 = vmul.f32 %v4839_v38, %v2078_v8  ;;  %v1758_v14 = vadd.f32 %v4821_v57, %v1757_v10 }
 0x18a   : > { %2635 = vst.msk [vmem:[%s4419_s23 + $0x428] sm:$0xff] %vm2501_vm4, %v2453_v7  ;;  %v3545_v15 = vpop.f32.mrf.mxu0  ;;  %v3729_v16 = vpop.f32.mrf.mxu1 }
 0x18b   : > { %v2362_v17 = vadd.f32 %v4850_v44, %v2174_v11  ;;  %v1987_v18 = vmax.f32 %v1390_v12, 0.0  ;;  %v2454_v19 = vadd.f32 %v4850_v44, %v2266_v13  ;;  %v2079_v20 = vmax.f32 %v1758_v14, 0.0 }
 0x18c   : > { %v1394_v21 = vpop.f32.mrf.mxu0  ;;  %v1762_v22 = vpop.f32.mrf.mxu1 }
 0x18d   : > { %2544 = vst.msk [vmem:[%s4419_s23 + $0x150] sm:$0xff] %vm2501_vm4, %v2362_v17  ;;  %v2175_v23 = vmul.f32 %v4839_v38, %v1987_v18  ;;  %2636 = vst.msk [vmem:[%s4419_s23 + $0x430] sm:$0xff] %vm2501_vm4, %v2454_v19  ;;  %v1395_v24 = vadd.f32 %v4821_v57, %v1394_v21  ;;  %v2267_v25 = vmul.f32 %v4839_v38, %v2079_v20 }
 0x18e   : > { %v1763_v26 = vadd.f32 %v4821_v57, %v1762_v22  ;;  %v3548_v27 = vpop.f32.mrf.mxu0  ;;  %v3732_v28 = vpop.f32.mrf.mxu1 }
 0x18f   : > { %v2363_v29 = vadd.f32 %v4850_v44, %v2175_v23  ;;  %v1988_v30 = vmax.f32 %v1395_v24, 0.0  ;;  %v2455_v31 = vadd.f32 %v4850_v44, %v2267_v25 }
 0x190   : > { %v2080_v32 = vmax.f32 %v1763_v26, 0.0  ;;  %v1397_v33 = vpop.f32.mrf.mxu0  ;;  %v1765_v34 = vpop.f32.mrf.mxu1 }
 0x191   : > { %2545 = vst.msk [vmem:[%s4419_s23 + $0x158] sm:$0xff] %vm2501_vm4, %v2363_v29  ;;  %v2176_v35 = vmul.f32 %v4839_v38, %v1988_v30  ;;  %2637 = vst.msk [vmem:[%s4419_s23 + $0x438] sm:$0xff] %vm2501_vm4, %v2455_v31  ;;  %v1398_v36 = vadd.f32 %v4821_v57, %v1397_v33  ;;  %v1766_v37 = vadd.f32 %v4821_v57, %v1765_v34 }
 0x192   : > { %v2268_v62 = vmul.f32 %v4839_v38, %v2080_v32  ;;  %v3549_v39 = vpop.f32.mrf.mxu0  ;;  %v3733_v40 = vpop.f32.mrf.mxu1 }
 0x193   : > { %v2364_v4 = vadd.f32 %v4850_v44, %v2176_v35  ;;  %v1989_v41 = vmax.f32 %v1398_v36, 0.0  ;;  %v2081_v43 = vmax.f32 %v1766_v37, 0.0 }
 0x194   : > { %v2456_v42 = vadd.f32 %v4850_v44, %v2268_v62  ;;  %v1402_v45 = vpop.f32.mrf.mxu0  ;;  %v1770_v46 = vpop.f32.mrf.mxu1 }
 0x195   : > { %2546 = vst.msk [vmem:[%s4419_s23 + $0x160] sm:$0xff] %vm2501_vm4, %v2364_v4  ;;  %v2177_v47 = vmul.f32 %v4839_v38, %v1989_v41  ;;  %v1403_v48 = vadd.f32 %v4821_v57, %v1402_v45  ;;  %v2269_v0 = vmul.f32 %v4839_v38, %v2081_v43  ;;  %v1771_v49 = vadd.f32 %v4821_v57, %v1770_v46 }
 0x196   : > { %2638 = vst.msk [vmem:[%s4419_s23 + $0x440] sm:$0xff] %vm2501_vm4, %v2456_v42  ;;  %v3552_v50 = vpop.f32.mrf.mxu0  ;;  %v3736_v51 = vpop.f32.mrf.mxu1 }
 0x197   : > { %v2365_v52 = vadd.f32 %v4850_v44, %v2177_v47  ;;  %v1990_v53 = vmax.f32 %v1403_v48, 0.0  ;;  %v2457_v54 = vadd.f32 %v4850_v44, %v2269_v0  ;;  %v2082_v55 = vmax.f32 %v1771_v49, 0.0 }
 0x198   : > { %v1405_v56 = vpop.f32.mrf.mxu0  ;;  %v1773_v58 = vpop.f32.mrf.mxu1 }
 0x199   : > { %2547 = vst.msk [vmem:[%s4419_s23 + $0x168] sm:$0xff] %vm2501_vm4, %v2365_v52  ;;  %v2178_v59 = vmul.f32 %v4839_v38, %v1990_v53  ;;  %2639 = vst.msk [vmem:[%s4419_s23 + $0x448] sm:$0xff] %vm2501_vm4, %v2457_v54  ;;  %v1406_v60 = vadd.f32 %v4821_v57, %v1405_v56  ;;  %v2270_v61 = vmul.f32 %v4839_v38, %v2082_v55 }
 0x19a   : > { %v1774_v63 = vadd.f32 %v4821_v57, %v1773_v58  ;;  %v3553_v1 = vpop.f32.mrf.mxu0  ;;  %v3737_v2 = vpop.f32.mrf.mxu1 }
 0x19b   : > { %v2366_v3 = vadd.f32 %v4850_v44, %v2178_v59  ;;  %v1991_v5 = vmax.f32 %v1406_v60, 0.0  ;;  %v2458_v6 = vadd.f32 %v4850_v44, %v2270_v61 }
 0x19c   : > { %v2083_v7 = vmax.f32 %v1774_v63, 0.0  ;;  %v1410_v8 = vpop.f32.mrf.mxu0  ;;  %v1778_v9 = vpop.f32.mrf.mxu1 }
 0x19d   : > { %2548 = vst.msk [vmem:[%s4419_s23 + $0x170] sm:$0xff] %vm2501_vm4, %v2366_v3  ;;  %v2179_v10 = vmul.f32 %v4839_v38, %v1991_v5  ;;  %2640 = vst.msk [vmem:[%s4419_s23 + $0x450] sm:$0xff] %vm2501_vm4, %v2458_v6  ;;  %v1411_v11 = vadd.f32 %v4821_v57, %v1410_v8  ;;  %v1779_v13 = vadd.f32 %v4821_v57, %v1778_v9 }
 0x19e   : > { %v2271_v12 = vmul.f32 %v4839_v38, %v2083_v7  ;;  %v3556_v14 = vpop.f32.mrf.mxu0  ;;  %v3740_v15 = vpop.f32.mrf.mxu1 }
 0x19f   : > { %v2367_v16 = vadd.f32 %v4850_v44, %v2179_v10  ;;  %v1992_v17 = vmax.f32 %v1411_v11, 0.0  ;;  %v2084_v19 = vmax.f32 %v1779_v13, 0.0 }
 0x1a0   : > { %v2459_v18 = vadd.f32 %v4850_v44, %v2271_v12  ;;  %v1413_v20 = vpop.f32.mrf.mxu0  ;;  %v1781_v21 = vpop.f32.mrf.mxu1 }
 0x1a1   : > { %2549 = vst.msk [vmem:[%s4419_s23 + $0x178] sm:$0xff] %vm2501_vm4, %v2367_v16  ;;  %v2180_v22 = vmul.f32 %v4839_v38, %v1992_v17  ;;  %v1414_v23 = vadd.f32 %v4821_v57, %v1413_v20  ;;  %v2272_v24 = vmul.f32 %v4839_v38, %v2084_v19  ;;  %v1782_v25 = vadd.f32 %v4821_v57, %v1781_v21 }
 0x1a2   : > { %2641 = vst.msk [vmem:[%s4419_s23 + $0x458] sm:$0xff] %vm2501_vm4, %v2459_v18  ;;  %v3557_v26 = vpop.f32.mrf.mxu0  ;;  %v3741_v27 = vpop.f32.mrf.mxu1 }
 0x1a3   : > { %v2368_v28 = vadd.f32 %v4850_v44, %v2180_v22  ;;  %v1993_v29 = vmax.f32 %v1414_v23, 0.0  ;;  %v2460_v30 = vadd.f32 %v4850_v44, %v2272_v24  ;;  %v2085_v31 = vmax.f32 %v1782_v25, 0.0 }
 0x1a4   : > { %v1418_v32 = vpop.f32.mrf.mxu0  ;;  %v1786_v33 = vpop.f32.mrf.mxu1 }
 0x1a5   : > { %2550 = vst.msk [vmem:[%s4419_s23 + $0x180] sm:$0xff] %vm2501_vm4, %v2368_v28  ;;  %v2181_v34 = vmul.f32 %v4839_v38, %v1993_v29  ;;  %2642 = vst.msk [vmem:[%s4419_s23 + $0x460] sm:$0xff] %vm2501_vm4, %v2460_v30  ;;  %v1419_v35 = vadd.f32 %v4821_v57, %v1418_v32  ;;  %v2273_v36 = vmul.f32 %v4839_v38, %v2085_v31 }
 0x1a6   : > { %v1787_v62 = vadd.f32 %v4821_v57, %v1786_v33  ;;  %v3560_v37 = vpop.f32.mrf.mxu0  ;;  %v3744_v39 = vpop.f32.mrf.mxu1 }
 0x1a7   : > { %v2369_v40 = vadd.f32 %v4850_v44, %v2181_v34  ;;  %v1994_v4 = vmax.f32 %v1419_v35, 0.0  ;;  %v2461_v41 = vadd.f32 %v4850_v44, %v2273_v36 }
 0x1a8   : > { %v2086_v42 = vmax.f32 %v1787_v62, 0.0  ;;  %v1421_v43 = vpop.f32.mrf.mxu0  ;;  %v1789_v45 = vpop.f32.mrf.mxu1 }
 0x1a9   : > { %2551 = vst.msk [vmem:[%s4419_s23 + $0x188] sm:$0xff] %vm2501_vm4, %v2369_v40  ;;  %v2182_v46 = vmul.f32 %v4839_v38, %v1994_v4  ;;  %2643 = vst.msk [vmem:[%s4419_s23 + $0x468] sm:$0xff] %vm2501_vm4, %v2461_v41  ;;  %v1422_v47 = vadd.f32 %v4821_v57, %v1421_v43  ;;  %v1790_v0 = vadd.f32 %v4821_v57, %v1789_v45 }
 0x1aa   : > { %v2274_v48 = vmul.f32 %v4839_v38, %v2086_v42  ;;  %v3561_v49 = vpop.f32.mrf.mxu0  ;;  %v3745_v50 = vpop.f32.mrf.mxu1 }
 0x1ab   : > { %v2370_v51 = vadd.f32 %v4850_v44, %v2182_v46  ;;  %v1995_v52 = vmax.f32 %v1422_v47, 0.0  ;;  %v2087_v54 = vmax.f32 %v1790_v0, 0.0 }
 0x1ac   : > { %v2462_v53 = vadd.f32 %v4850_v44, %v2274_v48  ;;  %v1426_v55 = vpop.f32.mrf.mxu0  ;;  %v1794_v56 = vpop.f32.mrf.mxu1 }
 0x1ad   : > { %2552 = vst.msk [vmem:[%s4419_s23 + $0x190] sm:$0xff] %vm2501_vm4, %v2370_v51  ;;  %v2183_v58 = vmul.f32 %v4839_v38, %v1995_v52  ;;  %v1427_v59 = vadd.f32 %v4821_v57, %v1426_v55  ;;  %v2275_v60 = vmul.f32 %v4839_v38, %v2087_v54  ;;  %v1795_v61 = vadd.f32 %v4821_v57, %v1794_v56 }
 0x1ae   : > { %2644 = vst.msk [vmem:[%s4419_s23 + $0x470] sm:$0xff] %vm2501_vm4, %v2462_v53  ;;  %v3564_v63 = vpop.f32.mrf.mxu0  ;;  %v3748_v1 = vpop.f32.mrf.mxu1 }
 0x1af   : > { %v2371_v2 = vadd.f32 %v4850_v44, %v2183_v58  ;;  %v1996_v3 = vmax.f32 %v1427_v59, 0.0  ;;  %v2463_v5 = vadd.f32 %v4850_v44, %v2275_v60  ;;  %v2088_v6 = vmax.f32 %v1795_v61, 0.0 }
 0x1b0   : > { %v1429_v7 = vpop.f32.mrf.mxu0  ;;  %v1797_v8 = vpop.f32.mrf.mxu1 }
 0x1b1   : > { %2553 = vst.msk [vmem:[%s4419_s23 + $0x198] sm:$0xff] %vm2501_vm4, %v2371_v2  ;;  %v2184_v9 = vmul.f32 %v4839_v38, %v1996_v3  ;;  %2645 = vst.msk [vmem:[%s4419_s23 + $0x478] sm:$0xff] %vm2501_vm4, %v2463_v5  ;;  %v1430_v10 = vadd.f32 %v4821_v57, %v1429_v7  ;;  %v2276_v11 = vmul.f32 %v4839_v38, %v2088_v6 }
 0x1b2   : > { %v1798_v12 = vadd.f32 %v4821_v57, %v1797_v8  ;;  %v3565_v13 = vpop.f32.mrf.mxu0  ;;  %v3749_v14 = vpop.f32.mrf.mxu1 }
 0x1b3   : > { %v2372_v15 = vadd.f32 %v4850_v44, %v2184_v9  ;;  %v1997_v16 = vmax.f32 %v1430_v10, 0.0  ;;  %v2464_v17 = vadd.f32 %v4850_v44, %v2276_v11 }
 0x1b4   : > { %v2089_v18 = vmax.f32 %v1798_v12, 0.0  ;;  %v1434_v19 = vpop.f32.mrf.mxu0  ;;  %v1802_v20 = vpop.f32.mrf.mxu1 }
 0x1b5   : > { %2554 = vst.msk [vmem:[%s4419_s23 + $0x1a0] sm:$0xff] %vm2501_vm4, %v2372_v15  ;;  %v2185_v21 = vmul.f32 %v4839_v38, %v1997_v16  ;;  %2646 = vst.msk [vmem:[%s4419_s23 + $0x480] sm:$0xff] %vm2501_vm4, %v2464_v17  ;;  %v1435_v22 = vadd.f32 %v4821_v57, %v1434_v19  ;;  %v1803_v24 = vadd.f32 %v4821_v57, %v1802_v20 }
 0x1b6   : > { %v2277_v23 = vmul.f32 %v4839_v38, %v2089_v18  ;;  %v3568_v25 = vpop.f32.mrf.mxu0  ;;  %v3752_v26 = vpop.f32.mrf.mxu1 }
 0x1b7   : > { %v2373_v27 = vadd.f32 %v4850_v44, %v2185_v21  ;;  %v1998_v28 = vmax.f32 %v1435_v22, 0.0  ;;  %v2090_v30 = vmax.f32 %v1803_v24, 0.0 }
 0x1b8   : > { %v2465_v29 = vadd.f32 %v4850_v44, %v2277_v23  ;;  %v1437_v31 = vpop.f32.mrf.mxu0  ;;  %v1805_v32 = vpop.f32.mrf.mxu1 }
 0x1b9   : > { %2555 = vst.msk [vmem:[%s4419_s23 + $0x1a8] sm:$0xff] %vm2501_vm4, %v2373_v27  ;;  %v2186_v33 = vmul.f32 %v4839_v38, %v1998_v28  ;;  %v1438_v34 = vadd.f32 %v4821_v57, %v1437_v31  ;;  %v2278_v35 = vmul.f32 %v4839_v38, %v2090_v30  ;;  %v1806_v36 = vadd.f32 %v4821_v57, %v1805_v32 }
 0x1ba   : > { %2647 = vst.msk [vmem:[%s4419_s23 + $0x488] sm:$0xff] %vm2501_vm4, %v2465_v29  ;;  %v3569_v62 = vpop.f32.mrf.mxu0  ;;  %v3753_v37 = vpop.f32.mrf.mxu1 }
 0x1bb   : > { %v2374_v39 = vadd.f32 %v4850_v44, %v2186_v33  ;;  %v1999_v40 = vmax.f32 %v1438_v34, 0.0  ;;  %v2466_v4 = vadd.f32 %v4850_v44, %v2278_v35  ;;  %v2091_v41 = vmax.f32 %v1806_v36, 0.0 }
 0x1bc   : > { %v1442_v42 = vpop.f32.mrf.mxu0  ;;  %v1810_v43 = vpop.f32.mrf.mxu1 }
 0x1bd   : > { %2556 = vst.msk [vmem:[%s4419_s23 + $0x1b0] sm:$0xff] %vm2501_vm4, %v2374_v39  ;;  %v2187_v45 = vmul.f32 %v4839_v38, %v1999_v40  ;;  %2648 = vst.msk [vmem:[%s4419_s23 + $0x490] sm:$0xff] %vm2501_vm4, %v2466_v4  ;;  %v1443_v46 = vadd.f32 %v4821_v57, %v1442_v42  ;;  %v2279_v47 = vmul.f32 %v4839_v38, %v2091_v41 }
 0x1be   : > { %v1811_v48 = vadd.f32 %v4821_v57, %v1810_v43  ;;  %v3572_v0 = vpop.f32.mrf.mxu0  ;;  %v3756_v49 = vpop.f32.mrf.mxu1 }
 0x1bf   : > { %v2375_v50 = vadd.f32 %v4850_v44, %v2187_v45  ;;  %v2000_v51 = vmax.f32 %v1443_v46, 0.0  ;;  %v2467_v52 = vadd.f32 %v4850_v44, %v2279_v47 }
 0x1c0   : > { %v2092_v53 = vmax.f32 %v1811_v48, 0.0  ;;  %v1445_v54 = vpop.f32.mrf.mxu0  ;;  %v1813_v55 = vpop.f32.mrf.mxu1 }
 0x1c1   : > { %2557 = vst.msk [vmem:[%s4419_s23 + $0x1b8] sm:$0xff] %vm2501_vm4, %v2375_v50  ;;  %v2188_v56 = vmul.f32 %v4839_v38, %v2000_v51  ;;  %2649 = vst.msk [vmem:[%s4419_s23 + $0x498] sm:$0xff] %vm2501_vm4, %v2467_v52  ;;  %v1446_v58 = vadd.f32 %v4821_v57, %v1445_v54  ;;  %v1814_v60 = vadd.f32 %v4821_v57, %v1813_v55 }
 0x1c2   : > { %v2280_v59 = vmul.f32 %v4839_v38, %v2092_v53  ;;  %v3573_v61 = vpop.f32.mrf.mxu0  ;;  %v3757_v63 = vpop.f32.mrf.mxu1 }
 0x1c3   : > { %v2376_v1 = vadd.f32 %v4850_v44, %v2188_v56  ;;  %v2001_v2 = vmax.f32 %v1446_v58, 0.0  ;;  %v2093_v5 = vmax.f32 %v1814_v60, 0.0 }
 0x1c4   : > { %v2468_v3 = vadd.f32 %v4850_v44, %v2280_v59  ;;  %v1450_v6 = vpop.f32.mrf.mxu0  ;;  %v1818_v7 = vpop.f32.mrf.mxu1 }
 0x1c5   : > { %2558 = vst.msk [vmem:[%s4419_s23 + $0x1c0] sm:$0xff] %vm2501_vm4, %v2376_v1  ;;  %v2189_v8 = vmul.f32 %v4839_v38, %v2001_v2  ;;  %v1451_v9 = vadd.f32 %v4821_v57, %v1450_v6  ;;  %v2281_v10 = vmul.f32 %v4839_v38, %v2093_v5  ;;  %v1819_v11 = vadd.f32 %v4821_v57, %v1818_v7 }
 0x1c6   : > { %2650 = vst.msk [vmem:[%s4419_s23 + $0x4a0] sm:$0xff] %vm2501_vm4, %v2468_v3  ;;  %v3576_v12 = vpop.f32.mrf.mxu0  ;;  %v3760_v13 = vpop.f32.mrf.mxu1 }
 0x1c7   : > { %v2377_v14 = vadd.f32 %v4850_v44, %v2189_v8  ;;  %v2002_v15 = vmax.f32 %v1451_v9, 0.0  ;;  %v2469_v16 = vadd.f32 %v4850_v44, %v2281_v10  ;;  %v2094_v17 = vmax.f32 %v1819_v11, 0.0 }
 0x1c8   : > { %v1453_v18 = vpop.f32.mrf.mxu0  ;;  %v1821_v19 = vpop.f32.mrf.mxu1 }
 0x1c9   : > { %2559 = vst.msk [vmem:[%s4419_s23 + $0x1c8] sm:$0xff] %vm2501_vm4, %v2377_v14  ;;  %v2190_v20 = vmul.f32 %v4839_v38, %v2002_v15  ;;  %2651 = vst.msk [vmem:[%s4419_s23 + $0x4a8] sm:$0xff] %vm2501_vm4, %v2469_v16  ;;  %v1454_v21 = vadd.f32 %v4821_v57, %v1453_v18  ;;  %v2282_v22 = vmul.f32 %v4839_v38, %v2094_v17 }
 0x1ca   : > { %v1822_v23 = vadd.f32 %v4821_v57, %v1821_v19  ;;  %v3577_v24 = vpop.f32.mrf.mxu0  ;;  %v3761_v25 = vpop.f32.mrf.mxu1 }
 0x1cb   : > { %v2378_v26 = vadd.f32 %v4850_v44, %v2190_v20  ;;  %v2003_v27 = vmax.f32 %v1454_v21, 0.0  ;;  %v2470_v28 = vadd.f32 %v4850_v44, %v2282_v22 }
 0x1cc   : > { %v2095_v29 = vmax.f32 %v1822_v23, 0.0  ;;  %v1458_v30 = vpop.f32.mrf.mxu0  ;;  %v1826_v31 = vpop.f32.mrf.mxu1 }
 0x1cd   : > { %2560 = vst.msk [vmem:[%s4419_s23 + $0x1d0] sm:$0xff] %vm2501_vm4, %v2378_v26  ;;  %v2191_v32 = vmul.f32 %v4839_v38, %v2003_v27  ;;  %2652 = vst.msk [vmem:[%s4419_s23 + $0x4b0] sm:$0xff] %vm2501_vm4, %v2470_v28  ;;  %v1459_v33 = vadd.f32 %v4821_v57, %v1458_v30  ;;  %v1827_v35 = vadd.f32 %v4821_v57, %v1826_v31 }
 0x1ce   : > { %v2283_v34 = vmul.f32 %v4839_v38, %v2095_v29  ;;  %v3580_v36 = vpop.f32.mrf.mxu0  ;;  %v3764_v62 = vpop.f32.mrf.mxu1 }
 0x1cf   : > { %v2379_v37 = vadd.f32 %v4850_v44, %v2191_v32  ;;  %v2004_v39 = vmax.f32 %v1459_v33, 0.0  ;;  %v2096_v4 = vmax.f32 %v1827_v35, 0.0 }
 0x1d0   : > { %v2471_v40 = vadd.f32 %v4850_v44, %v2283_v34  ;;  %v1461_v41 = vpop.f32.mrf.mxu0  ;;  %v1829_v42 = vpop.f32.mrf.mxu1 }
 0x1d1   : > { %2561 = vst.msk [vmem:[%s4419_s23 + $0x1d8] sm:$0xff] %vm2501_vm4, %v2379_v37  ;;  %v2192_v43 = vmul.f32 %v4839_v38, %v2004_v39  ;;  %v1462_v45 = vadd.f32 %v4821_v57, %v1461_v41  ;;  %v2284_v46 = vmul.f32 %v4839_v38, %v2096_v4  ;;  %v1830_v47 = vadd.f32 %v4821_v57, %v1829_v42  ;;  %v5242_v42 = vld [vmem:[%s5713_s3] ss:$0 sm:$0xff] }
 0x1d2   : > { %2653 = vst.msk [vmem:[%s4419_s23 + $0x4b8] sm:$0xff] %vm2501_vm4, %v2471_v40  ;;  %v3581_v48 = vpop.f32.mrf.mxu0  ;;  %v3765_v0 = vpop.f32.mrf.mxu1 }
 0x1d3   : > { %v2380_v49 = vadd.f32 %v4850_v44, %v2192_v43  ;;  %v2005_v50 = vmax.f32 %v1462_v45, 0.0  ;;  %v2472_v51 = vadd.f32 %v4850_v44, %v2284_v46  ;;  %v2097_v52 = vmax.f32 %v1830_v47, 0.0  ;;  %v5253_v48 = vld [vmem:[%s5714_s4] ss:$0 sm:$0xff] }
 0x1d4   : > { %v1466_v53 = vpop.f32.mrf.mxu0  ;;  %v1834_v54 = vpop.f32.mrf.mxu1 }
 0x1d5   : > { %2562 = vst.msk [vmem:[%s4419_s23 + $0x1e0] sm:$0xff] %vm2501_vm4, %v2380_v49  ;;  %v2193_v55 = vmul.f32 %v4839_v38, %v2005_v50  ;;  %2654 = vst.msk [vmem:[%s4419_s23 + $0x4c0] sm:$0xff] %vm2501_vm4, %v2472_v51  ;;  %v1467_v56 = vadd.f32 %v4821_v57, %v1466_v53  ;;  %v2285_v58 = vmul.f32 %v4839_v38, %v2097_v52 }
 0x1d6   : > { %v1835_v59 = vadd.f32 %v4821_v57, %v1834_v54  ;;  %v3584_v60 = vpop.f32.mrf.mxu0  ;;  %v3768_v61 = vpop.f32.mrf.mxu1 }
 0x1d7   : > { %v2381_v63 = vadd.f32 %v4850_v44, %v2193_v55  ;;  %v2006_v1 = vmax.f32 %v1467_v56, 0.0  ;;  %v2473_v2 = vadd.f32 %v4850_v44, %v2285_v58 }
 0x1d8   : > { %v2098_v3 = vmax.f32 %v1835_v59, 0.0  ;;  %v1469_v5 = vpop.f32.mrf.mxu0  ;;  %v1837_v6 = vpop.f32.mrf.mxu1 }
 0x1d9   : > { %2563 = vst.msk [vmem:[%s4419_s23 + $0x1e8] sm:$0xff] %vm2501_vm4, %v2381_v63  ;;  %v2194_v7 = vmul.f32 %v4839_v38, %v2006_v1  ;;  %2655 = vst.msk [vmem:[%s4419_s23 + $0x4c8] sm:$0xff] %vm2501_vm4, %v2473_v2  ;;  %v1470_v8 = vadd.f32 %v4821_v57, %v1469_v5  ;;  %v1838_v10 = vadd.f32 %v4821_v57, %v1837_v6 }
 0x1da   : > { %v2286_v9 = vmul.f32 %v4839_v38, %v2098_v3  ;;  %v3585_v11 = vpop.f32.mrf.mxu0  ;;  %v3769_v12 = vpop.f32.mrf.mxu1 }
 0x1db   : > { %v2382_v13 = vadd.f32 %v4850_v44, %v2194_v7  ;;  %v2007_v14 = vmax.f32 %v1470_v8, 0.0  ;;  %v2099_v16 = vmax.f32 %v1838_v10, 0.0 }
 0x1dc   : > { %v2474_v15 = vadd.f32 %v4850_v44, %v2286_v9  ;;  %v1474_v17 = vpop.f32.mrf.mxu0  ;;  %v1842_v18 = vpop.f32.mrf.mxu1 }
 0x1dd   : > { %2564 = vst.msk [vmem:[%s4419_s23 + $0x1f0] sm:$0xff] %vm2501_vm4, %v2382_v13  ;;  %v2195_v19 = vmul.f32 %v4839_v38, %v2007_v14  ;;  %v1475_v20 = vadd.f32 %v4821_v57, %v1474_v17  ;;  %v2287_v21 = vmul.f32 %v4839_v38, %v2099_v16  ;;  %v1843_v22 = vadd.f32 %v4821_v57, %v1842_v18  ;;  %v5230_v57 = vld [vmem:[%s5712_s2] ss:$0 sm:$0xff] }
 0x1de   : > { %2656 = vst.msk [vmem:[%s4419_s23 + $0x4d0] sm:$0xff] %vm2501_vm4, %v2474_v15  ;;  %v3588_v23 = vpop.f32.mrf.mxu0  ;;  %v3772_v24 = vpop.f32.mrf.mxu1 }
 0x1df   : > { %v2383_v25 = vadd.f32 %v4850_v44, %v2195_v19  ;;  %v2008_v26 = vmax.f32 %v1475_v20, 0.0  ;;  %v2475_v27 = vadd.f32 %v4850_v44, %v2287_v21  ;;  %v2100_v28 = vmax.f32 %v1843_v22, 0.0 }
 0x1e0   : > { %v1477_v29 = vpop.f32.mrf.mxu0  ;;  %v1845_v30 = vpop.f32.mrf.mxu1 }
 0x1e1   : > { %2565 = vst.msk [vmem:[%s4419_s23 + $0x1f8] sm:$0xff] %vm2501_vm4, %v2383_v25  ;;  %v2196_v31 = vmul.f32 %v4839_v38, %v2008_v26  ;;  %2657 = vst.msk [vmem:[%s4419_s23 + $0x4d8] sm:$0xff] %vm2501_vm4, %v2475_v27  ;;  %v1478_v32 = vadd.f32 %v5230_v57, %v1477_v29  ;;  %v2288_v33 = vmul.f32 %v4839_v38, %v2100_v28 }
 0x1e2   : > { %v1846_v34 = vadd.f32 %v5230_v57, %v1845_v30  ;;  %v3589_v35 = vpop.f32.mrf.mxu0  ;;  %v3773_v36 = vpop.f32.mrf.mxu1 }
 0x1e3   : > { %v2384_v62 = vadd.f32 %v4850_v44, %v2196_v31  ;;  %v2009_v37 = vmax.f32 %v1478_v32, 0.0  ;;  %v2476_v39 = vadd.f32 %v4850_v44, %v2288_v33 }
 0x1e4   : > { %v2101_v40 = vmax.f32 %v1846_v34, 0.0  ;;  %v1482_v4 = vpop.f32.mrf.mxu0  ;;  %v1850_v41 = vpop.f32.mrf.mxu1 }
 0x1e5   : > { %2566 = vst.msk [vmem:[%s4419_s23 + $0x200] sm:$0xff] %vm2501_vm4, %v2384_v62  ;;  %v2197_v38 = vmul.f32 %v5242_v42, %v2009_v37  ;;  %2658 = vst.msk [vmem:[%s4419_s23 + $0x4e0] sm:$0xff] %vm2501_vm4, %v2476_v39  ;;  %v1483_v43 = vadd.f32 %v5230_v57, %v1482_v4  ;;  %v1851_v45 = vadd.f32 %v5230_v57, %v1850_v41 }
 0x1e6   : > { %v2289_v44 = vmul.f32 %v5242_v42, %v2101_v40  ;;  %v3592_v46 = vpop.f32.mrf.mxu0  ;;  %v3776_v47 = vpop.f32.mrf.mxu1 }
 0x1e7   : > { %v2385_v0 = vadd.f32 %v5253_v48, %v2197_v38  ;;  %v2010_v49 = vmax.f32 %v1483_v43, 0.0  ;;  %v2102_v51 = vmax.f32 %v1851_v45, 0.0 }
 0x1e8   : > { %v2477_v50 = vadd.f32 %v5253_v48, %v2289_v44  ;;  %v1485_v52 = vpop.f32.mrf.mxu0  ;;  %v1853_v53 = vpop.f32.mrf.mxu1 }
 0x1e9   : > { %2567 = vst.msk [vmem:[%s4419_s23 + $0x208] sm:$0xff] %vm2501_vm4, %v2385_v0  ;;  %v2198_v54 = vmul.f32 %v5242_v42, %v2010_v49  ;;  %v1486_v55 = vadd.f32 %v5230_v57, %v1485_v52  ;;  %v2290_v56 = vmul.f32 %v5242_v42, %v2102_v51  ;;  %v1854_v58 = vadd.f32 %v5230_v57, %v1853_v53 }
 0x1ea   : > { %2659 = vst.msk [vmem:[%s4419_s23 + $0x4e8] sm:$0xff] %vm2501_vm4, %v2477_v50  ;;  %v3593_v59 = vpop.f32.mrf.mxu0  ;;  %v3777_v60 = vpop.f32.mrf.mxu1 }
 0x1eb   : > { %v2386_v61 = vadd.f32 %v5253_v48, %v2198_v54  ;;  %v2011_v63 = vmax.f32 %v1486_v55, 0.0  ;;  %v2478_v1 = vadd.f32 %v5253_v48, %v2290_v56  ;;  %v2103_v2 = vmax.f32 %v1854_v58, 0.0 }
 0x1ec   : > { %v1490_v3 = vpop.f32.mrf.mxu0  ;;  %v1858_v5 = vpop.f32.mrf.mxu1 }
 0x1ed   : > { %2568 = vst.msk [vmem:[%s4419_s23 + $0x210] sm:$0xff] %vm2501_vm4, %v2386_v61  ;;  %v2199_v6 = vmul.f32 %v5242_v42, %v2011_v63  ;;  %2660 = vst.msk [vmem:[%s4419_s23 + $0x4f0] sm:$0xff] %vm2501_vm4, %v2478_v1  ;;  %v1491_v7 = vadd.f32 %v5230_v57, %v1490_v3  ;;  %v2291_v8 = vmul.f32 %v5242_v42, %v2103_v2 }
 0x1ee   : > { %v1859_v9 = vadd.f32 %v5230_v57, %v1858_v5  ;;  %v3596_v10 = vpop.f32.mrf.mxu0  ;;  %v3780_v11 = vpop.f32.mrf.mxu1 }
 0x1ef   : > { %v2387_v12 = vadd.f32 %v5253_v48, %v2199_v6  ;;  %v2012_v13 = vmax.f32 %v1491_v7, 0.0  ;;  %v2479_v14 = vadd.f32 %v5253_v48, %v2291_v8 }
 0x1f0   : > { %v2104_v15 = vmax.f32 %v1859_v9, 0.0  ;;  %v1493_v16 = vpop.f32.mrf.mxu0  ;;  %v1861_v17 = vpop.f32.mrf.mxu1 }
 0x1f1   : > { %2569 = vst.msk [vmem:[%s4419_s23 + $0x218] sm:$0xff] %vm2501_vm4, %v2387_v12  ;;  %v2200_v18 = vmul.f32 %v5242_v42, %v2012_v13  ;;  %2661 = vst.msk [vmem:[%s4419_s23 + $0x4f8] sm:$0xff] %vm2501_vm4, %v2479_v14  ;;  %v1494_v19 = vadd.f32 %v5230_v57, %v1493_v16  ;;  %v1862_v21 = vadd.f32 %v5230_v57, %v1861_v17 }
 0x1f2   : > { %v2292_v20 = vmul.f32 %v5242_v42, %v2104_v15  ;;  %v3597_v22 = vpop.f32.mrf.mxu0  ;;  %v3781_v23 = vpop.f32.mrf.mxu1 }
 0x1f3   : > { %v2388_v24 = vadd.f32 %v5253_v48, %v2200_v18  ;;  %v2013_v25 = vmax.f32 %v1494_v19, 0.0  ;;  %v2105_v27 = vmax.f32 %v1862_v21, 0.0 }
 0x1f4   : > { %v2480_v26 = vadd.f32 %v5253_v48, %v2292_v20  ;;  %v1498_v28 = vpop.f32.mrf.mxu0  ;;  %v1866_v29 = vpop.f32.mrf.mxu1 }
 0x1f5   : > { %2570 = vst.msk [vmem:[%s4419_s23 + $0x220] sm:$0xff] %vm2501_vm4, %v2388_v24  ;;  %v2201_v30 = vmul.f32 %v5242_v42, %v2013_v25  ;;  %v1499_v31 = vadd.f32 %v5230_v57, %v1498_v28  ;;  %v2293_v32 = vmul.f32 %v5242_v42, %v2105_v27  ;;  %v1867_v33 = vadd.f32 %v5230_v57, %v1866_v29 }
 0x1f6   : > { %2662 = vst.msk [vmem:[%s4419_s23 + $0x500] sm:$0xff] %vm2501_vm4, %v2480_v26  ;;  %v3600_v34 = vpop.f32.mrf.mxu0  ;;  %v3784_v35 = vpop.f32.mrf.mxu1 }
 0x1f7   : > { %v2389_v36 = vadd.f32 %v5253_v48, %v2201_v30  ;;  %v2014_v62 = vmax.f32 %v1499_v31, 0.0  ;;  %v2481_v37 = vadd.f32 %v5253_v48, %v2293_v32  ;;  %v2106_v39 = vmax.f32 %v1867_v33, 0.0 }
 0x1f8   : > { %v1501_v40 = vpop.f32.mrf.mxu0  ;;  %v1869_v4 = vpop.f32.mrf.mxu1 }
 0x1f9   : > { %2571 = vst.msk [vmem:[%s4419_s23 + $0x228] sm:$0xff] %vm2501_vm4, %v2389_v36  ;;  %v2202_v41 = vmul.f32 %v5242_v42, %v2014_v62  ;;  %2663 = vst.msk [vmem:[%s4419_s23 + $0x508] sm:$0xff] %vm2501_vm4, %v2481_v37  ;;  %v1502_v38 = vadd.f32 %v5230_v57, %v1501_v40  ;;  %v2294_v43 = vmul.f32 %v5242_v42, %v2106_v39 }
 0x1fa   : > { %v1870_v44 = vadd.f32 %v5230_v57, %v1869_v4  ;;  %v3601_v45 = vpop.f32.mrf.mxu0  ;;  %v3785_v46 = vpop.f32.mrf.mxu1 }
 0x1fb   : > { %v2390_v47 = vadd.f32 %v5253_v48, %v2202_v41  ;;  %v2015_v0 = vmax.f32 %v1502_v38, 0.0  ;;  %v2482_v49 = vadd.f32 %v5253_v48, %v2294_v43 }
 0x1fc   : > { %v2107_v50 = vmax.f32 %v1870_v44, 0.0  ;;  %v1506_v51 = vpop.f32.mrf.mxu0  ;;  %v1874_v52 = vpop.f32.mrf.mxu1 }
 0x1fd   : > { %2572 = vst.msk [vmem:[%s4419_s23 + $0x230] sm:$0xff] %vm2501_vm4, %v2390_v47  ;;  %v2203_v53 = vmul.f32 %v5242_v42, %v2015_v0  ;;  %2664 = vst.msk [vmem:[%s4419_s23 + $0x510] sm:$0xff] %vm2501_vm4, %v2482_v49  ;;  %v1507_v54 = vadd.f32 %v5230_v57, %v1506_v51  ;;  %v1875_v56 = vadd.f32 %v5230_v57, %v1874_v52 }
 0x1fe   : > { %v2295_v55 = vmul.f32 %v5242_v42, %v2107_v50  ;;  %v3604_v58 = vpop.f32.mrf.mxu0  ;;  %v3788_v59 = vpop.f32.mrf.mxu1 }
 0x1ff   : > { %v2391_v60 = vadd.f32 %v5253_v48, %v2203_v53  ;;  %v2016_v61 = vmax.f32 %v1507_v54, 0.0  ;;  %v2108_v1 = vmax.f32 %v1875_v56, 0.0 }
 0x200   : > { %v2483_v63 = vadd.f32 %v5253_v48, %v2295_v55  ;;  %v1509_v2 = vpop.f32.mrf.mxu0  ;;  %v1877_v3 = vpop.f32.mrf.mxu1 }
 0x201   : > { %2573 = vst.msk [vmem:[%s4419_s23 + $0x238] sm:$0xff] %vm2501_vm4, %v2391_v60  ;;  %v2204_v5 = vmul.f32 %v5242_v42, %v2016_v61  ;;  %v1510_v6 = vadd.f32 %v5230_v57, %v1509_v2  ;;  %v2296_v7 = vmul.f32 %v5242_v42, %v2108_v1  ;;  %v1878_v8 = vadd.f32 %v5230_v57, %v1877_v3 }
 0x202   : > { %2665 = vst.msk [vmem:[%s4419_s23 + $0x518] sm:$0xff] %vm2501_vm4, %v2483_v63  ;;  %v3605_v9 = vpop.f32.mrf.mxu0  ;;  %v3789_v10 = vpop.f32.mrf.mxu1 }
 0x203   : > { %v2392_v11 = vadd.f32 %v5253_v48, %v2204_v5  ;;  %v2017_v12 = vmax.f32 %v1510_v6, 0.0  ;;  %v2484_v13 = vadd.f32 %v5253_v48, %v2296_v7  ;;  %v2109_v14 = vmax.f32 %v1878_v8, 0.0 }
 0x204   : > { %v1514_v15 = vpop.f32.mrf.mxu0  ;;  %v1882_v16 = vpop.f32.mrf.mxu1 }
 0x205   : > { %2574 = vst.msk [vmem:[%s4419_s23 + $0x240] sm:$0xff] %vm2501_vm4, %v2392_v11  ;;  %v2205_v17 = vmul.f32 %v5242_v42, %v2017_v12  ;;  %2666 = vst.msk [vmem:[%s4419_s23 + $0x520] sm:$0xff] %vm2501_vm4, %v2484_v13  ;;  %v1515_v18 = vadd.f32 %v5230_v57, %v1514_v15  ;;  %v2297_v19 = vmul.f32 %v5242_v42, %v2109_v14 }
 0x206   : > { %v1883_v20 = vadd.f32 %v5230_v57, %v1882_v16  ;;  %v3608_v21 = vpop.f32.mrf.mxu0  ;;  %v3792_v22 = vpop.f32.mrf.mxu1 }
 0x207   : > { %v2393_v23 = vadd.f32 %v5253_v48, %v2205_v17  ;;  %v2018_v24 = vmax.f32 %v1515_v18, 0.0  ;;  %v2485_v25 = vadd.f32 %v5253_v48, %v2297_v19 }
 0x208   : > { %v2110_v26 = vmax.f32 %v1883_v20, 0.0  ;;  %v1517_v27 = vpop.f32.mrf.mxu0  ;;  %v1885_v28 = vpop.f32.mrf.mxu1 }
 0x209   : > { %2575 = vst.msk [vmem:[%s4419_s23 + $0x248] sm:$0xff] %vm2501_vm4, %v2393_v23  ;;  %v2206_v29 = vmul.f32 %v5242_v42, %v2018_v24  ;;  %2667 = vst.msk [vmem:[%s4419_s23 + $0x528] sm:$0xff] %vm2501_vm4, %v2485_v25  ;;  %v1518_v30 = vadd.f32 %v5230_v57, %v1517_v27  ;;  %v1886_v32 = vadd.f32 %v5230_v57, %v1885_v28 }
 0x20a   : > { %v2298_v31 = vmul.f32 %v5242_v42, %v2110_v26  ;;  %v3609_v33 = vpop.f32.mrf.mxu0  ;;  %v3793_v34 = vpop.f32.mrf.mxu1 }
 0x20b   : > { %v2394_v35 = vadd.f32 %v5253_v48, %v2206_v29  ;;  %v2019_v36 = vmax.f32 %v1518_v30, 0.0  ;;  %v2111_v37 = vmax.f32 %v1886_v32, 0.0 }
 0x20c   : > { %v2486_v62 = vadd.f32 %v5253_v48, %v2298_v31  ;;  %v1522_v39 = vpop.f32.mrf.mxu0  ;;  %v1890_v40 = vpop.f32.mrf.mxu1 }
 0x20d   : > { %2576 = vst.msk [vmem:[%s4419_s23 + $0x250] sm:$0xff] %vm2501_vm4, %v2394_v35  ;;  %v2207_v4 = vmul.f32 %v5242_v42, %v2019_v36  ;;  %v1523_v41 = vadd.f32 %v5230_v57, %v1522_v39  ;;  %v2299_v38 = vmul.f32 %v5242_v42, %v2111_v37  ;;  %v1891_v43 = vadd.f32 %v5230_v57, %v1890_v40 }
 0x20e   : > { %2668 = vst.msk [vmem:[%s4419_s23 + $0x530] sm:$0xff] %vm2501_vm4, %v2486_v62  ;;  %v3612_v44 = vpop.f32.mrf.mxu0  ;;  %v3796_v45 = vpop.f32.mrf.mxu1 }
 0x20f   : > { %v2395_v46 = vadd.f32 %v5253_v48, %v2207_v4  ;;  %v2020_v47 = vmax.f32 %v1523_v41, 0.0  ;;  %v2487_v0 = vadd.f32 %v5253_v48, %v2299_v38  ;;  %v2112_v49 = vmax.f32 %v1891_v43, 0.0 }
 0x210   : > { %v1525_v50 = vpop.f32.mrf.mxu0  ;;  %v1893_v51 = vpop.f32.mrf.mxu1 }
 0x211   : > { %2577 = vst.msk [vmem:[%s4419_s23 + $0x258] sm:$0xff] %vm2501_vm4, %v2395_v46  ;;  %v2208_v52 = vmul.f32 %v5242_v42, %v2020_v47  ;;  %2669 = vst.msk [vmem:[%s4419_s23 + $0x538] sm:$0xff] %vm2501_vm4, %v2487_v0  ;;  %v1526_v53 = vadd.f32 %v5230_v57, %v1525_v50  ;;  %v2300_v54 = vmul.f32 %v5242_v42, %v2112_v49 }
 0x212   : > { %v1894_v55 = vadd.f32 %v5230_v57, %v1893_v51  ;;  %v3613_v56 = vpop.f32.mrf.mxu0  ;;  %v3797_v58 = vpop.f32.mrf.mxu1 }
 0x213   : > { %v2396_v59 = vadd.f32 %v5253_v48, %v2208_v52  ;;  %v2021_v60 = vmax.f32 %v1526_v53, 0.0  ;;  %v2488_v61 = vadd.f32 %v5253_v48, %v2300_v54 }
 0x214   : > { %v2113_v63 = vmax.f32 %v1894_v55, 0.0  ;;  %v1530_v1 = vpop.f32.mrf.mxu0  ;;  %v1898_v2 = vpop.f32.mrf.mxu1 }
 0x215   : > { %2578 = vst.msk [vmem:[%s4419_s23 + $0x260] sm:$0xff] %vm2501_vm4, %v2396_v59  ;;  %v2209_v3 = vmul.f32 %v5242_v42, %v2021_v60  ;;  %2670 = vst.msk [vmem:[%s4419_s23 + $0x540] sm:$0xff] %vm2501_vm4, %v2488_v61  ;;  %v1531_v5 = vadd.f32 %v5230_v57, %v1530_v1  ;;  %v1899_v7 = vadd.f32 %v5230_v57, %v1898_v2 }
 0x216   : > { %v2301_v6 = vmul.f32 %v5242_v42, %v2113_v63  ;;  %v3616_v8 = vpop.f32.mrf.mxu0  ;;  %v3800_v9 = vpop.f32.mrf.mxu1 }
 0x217   : > { %v2397_v10 = vadd.f32 %v5253_v48, %v2209_v3  ;;  %v2022_v11 = vmax.f32 %v1531_v5, 0.0  ;;  %v2114_v13 = vmax.f32 %v1899_v7, 0.0 }
 0x218   : > { %v2489_v12 = vadd.f32 %v5253_v48, %v2301_v6  ;;  %v1533_v14 = vpop.f32.mrf.mxu0  ;;  %v1901_v15 = vpop.f32.mrf.mxu1 }
 0x219   : > { %2579 = vst.msk [vmem:[%s4419_s23 + $0x268] sm:$0xff] %vm2501_vm4, %v2397_v10  ;;  %v2210_v16 = vmul.f32 %v5242_v42, %v2022_v11  ;;  %v1534_v17 = vadd.f32 %v5230_v57, %v1533_v14  ;;  %v2302_v18 = vmul.f32 %v5242_v42, %v2114_v13  ;;  %v1902_v19 = vadd.f32 %v5230_v57, %v1901_v15 }
 0x21a   : > { %2671 = vst.msk [vmem:[%s4419_s23 + $0x548] sm:$0xff] %vm2501_vm4, %v2489_v12  ;;  %v3617_v20 = vpop.f32.mrf.mxu0  ;;  %v3801_v21 = vpop.f32.mrf.mxu1 }
 0x21b   : > { %v2398_v22 = vadd.f32 %v5253_v48, %v2210_v16  ;;  %v2023_v23 = vmax.f32 %v1534_v17, 0.0  ;;  %v2490_v24 = vadd.f32 %v5253_v48, %v2302_v18  ;;  %v2115_v25 = vmax.f32 %v1902_v19, 0.0 }
 0x21c   : > { %v1538_v26 = vpop.f32.mrf.mxu0  ;;  %v1906_v27 = vpop.f32.mrf.mxu1 }
 0x21d   : > { %2580 = vst.msk [vmem:[%s4419_s23 + $0x270] sm:$0xff] %vm2501_vm4, %v2398_v22  ;;  %v2211_v28 = vmul.f32 %v5242_v42, %v2023_v23  ;;  %2672 = vst.msk [vmem:[%s4419_s23 + $0x550] sm:$0xff] %vm2501_vm4, %v2490_v24  ;;  %v1539_v29 = vadd.f32 %v5230_v57, %v1538_v26  ;;  %v2303_v30 = vmul.f32 %v5242_v42, %v2115_v25 }
 0x21e   : > { %v1907_v31 = vadd.f32 %v5230_v57, %v1906_v27  ;;  %v3620_v32 = vpop.f32.mrf.mxu0  ;;  %v3804_v33 = vpop.f32.mrf.mxu1 }
 0x21f   : > { %v2399_v34 = vadd.f32 %v5253_v48, %v2211_v28  ;;  %v2024_v35 = vmax.f32 %v1539_v29, 0.0  ;;  %v2491_v36 = vadd.f32 %v5253_v48, %v2303_v30 }
 0x220   : > { %v2116_v62 = vmax.f32 %v1907_v31, 0.0  ;;  %v1541_v37 = vpop.f32.mrf.mxu0  ;;  %v1909_v39 = vpop.f32.mrf.mxu1 }
 0x221   : > { %2581 = vst.msk [vmem:[%s4419_s23 + $0x278] sm:$0xff] %vm2501_vm4, %v2399_v34  ;;  %v2212_v40 = vmul.f32 %v5242_v42, %v2024_v35  ;;  %2673 = vst.msk [vmem:[%s4419_s23 + $0x558] sm:$0xff] %vm2501_vm4, %v2491_v36  ;;  %v1542_v4 = vadd.f32 %v5230_v57, %v1541_v37  ;;  %v1910_v38 = vadd.f32 %v5230_v57, %v1909_v39 }
 0x222   : > { %v2304_v41 = vmul.f32 %v5242_v42, %v2116_v62  ;;  %v3621_v43 = vpop.f32.mrf.mxu0  ;;  %v3805_v44 = vpop.f32.mrf.mxu1 }
 0x223   : > { %v2400_v45 = vadd.f32 %v5253_v48, %v2212_v40  ;;  %v2025_v46 = vmax.f32 %v1542_v4, 0.0  ;;  %v2117_v0 = vmax.f32 %v1910_v38, 0.0 }
 0x224   : > { %v2492_v47 = vadd.f32 %v5253_v48, %v2304_v41  ;;  %v1546_v49 = vpop.f32.mrf.mxu0  ;;  %v1914_v50 = vpop.f32.mrf.mxu1 }
 0x225   : > { %2582 = vst.msk [vmem:[%s4419_s23 + $0x280] sm:$0xff] %vm2501_vm4, %v2400_v45  ;;  %v2213_v51 = vmul.f32 %v5242_v42, %v2025_v46  ;;  %v1547_v52 = vadd.f32 %v5230_v57, %v1546_v49  ;;  %v2305_v53 = vmul.f32 %v5242_v42, %v2117_v0  ;;  %v1915_v54 = vadd.f32 %v5230_v57, %v1914_v50 }
 0x226   : > { %2674 = vst.msk [vmem:[%s4419_s23 + $0x560] sm:$0xff] %vm2501_vm4, %v2492_v47  ;;  %v3624_v55 = vpop.f32.mrf.mxu0  ;;  %v3808_v56 = vpop.f32.mrf.mxu1 }
 0x227   : > { %v2401_v58 = vadd.f32 %v5253_v48, %v2213_v51  ;;  %v2026_v59 = vmax.f32 %v1547_v52, 0.0  ;;  %v2493_v60 = vadd.f32 %v5253_v48, %v2305_v53  ;;  %v2118_v61 = vmax.f32 %v1915_v54, 0.0 }
 0x228   : > { %v1549_v63 = vpop.f32.mrf.mxu0  ;;  %v1917_v1 = vpop.f32.mrf.mxu1 }
 0x229   : > { %2583 = vst.msk [vmem:[%s4419_s23 + $0x288] sm:$0xff] %vm2501_vm4, %v2401_v58  ;;  %v2214_v2 = vmul.f32 %v5242_v42, %v2026_v59  ;;  %2675 = vst.msk [vmem:[%s4419_s23 + $0x568] sm:$0xff] %vm2501_vm4, %v2493_v60  ;;  %v1550_v3 = vadd.f32 %v5230_v57, %v1549_v63  ;;  %v2306_v5 = vmul.f32 %v5242_v42, %v2118_v61 }
 0x22a   : > { %v1918_v6 = vadd.f32 %v5230_v57, %v1917_v1  ;;  %v3625_v7 = vpop.f32.mrf.mxu0  ;;  %v3809_v8 = vpop.f32.mrf.mxu1 }
 0x22b   : > { %v2402_v9 = vadd.f32 %v5253_v48, %v2214_v2  ;;  %v2027_v10 = vmax.f32 %v1550_v3, 0.0  ;;  %v2494_v11 = vadd.f32 %v5253_v48, %v2306_v5 }
 0x22c   : > { %v2119_v12 = vmax.f32 %v1918_v6, 0.0  ;;  %v1554_v13 = vpop.f32.mrf.mxu0  ;;  %v1922_v14 = vpop.f32.mrf.mxu1 }
 0x22d   : > { %2584 = vst.msk [vmem:[%s4419_s23 + $0x290] sm:$0xff] %vm2501_vm4, %v2402_v9  ;;  %v2215_v15 = vmul.f32 %v5242_v42, %v2027_v10  ;;  %2676 = vst.msk [vmem:[%s4419_s23 + $0x570] sm:$0xff] %vm2501_vm4, %v2494_v11  ;;  %v1555_v16 = vadd.f32 %v5230_v57, %v1554_v13  ;;  %v1923_v18 = vadd.f32 %v5230_v57, %v1922_v14 }
 0x22e   : > { %v2307_v17 = vmul.f32 %v5242_v42, %v2119_v12  ;;  %v3628_v19 = vpop.f32.mrf.mxu0  ;;  %v3812_v20 = vpop.f32.mrf.mxu1 }
 0x22f   : > { %v2403_v21 = vadd.f32 %v5253_v48, %v2215_v15  ;;  %v2028_v22 = vmax.f32 %v1555_v16, 0.0  ;;  %v2120_v24 = vmax.f32 %v1923_v18, 0.0 }
 0x230   : > { %v2495_v23 = vadd.f32 %v5253_v48, %v2307_v17  ;;  %v1557_v25 = vpop.f32.mrf.mxu0  ;;  %v1925_v26 = vpop.f32.mrf.mxu1 }
 0x231   : > { %2585 = vst.msk [vmem:[%s4419_s23 + $0x298] sm:$0xff] %vm2501_vm4, %v2403_v21  ;;  %v2216_v27 = vmul.f32 %v5242_v42, %v2028_v22  ;;  %v1558_v28 = vadd.f32 %v5230_v57, %v1557_v25  ;;  %v2308_v29 = vmul.f32 %v5242_v42, %v2120_v24  ;;  %v1926_v30 = vadd.f32 %v5230_v57, %v1925_v26 }
 0x232   : > { %2677 = vst.msk [vmem:[%s4419_s23 + $0x578] sm:$0xff] %vm2501_vm4, %v2495_v23  ;;  %v3629_v31 = vpop.f32.mrf.mxu0  ;;  %v3813_v32 = vpop.f32.mrf.mxu1 }
 0x233   : > { %v2404_v33 = vadd.f32 %v5253_v48, %v2216_v27  ;;  %v2029_v34 = vmax.f32 %v1558_v28, 0.0  ;;  %v2496_v35 = vadd.f32 %v5253_v48, %v2308_v29  ;;  %v2121_v36 = vmax.f32 %v1926_v30, 0.0 }
 0x234   : > { %v1562_v62 = vpop.f32.mrf.mxu0  ;;  %v1930_v37 = vpop.f32.mrf.mxu1 }
 0x235   : > { %2586 = vst.msk [vmem:[%s4419_s23 + $0x2a0] sm:$0xff] %vm2501_vm4, %v2404_v33  ;;  %v2217_v39 = vmul.f32 %v5242_v42, %v2029_v34  ;;  %2678 = vst.msk [vmem:[%s4419_s23 + $0x580] sm:$0xff] %vm2501_vm4, %v2496_v35  ;;  %v1563_v40 = vadd.f32 %v5230_v57, %v1562_v62  ;;  %v2309_v4 = vmul.f32 %v5242_v42, %v2121_v36 }
 0x236   : > { %v1931_v41 = vadd.f32 %v5230_v57, %v1930_v37  ;;  %v3632_v38 = vpop.f32.mrf.mxu0  ;;  %v3816_v43 = vpop.f32.mrf.mxu1 }
 0x237   : > { %v2405_v44 = vadd.f32 %v5253_v48, %v2217_v39  ;;  %v2030_v45 = vmax.f32 %v1563_v40, 0.0  ;;  %v2497_v46 = vadd.f32 %v5253_v48, %v2309_v4 }
 0x238   : > { %v2122_v47 = vmax.f32 %v1931_v41, 0.0  ;;  %v1565_v0 = vpop.f32.mrf.mxu0  ;;  %v1933_v49 = vpop.f32.mrf.mxu1 }
 0x239   : > { %2587 = vst.msk [vmem:[%s4419_s23 + $0x2a8] sm:$0xff] %vm2501_vm4, %v2405_v44  ;;  %v2218_v50 = vmul.f32 %v5242_v42, %v2030_v45  ;;  %2679 = vst.msk [vmem:[%s4419_s23 + $0x588] sm:$0xff] %vm2501_vm4, %v2497_v46  ;;  %v1566_v51 = vadd.f32 %v5230_v57, %v1565_v0  ;;  %v1934_v53 = vadd.f32 %v5230_v57, %v1933_v49 }
 0x23a   : > { %v2310_v52 = vmul.f32 %v5242_v42, %v2122_v47  ;;  %v3633_v54 = vpop.f32.mrf.mxu0  ;;  %v3817_v55 = vpop.f32.mrf.mxu1 }
 0x23b   : > { %v2406_v56 = vadd.f32 %v5253_v48, %v2218_v50  ;;  %v2031_v58 = vmax.f32 %v1566_v51, 0.0  ;;  %v2123_v60 = vmax.f32 %v1934_v53, 0.0 }
 0x23c   : > { %v2498_v59 = vadd.f32 %v5253_v48, %v2310_v52  ;;  %v1570_v61 = vpop.f32.mrf.mxu0  ;;  %v1938_v63 = vpop.f32.mrf.mxu1 }
 0x23d   : > { %2588 = vst.msk [vmem:[%s4419_s23 + $0x2b0] sm:$0xff] %vm2501_vm4, %v2406_v56  ;;  %v2219_v1 = vmul.f32 %v5242_v42, %v2031_v58  ;;  %v1571_v2 = vadd.f32 %v5230_v57, %v1570_v61  ;;  %v2311_v3 = vmul.f32 %v5242_v42, %v2123_v60  ;;  %v1939_v5 = vadd.f32 %v5230_v57, %v1938_v63 }
 0x23e   : > { %2680 = vst.msk [vmem:[%s4419_s23 + $0x590] sm:$0xff] %vm2501_vm4, %v2498_v59  ;;  %v3636_v6 = vpop.f32.mrf.mxu0  ;;  %v3820_v7 = vpop.f32.mrf.mxu1 }
 0x23f   : > { %v2407_v8 = vadd.f32 %v5253_v48, %v2219_v1  ;;  %v2032_v9 = vmax.f32 %v1571_v2, 0.0  ;;  %v2499_v10 = vadd.f32 %v5253_v48, %v2311_v3  ;;  %v2124_v11 = vmax.f32 %v1939_v5, 0.0 }
 0x240   : > { %v1573_v12 = vpop.f32.mrf.mxu0  ;;  %v1941_v13 = vpop.f32.mrf.mxu1 }
 0x241   : > { %2589 = vst.msk [vmem:[%s4419_s23 + $0x2b8] sm:$0xff] %vm2501_vm4, %v2407_v8  ;;  %v2220_v14 = vmul.f32 %v5242_v42, %v2032_v9  ;;  %2681 = vst.msk [vmem:[%s4419_s23 + $0x598] sm:$0xff] %vm2501_vm4, %v2499_v10  ;;  %v1574_v15 = vadd.f32 %v5230_v57, %v1573_v12  ;;  %v2312_v16 = vmul.f32 %v5242_v42, %v2124_v11 }
 0x242   : > { %v3637_v17 = vpop.f32.mrf.mxu0  ;;  %v3821_v18 = vpop.f32.mrf.mxu1 }
 0x243   : > { %v2408_v19 = vadd.f32 %v5253_v48, %v2220_v14  ;;  %v2033_v20 = vmax.f32 %v1574_v15, 0.0  ;;  %v2500_v21 = vadd.f32 %v5253_v48, %v2312_v16 }
 0x244   : > { %v1578_v22 = vpop.f32.mrf.mxu0 }
 0x245   : > { %2590 = vst.msk [vmem:[%s4419_s23 + $0x2c0] sm:$0xff] %vm2501_vm4, %v2408_v19  ;;  %v2221_v23 = vmul.f32 %v5242_v42, %v2033_v20  ;;  %2682 = vst.msk [vmem:[%s4419_s23 + $0x5a0] sm:$0xff] %vm2501_vm4, %v2500_v21  ;;  %v1579_v24 = vadd.f32 %v5230_v57, %v1578_v22 }
 0x246   : > { %v3640_v25 = vpop.f32.mrf.mxu0 }
 0x247   : > { %v2409_v26 = vadd.f32 %v5253_v48, %v2221_v23  ;;  %v2034_v27 = vmax.f32 %v1579_v24, 0.0 }
 0x248   : > { %v1581_v28 = vpop.f32.mrf.mxu0 }
 0x249   : > { %2591 = vst.msk [vmem:[%s4419_s23 + $0x2c8] sm:$0xff] %vm2501_vm4, %v2409_v26  ;;  %v2222_v29 = vmul.f32 %v5242_v42, %v2034_v27  ;;  %v1582_v30 = vadd.f32 %v5230_v57, %v1581_v28 }
 0x24a   : > { %v3641_v31 = vpop.f32.mrf.mxu0 }
 0x24b   : > { %v2410_v32 = vadd.f32 %v5253_v48, %v2222_v29  ;;  %v2035_v33 = vmax.f32 %v1582_v30, 0.0 }
 0x24d   : > { %2592 = vst.msk [vmem:[%s4419_s23 + $0x2d0] sm:$0xff] %vm2501_vm4, %v2410_v32  ;;  %v2223_v34 = vmul.f32 %v5242_v42, %v2035_v33  ;;  %2689 = sbr.rel (!%p4163_p4) target bundleno = 658 (0x292), region = 44 }
 0x24f   : > { %v2411_v35 = vadd.f32 %v5253_v48, %v2223_v34 }
 0x251   : > { %2593 = vst.msk [vmem:[%s4419_s23 + $0x2d8] sm:$0xff] %vm2501_vm4, %v2411_v35 }
 0x252   : > { %s5726_s14 = smov (!%p2692_p8, %s2691_s14), 181 }
 0x253   : > { %s3343_s20 = sshll.u32 %s5726_s14, 7 }
 0x254   : > { %p3346_p9 = scmp.eq.s32.totalorder %s3343_s20, 0 }
 0x255   : > { %s5517_s24 = sshrl.u32 (!%p3346_p9), %s5726_s14, 6 }
 0x256   : > { %2700 = sbr.rel (%p3346_p9) target bundleno = 658 (0x292), region = 48  ;;  %p3347_p10 = scmp.le.s32.totalorder (!%p3346_p9), %s5517_s24, 0 }
 0x25b   : > { %3107 = sbr.rel (%p3347_p10) target bundleno = 641 (0x281), region = 124  ;;  %s5717_s21 = smov (!%p3347_p10), %s5511_s18 }
 0x25c   : > { %s5718_s26 = smov (!%p3347_p10), %s4419_s23  ;;  %s5526_s29 = smov (!%p3347_p10), 0  }
 0x25d   : > { %s5528_s27 = smov (!%p3347_p10), 0  }
 0x260 LB: >> { %v2889_v57 = vld [vmem:[%s4079_s26] sm:$0xff]  ;;  %v2891_v42 = vld [vmem:[%s4079_s26 + $0x8] sm:$0xff]  ;;  %v2893_v48 = vld [vmem:[%s4079_s26 + $0x10] sm:$0xff]  ;;  %s3017_s28 = sadd.s32 1, %s4083_s29  ;;  %s2883_s27 = sadd.s32 1, %s4087_s27   ;;  %s4087_s27 = sphi %s5528_s27, %s2883_s27   ;;  %s4083_s29 = sphi %s5526_s29, %s5721_s29   ;;  %s4079_s26 = sphi %s5718_s26, %s5720_s26   ;;  %s4075_s21 = sphi %s5717_s21, %s5719_s21  }
 0x261   : >> { %2890 = vst [vmem:[%s4075_s21] sm:$0xff] %v2889_v57  ;;  %2892 = vst [vmem:[%s4075_s21 + $0x8] sm:$0xff] %v2891_v42  ;;  %v2895_v36 = vld [vmem:[%s4079_s26 + $0x18] sm:$0xff]  ;;  %v2897_v62 = vld [vmem:[%s4079_s26 + $0x20] sm:$0xff]  ;;  %p3018_p11 = scmp.ge.s32.totalorder %s3017_s28, %s5517_s24  ;;  %p2882_p12 = scmp.ge.s32.totalorder %s2883_s27, %s5517_s24 }
 0x262   : >> { %2894 = vst [vmem:[%s4075_s21 + $0x10] sm:$0xff] %v2893_v48  ;;  %v2899_v37 = vld [vmem:[%s4079_s26 + $0x28] sm:$0xff]  ;;  %2896 = vst [vmem:[%s4075_s21 + $0x18] sm:$0xff] %v2895_v36  ;;  %v2901_v39 = vld [vmem:[%s4079_s26 + $0x30] sm:$0xff] }
 0x263   : >> { %2898 = vst [vmem:[%s4075_s21 + $0x20] sm:$0xff] %v2897_v62  ;;  %2900 = vst [vmem:[%s4075_s21 + $0x28] sm:$0xff] %v2899_v37  ;;  %v2903_v40 = vld [vmem:[%s4079_s26 + $0x38] sm:$0xff]  ;;  %v2905_v4 = vld [vmem:[%s4079_s26 + $0x40] sm:$0xff]  ;;  %s5728_s28 = smov (%p3018_p11, %s3017_s28), 0 }
 0x264   : >> { %2902 = vst [vmem:[%s4075_s21 + $0x30] sm:$0xff] %v2901_v39  ;;  %2904 = vst [vmem:[%s4075_s21 + $0x38] sm:$0xff] %v2903_v40  ;;  %v2907_v41 = vld [vmem:[%s4079_s26 + $0x48] sm:$0xff]  ;;  %v2909_v38 = vld [vmem:[%s4079_s26 + $0x50] sm:$0xff]  ;;  %s3348_s30 = sshll.u32 %s5728_s28, 9  ;;  %s5721_s29 = smov %s5728_s28 }
 0x265   : >> { %2906 = vst [vmem:[%s4075_s21 + $0x40] sm:$0xff] %v2905_v4  ;;  %v2911_v43 = vld [vmem:[%s4079_s26 + $0x58] sm:$0xff]  ;;  %2908 = vst [vmem:[%s4075_s21 + $0x48] sm:$0xff] %v2907_v41  ;;  %v2913_v44 = vld [vmem:[%s4079_s26 + $0x60] sm:$0xff]  ;;  %s5584_s6 = scalar_lea.vmem %s4419_s23, %s3348_s30 [#allocation2]   ;;  %s5587_s7 = scalar_lea.vmem %s5511_s18, %s3348_s30  }
 0x266   : >> { %2910 = vst [vmem:[%s4075_s21 + $0x50] sm:$0xff] %v2909_v38  ;;  %2912 = vst [vmem:[%s4075_s21 + $0x58] sm:$0xff] %v2911_v43  ;;  %v2915_v45 = vld [vmem:[%s4079_s26 + $0x68] sm:$0xff]  ;;  %v2917_v46 = vld [vmem:[%s4079_s26 + $0x70] sm:$0xff] }
 0x267   : >> { %2914 = vst [vmem:[%s4075_s21 + $0x60] sm:$0xff] %v2913_v44  ;;  %2916 = vst [vmem:[%s4075_s21 + $0x68] sm:$0xff] %v2915_v45  ;;  %v2919_v47 = vld [vmem:[%s4079_s26 + $0x78] sm:$0xff]  ;;  %v2921_v0 = vld [vmem:[%s4079_s26 + $0x80] sm:$0xff] }
 0x268   : >> { %2918 = vst [vmem:[%s4075_s21 + $0x70] sm:$0xff] %v2917_v46  ;;  %v2923_v49 = vld [vmem:[%s4079_s26 + $0x88] sm:$0xff]  ;;  %2920 = vst [vmem:[%s4075_s21 + $0x78] sm:$0xff] %v2919_v47  ;;  %v2925_v50 = vld [vmem:[%s4079_s26 + $0x90] sm:$0xff] }
 0x269   : >> { %2922 = vst [vmem:[%s4075_s21 + $0x80] sm:$0xff] %v2921_v0  ;;  %2924 = vst [vmem:[%s4075_s21 + $0x88] sm:$0xff] %v2923_v49  ;;  %v2927_v51 = vld [vmem:[%s4079_s26 + $0x98] sm:$0xff]  ;;  %v2929_v52 = vld [vmem:[%s4079_s26 + $0xa0] sm:$0xff] }
 0x26a   : >> { %2926 = vst [vmem:[%s4075_s21 + $0x90] sm:$0xff] %v2925_v50  ;;  %2928 = vst [vmem:[%s4075_s21 + $0x98] sm:$0xff] %v2927_v51  ;;  %v2931_v53 = vld [vmem:[%s4079_s26 + $0xa8] sm:$0xff]  ;;  %v2933_v54 = vld [vmem:[%s4079_s26 + $0xb0] sm:$0xff] }
 0x26b   : >> { %2930 = vst [vmem:[%s4075_s21 + $0xa0] sm:$0xff] %v2929_v52  ;;  %v2935_v55 = vld [vmem:[%s4079_s26 + $0xb8] sm:$0xff]  ;;  %2932 = vst [vmem:[%s4075_s21 + $0xa8] sm:$0xff] %v2931_v53  ;;  %v2937_v56 = vld [vmem:[%s4079_s26 + $0xc0] sm:$0xff] }
 0x26c   : >> { %2934 = vst [vmem:[%s4075_s21 + $0xb0] sm:$0xff] %v2933_v54  ;;  %2936 = vst [vmem:[%s4075_s21 + $0xb8] sm:$0xff] %v2935_v55  ;;  %v2939_v58 = vld [vmem:[%s4079_s26 + $0xc8] sm:$0xff]  ;;  %v2941_v59 = vld [vmem:[%s4079_s26 + $0xd0] sm:$0xff] }
 0x26d   : >> { %2938 = vst [vmem:[%s4075_s21 + $0xc0] sm:$0xff] %v2937_v56  ;;  %2940 = vst [vmem:[%s4075_s21 + $0xc8] sm:$0xff] %v2939_v58  ;;  %v2943_v60 = vld [vmem:[%s4079_s26 + $0xd8] sm:$0xff]  ;;  %v2945_v61 = vld [vmem:[%s4079_s26 + $0xe0] sm:$0xff] }
 0x26e   : >> { %2942 = vst [vmem:[%s4075_s21 + $0xd0] sm:$0xff] %v2941_v59  ;;  %v2947_v63 = vld [vmem:[%s4079_s26 + $0xe8] sm:$0xff]  ;;  %2944 = vst [vmem:[%s4075_s21 + $0xd8] sm:$0xff] %v2943_v60  ;;  %v2949_v1 = vld [vmem:[%s4079_s26 + $0xf0] sm:$0xff] }
 0x26f   : >> { %2946 = vst [vmem:[%s4075_s21 + $0xe0] sm:$0xff] %v2945_v61  ;;  %2948 = vst [vmem:[%s4075_s21 + $0xe8] sm:$0xff] %v2947_v63  ;;  %v2951_v2 = vld [vmem:[%s4079_s26 + $0xf8] sm:$0xff]  ;;  %v2953_v3 = vld [vmem:[%s4079_s26 + $0x100] sm:$0xff] }
 0x270   : >> { %2950 = vst [vmem:[%s4075_s21 + $0xf0] sm:$0xff] %v2949_v1  ;;  %2952 = vst [vmem:[%s4075_s21 + $0xf8] sm:$0xff] %v2951_v2  ;;  %v2955_v5 = vld [vmem:[%s4079_s26 + $0x108] sm:$0xff]  ;;  %v2957_v6 = vld [vmem:[%s4079_s26 + $0x110] sm:$0xff] }
 0x271   : >> { %2954 = vst [vmem:[%s4075_s21 + $0x100] sm:$0xff] %v2953_v3  ;;  %v2959_v7 = vld [vmem:[%s4079_s26 + $0x118] sm:$0xff]  ;;  %2956 = vst [vmem:[%s4075_s21 + $0x108] sm:$0xff] %v2955_v5  ;;  %v2961_v8 = vld [vmem:[%s4079_s26 + $0x120] sm:$0xff] }
 0x272   : >> { %2958 = vst [vmem:[%s4075_s21 + $0x110] sm:$0xff] %v2957_v6  ;;  %2960 = vst [vmem:[%s4075_s21 + $0x118] sm:$0xff] %v2959_v7  ;;  %v2963_v9 = vld [vmem:[%s4079_s26 + $0x128] sm:$0xff]  ;;  %v2965_v10 = vld [vmem:[%s4079_s26 + $0x130] sm:$0xff] }
 0x273   : >> { %2962 = vst [vmem:[%s4075_s21 + $0x120] sm:$0xff] %v2961_v8  ;;  %2964 = vst [vmem:[%s4075_s21 + $0x128] sm:$0xff] %v2963_v9  ;;  %v2967_v11 = vld [vmem:[%s4079_s26 + $0x138] sm:$0xff]  ;;  %v2969_v12 = vld [vmem:[%s4079_s26 + $0x140] sm:$0xff] }
 0x274   : >> { %2966 = vst [vmem:[%s4075_s21 + $0x130] sm:$0xff] %v2965_v10  ;;  %v2971_v13 = vld [vmem:[%s4079_s26 + $0x148] sm:$0xff]  ;;  %2968 = vst [vmem:[%s4075_s21 + $0x138] sm:$0xff] %v2967_v11  ;;  %v2973_v14 = vld [vmem:[%s4079_s26 + $0x150] sm:$0xff] }
 0x275   : >> { %2970 = vst [vmem:[%s4075_s21 + $0x140] sm:$0xff] %v2969_v12  ;;  %2972 = vst [vmem:[%s4075_s21 + $0x148] sm:$0xff] %v2971_v13  ;;  %v2975_v15 = vld [vmem:[%s4079_s26 + $0x158] sm:$0xff]  ;;  %v2977_v16 = vld [vmem:[%s4079_s26 + $0x160] sm:$0xff] }
 0x276   : >> { %2974 = vst [vmem:[%s4075_s21 + $0x150] sm:$0xff] %v2973_v14  ;;  %2976 = vst [vmem:[%s4075_s21 + $0x158] sm:$0xff] %v2975_v15  ;;  %v2979_v17 = vld [vmem:[%s4079_s26 + $0x168] sm:$0xff]  ;;  %v2981_v18 = vld [vmem:[%s4079_s26 + $0x170] sm:$0xff] }
 0x277   : >> { %2978 = vst [vmem:[%s4075_s21 + $0x160] sm:$0xff] %v2977_v16  ;;  %v2983_v19 = vld [vmem:[%s4079_s26 + $0x178] sm:$0xff]  ;;  %2980 = vst [vmem:[%s4075_s21 + $0x168] sm:$0xff] %v2979_v17  ;;  %v2985_v20 = vld [vmem:[%s4079_s26 + $0x180] sm:$0xff] }
 0x278   : >> { %2982 = vst [vmem:[%s4075_s21 + $0x170] sm:$0xff] %v2981_v18  ;;  %2984 = vst [vmem:[%s4075_s21 + $0x178] sm:$0xff] %v2983_v19  ;;  %v2987_v21 = vld [vmem:[%s4079_s26 + $0x188] sm:$0xff]  ;;  %v2989_v22 = vld [vmem:[%s4079_s26 + $0x190] sm:$0xff] }
 0x279   : >> { %2986 = vst [vmem:[%s4075_s21 + $0x180] sm:$0xff] %v2985_v20  ;;  %2988 = vst [vmem:[%s4075_s21 + $0x188] sm:$0xff] %v2987_v21  ;;  %v2991_v23 = vld [vmem:[%s4079_s26 + $0x198] sm:$0xff]  ;;  %v2993_v24 = vld [vmem:[%s4079_s26 + $0x1a0] sm:$0xff] }
 0x27a   : >> { %2990 = vst [vmem:[%s4075_s21 + $0x190] sm:$0xff] %v2989_v22  ;;  %v2995_v25 = vld [vmem:[%s4079_s26 + $0x1a8] sm:$0xff]  ;;  %2992 = vst [vmem:[%s4075_s21 + $0x198] sm:$0xff] %v2991_v23  ;;  %v2997_v26 = vld [vmem:[%s4079_s26 + $0x1b0] sm:$0xff] }
 0x27b   : >> { %2994 = vst [vmem:[%s4075_s21 + $0x1a0] sm:$0xff] %v2993_v24  ;;  %2996 = vst [vmem:[%s4075_s21 + $0x1a8] sm:$0xff] %v2995_v25  ;;  %v2999_v27 = vld [vmem:[%s4079_s26 + $0x1b8] sm:$0xff]  ;;  %v3001_v28 = vld [vmem:[%s4079_s26 + $0x1c0] sm:$0xff] }
 0x27c   : >> { %2998 = vst [vmem:[%s4075_s21 + $0x1b0] sm:$0xff] %v2997_v26  ;;  %3000 = vst [vmem:[%s4075_s21 + $0x1b8] sm:$0xff] %v2999_v27  ;;  %v3003_v29 = vld [vmem:[%s4079_s26 + $0x1c8] sm:$0xff]  ;;  %v3005_v30 = vld [vmem:[%s4079_s26 + $0x1d0] sm:$0xff]  ;;  %2885 = sbr.rel (!%p2882_p12) target bundleno = 608 (0x260), region = 130 }
 0x27d   : >> { %3002 = vst [vmem:[%s4075_s21 + $0x1c0] sm:$0xff] %v3001_v28  ;;  %v3007_v31 = vld [vmem:[%s4079_s26 + $0x1d8] sm:$0xff]  ;;  %3004 = vst [vmem:[%s4075_s21 + $0x1c8] sm:$0xff] %v3003_v29  ;;  %v3009_v32 = vld [vmem:[%s4079_s26 + $0x1e0] sm:$0xff] }
 0x27e   : >> { %3006 = vst [vmem:[%s4075_s21 + $0x1d0] sm:$0xff] %v3005_v30  ;;  %3008 = vst [vmem:[%s4075_s21 + $0x1d8] sm:$0xff] %v3007_v31  ;;  %v3011_v33 = vld [vmem:[%s4079_s26 + $0x1e8] sm:$0xff]  ;;  %v3013_v34 = vld [vmem:[%s4079_s26 + $0x1f0] sm:$0xff] }
 0x27f   : >> { %3010 = vst [vmem:[%s4075_s21 + $0x1e0] sm:$0xff] %v3009_v32  ;;  %3012 = vst [vmem:[%s4075_s21 + $0x1e8] sm:$0xff] %v3011_v33  ;;  %v3015_v35 = vld [vmem:[%s4079_s26 + $0x1f8] sm:$0xff]  ;;  %s5720_s26 = smov %s5584_s6 }
 0x280   : >> { %3014 = vst [vmem:[%s4075_s21 + $0x1f0] sm:$0xff] %v3013_v34  ;;  %3016 = vst [vmem:[%s4075_s21 + $0x1f8] sm:$0xff] %v3015_v35  ;;  %s5719_s21 = smov %s5587_s7 }
 0x281 PF: > { %s5692_s8 = sand.u32 63, %s5726_s14   ;;  %s3359_s9 = sshll.u32 %s5517_s24, 9 }
 0x282   : > { %s3028_s10 = scalar_lea.vmem %s4419_s23, %s3359_s9 [#allocation2]   ;;  %s3030_s11 = scalar_lea.vmem %s5511_s18, %s3359_s9  }
 0x283   : > { %p3353_p13 = scmp.le.s32.totalorder %s5692_s8, 0 }
 0x284   : > { %s4089_s12 = smov (!%p3353_p13), %s3030_s11   ;;  %s4093_s13 = smov (!%p3353_p13), %s3028_s10  }
 0x285   : > { %3121 = sbr.rel (%p3353_p13) target bundleno = 658 (0x292), region = 135  ;;  %s4097_s15 = smov (!%p3353_p13), 0  }
 0x286   : > { %s4101_s16 = smov (!%p3353_p13), 0  }
 0x28a LB: >> { %v3040_v57 = vld [vmem:[%s4095_s13] sm:$0xff]  ;;  %s3042_s14 = sadd.s32 1, %s4099_s15  ;;  %s3034_s16 = sadd.s32 1, %s4103_s16   ;;  %s4103_s16 = sphi %s4101_s16, %s3034_s16   ;;  %s4099_s15 = sphi %s4097_s15, %s4098_s15   ;;  %s4095_s13 = sphi %s4093_s13, %s3047_s13   ;;  %s4091_s12 = sphi %s4089_s12, %s3048_s12  }
 0x28b   : >> { %3041 = vst [vmem:[%s4091_s12] sm:$0xff] %v3040_v57  ;;  %p3043_p0 = scmp.ge.s32.totalorder %s3042_s14, %s5692_s8  ;;  %p3033_p1 = scmp.ge.s32.totalorder %s3034_s16, %s5692_s8 }
 0x28d   : >> { %s5730_s14 = smov (%p3043_p0, %s3042_s14), 0  ;;  %3036 = sbr.rel (!%p3033_p1) target bundleno = 650 (0x28a), region = 141 }
 0x28e   : >> { %s3354_s23 = sshll.u32 %s5730_s14, 3  ;;  %s4098_s15 = smov %s5730_s14  }
 0x28f   : >> { %s3047_s13 = scalar_lea.vmem %s3028_s10, %s3354_s23 [#allocation2]   ;;  %s3048_s12 = scalar_lea.vmem %s3030_s11, %s3354_s23  }
 0x292 PF: > { %p12_p2 = scmp.ge.s32.totalorder %s4153_s22, 4   ;;  %s5722_s18 = smov %s4067_s19 }
 0x293   : > { %s5723_s19 = smov %s4161_s25  ;;  %s5724_s20 = smov %s4153_s22 }
 0x294   :  { %14 = sbr.rel (!%p12_p2) target bundleno = 2 (0x2), region = 152 }

// kernel: rn_forward.6
= control target key start
LH: loop header
LB: loop body
LE: loop exit
PB: predicated region body
PF: predicated region fallthrough
CT: control target
= control target key end

     0   :  { %s1942_s18 = smov 0   ;;  %s1944_s19 = smov 0   ;;  %s2533_s0 = inlined_call_operand.vmem [shape: bf16[722,216], index: 0, kind: input, shape index: {}]   ;;  %s2534_s1 = inlined_call_operand.vmem [shape: bf16[216,24], index: 1, kind: input, shape index: {}]   ;;  %s2535_s2 = inlined_call_operand.vmem [shape: f32[1,24], index: 2, kind: input, shape index: {}]   ;;  %s2536_s3 = inlined_call_operand.vmem [shape: f32[1,24], index: 3, kind: input, shape index: {}]   ;;  %s2537_s4 = inlined_call_operand.vmem [shape: f32[1,24], index: 4, kind: input, shape index: {}]   ;;  %s2538_s5 = inlined_call_operand.vmem [shape: f32[722,24], index: 5, kind: output, shape index: {}]  }
   0x1   :  { %s1946_s20 = smov 0  }
   0x2 LB: > { %s1955_s21 = sadd.s32 4294967295, %s1877_s20   ;;  %s1957_s22 = sadd.s32 1, %s1877_s20   ;;  %s1877_s20 = sphi %s1946_s20, %s2547_s20   ;;  %s1873_s19 = sphi %s1944_s19, %s2546_s19   ;;  %s1869_s18 = sphi %s1942_s18, %s2545_s18  }
   0x3   : > { %s129_s23 = ssub.s32 %s1877_s20, %s1957_s22  ;;  %s132_s24 = sadd.s32 1, %s1873_s19 }
   0x4   : > { %p130_p0 = scmp.eq.s32.totalorder %s129_s23, 0  ;;  %p142_p1 = scmp.ne.s32.totalorder %s1873_s19, %s1869_s18 }
   0x5   : > { %p143_p2 = scmp.eq.s32.totalorder %s1955_s21, 1  ;;  %p1514_p3 = scmp.ge.s32.totalorder %s1877_s20, 1 }
   0x6   : > { %s1965_s25 = scalar_select %p130_p0, %s1873_s19, %s132_s24  }
   0x7   : > { %p1967_p4 = por %p143_p2, %p142_p1  ;;  %p199_p5 = scmp.lt.s32.totalorder %s1877_s20, 3 }
   0x9   : > { %p200_p6 = pnand %p1514_p3, %p199_p5 }
   0xa   : > { %s1980_s6 = smul.u32 (!%p200_p6), 46, %s1955_s21  ;;  %s229_s27 = sand.u32 (!%p200_p6), 1, %s1869_s18  }
   0xb   : > { %203 = sbr.rel (%p200_p6) target bundleno = 436 (0x1b4), region = 40 }
   0xc   : > { %p238_p7 = scmp.lt.s32.totalorder (!%p200_p6), %s1980_s6, 90  ;;  %s1645_s28 = smul.u32 (!%p200_p6), 368, %s229_s27 }
   0xe   : > { %s2144_s18 = scalar_lea.vmem (!%p200_p6), [#allocation2], %s1645_s28  }
  0x10   : > { %v1736_v0 = vld [vmem:[%s2534_s1 + $0x38] sm:$0xff]   ;;  %v1911_v1 = vmov 0   ;;  %v1737_v2 = vld [vmem:[%s2534_s1 + $0x30] sm:$0xff]   ;;  %v1738_v3 = vld [vmem:[%s2534_s1 + $0x28] sm:$0xff]   ;;  %s239_s9 = scalar_select %p238_p7, %s1980_s6, 90  ;;  %vm623_vm0 = vcmask 719872  }
  0x11   : > { %697 = vmatprep.subr.bf16.mxu0 %v1911_v1  ;;  %1617 = vmatprep.subr.bf16.mxu1 %v1911_v1  ;;  %v1739_v4 = vld [vmem:[%s2534_s1 + $0x20] sm:$0xff]   ;;  %v1740_v5 = vld [vmem:[%s2534_s1 + $0x18] sm:$0xff]   ;;  %v1741_v8 = vld [vmem:[%s2534_s1 + $0x10] sm:$0xff]   ;;  %vm693_vm1 = vcmask 1043456   ;;  %vm1066_vm2 = vcmask 195584   ;;  %s1121_s8 = ssub.s32 (%p1967_p4), 91, %s1980_s6 }
  0x12   : > { %698 = vmatpush1.bf16.msra.mxu0 %v1736_v0  ;;  %1631 = vmatpush1.bf16.msra.mxu1 %v1736_v0  ;;  %s1615_s10 = sshll.u32 %s239_s9, 3  ;;  %v1742_v9 = vld [vmem:[%s2534_s1 + $0x8] sm:$0xff]   ;;  %v1743_v10 = vld [vmem:[%s2534_s1] sm:$0xff]   ;;  %v1746_v14 = vld [vmem:[%s2534_s1 + $0x58] sm:$0xff]   ;;  %s1616_s9 = smul.u32 (%p1967_p4), 368, %s1955_s21 }
  0x13   : > { %699 = vmatprep.subr.bf16.mxu0 %v1911_v1  ;;  %1618 = vmatprep.subr.bf16.mxu1 %v1911_v1  ;;  %s1999_s15 = scalar_lea.vmem %s2533_s0, %s1615_s10  ;;  %v1744_v11 = vld [vmem:[%s2534_s1 + $0x68] ss:$0 sps:$4 sm:$0xff]   ;;  %v1745_v13 = vld [vmem:[%s2534_s1 + $0x60] sm:$0xff]   ;;  %v1747_v15 = vld [vmem:[%s2534_s1 + $0x50] sm:$0xff]   ;;  %p1122_p8 = scmp.lt.s32.totalorder (%p1967_p4), %s1121_s8, 46 }
  0x14   : > { %v1752_v6 = vld [vmem:[%s1999_s15 + $0x4] ss:$8 sps:$4 sm:$0xff]   ;;  %v695_v12 = vsel %vm693_vm1, %v1744_v11, 0  ;;  %v1750_v18 = vld [vmem:[%s1999_s15] ss:$8 sps:$4 sm:$0xff]   ;;  %s2375_s12 = scalar_lea.vmem (%p1967_p4), %s2538_s5, %s1616_s9  }
  0x15   : > { %1578 = vmatprep.mubr.msk.bf16.mxu0 %vm623_vm0, %v1752_v6  ;;  %v1755_v7 = vld [vmem:[%s1999_s15 + $0xc4] ss:$8 sps:$4 sm:$0xff]   ;;  %v1753_v19 = vld [vmem:[%s1999_s15 + $0xc0] ss:$8 sps:$4 sm:$0xff]   ;;  %v1756_v20 = vld [vmem:[%s1999_s15 + $0x14] ss:$8 sps:$4 sm:$0xff]  }
  0x16   : > { %700 = vmatpush1.bf16.msra.mxu0 %v1737_v2  ;;  %1632 = vmatpush1.bf16.msra.mxu1 %v1737_v2  ;;  %v1748_v16 = vld [vmem:[%s2534_s1 + $0x48] sm:$0xff]   ;;  %v1749_v17 = vld [vmem:[%s2534_s1 + $0x40] sm:$0xff]   ;;  %v1759_v21 = vld [vmem:[%s1999_s15 + $0xd4] ss:$8 sps:$4 sm:$0xff]  }
  0x17   : > { %701 = vmatprep.subr.bf16.mxu0 %v1911_v1  ;;  %1619 = vmatprep.subr.bf16.mxu1 %v1911_v1  ;;  %v1758_v22 = vld [vmem:[%s1999_s15 + $0x10] ss:$8 sps:$4 sm:$0xff]   ;;  %v1762_v24 = vld [vmem:[%s1999_s15 + $0x24] ss:$8 sps:$4 sm:$0xff]   ;;  %v1764_v26 = vld [vmem:[%s1999_s15 + $0x20] ss:$8 sps:$4 sm:$0xff]  }
  0x18   : > { %1590 = vmatprep.mubr.msk.bf16.mxu1 %vm623_vm0, %v1755_v7  ;;  %v1761_v23 = vld [vmem:[%s1999_s15 + $0xd0] ss:$8 sps:$4 sm:$0xff]   ;;  %v1765_v25 = vld [vmem:[%s1999_s15 + $0xe4] ss:$8 sps:$4 sm:$0xff]   ;;  %v1767_v27 = vld [vmem:[%s1999_s15 + $0xe0] ss:$8 sps:$4 sm:$0xff]  }
  0x19   : > { %v1768_v28 = vld [vmem:[%s1999_s15 + $0x34] ss:$8 sps:$4 sm:$0xff]   ;;  %v1770_v30 = vld [vmem:[%s1999_s15 + $0x30] ss:$8 sps:$4 sm:$0xff]   ;;  %v1774_v32 = vld [vmem:[%s1999_s15 + $0x44] ss:$8 sps:$4 sm:$0xff]  }
  0x1a   : > { %702 = vmatpush1.bf16.msra.mxu0 %v1738_v3  ;;  %1633 = vmatpush1.bf16.msra.mxu1 %v1738_v3  ;;  %v1771_v29 = vld [vmem:[%s1999_s15 + $0xf4] ss:$8 sps:$4 sm:$0xff]   ;;  %v1773_v31 = vld [vmem:[%s1999_s15 + $0xf0] ss:$8 sps:$4 sm:$0xff]   ;;  %v1777_v33 = vld [vmem:[%s1999_s15 + $0x104] ss:$8 sps:$4 sm:$0xff]  }
  0x1b   : > { %703 = vmatprep.subr.bf16.mxu0 %v1911_v1  ;;  %1620 = vmatprep.subr.bf16.mxu1 %v1911_v1  ;;  %v1776_v34 = vld [vmem:[%s1999_s15 + $0x40] ss:$8 sps:$4 sm:$0xff]   ;;  %v1780_v36 = vld [vmem:[%s1999_s15 + $0x54] ss:$8 sps:$4 sm:$0xff]   ;;  %v1782_v38 = vld [vmem:[%s1999_s15 + $0x50] ss:$8 sps:$4 sm:$0xff]  }
  0x1c   : > { %v1779_v35 = vld [vmem:[%s1999_s15 + $0x100] ss:$8 sps:$4 sm:$0xff]   ;;  %v1783_v37 = vld [vmem:[%s1999_s15 + $0x114] ss:$8 sps:$4 sm:$0xff]   ;;  %v1785_v39 = vld [vmem:[%s1999_s15 + $0x110] ss:$8 sps:$4 sm:$0xff]  }
  0x1d   : > { %v1786_v40 = vld [vmem:[%s1999_s15 + $0x64] ss:$8 sps:$4 sm:$0xff]   ;;  %v1788_v42 = vld [vmem:[%s1999_s15 + $0x60] ss:$8 sps:$4 sm:$0xff]   ;;  %v1792_v44 = vld [vmem:[%s1999_s15 + $0x74] ss:$8 sps:$4 sm:$0xff]  }
  0x1e   : > { %704 = vmatpush1.bf16.msra.mxu0 %v1739_v4  ;;  %1634 = vmatpush1.bf16.msra.mxu1 %v1739_v4  ;;  %v1789_v41 = vld [vmem:[%s1999_s15 + $0x124] ss:$8 sps:$4 sm:$0xff]   ;;  %v1791_v43 = vld [vmem:[%s1999_s15 + $0x120] ss:$8 sps:$4 sm:$0xff]   ;;  %v1795_v45 = vld [vmem:[%s1999_s15 + $0x134] ss:$8 sps:$4 sm:$0xff]  }
  0x1f   : > { %705 = vmatprep.subr.bf16.mxu0 %v1911_v1  ;;  %1621 = vmatprep.subr.bf16.mxu1 %v1911_v1  ;;  %v1794_v46 = vld [vmem:[%s1999_s15 + $0x70] ss:$8 sps:$4 sm:$0xff]   ;;  %v1798_v48 = vld [vmem:[%s1999_s15 + $0x84] ss:$8 sps:$4 sm:$0xff]   ;;  %v1800_v50 = vld [vmem:[%s1999_s15 + $0x80] ss:$8 sps:$4 sm:$0xff]  }
  0x20   : > { %v1797_v47 = vld [vmem:[%s1999_s15 + $0x130] ss:$8 sps:$4 sm:$0xff]   ;;  %v1801_v49 = vld [vmem:[%s1999_s15 + $0x144] ss:$8 sps:$4 sm:$0xff]   ;;  %v1803_v51 = vld [vmem:[%s1999_s15 + $0x140] ss:$8 sps:$4 sm:$0xff]  }
  0x21   : > { %v1804_v52 = vld [vmem:[%s1999_s15 + $0x94] ss:$8 sps:$4 sm:$0xff]   ;;  %v1806_v54 = vld [vmem:[%s1999_s15 + $0x90] ss:$8 sps:$4 sm:$0xff]   ;;  %v1810_v56 = vld [vmem:[%s1999_s15 + $0xa4] ss:$8 sps:$4 sm:$0xff]  }
  0x22   : > { %706 = vmatpush1.bf16.msra.mxu0 %v1740_v5  ;;  %1635 = vmatpush1.bf16.msra.mxu1 %v1740_v5  ;;  %v1807_v53 = vld [vmem:[%s1999_s15 + $0x154] ss:$8 sps:$4 sm:$0xff]   ;;  %v1809_v55 = vld [vmem:[%s1999_s15 + $0x150] ss:$8 sps:$4 sm:$0xff]   ;;  %v1813_v57 = vld [vmem:[%s1999_s15 + $0x164] ss:$8 sps:$4 sm:$0xff]  }
  0x23   : > { %707 = vmatprep.subr.bf16.mxu0 %v1911_v1  ;;  %1622 = vmatprep.subr.bf16.mxu1 %v1911_v1  ;;  %v1812_v58 = vld [vmem:[%s1999_s15 + $0xa0] ss:$8 sps:$4 sm:$0xff]   ;;  %v1816_v60 = vld [vmem:[%s1999_s15 + $0xb4] ss:$8 sps:$4 sm:$0xff]   ;;  %v1818_v61 = vld [vmem:[%s1999_s15 + $0xb0] ss:$8 sps:$4 sm:$0xff]  }
  0x24   : > { %v1815_v59 = vld [vmem:[%s1999_s15 + $0x160] ss:$8 sps:$4 sm:$0xff]  }
  0x25   : > { %v2123_v62 = vld [vmem:[%s2535_s2] ss:$0 sm:$0xff] }
  0x26   : > { %708 = vmatpush1.bf16.msra.mxu0 %v1741_v8  ;;  %1636 = vmatpush1.bf16.msra.mxu1 %v1741_v8  ;;  %v2131_v3 = vld [vmem:[%s2536_s3] ss:$0 sm:$0xff] }
  0x27   : > { %709 = vmatprep.subr.bf16.mxu0 %v1911_v1  ;;  %1623 = vmatprep.subr.bf16.mxu1 %v1911_v1  ;;  %v2136_v8 = vld [vmem:[%s2537_s4] ss:$0 sm:$0xff] }
  0x2a   : > { %710 = vmatpush1.bf16.msra.mxu0 %v1742_v9  ;;  %1637 = vmatpush1.bf16.msra.mxu1 %v1742_v9 }
  0x2b   : > { %711 = vmatprep.subr.bf16.mxu0 %v1911_v1  ;;  %1624 = vmatprep.subr.bf16.mxu1 %v1911_v1 }
  0x2e   : > { %712 = vmatpush1.bf16.msra.mxu0 %v1743_v10  ;;  %1638 = vmatpush1.bf16.msra.mxu1 %v1743_v10 }
  0x2f   : > { %717 = vmatprep.subr.bf16.mxu0 %v1911_v1  ;;  %1625 = vmatprep.subr.bf16.mxu1 %v1911_v1 }
  0x32   : > { %718 = vmatpush2.bf16.msra.mxu0 %v695_v12  ;;  %1639 = vmatpush2.bf16.msra.mxu1 %v695_v12 }
  0x33   : > { %719 = vmatprep.subr.bf16.mxu0 %v1911_v1  ;;  %1626 = vmatprep.subr.bf16.mxu1 %v1911_v1 }
  0x36   : > { %720 = vmatpush2.bf16.msra.mxu0 %v1745_v13  ;;  %1640 = vmatpush2.bf16.msra.mxu1 %v1745_v13 }
  0x37   : > { %721 = vmatprep.subr.bf16.mxu0 %v1911_v1  ;;  %1627 = vmatprep.subr.bf16.mxu1 %v1911_v1 }
  0x3a   : > { %722 = vmatpush2.bf16.msra.mxu0 %v1746_v14  ;;  %1641 = vmatpush2.bf16.msra.mxu1 %v1746_v14 }
  0x3b   : > { %723 = vmatprep.subr.bf16.mxu0 %v1911_v1  ;;  %1628 = vmatprep.subr.bf16.mxu1 %v1911_v1 }
  0x3e   : > { %724 = vmatpush2.bf16.msra.mxu0 %v1747_v15  ;;  %1642 = vmatpush2.bf16.msra.mxu1 %v1747_v15 }
  0x3f   : > { %725 = vmatprep.subr.bf16.mxu0 %v1911_v1  ;;  %1629 = vmatprep.subr.bf16.mxu1 %v1911_v1 }
  0x42   : > { %726 = vmatpush2.bf16.msra.mxu0 %v1748_v16  ;;  %1643 = vmatpush2.bf16.msra.mxu1 %v1748_v16 }
  0x43   : > { %727 = vmatprep.subr.bf16.mxu0 %v1911_v1  ;;  %1630 = vmatprep.subr.bf16.mxu1 %v1911_v1 }
  0x46   : > { %728 = vmatpush2.bf16.msra.mxu0 %v1749_v17  ;;  %1644 = vmatpush2.bf16.msra.mxu1 %v1749_v17 }
  0x49   : > { %730 = vmatmul.mubr.bf16.vlgmr.msra.gmra.mxu0 %v1750_v18  ;;  %826 = vmatmul.mubr.bf16.vlgmr.msra.gmra.mxu1 %v1753_v19 }
  0x4a   : > { %1579 = vmatprep.mubr.msk.bf16.mxu0 %vm623_vm0, %v1756_v20  ;;  %1591 = vmatprep.mubr.msk.bf16.mxu1 %vm623_vm0, %v1759_v21 }
  0x51   : > { %738 = vmatmul.mubr.bf16.gmra.mxu0 %v1758_v22  ;;  %834 = vmatmul.mubr.bf16.gmra.mxu1 %v1761_v23 }
  0x52   : > { %1580 = vmatprep.mubr.msk.bf16.mxu0 %vm623_vm0, %v1762_v24  ;;  %1592 = vmatprep.mubr.msk.bf16.mxu1 %vm623_vm0, %v1765_v25 }
  0x59   : > { %746 = vmatmul.mubr.bf16.gmra.mxu0 %v1764_v26  ;;  %842 = vmatmul.mubr.bf16.gmra.mxu1 %v1767_v27 }
  0x5a   : > { %1581 = vmatprep.mubr.msk.bf16.mxu0 %vm623_vm0, %v1768_v28  ;;  %1593 = vmatprep.mubr.msk.bf16.mxu1 %vm623_vm0, %v1771_v29 }
  0x61   : > { %754 = vmatmul.mubr.bf16.gmra.mxu0 %v1770_v30  ;;  %850 = vmatmul.mubr.bf16.gmra.mxu1 %v1773_v31 }
  0x62   : > { %1582 = vmatprep.mubr.msk.bf16.mxu0 %vm623_vm0, %v1774_v32  ;;  %1594 = vmatprep.mubr.msk.bf16.mxu1 %vm623_vm0, %v1777_v33 }
  0x69   : > { %762 = vmatmul.mubr.bf16.gmra.mxu0 %v1776_v34  ;;  %858 = vmatmul.mubr.bf16.gmra.mxu1 %v1779_v35 }
  0x6a   : > { %1583 = vmatprep.mubr.msk.bf16.mxu0 %vm623_vm0, %v1780_v36  ;;  %1595 = vmatprep.mubr.msk.bf16.mxu1 %vm623_vm0, %v1783_v37 }
  0x71   : > { %770 = vmatmul.mubr.bf16.gmra.mxu0 %v1782_v38  ;;  %866 = vmatmul.mubr.bf16.gmra.mxu1 %v1785_v39 }
  0x72   : > { %1584 = vmatprep.mubr.msk.bf16.mxu0 %vm623_vm0, %v1786_v40  ;;  %1596 = vmatprep.mubr.msk.bf16.mxu1 %vm623_vm0, %v1789_v41 }
  0x79   : > { %778 = vmatmul.mubr.bf16.gmra.mxu0 %v1788_v42  ;;  %874 = vmatmul.mubr.bf16.gmra.mxu1 %v1791_v43 }
  0x7a   : > { %1585 = vmatprep.mubr.msk.bf16.mxu0 %vm623_vm0, %v1792_v44  ;;  %1597 = vmatprep.mubr.msk.bf16.mxu1 %vm623_vm0, %v1795_v45 }
  0x81   : > { %786 = vmatmul.mubr.bf16.gmra.mxu0 %v1794_v46  ;;  %882 = vmatmul.mubr.bf16.gmra.mxu1 %v1797_v47 }
  0x82   : > { %1586 = vmatprep.mubr.msk.bf16.mxu0 %vm623_vm0, %v1798_v48  ;;  %1598 = vmatprep.mubr.msk.bf16.mxu1 %vm623_vm0, %v1801_v49 }
  0x89   : > { %794 = vmatmul.mubr.bf16.gmra.mxu0 %v1800_v50  ;;  %890 = vmatmul.mubr.bf16.gmra.mxu1 %v1803_v51 }
  0x8a   : > { %1587 = vmatprep.mubr.msk.bf16.mxu0 %vm623_vm0, %v1804_v52  ;;  %1599 = vmatprep.mubr.msk.bf16.mxu1 %vm623_vm0, %v1807_v53 }
  0x91   : > { %802 = vmatmul.mubr.bf16.gmra.mxu0 %v1806_v54  ;;  %898 = vmatmul.mubr.bf16.gmra.mxu1 %v1809_v55 }
  0x92   : > { %1588 = vmatprep.mubr.msk.bf16.mxu0 %vm623_vm0, %v1810_v56  ;;  %1600 = vmatprep.mubr.msk.bf16.mxu1 %vm623_vm0, %v1813_v57 }
  0x99   : > { %810 = vmatmul.mubr.bf16.gmra.mxu0 %v1812_v58  ;;  %906 = vmatmul.mubr.bf16.gmra.mxu1 %v1815_v59 }
  0x9a   : > { %1589 = vmatprep.mubr.msk.bf16.mxu0 %vm623_vm0, %v1816_v60 }
  0xa1   : > { %818 = vmatmul.mubr.bf16.gmra.mxu0 %v1818_v61 }
 0x109   : > { %v731_v63 = vpop.f32.mrf.mxu0  ;;  %v827_v0 = vpop.f32.mrf.mxu1 }
 0x10a   : > { %v732_v1 = vadd.f32 %v2123_v62, %v731_v63  ;;  %v828_v2 = vadd.f32 %v2123_v62, %v827_v0 }
 0x10b   : > { %v733_v4 = vpop.f32.mrf.mxu0  ;;  %v829_v5 = vpop.f32.mrf.mxu1 }
 0x10c   : > { %v914_v6 = vmax.f32 %v732_v1, 0.0  ;;  %v938_v7 = vmax.f32 %v828_v2, 0.0 }
 0x10d   : > { %v734_v9 = vpop.f32.mrf.mxu0  ;;  %v830_v10 = vpop.f32.mrf.mxu1 }
 0x10e   : > { %v967_v11 = vmul.f32 %v2131_v3, %v914_v6  ;;  %v991_v12 = vmul.f32 %v2131_v3, %v938_v7  ;;  %v735_v13 = vadd.f32 %v2123_v62, %v734_v9  ;;  %v831_v14 = vadd.f32 %v2123_v62, %v830_v10 }
 0x10f   : > { %v736_v15 = vpop.f32.mrf.mxu0  ;;  %v832_v16 = vpop.f32.mrf.mxu1 }
 0x110   : > { %v1020_v17 = vadd.f32 %v2136_v8, %v967_v11  ;;  %v1044_v18 = vadd.f32 %v2136_v8, %v991_v12  ;;  %v915_v19 = vmax.f32 %v735_v13, 0.0  ;;  %v939_v20 = vmax.f32 %v831_v14, 0.0 }
 0x111   : > { %v739_v21 = vpop.f32.mrf.mxu0  ;;  %v835_v22 = vpop.f32.mrf.mxu1 }
 0x112   : > { %1067 = vst.msk [vmem:[%s2144_s18] sm:$0xff] %vm1066_vm2, %v1020_v17  ;;  %1091 = vst.msk [vmem:[%s2144_s18 + $0xc0] sm:$0xff] %vm1066_vm2, %v1044_v18  ;;  %v968_v23 = vmul.f32 %v2131_v3, %v915_v19  ;;  %v992_v24 = vmul.f32 %v2131_v3, %v939_v20  ;;  %v740_v25 = vadd.f32 %v2123_v62, %v739_v21 }
 0x113   : > { %v836_v26 = vadd.f32 %v2123_v62, %v835_v22  ;;  %v741_v27 = vpop.f32.mrf.mxu0  ;;  %v837_v28 = vpop.f32.mrf.mxu1 }
 0x114   : > { %v1021_v29 = vadd.f32 %v2136_v8, %v968_v23  ;;  %v1045_v30 = vadd.f32 %v2136_v8, %v992_v24  ;;  %v916_v31 = vmax.f32 %v740_v25, 0.0 }
 0x115   : > { %v940_v32 = vmax.f32 %v836_v26, 0.0  ;;  %v742_v33 = vpop.f32.mrf.mxu0  ;;  %v838_v34 = vpop.f32.mrf.mxu1 }
 0x116   : > { %1068 = vst.msk [vmem:[%s2144_s18 + $0x8] sm:$0xff] %vm1066_vm2, %v1021_v29  ;;  %1092 = vst.msk [vmem:[%s2144_s18 + $0xc8] sm:$0xff] %vm1066_vm2, %v1045_v30  ;;  %v969_v35 = vmul.f32 %v2131_v3, %v916_v31  ;;  %v743_v37 = vadd.f32 %v2123_v62, %v742_v33  ;;  %v839_v38 = vadd.f32 %v2123_v62, %v838_v34 }
 0x117   : > { %v993_v36 = vmul.f32 %v2131_v3, %v940_v32  ;;  %v744_v39 = vpop.f32.mrf.mxu0  ;;  %v840_v40 = vpop.f32.mrf.mxu1 }
 0x118   : > { %v1022_v41 = vadd.f32 %v2136_v8, %v969_v35  ;;  %v917_v43 = vmax.f32 %v743_v37, 0.0  ;;  %v941_v44 = vmax.f32 %v839_v38, 0.0 }
 0x119   : > { %v1046_v42 = vadd.f32 %v2136_v8, %v993_v36  ;;  %v747_v45 = vpop.f32.mrf.mxu0  ;;  %v843_v46 = vpop.f32.mrf.mxu1 }
 0x11a   : > { %1069 = vst.msk [vmem:[%s2144_s18 + $0x10] sm:$0xff] %vm1066_vm2, %v1022_v41  ;;  %v970_v47 = vmul.f32 %v2131_v3, %v917_v43  ;;  %v994_v48 = vmul.f32 %v2131_v3, %v941_v44  ;;  %v748_v49 = vadd.f32 %v2123_v62, %v747_v45  ;;  %v844_v50 = vadd.f32 %v2123_v62, %v843_v46 }
 0x11b   : > { %1093 = vst.msk [vmem:[%s2144_s18 + $0xd0] sm:$0xff] %vm1066_vm2, %v1046_v42  ;;  %v749_v51 = vpop.f32.mrf.mxu0  ;;  %v845_v52 = vpop.f32.mrf.mxu1 }
 0x11c   : > { %v1023_v53 = vadd.f32 %v2136_v8, %v970_v47  ;;  %v1047_v54 = vadd.f32 %v2136_v8, %v994_v48  ;;  %v918_v55 = vmax.f32 %v748_v49, 0.0  ;;  %v942_v56 = vmax.f32 %v844_v50, 0.0 }
 0x11d   : > { %v750_v57 = vpop.f32.mrf.mxu0  ;;  %v846_v58 = vpop.f32.mrf.mxu1 }
 0x11e   : > { %1070 = vst.msk [vmem:[%s2144_s18 + $0x18] sm:$0xff] %vm1066_vm2, %v1023_v53  ;;  %1094 = vst.msk [vmem:[%s2144_s18 + $0xd8] sm:$0xff] %vm1066_vm2, %v1047_v54  ;;  %v971_v59 = vmul.f32 %v2131_v3, %v918_v55  ;;  %v995_v60 = vmul.f32 %v2131_v3, %v942_v56  ;;  %v751_v61 = vadd.f32 %v2123_v62, %v750_v57 }
 0x11f   : > { %v847_v63 = vadd.f32 %v2123_v62, %v846_v58  ;;  %v752_v0 = vpop.f32.mrf.mxu0  ;;  %v848_v1 = vpop.f32.mrf.mxu1 }
 0x120   : > { %v1024_v2 = vadd.f32 %v2136_v8, %v971_v59  ;;  %v1048_v4 = vadd.f32 %v2136_v8, %v995_v60  ;;  %v919_v5 = vmax.f32 %v751_v61, 0.0 }
 0x121   : > { %v943_v6 = vmax.f32 %v847_v63, 0.0  ;;  %v755_v7 = vpop.f32.mrf.mxu0  ;;  %v851_v9 = vpop.f32.mrf.mxu1 }
 0x122   : > { %1071 = vst.msk [vmem:[%s2144_s18 + $0x20] sm:$0xff] %vm1066_vm2, %v1024_v2  ;;  %1095 = vst.msk [vmem:[%s2144_s18 + $0xe0] sm:$0xff] %vm1066_vm2, %v1048_v4  ;;  %v972_v10 = vmul.f32 %v2131_v3, %v919_v5  ;;  %v756_v12 = vadd.f32 %v2123_v62, %v755_v7  ;;  %v852_v13 = vadd.f32 %v2123_v62, %v851_v9 }
 0x123   : > { %v996_v11 = vmul.f32 %v2131_v3, %v943_v6  ;;  %v757_v14 = vpop.f32.mrf.mxu0  ;;  %v853_v15 = vpop.f32.mrf.mxu1 }
 0x124   : > { %v1025_v16 = vadd.f32 %v2136_v8, %v972_v10  ;;  %v920_v18 = vmax.f32 %v756_v12, 0.0  ;;  %v944_v19 = vmax.f32 %v852_v13, 0.0 }
 0x125   : > { %v1049_v17 = vadd.f32 %v2136_v8, %v996_v11  ;;  %v758_v20 = vpop.f32.mrf.mxu0  ;;  %v854_v21 = vpop.f32.mrf.mxu1 }
 0x126   : > { %1072 = vst.msk [vmem:[%s2144_s18 + $0x28] sm:$0xff] %vm1066_vm2, %v1025_v16  ;;  %v973_v22 = vmul.f32 %v2131_v3, %v920_v18  ;;  %v997_v23 = vmul.f32 %v2131_v3, %v944_v19  ;;  %v759_v24 = vadd.f32 %v2123_v62, %v758_v20  ;;  %v855_v25 = vadd.f32 %v2123_v62, %v854_v21 }
 0x127   : > { %1096 = vst.msk [vmem:[%s2144_s18 + $0xe8] sm:$0xff] %vm1066_vm2, %v1049_v17  ;;  %v760_v26 = vpop.f32.mrf.mxu0  ;;  %v856_v27 = vpop.f32.mrf.mxu1 }
 0x128   : > { %v1026_v28 = vadd.f32 %v2136_v8, %v973_v22  ;;  %v1050_v29 = vadd.f32 %v2136_v8, %v997_v23  ;;  %v921_v30 = vmax.f32 %v759_v24, 0.0  ;;  %v945_v31 = vmax.f32 %v855_v25, 0.0 }
 0x129   : > { %v763_v32 = vpop.f32.mrf.mxu0  ;;  %v859_v33 = vpop.f32.mrf.mxu1 }
 0x12a   : > { %1073 = vst.msk [vmem:[%s2144_s18 + $0x30] sm:$0xff] %vm1066_vm2, %v1026_v28  ;;  %1097 = vst.msk [vmem:[%s2144_s18 + $0xf0] sm:$0xff] %vm1066_vm2, %v1050_v29  ;;  %v974_v34 = vmul.f32 %v2131_v3, %v921_v30  ;;  %v998_v35 = vmul.f32 %v2131_v3, %v945_v31  ;;  %v764_v36 = vadd.f32 %v2123_v62, %v763_v32 }
 0x12b   : > { %v860_v37 = vadd.f32 %v2123_v62, %v859_v33  ;;  %v765_v38 = vpop.f32.mrf.mxu0  ;;  %v861_v39 = vpop.f32.mrf.mxu1 }
 0x12c   : > { %v1027_v40 = vadd.f32 %v2136_v8, %v974_v34  ;;  %v1051_v41 = vadd.f32 %v2136_v8, %v998_v35  ;;  %v922_v42 = vmax.f32 %v764_v36, 0.0 }
 0x12d   : > { %v946_v43 = vmax.f32 %v860_v37, 0.0  ;;  %v766_v44 = vpop.f32.mrf.mxu0  ;;  %v862_v45 = vpop.f32.mrf.mxu1 }
 0x12e   : > { %1074 = vst.msk [vmem:[%s2144_s18 + $0x38] sm:$0xff] %vm1066_vm2, %v1027_v40  ;;  %1098 = vst.msk [vmem:[%s2144_s18 + $0xf8] sm:$0xff] %vm1066_vm2, %v1051_v41  ;;  %v975_v46 = vmul.f32 %v2131_v3, %v922_v42  ;;  %v767_v48 = vadd.f32 %v2123_v62, %v766_v44  ;;  %v863_v49 = vadd.f32 %v2123_v62, %v862_v45 }
 0x12f   : > { %v999_v47 = vmul.f32 %v2131_v3, %v946_v43  ;;  %v768_v50 = vpop.f32.mrf.mxu0  ;;  %v864_v51 = vpop.f32.mrf.mxu1 }
 0x130   : > { %v1028_v52 = vadd.f32 %v2136_v8, %v975_v46  ;;  %v923_v54 = vmax.f32 %v767_v48, 0.0  ;;  %v947_v55 = vmax.f32 %v863_v49, 0.0 }
 0x131   : > { %v1052_v53 = vadd.f32 %v2136_v8, %v999_v47  ;;  %v771_v56 = vpop.f32.mrf.mxu0  ;;  %v867_v57 = vpop.f32.mrf.mxu1 }
 0x132   : > { %1075 = vst.msk [vmem:[%s2144_s18 + $0x40] sm:$0xff] %vm1066_vm2, %v1028_v52  ;;  %v976_v58 = vmul.f32 %v2131_v3, %v923_v54  ;;  %v1000_v59 = vmul.f32 %v2131_v3, %v947_v55  ;;  %v772_v60 = vadd.f32 %v2123_v62, %v771_v56  ;;  %v868_v61 = vadd.f32 %v2123_v62, %v867_v57 }
 0x133   : > { %1099 = vst.msk [vmem:[%s2144_s18 + $0x100] sm:$0xff] %vm1066_vm2, %v1052_v53  ;;  %v773_v63 = vpop.f32.mrf.mxu0  ;;  %v869_v0 = vpop.f32.mrf.mxu1 }
 0x134   : > { %v1029_v1 = vadd.f32 %v2136_v8, %v976_v58  ;;  %v1053_v2 = vadd.f32 %v2136_v8, %v1000_v59  ;;  %v924_v4 = vmax.f32 %v772_v60, 0.0  ;;  %v948_v5 = vmax.f32 %v868_v61, 0.0 }
 0x135   : > { %v774_v6 = vpop.f32.mrf.mxu0  ;;  %v870_v7 = vpop.f32.mrf.mxu1 }
 0x136   : > { %1076 = vst.msk [vmem:[%s2144_s18 + $0x48] sm:$0xff] %vm1066_vm2, %v1029_v1  ;;  %1100 = vst.msk [vmem:[%s2144_s18 + $0x108] sm:$0xff] %vm1066_vm2, %v1053_v2  ;;  %v977_v9 = vmul.f32 %v2131_v3, %v924_v4  ;;  %v1001_v10 = vmul.f32 %v2131_v3, %v948_v5  ;;  %v775_v11 = vadd.f32 %v2123_v62, %v774_v6 }
 0x137   : > { %v871_v12 = vadd.f32 %v2123_v62, %v870_v7  ;;  %v776_v13 = vpop.f32.mrf.mxu0  ;;  %v872_v14 = vpop.f32.mrf.mxu1 }
 0x138   : > { %v1030_v15 = vadd.f32 %v2136_v8, %v977_v9  ;;  %v1054_v16 = vadd.f32 %v2136_v8, %v1001_v10  ;;  %v925_v17 = vmax.f32 %v775_v11, 0.0 }
 0x139   : > { %v949_v18 = vmax.f32 %v871_v12, 0.0  ;;  %v779_v19 = vpop.f32.mrf.mxu0  ;;  %v875_v20 = vpop.f32.mrf.mxu1 }
 0x13a   : > { %1077 = vst.msk [vmem:[%s2144_s18 + $0x50] sm:$0xff] %vm1066_vm2, %v1030_v15  ;;  %1101 = vst.msk [vmem:[%s2144_s18 + $0x110] sm:$0xff] %vm1066_vm2, %v1054_v16  ;;  %v978_v21 = vmul.f32 %v2131_v3, %v925_v17  ;;  %v780_v23 = vadd.f32 %v2123_v62, %v779_v19  ;;  %v876_v24 = vadd.f32 %v2123_v62, %v875_v20 }
 0x13b   : > { %v1002_v22 = vmul.f32 %v2131_v3, %v949_v18  ;;  %v781_v25 = vpop.f32.mrf.mxu0  ;;  %v877_v26 = vpop.f32.mrf.mxu1 }
 0x13c   : > { %v1031_v27 = vadd.f32 %v2136_v8, %v978_v21  ;;  %v926_v29 = vmax.f32 %v780_v23, 0.0  ;;  %v950_v30 = vmax.f32 %v876_v24, 0.0 }
 0x13d   : > { %v1055_v28 = vadd.f32 %v2136_v8, %v1002_v22  ;;  %v782_v31 = vpop.f32.mrf.mxu0  ;;  %v878_v32 = vpop.f32.mrf.mxu1 }
 0x13e   : > { %1078 = vst.msk [vmem:[%s2144_s18 + $0x58] sm:$0xff] %vm1066_vm2, %v1031_v27  ;;  %v979_v33 = vmul.f32 %v2131_v3, %v926_v29  ;;  %v1003_v34 = vmul.f32 %v2131_v3, %v950_v30  ;;  %v783_v35 = vadd.f32 %v2123_v62, %v782_v31  ;;  %v879_v36 = vadd.f32 %v2123_v62, %v878_v32 }
 0x13f   : > { %1102 = vst.msk [vmem:[%s2144_s18 + $0x118] sm:$0xff] %vm1066_vm2, %v1055_v28  ;;  %v784_v37 = vpop.f32.mrf.mxu0  ;;  %v880_v38 = vpop.f32.mrf.mxu1 }
 0x140   : > { %v1032_v39 = vadd.f32 %v2136_v8, %v979_v33  ;;  %v1056_v40 = vadd.f32 %v2136_v8, %v1003_v34  ;;  %v927_v41 = vmax.f32 %v783_v35, 0.0  ;;  %v951_v42 = vmax.f32 %v879_v36, 0.0 }
 0x141   : > { %v787_v43 = vpop.f32.mrf.mxu0  ;;  %v883_v44 = vpop.f32.mrf.mxu1 }
 0x142   : > { %1079 = vst.msk [vmem:[%s2144_s18 + $0x60] sm:$0xff] %vm1066_vm2, %v1032_v39  ;;  %1103 = vst.msk [vmem:[%s2144_s18 + $0x120] sm:$0xff] %vm1066_vm2, %v1056_v40  ;;  %v980_v45 = vmul.f32 %v2131_v3, %v927_v41  ;;  %v1004_v46 = vmul.f32 %v2131_v3, %v951_v42  ;;  %v788_v47 = vadd.f32 %v2123_v62, %v787_v43 }
 0x143   : > { %v884_v48 = vadd.f32 %v2123_v62, %v883_v44  ;;  %v789_v49 = vpop.f32.mrf.mxu0  ;;  %v885_v50 = vpop.f32.mrf.mxu1 }
 0x144   : > { %v1033_v51 = vadd.f32 %v2136_v8, %v980_v45  ;;  %v1057_v52 = vadd.f32 %v2136_v8, %v1004_v46  ;;  %v928_v53 = vmax.f32 %v788_v47, 0.0 }
 0x145   : > { %v952_v54 = vmax.f32 %v884_v48, 0.0  ;;  %v790_v55 = vpop.f32.mrf.mxu0  ;;  %v886_v56 = vpop.f32.mrf.mxu1 }
 0x146   : > { %1080 = vst.msk [vmem:[%s2144_s18 + $0x68] sm:$0xff] %vm1066_vm2, %v1033_v51  ;;  %1104 = vst.msk [vmem:[%s2144_s18 + $0x128] sm:$0xff] %vm1066_vm2, %v1057_v52  ;;  %v981_v57 = vmul.f32 %v2131_v3, %v928_v53  ;;  %v791_v59 = vadd.f32 %v2123_v62, %v790_v55  ;;  %v887_v60 = vadd.f32 %v2123_v62, %v886_v56 }
 0x147   : > { %v1005_v58 = vmul.f32 %v2131_v3, %v952_v54  ;;  %v792_v61 = vpop.f32.mrf.mxu0  ;;  %v888_v63 = vpop.f32.mrf.mxu1 }
 0x148   : > { %v1034_v0 = vadd.f32 %v2136_v8, %v981_v57  ;;  %v929_v2 = vmax.f32 %v791_v59, 0.0  ;;  %v953_v4 = vmax.f32 %v887_v60, 0.0 }
 0x149   : > { %v1058_v1 = vadd.f32 %v2136_v8, %v1005_v58  ;;  %v795_v5 = vpop.f32.mrf.mxu0  ;;  %v891_v6 = vpop.f32.mrf.mxu1 }
 0x14a   : > { %1081 = vst.msk [vmem:[%s2144_s18 + $0x70] sm:$0xff] %vm1066_vm2, %v1034_v0  ;;  %v982_v7 = vmul.f32 %v2131_v3, %v929_v2  ;;  %v1006_v9 = vmul.f32 %v2131_v3, %v953_v4  ;;  %v796_v10 = vadd.f32 %v2123_v62, %v795_v5  ;;  %v892_v11 = vadd.f32 %v2123_v62, %v891_v6 }
 0x14b   : > { %1105 = vst.msk [vmem:[%s2144_s18 + $0x130] sm:$0xff] %vm1066_vm2, %v1058_v1  ;;  %v797_v12 = vpop.f32.mrf.mxu0  ;;  %v893_v13 = vpop.f32.mrf.mxu1 }
 0x14c   : > { %v1035_v14 = vadd.f32 %v2136_v8, %v982_v7  ;;  %v1059_v15 = vadd.f32 %v2136_v8, %v1006_v9  ;;  %v930_v16 = vmax.f32 %v796_v10, 0.0  ;;  %v954_v17 = vmax.f32 %v892_v11, 0.0 }
 0x14d   : > { %v798_v18 = vpop.f32.mrf.mxu0  ;;  %v894_v19 = vpop.f32.mrf.mxu1 }
 0x14e   : > { %1082 = vst.msk [vmem:[%s2144_s18 + $0x78] sm:$0xff] %vm1066_vm2, %v1035_v14  ;;  %1106 = vst.msk [vmem:[%s2144_s18 + $0x138] sm:$0xff] %vm1066_vm2, %v1059_v15  ;;  %v983_v20 = vmul.f32 %v2131_v3, %v930_v16  ;;  %v1007_v21 = vmul.f32 %v2131_v3, %v954_v17  ;;  %v799_v22 = vadd.f32 %v2123_v62, %v798_v18 }
 0x14f   : > { %v895_v23 = vadd.f32 %v2123_v62, %v894_v19  ;;  %v800_v24 = vpop.f32.mrf.mxu0  ;;  %v896_v25 = vpop.f32.mrf.mxu1 }
 0x150   : > { %v1036_v26 = vadd.f32 %v2136_v8, %v983_v20  ;;  %v1060_v27 = vadd.f32 %v2136_v8, %v1007_v21  ;;  %v931_v28 = vmax.f32 %v799_v22, 0.0 }
 0x151   : > { %v955_v29 = vmax.f32 %v895_v23, 0.0  ;;  %v803_v30 = vpop.f32.mrf.mxu0  ;;  %v899_v31 = vpop.f32.mrf.mxu1 }
 0x152   : > { %1083 = vst.msk [vmem:[%s2144_s18 + $0x80] sm:$0xff] %vm1066_vm2, %v1036_v26  ;;  %1107 = vst.msk [vmem:[%s2144_s18 + $0x140] sm:$0xff] %vm1066_vm2, %v1060_v27  ;;  %v984_v32 = vmul.f32 %v2131_v3, %v931_v28  ;;  %v804_v34 = vadd.f32 %v2123_v62, %v803_v30  ;;  %v900_v35 = vadd.f32 %v2123_v62, %v899_v31 }
 0x153   : > { %v1008_v33 = vmul.f32 %v2131_v3, %v955_v29  ;;  %v805_v36 = vpop.f32.mrf.mxu0  ;;  %v901_v37 = vpop.f32.mrf.mxu1 }
 0x154   : > { %v1037_v38 = vadd.f32 %v2136_v8, %v984_v32  ;;  %v932_v40 = vmax.f32 %v804_v34, 0.0  ;;  %v956_v41 = vmax.f32 %v900_v35, 0.0 }
 0x155   : > { %v1061_v39 = vadd.f32 %v2136_v8, %v1008_v33  ;;  %v806_v42 = vpop.f32.mrf.mxu0  ;;  %v902_v43 = vpop.f32.mrf.mxu1 }
 0x156   : > { %1084 = vst.msk [vmem:[%s2144_s18 + $0x88] sm:$0xff] %vm1066_vm2, %v1037_v38  ;;  %v985_v44 = vmul.f32 %v2131_v3, %v932_v40  ;;  %v1009_v45 = vmul.f32 %v2131_v3, %v956_v41  ;;  %v807_v46 = vadd.f32 %v2123_v62, %v806_v42  ;;  %v903_v47 = vadd.f32 %v2123_v62, %v902_v43 }
 0x157   : > { %1108 = vst.msk [vmem:[%s2144_s18 + $0x148] sm:$0xff] %vm1066_vm2, %v1061_v39  ;;  %v808_v48 = vpop.f32.mrf.mxu0  ;;  %v904_v49 = vpop.f32.mrf.mxu1 }
 0x158   : > { %v1038_v50 = vadd.f32 %v2136_v8, %v985_v44  ;;  %v1062_v51 = vadd.f32 %v2136_v8, %v1009_v45  ;;  %v933_v52 = vmax.f32 %v807_v46, 0.0  ;;  %v957_v53 = vmax.f32 %v903_v47, 0.0 }
 0x159   : > { %v811_v54 = vpop.f32.mrf.mxu0  ;;  %v907_v55 = vpop.f32.mrf.mxu1 }
 0x15a   : > { %1085 = vst.msk [vmem:[%s2144_s18 + $0x90] sm:$0xff] %vm1066_vm2, %v1038_v50  ;;  %1109 = vst.msk [vmem:[%s2144_s18 + $0x150] sm:$0xff] %vm1066_vm2, %v1062_v51  ;;  %v986_v56 = vmul.f32 %v2131_v3, %v933_v52  ;;  %v1010_v57 = vmul.f32 %v2131_v3, %v957_v53  ;;  %v812_v58 = vadd.f32 %v2123_v62, %v811_v54 }
 0x15b   : > { %v908_v59 = vadd.f32 %v2123_v62, %v907_v55  ;;  %v813_v60 = vpop.f32.mrf.mxu0  ;;  %v909_v61 = vpop.f32.mrf.mxu1 }
 0x15c   : > { %v1039_v63 = vadd.f32 %v2136_v8, %v986_v56  ;;  %v1063_v0 = vadd.f32 %v2136_v8, %v1010_v57  ;;  %v934_v1 = vmax.f32 %v812_v58, 0.0 }
 0x15d   : > { %v958_v2 = vmax.f32 %v908_v59, 0.0  ;;  %v814_v4 = vpop.f32.mrf.mxu0  ;;  %v910_v5 = vpop.f32.mrf.mxu1 }
 0x15e   : > { %1086 = vst.msk [vmem:[%s2144_s18 + $0x98] sm:$0xff] %vm1066_vm2, %v1039_v63  ;;  %1110 = vst.msk [vmem:[%s2144_s18 + $0x158] sm:$0xff] %vm1066_vm2, %v1063_v0  ;;  %v987_v6 = vmul.f32 %v2131_v3, %v934_v1  ;;  %v815_v9 = vadd.f32 %v2123_v62, %v814_v4  ;;  %v911_v10 = vadd.f32 %v2123_v62, %v910_v5 }
 0x15f   : > { %v1011_v7 = vmul.f32 %v2131_v3, %v958_v2  ;;  %v816_v11 = vpop.f32.mrf.mxu0  ;;  %v912_v12 = vpop.f32.mrf.mxu1 }
 0x160   : > { %v1040_v13 = vadd.f32 %v2136_v8, %v987_v6  ;;  %v935_v15 = vmax.f32 %v815_v9, 0.0  ;;  %v959_v16 = vmax.f32 %v911_v10, 0.0 }
 0x161   : > { %v1064_v14 = vadd.f32 %v2136_v8, %v1011_v7  ;;  %v819_v17 = vpop.f32.mrf.mxu0 }
 0x162   : > { %1087 = vst.msk [vmem:[%s2144_s18 + $0xa0] sm:$0xff] %vm1066_vm2, %v1040_v13  ;;  %v988_v18 = vmul.f32 %v2131_v3, %v935_v15  ;;  %v1012_v19 = vmul.f32 %v2131_v3, %v959_v16  ;;  %v820_v20 = vadd.f32 %v2123_v62, %v819_v17 }
 0x163   : > { %1111 = vst.msk [vmem:[%s2144_s18 + $0x160] sm:$0xff] %vm1066_vm2, %v1064_v14  ;;  %v821_v21 = vpop.f32.mrf.mxu0 }
 0x164   : > { %v1041_v22 = vadd.f32 %v2136_v8, %v988_v18  ;;  %v1065_v23 = vadd.f32 %v2136_v8, %v1012_v19  ;;  %v936_v24 = vmax.f32 %v820_v20, 0.0 }
 0x165   : > { %v822_v25 = vpop.f32.mrf.mxu0 }
 0x166   : > { %1088 = vst.msk [vmem:[%s2144_s18 + $0xa8] sm:$0xff] %vm1066_vm2, %v1041_v22  ;;  %1112 = vst.msk [vmem:[%s2144_s18 + $0x168] sm:$0xff] %vm1066_vm2, %v1065_v23  ;;  %v989_v26 = vmul.f32 %v2131_v3, %v936_v24  ;;  %v823_v27 = vadd.f32 %v2123_v62, %v822_v25 }
 0x167   : > { %v824_v28 = vpop.f32.mrf.mxu0 }
 0x168   : > { %v1042_v29 = vadd.f32 %v2136_v8, %v989_v26  ;;  %v937_v30 = vmax.f32 %v823_v27, 0.0 }
 0x16a   : > { %1089 = vst.msk [vmem:[%s2144_s18 + $0xb0] sm:$0xff] %vm1066_vm2, %v1042_v29  ;;  %v990_v31 = vmul.f32 %v2131_v3, %v937_v30  ;;  %1119 = sbr.rel (!%p1967_p4) target bundleno = 436 (0x1b4), region = 44 }
 0x16c   : > { %v1043_v32 = vadd.f32 %v2136_v8, %v990_v31 }
 0x16e   : > { %1090 = vst.msk [vmem:[%s2144_s18 + $0xb8] sm:$0xff] %vm1066_vm2, %v1043_v32 }
 0x16f   : > { %s2549_s8 = smov (!%p1122_p8, %s1121_s8), 46 }
 0x170   : > { %s1603_s13 = sshll.u32 %s2549_s8, 7 }
 0x171   : > { %p1606_p9 = scmp.eq.s32.totalorder %s1603_s13, 0 }
 0x172   : > { %1819 = sdivrem.u32 (!%p1606_p9), %s2549_s8, 46 }
 0x173   : > { %1130 = sbr.rel (%p1606_p9) target bundleno = 436 (0x1b4), region = 48 }
 0x17b   : > { %s2381_s26 = spop.drf %1819 }
 0x17c   : > { %p1607_p10 = scmp.le.s32.totalorder %s2381_s26, 0 }
 0x17d   : > { %s2540_s21 = smov (!%p1607_p10), %s2375_s12  ;;  %s2541_s6 = smov (!%p1607_p10), %s2144_s18 }
 0x17e   : > { %1467 = sbr.rel (%p1607_p10) target bundleno = 411 (0x19b), region = 124  ;;  %s2390_s14 = smov (!%p1607_p10), 0  }
 0x17f   : > { %s2392_s16 = smov (!%p1607_p10), 0  }
 0x183 LB: >> { %v1285_v62 = vld [vmem:[%s1885_s6] sm:$0xff]  ;;  %v1287_v3 = vld [vmem:[%s1885_s6 + $0x8] sm:$0xff]  ;;  %v1289_v8 = vld [vmem:[%s1885_s6 + $0x10] sm:$0xff]  ;;  %s1377_s17 = sadd.s32 1, %s1889_s14  ;;  %s1279_s16 = sadd.s32 1, %s1893_s16   ;;  %s1893_s16 = sphi %s2392_s16, %s1279_s16   ;;  %s1889_s14 = sphi %s2390_s14, %s2544_s14   ;;  %s1885_s6 = sphi %s2541_s6, %s2543_s6   ;;  %s1881_s21 = sphi %s2540_s21, %s2542_s21  }
 0x184   : >> { %1286 = vst [vmem:[%s1881_s21] sm:$0xff] %v1285_v62  ;;  %1288 = vst [vmem:[%s1881_s21 + $0x8] sm:$0xff] %v1287_v3  ;;  %v1291_v33 = vld [vmem:[%s1885_s6 + $0x18] sm:$0xff]  ;;  %v1293_v34 = vld [vmem:[%s1885_s6 + $0x20] sm:$0xff]  ;;  %p1378_p11 = scmp.ge.s32.totalorder %s1377_s17, %s2381_s26  ;;  %p1278_p12 = scmp.ge.s32.totalorder %s1279_s16, %s2381_s26 }
 0x185   : >> { %1290 = vst [vmem:[%s1881_s21 + $0x10] sm:$0xff] %v1289_v8  ;;  %v1295_v35 = vld [vmem:[%s1885_s6 + $0x28] sm:$0xff]  ;;  %1292 = vst [vmem:[%s1881_s21 + $0x18] sm:$0xff] %v1291_v33  ;;  %v1297_v36 = vld [vmem:[%s1885_s6 + $0x30] sm:$0xff] }
 0x186   : >> { %1294 = vst [vmem:[%s1881_s21 + $0x20] sm:$0xff] %v1293_v34  ;;  %1296 = vst [vmem:[%s1881_s21 + $0x28] sm:$0xff] %v1295_v35  ;;  %v1299_v37 = vld [vmem:[%s1885_s6 + $0x38] sm:$0xff]  ;;  %v1301_v38 = vld [vmem:[%s1885_s6 + $0x40] sm:$0xff]  ;;  %s2551_s17 = smov (%p1378_p11, %s1377_s17), 0 }
 0x187   : >> { %1298 = vst [vmem:[%s1881_s21 + $0x30] sm:$0xff] %v1297_v36  ;;  %1300 = vst [vmem:[%s1881_s21 + $0x38] sm:$0xff] %v1299_v37  ;;  %v1303_v39 = vld [vmem:[%s1885_s6 + $0x48] sm:$0xff]  ;;  %v1305_v40 = vld [vmem:[%s1885_s6 + $0x50] sm:$0xff]  ;;  %s1380_s20 = smul.u32 368, %s2551_s17  ;;  %s2544_s14 = smov %s2551_s17 }
 0x188   : >> { %1302 = vst [vmem:[%s1881_s21 + $0x40] sm:$0xff] %v1301_v38  ;;  %v1307_v41 = vld [vmem:[%s1885_s6 + $0x58] sm:$0xff]  ;;  %1304 = vst [vmem:[%s1881_s21 + $0x48] sm:$0xff] %v1303_v39  ;;  %v1309_v42 = vld [vmem:[%s1885_s6 + $0x60] sm:$0xff] }
 0x189   : >> { %1306 = vst [vmem:[%s1881_s21 + $0x50] sm:$0xff] %v1305_v40  ;;  %1308 = vst [vmem:[%s1881_s21 + $0x58] sm:$0xff] %v1307_v41  ;;  %v1311_v43 = vld [vmem:[%s1885_s6 + $0x68] sm:$0xff]  ;;  %v1313_v44 = vld [vmem:[%s1885_s6 + $0x70] sm:$0xff]  ;;  %s2454_s23 = scalar_lea.vmem %s2144_s18, %s1380_s20 [#allocation2]   ;;  %s2457_s24 = scalar_lea.vmem %s2375_s12, %s1380_s20  }
 0x18a   : >> { %1310 = vst [vmem:[%s1881_s21 + $0x60] sm:$0xff] %v1309_v42  ;;  %1312 = vst [vmem:[%s1881_s21 + $0x68] sm:$0xff] %v1311_v43  ;;  %v1315_v45 = vld [vmem:[%s1885_s6 + $0x78] sm:$0xff]  ;;  %v1317_v46 = vld [vmem:[%s1885_s6 + $0x80] sm:$0xff] }
 0x18b   : >> { %1314 = vst [vmem:[%s1881_s21 + $0x70] sm:$0xff] %v1313_v44  ;;  %v1319_v47 = vld [vmem:[%s1885_s6 + $0x88] sm:$0xff]  ;;  %1316 = vst [vmem:[%s1881_s21 + $0x78] sm:$0xff] %v1315_v45  ;;  %v1321_v48 = vld [vmem:[%s1885_s6 + $0x90] sm:$0xff] }
 0x18c   : >> { %1318 = vst [vmem:[%s1881_s21 + $0x80] sm:$0xff] %v1317_v46  ;;  %1320 = vst [vmem:[%s1881_s21 + $0x88] sm:$0xff] %v1319_v47  ;;  %v1323_v49 = vld [vmem:[%s1885_s6 + $0x98] sm:$0xff]  ;;  %v1325_v50 = vld [vmem:[%s1885_s6 + $0xa0] sm:$0xff] }
 0x18d   : >> { %1322 = vst [vmem:[%s1881_s21 + $0x90] sm:$0xff] %v1321_v48  ;;  %1324 = vst [vmem:[%s1881_s21 + $0x98] sm:$0xff] %v1323_v49  ;;  %v1327_v51 = vld [vmem:[%s1885_s6 + $0xa8] sm:$0xff]  ;;  %v1329_v52 = vld [vmem:[%s1885_s6 + $0xb0] sm:$0xff] }
 0x18e   : >> { %1326 = vst [vmem:[%s1881_s21 + $0xa0] sm:$0xff] %v1325_v50  ;;  %v1331_v53 = vld [vmem:[%s1885_s6 + $0xb8] sm:$0xff]  ;;  %1328 = vst [vmem:[%s1881_s21 + $0xa8] sm:$0xff] %v1327_v51  ;;  %v1333_v54 = vld [vmem:[%s1885_s6 + $0xc0] sm:$0xff] }
 0x18f   : >> { %1330 = vst [vmem:[%s1881_s21 + $0xb0] sm:$0xff] %v1329_v52  ;;  %1332 = vst [vmem:[%s1881_s21 + $0xb8] sm:$0xff] %v1331_v53  ;;  %v1335_v55 = vld [vmem:[%s1885_s6 + $0xc8] sm:$0xff]  ;;  %v1337_v56 = vld [vmem:[%s1885_s6 + $0xd0] sm:$0xff] }
 0x190   : >> { %1334 = vst [vmem:[%s1881_s21 + $0xc0] sm:$0xff] %v1333_v54  ;;  %1336 = vst [vmem:[%s1881_s21 + $0xc8] sm:$0xff] %v1335_v55  ;;  %v1339_v57 = vld [vmem:[%s1885_s6 + $0xd8] sm:$0xff]  ;;  %v1341_v58 = vld [vmem:[%s1885_s6 + $0xe0] sm:$0xff] }
 0x191   : >> { %1338 = vst [vmem:[%s1881_s21 + $0xd0] sm:$0xff] %v1337_v56  ;;  %v1343_v59 = vld [vmem:[%s1885_s6 + $0xe8] sm:$0xff]  ;;  %1340 = vst [vmem:[%s1881_s21 + $0xd8] sm:$0xff] %v1339_v57  ;;  %v1345_v60 = vld [vmem:[%s1885_s6 + $0xf0] sm:$0xff] }
 0x192   : >> { %1342 = vst [vmem:[%s1881_s21 + $0xe0] sm:$0xff] %v1341_v58  ;;  %1344 = vst [vmem:[%s1881_s21 + $0xe8] sm:$0xff] %v1343_v59  ;;  %v1347_v61 = vld [vmem:[%s1885_s6 + $0xf8] sm:$0xff]  ;;  %v1349_v63 = vld [vmem:[%s1885_s6 + $0x100] sm:$0xff] }
 0x193   : >> { %1346 = vst [vmem:[%s1881_s21 + $0xf0] sm:$0xff] %v1345_v60  ;;  %1348 = vst [vmem:[%s1881_s21 + $0xf8] sm:$0xff] %v1347_v61  ;;  %v1351_v0 = vld [vmem:[%s1885_s6 + $0x108] sm:$0xff]  ;;  %v1353_v1 = vld [vmem:[%s1885_s6 + $0x110] sm:$0xff] }
 0x194   : >> { %1350 = vst [vmem:[%s1881_s21 + $0x100] sm:$0xff] %v1349_v63  ;;  %v1355_v2 = vld [vmem:[%s1885_s6 + $0x118] sm:$0xff]  ;;  %1352 = vst [vmem:[%s1881_s21 + $0x108] sm:$0xff] %v1351_v0  ;;  %v1357_v4 = vld [vmem:[%s1885_s6 + $0x120] sm:$0xff] }
 0x195   : >> { %1354 = vst [vmem:[%s1881_s21 + $0x110] sm:$0xff] %v1353_v1  ;;  %1356 = vst [vmem:[%s1881_s21 + $0x118] sm:$0xff] %v1355_v2  ;;  %v1359_v5 = vld [vmem:[%s1885_s6 + $0x128] sm:$0xff]  ;;  %v1361_v6 = vld [vmem:[%s1885_s6 + $0x130] sm:$0xff] }
 0x196   : >> { %1358 = vst [vmem:[%s1881_s21 + $0x120] sm:$0xff] %v1357_v4  ;;  %1360 = vst [vmem:[%s1881_s21 + $0x128] sm:$0xff] %v1359_v5  ;;  %v1363_v7 = vld [vmem:[%s1885_s6 + $0x138] sm:$0xff]  ;;  %v1365_v9 = vld [vmem:[%s1885_s6 + $0x140] sm:$0xff]  ;;  %1281 = sbr.rel (!%p1278_p12) target bundleno = 387 (0x183), region = 130 }
 0x197   : >> { %1362 = vst [vmem:[%s1881_s21 + $0x130] sm:$0xff] %v1361_v6  ;;  %v1367_v10 = vld [vmem:[%s1885_s6 + $0x148] sm:$0xff]  ;;  %1364 = vst [vmem:[%s1881_s21 + $0x138] sm:$0xff] %v1363_v7  ;;  %v1369_v11 = vld [vmem:[%s1885_s6 + $0x150] sm:$0xff] }
 0x198   : >> { %1366 = vst [vmem:[%s1881_s21 + $0x140] sm:$0xff] %v1365_v9  ;;  %1368 = vst [vmem:[%s1881_s21 + $0x148] sm:$0xff] %v1367_v10  ;;  %v1371_v12 = vld [vmem:[%s1885_s6 + $0x158] sm:$0xff]  ;;  %v1373_v13 = vld [vmem:[%s1885_s6 + $0x160] sm:$0xff] }
 0x199   : >> { %1370 = vst [vmem:[%s1881_s21 + $0x150] sm:$0xff] %v1369_v11  ;;  %1372 = vst [vmem:[%s1881_s21 + $0x158] sm:$0xff] %v1371_v12  ;;  %v1375_v14 = vld [vmem:[%s1885_s6 + $0x168] sm:$0xff]  ;;  %s2543_s6 = smov %s2454_s23 }
 0x19a   : >> { %1374 = vst [vmem:[%s1881_s21 + $0x160] sm:$0xff] %v1373_v13  ;;  %1376 = vst [vmem:[%s1881_s21 + $0x168] sm:$0xff] %v1375_v14  ;;  %s2542_s21 = smov %s2457_s24 }
 0x19b PF: > { %1821 = sdivrem.u32 %s2549_s8, 46 }
 0x19c   : > { %s1608_s27 = smul.u32 368, %s2381_s26 }
 0x19e   : > { %s1388_s28 = scalar_lea.vmem %s2144_s18, %s1608_s27 [#allocation2]   ;;  %s1390_s29 = scalar_lea.vmem %s2375_s12, %s1608_s27  }
 0x1a4   : > { %s1822_s30 = spop.drf %1821 }
 0x1a5   : > { %p1610_p13 = scmp.le.s32.totalorder %s1822_s30, 0 }
 0x1a6   : > { %s1895_s15 = smov (!%p1610_p13), %s1390_s29   ;;  %s1899_s7 = smov (!%p1610_p13), %s1388_s28  }
 0x1a7   : > { %1481 = sbr.rel (%p1610_p13) target bundleno = 436 (0x1b4), region = 135  ;;  %s1903_s9 = smov (!%p1610_p13), 0  }
 0x1a8   : > { %s1907_s10 = smov (!%p1610_p13), 0  }
 0x1ac LB: >> { %v1400_v15 = vld [vmem:[%s1901_s7] sm:$0xff]  ;;  %s1402_s11 = sadd.s32 1, %s1905_s9  ;;  %s1394_s10 = sadd.s32 1, %s1909_s10   ;;  %s1909_s10 = sphi %s1907_s10, %s1394_s10   ;;  %s1905_s9 = sphi %s1903_s9, %s1904_s9   ;;  %s1901_s7 = sphi %s1899_s7, %s1407_s7   ;;  %s1897_s15 = sphi %s1895_s15, %s1408_s15  }
 0x1ad   : >> { %1401 = vst [vmem:[%s1897_s15] sm:$0xff] %v1400_v15  ;;  %p1403_p0 = scmp.ge.s32.totalorder %s1402_s11, %s1822_s30  ;;  %p1393_p1 = scmp.ge.s32.totalorder %s1394_s10, %s1822_s30 }
 0x1af   : >> { %s2553_s11 = smov (%p1403_p0, %s1402_s11), 0  ;;  %1396 = sbr.rel (!%p1393_p1) target bundleno = 428 (0x1ac), region = 141 }
 0x1b0   : >> { %s1611_s18 = sshll.u32 %s2553_s11, 3  ;;  %s1904_s9 = smov %s2553_s11  }
 0x1b1   : >> { %s1407_s7 = scalar_lea.vmem %s1388_s28, %s1611_s18 [#allocation2]   ;;  %s1408_s15 = scalar_lea.vmem %s1390_s29, %s1611_s18  }
 0x1b4 PF: > { %p12_p2 = scmp.ge.s32.totalorder %s1957_s22, 4   ;;  %s2545_s18 = smov %s1873_s19 }
 0x1b5   : > { %s2546_s19 = smov %s1965_s25  ;;  %s2547_s20 = smov %s1957_s22 }
 0x1b6   :  { %14 = sbr.rel (!%p12_p2) target bundleno = 2 (0x2), region = 152 }

// kernel: rn_forward.7
= control target key start
LH: loop header
LB: loop body
LE: loop exit
PB: predicated region body
PF: predicated region fallthrough
CT: control target
= control target key end

     0   :  { %s1224_s18 = smov 0   ;;  %s1226_s19 = smov 0   ;;  %s1525_s0 = inlined_call_operand.vmem [shape: bf16[200,216], index: 0, kind: input, shape index: {}]   ;;  %s1526_s1 = inlined_call_operand.vmem [shape: bf16[216,24], index: 1, kind: input, shape index: {}]   ;;  %s1527_s2 = inlined_call_operand.vmem [shape: f32[1,24], index: 2, kind: input, shape index: {}]   ;;  %s1528_s3 = inlined_call_operand.vmem [shape: f32[1,24], index: 3, kind: input, shape index: {}]   ;;  %s1529_s4 = inlined_call_operand.vmem [shape: f32[1,24], index: 4, kind: input, shape index: {}]   ;;  %s1530_s5 = inlined_call_operand.vmem [shape: f32[200,24], index: 5, kind: output, shape index: {}]  }
   0x1   :  { %s1228_s20 = smov 0  }
   0x2 LB: > { %s1237_s21 = sadd.s32 4294967295, %s1159_s20   ;;  %s1239_s22 = sadd.s32 1, %s1159_s20   ;;  %s1159_s20 = sphi %s1228_s20, %s1537_s20   ;;  %s1155_s19 = sphi %s1226_s19, %s1536_s19   ;;  %s1151_s18 = sphi %s1224_s18, %s1535_s18  }
   0x3   : > { %s129_s23 = ssub.s32 %s1159_s20, %s1239_s22  ;;  %s132_s24 = sadd.s32 1, %s1155_s19 }
   0x4   : > { %p130_p0 = scmp.eq.s32.totalorder %s129_s23, 0  ;;  %p142_p1 = scmp.ne.s32.totalorder %s1155_s19, %s1151_s18 }
   0x5   : > { %p143_p2 = scmp.eq.s32.totalorder %s1237_s21, 1  ;;  %p893_p3 = scmp.ge.s32.totalorder %s1159_s20, 1 }
   0x6   : > { %s1247_s25 = scalar_select %p130_p0, %s1155_s19, %s132_s24  }
   0x7   : > { %p1249_p4 = por %p143_p2, %p142_p1  ;;  %p199_p5 = scmp.lt.s32.totalorder %s1159_s20, 3 }
   0x9   : > { %p200_p6 = pnand %p893_p3, %p199_p5 }
   0xa   : > { %s1262_s6 = smul.u32 (!%p200_p6), 13, %s1237_s21  ;;  %s229_s27 = sand.u32 (!%p200_p6), 1, %s1151_s18  }
   0xb   : > { %203 = sbr.rel (%p200_p6) target bundleno = 356 (0x164), region = 40 }
   0xc   : > { %p238_p7 = scmp.lt.s32.totalorder (!%p200_p6), %s1262_s6, 24  ;;  %s976_s28 = smul.u32 (!%p200_p6), 104, %s229_s27 }
   0xe   : > { %s1377_s18 = scalar_lea.vmem (!%p200_p6), [#allocation2], %s976_s28  }
  0x10   : > { %v1067_v0 = vld [vmem:[%s1526_s1 + $0x38] sm:$0xff]   ;;  %v1193_v1 = vmov 0   ;;  %v1068_v2 = vld [vmem:[%s1526_s1 + $0x30] sm:$0xff]   ;;  %v1069_v3 = vld [vmem:[%s1526_s1 + $0x28] sm:$0xff]   ;;  %s239_s9 = scalar_select %p238_p7, %s1262_s6, 24  ;;  %vm443_vm0 = vcmask 719872  }
  0x11   : > { %469 = vmatprep.subr.bf16.mxu0 %v1193_v1  ;;  %948 = vmatprep.subr.bf16.mxu1 %v1193_v1  ;;  %v1070_v4 = vld [vmem:[%s1526_s1 + $0x20] sm:$0xff]   ;;  %v1071_v5 = vld [vmem:[%s1526_s1 + $0x18] sm:$0xff]   ;;  %v1072_v8 = vld [vmem:[%s1526_s1 + $0x10] sm:$0xff]   ;;  %vm465_vm1 = vcmask 1043456   ;;  %vm610_vm2 = vcmask 195584   ;;  %s632_s8 = ssub.s32 (%p1249_p4), 25, %s1262_s6 }
  0x12   : > { %470 = vmatpush1.bf16.msra.mxu0 %v1067_v0  ;;  %962 = vmatpush1.bf16.msra.mxu1 %v1067_v0  ;;  %s946_s10 = sshll.u32 %s239_s9, 3  ;;  %v1073_v9 = vld [vmem:[%s1526_s1 + $0x8] sm:$0xff]   ;;  %v1074_v10 = vld [vmem:[%s1526_s1] sm:$0xff]   ;;  %v1077_v14 = vld [vmem:[%s1526_s1 + $0x58] sm:$0xff]   ;;  %s947_s9 = smul.u32 (%p1249_p4), 104, %s1237_s21 }
  0x13   : > { %471 = vmatprep.subr.bf16.mxu0 %v1193_v1  ;;  %949 = vmatprep.subr.bf16.mxu1 %v1193_v1  ;;  %s1281_s15 = scalar_lea.vmem %s1525_s0, %s946_s10  ;;  %v1075_v11 = vld [vmem:[%s1526_s1 + $0x68] ss:$0 sps:$4 sm:$0xff]   ;;  %v1076_v13 = vld [vmem:[%s1526_s1 + $0x60] sm:$0xff]   ;;  %v1078_v15 = vld [vmem:[%s1526_s1 + $0x50] sm:$0xff]   ;;  %p633_p8 = scmp.lt.s32.totalorder (%p1249_p4), %s632_s8, 13 }
  0x14   : > { %v1083_v6 = vld [vmem:[%s1281_s15 + $0x4] ss:$8 sps:$4 sm:$0xff]   ;;  %v467_v12 = vsel %vm465_vm1, %v1075_v11, 0  ;;  %v1081_v18 = vld [vmem:[%s1281_s15] ss:$8 sps:$4 sm:$0xff]   ;;  %s1443_s12 = scalar_lea.vmem (%p1249_p4), %s1530_s5, %s947_s9  }
  0x15   : > { %925 = vmatprep.mubr.msk.bf16.mxu0 %vm443_vm0, %v1083_v6  ;;  %v1086_v7 = vld [vmem:[%s1281_s15 + $0x44] ss:$8 sps:$4 sm:$0xff]   ;;  %v1084_v19 = vld [vmem:[%s1281_s15 + $0x40] ss:$8 sps:$4 sm:$0xff]   ;;  %v1087_v20 = vld [vmem:[%s1281_s15 + $0x14] ss:$8 sps:$4 sm:$0xff]  }
  0x16   : > { %472 = vmatpush1.bf16.msra.mxu0 %v1068_v2  ;;  %963 = vmatpush1.bf16.msra.mxu1 %v1068_v2  ;;  %v1079_v16 = vld [vmem:[%s1526_s1 + $0x48] sm:$0xff]   ;;  %v1080_v17 = vld [vmem:[%s1526_s1 + $0x40] sm:$0xff]   ;;  %v1090_v21 = vld [vmem:[%s1281_s15 + $0x54] ss:$8 sps:$4 sm:$0xff]  }
  0x17   : > { %473 = vmatprep.subr.bf16.mxu0 %v1193_v1  ;;  %950 = vmatprep.subr.bf16.mxu1 %v1193_v1  ;;  %v267_v22 = vld [vmem:[%s1281_s15 + $0x60] sm:$0xff]  ;;  %v1089_v23 = vld [vmem:[%s1281_s15 + $0x10] ss:$8 sps:$4 sm:$0xff]   ;;  %v1098_v29 = vld [vmem:[%s1281_s15 + $0x34] ss:$8 sps:$4 sm:$0xff]  }
  0x18   : > { %929 = vmatprep.mubr.msk.bf16.mxu1 %vm443_vm0, %v1086_v7  ;;  %v1092_v24 = vld [vmem:[%s1281_s15 + $0x50] ss:$8 sps:$4 sm:$0xff]   ;;  %v1093_v25 = vld [vmem:[%s1281_s15 + $0x24] ss:$8 sps:$4 sm:$0xff]   ;;  %v910_v26 = vcombine.high %v267_v22, %v267_v22  ;;  %v1095_v27 = vld [vmem:[%s1281_s15 + $0x20] ss:$8 sps:$4 sm:$0xff]   ;;  %v909_v28 = vcombine.low %v267_v22, %v267_v22 }
  0x19   : > { %v1100_v30 = vld [vmem:[%s1281_s15 + $0x30] ss:$8 sps:$4 sm:$0xff]   ;;  %v1356_v31 = vld [vmem:[%s1527_s2] ss:$0 sm:$0xff] }
  0x1a   : > { %474 = vmatpush1.bf16.msra.mxu0 %v1069_v3  ;;  %964 = vmatpush1.bf16.msra.mxu1 %v1069_v3  ;;  %v1364_v36 = vld [vmem:[%s1528_s3] ss:$0 sm:$0xff] }
  0x1b   : > { %475 = vmatprep.subr.bf16.mxu0 %v1193_v1  ;;  %951 = vmatprep.subr.bf16.mxu1 %v1193_v1  ;;  %v1369_v41 = vld [vmem:[%s1529_s4] ss:$0 sm:$0xff] }
  0x1e   : > { %476 = vmatpush1.bf16.msra.mxu0 %v1070_v4  ;;  %965 = vmatpush1.bf16.msra.mxu1 %v1070_v4 }
  0x1f   : > { %477 = vmatprep.subr.bf16.mxu0 %v1193_v1  ;;  %952 = vmatprep.subr.bf16.mxu1 %v1193_v1 }
  0x22   : > { %478 = vmatpush1.bf16.msra.mxu0 %v1071_v5  ;;  %966 = vmatpush1.bf16.msra.mxu1 %v1071_v5 }
  0x23   : > { %479 = vmatprep.subr.bf16.mxu0 %v1193_v1  ;;  %953 = vmatprep.subr.bf16.mxu1 %v1193_v1 }
  0x26   : > { %480 = vmatpush1.bf16.msra.mxu0 %v1072_v8  ;;  %967 = vmatpush1.bf16.msra.mxu1 %v1072_v8 }
  0x27   : > { %481 = vmatprep.subr.bf16.mxu0 %v1193_v1  ;;  %954 = vmatprep.subr.bf16.mxu1 %v1193_v1 }
  0x2a   : > { %482 = vmatpush1.bf16.msra.mxu0 %v1073_v9  ;;  %968 = vmatpush1.bf16.msra.mxu1 %v1073_v9 }
  0x2b   : > { %483 = vmatprep.subr.bf16.mxu0 %v1193_v1  ;;  %955 = vmatprep.subr.bf16.mxu1 %v1193_v1 }
  0x2e   : > { %484 = vmatpush1.bf16.msra.mxu0 %v1074_v10  ;;  %969 = vmatpush1.bf16.msra.mxu1 %v1074_v10 }
  0x2f   : > { %489 = vmatprep.subr.bf16.mxu0 %v1193_v1  ;;  %956 = vmatprep.subr.bf16.mxu1 %v1193_v1 }
  0x32   : > { %490 = vmatpush2.bf16.msra.mxu0 %v467_v12  ;;  %970 = vmatpush2.bf16.msra.mxu1 %v467_v12 }
  0x33   : > { %491 = vmatprep.subr.bf16.mxu0 %v1193_v1  ;;  %957 = vmatprep.subr.bf16.mxu1 %v1193_v1 }
  0x36   : > { %492 = vmatpush2.bf16.msra.mxu0 %v1076_v13  ;;  %971 = vmatpush2.bf16.msra.mxu1 %v1076_v13 }
  0x37   : > { %493 = vmatprep.subr.bf16.mxu0 %v1193_v1  ;;  %958 = vmatprep.subr.bf16.mxu1 %v1193_v1 }
  0x3a   : > { %494 = vmatpush2.bf16.msra.mxu0 %v1077_v14  ;;  %972 = vmatpush2.bf16.msra.mxu1 %v1077_v14 }
  0x3b   : > { %495 = vmatprep.subr.bf16.mxu0 %v1193_v1  ;;  %959 = vmatprep.subr.bf16.mxu1 %v1193_v1 }
  0x3e   : > { %496 = vmatpush2.bf16.msra.mxu0 %v1078_v15  ;;  %973 = vmatpush2.bf16.msra.mxu1 %v1078_v15 }
  0x3f   : > { %497 = vmatprep.subr.bf16.mxu0 %v1193_v1  ;;  %960 = vmatprep.subr.bf16.mxu1 %v1193_v1 }
  0x42   : > { %498 = vmatpush2.bf16.msra.mxu0 %v1079_v16  ;;  %974 = vmatpush2.bf16.msra.mxu1 %v1079_v16 }
  0x43   : > { %499 = vmatprep.subr.bf16.mxu0 %v1193_v1  ;;  %961 = vmatprep.subr.bf16.mxu1 %v1193_v1 }
  0x46   : > { %500 = vmatpush2.bf16.msra.mxu0 %v1080_v17  ;;  %975 = vmatpush2.bf16.msra.mxu1 %v1080_v17 }
  0x49   : > { %502 = vmatmul.mubr.bf16.vlgmr.msra.gmra.mxu0 %v1081_v18  ;;  %534 = vmatmul.mubr.bf16.vlgmr.msra.gmra.mxu1 %v1084_v19 }
  0x4a   : > { %926 = vmatprep.mubr.msk.bf16.mxu0 %vm443_vm0, %v1087_v20  ;;  %930 = vmatprep.mubr.msk.bf16.mxu1 %vm443_vm0, %v1090_v21 }
  0x51   : > { %510 = vmatmul.mubr.bf16.gmra.mxu0 %v1089_v23  ;;  %542 = vmatmul.mubr.bf16.gmra.mxu1 %v1092_v24 }
  0x52   : > { %927 = vmatprep.mubr.msk.bf16.mxu0 %vm443_vm0, %v1093_v25  ;;  %931 = vmatprep.mubr.msk.bf16.mxu1 %vm443_vm0, %v910_v26 }
  0x59   : > { %518 = vmatmul.mubr.bf16.gmra.mxu0 %v1095_v27  ;;  %550 = vmatmul.mubr.bf16.gmra.mxu1 %v909_v28 }
  0x5a   : > { %928 = vmatprep.mubr.msk.bf16.mxu0 %vm443_vm0, %v1098_v29 }
  0x61   : > { %526 = vmatmul.mubr.bf16.gmra.mxu0 %v1100_v30 }
 0x109   : > { %v503_v32 = vpop.f32.mrf.mxu0  ;;  %v535_v33 = vpop.f32.mrf.mxu1 }
 0x10a   : > { %v504_v34 = vadd.f32 %v1356_v31, %v503_v32  ;;  %v536_v35 = vadd.f32 %v1356_v31, %v535_v33 }
 0x10b   : > { %v505_v37 = vpop.f32.mrf.mxu0  ;;  %v537_v38 = vpop.f32.mrf.mxu1 }
 0x10c   : > { %v557_v39 = vmax.f32 %v504_v34, 0.0  ;;  %v565_v40 = vmax.f32 %v536_v35, 0.0 }
 0x10d   : > { %v506_v42 = vpop.f32.mrf.mxu0  ;;  %v538_v43 = vpop.f32.mrf.mxu1 }
 0x10e   : > { %v577_v44 = vmul.f32 %v1364_v36, %v557_v39  ;;  %v507_v45 = vadd.f32 %v1356_v31, %v506_v42  ;;  %v585_v46 = vmul.f32 %v1364_v36, %v565_v40  ;;  %v539_v47 = vadd.f32 %v1356_v31, %v538_v43 }
 0x10f   : > { %v508_v48 = vpop.f32.mrf.mxu0  ;;  %v540_v49 = vpop.f32.mrf.mxu1 }
 0x110   : > { %v597_v50 = vadd.f32 %v1369_v41, %v577_v44  ;;  %v558_v51 = vmax.f32 %v507_v45, 0.0  ;;  %v605_v52 = vadd.f32 %v1369_v41, %v585_v46  ;;  %v566_v53 = vmax.f32 %v539_v47, 0.0 }
 0x111   : > { %v511_v54 = vpop.f32.mrf.mxu0  ;;  %v543_v55 = vpop.f32.mrf.mxu1 }
 0x112   : > { %611 = vst.msk [vmem:[%s1377_s18] sm:$0xff] %vm610_vm2, %v597_v50  ;;  %v578_v56 = vmul.f32 %v1364_v36, %v558_v51  ;;  %619 = vst.msk [vmem:[%s1377_s18 + $0x40] sm:$0xff] %vm610_vm2, %v605_v52  ;;  %v512_v57 = vadd.f32 %v1356_v31, %v511_v54  ;;  %v586_v58 = vmul.f32 %v1364_v36, %v566_v53 }
 0x113   : > { %v544_v59 = vadd.f32 %v1356_v31, %v543_v55  ;;  %v513_v60 = vpop.f32.mrf.mxu0  ;;  %v545_v61 = vpop.f32.mrf.mxu1 }
 0x114   : > { %v598_v62 = vadd.f32 %v1369_v41, %v578_v56  ;;  %v559_v63 = vmax.f32 %v512_v57, 0.0  ;;  %v606_v0 = vadd.f32 %v1369_v41, %v586_v58 }
 0x115   : > { %v567_v1 = vmax.f32 %v544_v59, 0.0  ;;  %v514_v2 = vpop.f32.mrf.mxu0  ;;  %v546_v3 = vpop.f32.mrf.mxu1 }
 0x116   : > { %612 = vst.msk [vmem:[%s1377_s18 + $0x8] sm:$0xff] %vm610_vm2, %v598_v62  ;;  %v579_v4 = vmul.f32 %v1364_v36, %v559_v63  ;;  %620 = vst.msk [vmem:[%s1377_s18 + $0x48] sm:$0xff] %vm610_vm2, %v606_v0  ;;  %v515_v5 = vadd.f32 %v1356_v31, %v514_v2  ;;  %v547_v7 = vadd.f32 %v1356_v31, %v546_v3 }
 0x117   : > { %v587_v6 = vmul.f32 %v1364_v36, %v567_v1  ;;  %v516_v8 = vpop.f32.mrf.mxu0  ;;  %v548_v9 = vpop.f32.mrf.mxu1 }
 0x118   : > { %v599_v10 = vadd.f32 %v1369_v41, %v579_v4  ;;  %v560_v11 = vmax.f32 %v515_v5, 0.0  ;;  %v568_v13 = vmax.f32 %v547_v7, 0.0 }
 0x119   : > { %v607_v12 = vadd.f32 %v1369_v41, %v587_v6  ;;  %v519_v14 = vpop.f32.mrf.mxu0  ;;  %v551_v15 = vpop.f32.mrf.mxu1 }
 0x11a   : > { %613 = vst.msk [vmem:[%s1377_s18 + $0x10] sm:$0xff] %vm610_vm2, %v599_v10  ;;  %v580_v16 = vmul.f32 %v1364_v36, %v560_v11  ;;  %v520_v17 = vadd.f32 %v1356_v31, %v519_v14  ;;  %v588_v18 = vmul.f32 %v1364_v36, %v568_v13  ;;  %v552_v19 = vadd.f32 %v1356_v31, %v551_v15 }
 0x11b   : > { %621 = vst.msk [vmem:[%s1377_s18 + $0x50] sm:$0xff] %vm610_vm2, %v607_v12  ;;  %v521_v20 = vpop.f32.mrf.mxu0  ;;  %v553_v21 = vpop.f32.mrf.mxu1 }
 0x11c   : > { %v600_v22 = vadd.f32 %v1369_v41, %v580_v16  ;;  %v561_v23 = vmax.f32 %v520_v17, 0.0  ;;  %v608_v24 = vadd.f32 %v1369_v41, %v588_v18  ;;  %v569_v25 = vmax.f32 %v552_v19, 0.0 }
 0x11d   : > { %v522_v26 = vpop.f32.mrf.mxu0  ;;  %v554_v27 = vpop.f32.mrf.mxu1 }
 0x11e   : > { %614 = vst.msk [vmem:[%s1377_s18 + $0x18] sm:$0xff] %vm610_vm2, %v600_v22  ;;  %v581_v28 = vmul.f32 %v1364_v36, %v561_v23  ;;  %622 = vst.msk [vmem:[%s1377_s18 + $0x58] sm:$0xff] %vm610_vm2, %v608_v24  ;;  %v523_v29 = vadd.f32 %v1356_v31, %v522_v26  ;;  %v589_v30 = vmul.f32 %v1364_v36, %v569_v25 }
 0x11f   : > { %v524_v32 = vpop.f32.mrf.mxu0  ;;  %v555_v33 = vpop.f32.mrf.mxu1 }
 0x120   : > { %v601_v34 = vadd.f32 %v1369_v41, %v581_v28  ;;  %v562_v35 = vmax.f32 %v523_v29, 0.0  ;;  %v609_v37 = vadd.f32 %v1369_v41, %v589_v30 }
 0x121   : > { %v527_v38 = vpop.f32.mrf.mxu0 }
 0x122   : > { %615 = vst.msk [vmem:[%s1377_s18 + $0x20] sm:$0xff] %vm610_vm2, %v601_v34  ;;  %v582_v39 = vmul.f32 %v1364_v36, %v562_v35  ;;  %623 = vst.msk [vmem:[%s1377_s18 + $0x60] sm:$0xff] %vm610_vm2, %v609_v37  ;;  %v528_v40 = vadd.f32 %v1356_v31, %v527_v38 }
 0x123   : > { %v529_v42 = vpop.f32.mrf.mxu0 }
 0x124   : > { %v602_v43 = vadd.f32 %v1369_v41, %v582_v39  ;;  %v563_v44 = vmax.f32 %v528_v40, 0.0 }
 0x125   : > { %v530_v45 = vpop.f32.mrf.mxu0 }
 0x126   : > { %616 = vst.msk [vmem:[%s1377_s18 + $0x28] sm:$0xff] %vm610_vm2, %v602_v43  ;;  %v583_v46 = vmul.f32 %v1364_v36, %v563_v44  ;;  %v531_v47 = vadd.f32 %v1356_v31, %v530_v45 }
 0x127   : > { %v532_v48 = vpop.f32.mrf.mxu0 }
 0x128   : > { %v603_v49 = vadd.f32 %v1369_v41, %v583_v46  ;;  %v564_v50 = vmax.f32 %v531_v47, 0.0 }
 0x12a   : > { %617 = vst.msk [vmem:[%s1377_s18 + $0x30] sm:$0xff] %vm610_vm2, %v603_v49  ;;  %v584_v51 = vmul.f32 %v1364_v36, %v564_v50  ;;  %630 = sbr.rel (!%p1249_p4) target bundleno = 356 (0x164), region = 44 }
 0x12c   : > { %v604_v52 = vadd.f32 %v1369_v41, %v584_v51 }
 0x12e   : > { %618 = vst.msk [vmem:[%s1377_s18 + $0x38] sm:$0xff] %vm610_vm2, %v604_v52 }
 0x12f   : > { %s1539_s8 = smov (!%p633_p8, %s632_s8), 13 }
 0x130   : > { %s934_s13 = sshll.u32 %s1539_s8, 7 }
 0x131   : > { %p937_p9 = scmp.eq.s32.totalorder %s934_s13, 0 }
 0x132   : > { %1101 = sdivrem.u32 (!%p937_p9), %s1539_s8, 13 }
 0x133   : > { %641 = sbr.rel (%p937_p9) target bundleno = 356 (0x164), region = 48 }
 0x13b   : > { %s1449_s26 = spop.drf %1101 }
 0x13c   : > { %p938_p10 = scmp.le.s32.totalorder %s1449_s26, 0 }
 0x13d   : > { %s1532_s21 = smov (!%p938_p10), %s1443_s12  ;;  %s1533_s6 = smov (!%p938_p10), %s1377_s18 }
 0x13e   : > { %846 = sbr.rel (%p938_p10) target bundleno = 331 (0x14b), region = 124  ;;  %s1458_s14 = smov (!%p938_p10), 0  }
 0x13f   : > { %s1460_s16 = smov (!%p938_p10), 0  }
 0x143 LB: >> { %v730_v31 = vld [vmem:[%s1167_s6] sm:$0xff]  ;;  %v732_v36 = vld [vmem:[%s1167_s6 + $0x8] sm:$0xff]  ;;  %v734_v41 = vld [vmem:[%s1167_s6 + $0x10] sm:$0xff]  ;;  %s756_s17 = sadd.s32 1, %s1171_s14  ;;  %s724_s16 = sadd.s32 1, %s1175_s16   ;;  %s1175_s16 = sphi %s1460_s16, %s724_s16   ;;  %s1171_s14 = sphi %s1458_s14, %s1534_s14   ;;  %s1167_s6 = sphi %s1533_s6, %s761_s6   ;;  %s1163_s21 = sphi %s1532_s21, %s762_s21  }
 0x144   : >> { %731 = vst [vmem:[%s1163_s21] sm:$0xff] %v730_v31  ;;  %733 = vst [vmem:[%s1163_s21 + $0x8] sm:$0xff] %v732_v36  ;;  %v736_v53 = vld [vmem:[%s1167_s6 + $0x18] sm:$0xff]  ;;  %v738_v54 = vld [vmem:[%s1167_s6 + $0x20] sm:$0xff]  ;;  %p757_p11 = scmp.ge.s32.totalorder %s756_s17, %s1449_s26  ;;  %p723_p12 = scmp.ge.s32.totalorder %s724_s16, %s1449_s26 }
 0x145   : >> { %735 = vst [vmem:[%s1163_s21 + $0x10] sm:$0xff] %v734_v41  ;;  %v740_v55 = vld [vmem:[%s1167_s6 + $0x28] sm:$0xff]  ;;  %737 = vst [vmem:[%s1163_s21 + $0x18] sm:$0xff] %v736_v53  ;;  %v742_v56 = vld [vmem:[%s1167_s6 + $0x30] sm:$0xff] }
 0x146   : >> { %739 = vst [vmem:[%s1163_s21 + $0x20] sm:$0xff] %v738_v54  ;;  %741 = vst [vmem:[%s1163_s21 + $0x28] sm:$0xff] %v740_v55  ;;  %v744_v57 = vld [vmem:[%s1167_s6 + $0x38] sm:$0xff]  ;;  %v746_v58 = vld [vmem:[%s1167_s6 + $0x40] sm:$0xff]  ;;  %s1541_s17 = smov (%p757_p11, %s756_s17), 0  ;;  %726 = sbr.rel (!%p723_p12) target bundleno = 323 (0x143), region = 130 }
 0x147   : >> { %743 = vst [vmem:[%s1163_s21 + $0x30] sm:$0xff] %v742_v56  ;;  %745 = vst [vmem:[%s1163_s21 + $0x38] sm:$0xff] %v744_v57  ;;  %v748_v59 = vld [vmem:[%s1167_s6 + $0x48] sm:$0xff]  ;;  %v750_v60 = vld [vmem:[%s1167_s6 + $0x50] sm:$0xff]  ;;  %s759_s20 = smul.u32 104, %s1541_s17  ;;  %s1534_s14 = smov %s1541_s17 }
 0x148   : >> { %747 = vst [vmem:[%s1163_s21 + $0x40] sm:$0xff] %v746_v58  ;;  %v752_v61 = vld [vmem:[%s1167_s6 + $0x58] sm:$0xff]  ;;  %749 = vst [vmem:[%s1163_s21 + $0x48] sm:$0xff] %v748_v59  ;;  %v754_v62 = vld [vmem:[%s1167_s6 + $0x60] sm:$0xff] }
 0x149   : >> { %751 = vst [vmem:[%s1163_s21 + $0x50] sm:$0xff] %v750_v60  ;;  %753 = vst [vmem:[%s1163_s21 + $0x58] sm:$0xff] %v752_v61  ;;  %s761_s6 = scalar_lea.vmem %s1377_s18, %s759_s20 [#allocation2]  }
 0x14a   : >> { %755 = vst [vmem:[%s1163_s21 + $0x60] sm:$0xff] %v754_v62  ;;  %s762_s21 = scalar_lea.vmem %s1443_s12, %s759_s20  }
 0x14b PF: > { %1103 = sdivrem.u32 %s1539_s8, 13 }
 0x14c   : > { %s939_s23 = smul.u32 104, %s1449_s26 }
 0x14e   : > { %s767_s24 = scalar_lea.vmem %s1377_s18, %s939_s23 [#allocation2]   ;;  %s769_s27 = scalar_lea.vmem %s1443_s12, %s939_s23  }
 0x154   : > { %s1104_s28 = spop.drf %1103 }
 0x155   : > { %p941_p13 = scmp.le.s32.totalorder %s1104_s28, 0 }
 0x156   : > { %s1177_s29 = smov (!%p941_p13), %s769_s27   ;;  %s1181_s30 = smov (!%p941_p13), %s767_s24  }
 0x157   : > { %860 = sbr.rel (%p941_p13) target bundleno = 356 (0x164), region = 135  ;;  %s1185_s15 = smov (!%p941_p13), 0  }
 0x158   : > { %s1189_s7 = smov (!%p941_p13), 0  }
 0x15c LB: >> { %v779_v63 = vld [vmem:[%s1183_s30] sm:$0xff]  ;;  %s781_s9 = sadd.s32 1, %s1187_s15  ;;  %s773_s7 = sadd.s32 1, %s1191_s7   ;;  %s1191_s7 = sphi %s1189_s7, %s773_s7   ;;  %s1187_s15 = sphi %s1185_s15, %s1186_s15   ;;  %s1183_s30 = sphi %s1181_s30, %s786_s30   ;;  %s1179_s29 = sphi %s1177_s29, %s787_s29  }
 0x15d   : >> { %780 = vst [vmem:[%s1179_s29] sm:$0xff] %v779_v63  ;;  %p782_p0 = scmp.ge.s32.totalorder %s781_s9, %s1104_s28  ;;  %p772_p1 = scmp.ge.s32.totalorder %s773_s7, %s1104_s28 }
 0x15f   : >> { %s1543_s9 = smov (%p782_p0, %s781_s9), 0  ;;  %775 = sbr.rel (!%p772_p1) target bundleno = 348 (0x15c), region = 141 }
 0x160   : >> { %s942_s18 = sshll.u32 %s1543_s9, 3  ;;  %s1186_s15 = smov %s1543_s9  }
 0x161   : >> { %s786_s30 = scalar_lea.vmem %s767_s24, %s942_s18 [#allocation2]   ;;  %s787_s29 = scalar_lea.vmem %s769_s27, %s942_s18  }
 0x164 PF: > { %p12_p2 = scmp.ge.s32.totalorder %s1239_s22, 4   ;;  %s1535_s18 = smov %s1155_s19 }
 0x165   : > { %s1536_s19 = smov %s1247_s25  ;;  %s1537_s20 = smov %s1239_s22 }
 0x166   :  { %14 = sbr.rel (!%p12_p2) target bundleno = 2 (0x2), region = 152 }

// kernel: rn_forward.8
= control target key start
LH: loop header
LB: loop body
LE: loop exit
PB: predicated region body
PF: predicated region fallthrough
CT: control target
= control target key end

     0   :  { %s1019_s18 = smov 0   ;;  %s1021_s19 = smov 0   ;;  %s1204_s0 = inlined_call_operand.vmem [shape: bf16[50,216], index: 0, kind: input, shape index: {}]   ;;  %s1205_s1 = inlined_call_operand.vmem [shape: bf16[216,24], index: 1, kind: input, shape index: {}]   ;;  %s1206_s2 = inlined_call_operand.vmem [shape: f32[1,24], index: 2, kind: input, shape index: {}]   ;;  %s1207_s3 = inlined_call_operand.vmem [shape: f32[1,24], index: 3, kind: input, shape index: {}]   ;;  %s1208_s4 = inlined_call_operand.vmem [shape: f32[1,24], index: 4, kind: input, shape index: {}]   ;;  %s1209_s5 = inlined_call_operand.vmem [shape: f32[50,24], index: 5, kind: output, shape index: {}]  }
   0x1   :  { %s1023_s20 = smov 0  }
   0x2 LB: > { %s1032_s21 = sadd.s32 4294967295, %s954_s20   ;;  %s1034_s22 = sadd.s32 1, %s954_s20   ;;  %s954_s20 = sphi %s1023_s20, %s1216_s20   ;;  %s950_s19 = sphi %s1021_s19, %s1215_s19   ;;  %s946_s18 = sphi %s1019_s18, %s1214_s18  }
   0x3   : > { %s129_s23 = ssub.s32 %s954_s20, %s1034_s22  ;;  %s132_s24 = sadd.s32 1, %s950_s19 }
   0x4   : > { %p130_p0 = scmp.eq.s32.totalorder %s129_s23, 0  ;;  %p142_p1 = scmp.ne.s32.totalorder %s950_s19, %s946_s18 }
   0x5   : > { %p143_p2 = scmp.eq.s32.totalorder %s1032_s21, 1  ;;  %p714_p3 = scmp.ge.s32.totalorder %s954_s20, 1 }
   0x6   : > { %s1042_s25 = scalar_select %p130_p0, %s950_s19, %s132_s24  }
   0x7   : > { %p1044_p4 = por %p143_p2, %p142_p1  ;;  %p199_p5 = scmp.lt.s32.totalorder %s954_s20, 3 }
   0x9   : > { %p200_p6 = pnand %p714_p3, %p199_p5 }
   0xa   : > { %s1057_s6 = sshll.u32 (!%p200_p6), %s1032_s21, 2  ;;  %s229_s27 = sand.u32 (!%p200_p6), 1, %s946_s18  }
   0xb   : > { %203 = sbr.rel (%p200_p6) target bundleno = 318 (0x13e), region = 40  ;;  %p238_p7 = scmp.lt.s32.totalorder (!%p200_p6), %s1057_s6, 6 }
  0x10   : > { %v880_v0 = vld [vmem:[%s1205_s1 + $0x38] sm:$0xff]   ;;  %v988_v1 = vmov 0   ;;  %v881_v2 = vld [vmem:[%s1205_s1 + $0x30] sm:$0xff]   ;;  %s239_s7 = scalar_select %p238_p7, %s1057_s6, 6  ;;  %v882_v3 = vld [vmem:[%s1205_s1 + $0x28] sm:$0xff]   ;;  %vm392_vm0 = vcmask 719872  }
  0x11   : > { %403 = vmatprep.subr.bf16.mxu0 %v988_v1  ;;  %763 = vmatprep.subr.bf16.mxu1 %v988_v1  ;;  %v883_v4 = vld [vmem:[%s1205_s1 + $0x20] sm:$0xff]   ;;  %v884_v5 = vld [vmem:[%s1205_s1 + $0x18] sm:$0xff]   ;;  %v885_v8 = vld [vmem:[%s1205_s1 + $0x10] sm:$0xff]   ;;  %vm399_vm1 = vcmask 1043456   ;;  %vm478_vm2 = vcmask 195584   ;;  %s491_s8 = ssub.s32 (%p1044_p4), 7, %s1057_s6 }
  0x12   : > { %404 = vmatpush1.bf16.msra.mxu0 %v880_v0  ;;  %777 = vmatpush1.bf16.msra.mxu1 %v880_v0  ;;  %s759_s10 = sshll.u32 %s239_s7, 3  ;;  %v886_v9 = vld [vmem:[%s1205_s1 + $0x8] sm:$0xff]   ;;  %v887_v10 = vld [vmem:[%s1205_s1] sm:$0xff]   ;;  %v890_v14 = vld [vmem:[%s1205_s1 + $0x58] sm:$0xff]   ;;  %s760_s9 = sshll.u32 (%p1044_p4), %s1032_s21, 5 }
  0x13   : > { %405 = vmatprep.subr.bf16.mxu0 %v988_v1  ;;  %764 = vmatprep.subr.bf16.mxu1 %v988_v1  ;;  %s1076_s15 = scalar_lea.vmem %s1204_s0, %s759_s10  ;;  %v888_v11 = vld [vmem:[%s1205_s1 + $0x68] ss:$0 sps:$4 sm:$0xff]   ;;  %v889_v13 = vld [vmem:[%s1205_s1 + $0x60] sm:$0xff]   ;;  %v891_v15 = vld [vmem:[%s1205_s1 + $0x50] sm:$0xff]   ;;  %p492_p8 = scmp.lt.s32.totalorder (%p1044_p4), %s491_s8, 4 }
  0x14   : > { %v896_v6 = vld [vmem:[%s1076_s15 + $0x4] ss:$8 sps:$4 sm:$0xff]   ;;  %v899_v7 = vld [vmem:[%s1076_s15 + $0x14] ss:$8 sps:$4 sm:$0xff]   ;;  %v401_v12 = vsel %vm399_vm1, %v888_v11, 0  ;;  %s1155_s12 = scalar_lea.vmem (%p1044_p4), %s1209_s5, %s760_s9  }
  0x15   : > { %738 = vmatprep.mubr.msk.bf16.mxu0 %vm392_vm0, %v896_v6  ;;  %739 = vmatprep.mubr.msk.bf16.mxu1 %vm392_vm0, %v899_v7  ;;  %v892_v16 = vld [vmem:[%s1205_s1 + $0x48] sm:$0xff]   ;;  %v893_v17 = vld [vmem:[%s1205_s1 + $0x40] sm:$0xff]   ;;  %v897_v19 = vld [vmem:[%s1076_s15 + $0x10] ss:$8 sps:$4 sm:$0xff]  }
  0x16   : > { %406 = vmatpush1.bf16.msra.mxu0 %v881_v2  ;;  %778 = vmatpush1.bf16.msra.mxu1 %v881_v2  ;;  %v894_v18 = vld [vmem:[%s1076_s15] ss:$8 sps:$4 sm:$0xff]   ;;  %s715_s15 = sshll.u32 %s229_s27, 5 }
  0x17   : > { %407 = vmatprep.subr.bf16.mxu0 %v988_v1  ;;  %765 = vmatprep.subr.bf16.mxu1 %v988_v1  ;;  %v719_v20 = vld [vmem:[%s1206_s2] ss:$0 sm:$0xff]  ;;  %s1142_s18 = scalar_lea.vmem [#allocation2], %s715_s15  }
  0x18   : > { %v740_v25 = vld [vmem:[%s1207_s3] ss:$0 sm:$0xff] }
  0x19   : > { %v741_v30 = vld [vmem:[%s1208_s4] ss:$0 sm:$0xff] }
  0x1a   : > { %408 = vmatpush1.bf16.msra.mxu0 %v882_v3  ;;  %779 = vmatpush1.bf16.msra.mxu1 %v882_v3 }
  0x1b   : > { %409 = vmatprep.subr.bf16.mxu0 %v988_v1  ;;  %766 = vmatprep.subr.bf16.mxu1 %v988_v1 }
  0x1e   : > { %410 = vmatpush1.bf16.msra.mxu0 %v883_v4  ;;  %780 = vmatpush1.bf16.msra.mxu1 %v883_v4 }
  0x1f   : > { %411 = vmatprep.subr.bf16.mxu0 %v988_v1  ;;  %767 = vmatprep.subr.bf16.mxu1 %v988_v1 }
  0x22   : > { %412 = vmatpush1.bf16.msra.mxu0 %v884_v5  ;;  %781 = vmatpush1.bf16.msra.mxu1 %v884_v5 }
  0x23   : > { %413 = vmatprep.subr.bf16.mxu0 %v988_v1  ;;  %768 = vmatprep.subr.bf16.mxu1 %v988_v1 }
  0x26   : > { %414 = vmatpush1.bf16.msra.mxu0 %v885_v8  ;;  %782 = vmatpush1.bf16.msra.mxu1 %v885_v8 }
  0x27   : > { %415 = vmatprep.subr.bf16.mxu0 %v988_v1  ;;  %769 = vmatprep.subr.bf16.mxu1 %v988_v1 }
  0x2a   : > { %416 = vmatpush1.bf16.msra.mxu0 %v886_v9  ;;  %783 = vmatpush1.bf16.msra.mxu1 %v886_v9 }
  0x2b   : > { %417 = vmatprep.subr.bf16.mxu0 %v988_v1  ;;  %770 = vmatprep.subr.bf16.mxu1 %v988_v1 }
  0x2e   : > { %418 = vmatpush1.bf16.msra.mxu0 %v887_v10  ;;  %784 = vmatpush1.bf16.msra.mxu1 %v887_v10 }
  0x2f   : > { %423 = vmatprep.subr.bf16.mxu0 %v988_v1  ;;  %771 = vmatprep.subr.bf16.mxu1 %v988_v1 }
  0x32   : > { %424 = vmatpush2.bf16.msra.mxu0 %v401_v12  ;;  %785 = vmatpush2.bf16.msra.mxu1 %v401_v12 }
  0x33   : > { %425 = vmatprep.subr.bf16.mxu0 %v988_v1  ;;  %772 = vmatprep.subr.bf16.mxu1 %v988_v1 }
  0x36   : > { %426 = vmatpush2.bf16.msra.mxu0 %v889_v13  ;;  %786 = vmatpush2.bf16.msra.mxu1 %v889_v13 }
  0x37   : > { %427 = vmatprep.subr.bf16.mxu0 %v988_v1  ;;  %773 = vmatprep.subr.bf16.mxu1 %v988_v1 }
  0x3a   : > { %428 = vmatpush2.bf16.msra.mxu0 %v890_v14  ;;  %787 = vmatpush2.bf16.msra.mxu1 %v890_v14 }
  0x3b   : > { %429 = vmatprep.subr.bf16.mxu0 %v988_v1  ;;  %774 = vmatprep.subr.bf16.mxu1 %v988_v1 }
  0x3e   : > { %430 = vmatpush2.bf16.msra.mxu0 %v891_v15  ;;  %788 = vmatpush2.bf16.msra.mxu1 %v891_v15 }
  0x3f   : > { %431 = vmatprep.subr.bf16.mxu0 %v988_v1  ;;  %775 = vmatprep.subr.bf16.mxu1 %v988_v1 }
  0x42   : > { %432 = vmatpush2.bf16.msra.mxu0 %v892_v16  ;;  %789 = vmatpush2.bf16.msra.mxu1 %v892_v16 }
  0x43   : > { %433 = vmatprep.subr.bf16.mxu0 %v988_v1  ;;  %776 = vmatprep.subr.bf16.mxu1 %v988_v1 }
  0x46   : > { %434 = vmatpush2.bf16.msra.mxu0 %v893_v17  ;;  %790 = vmatpush2.bf16.msra.mxu1 %v893_v17 }
  0x49   : > { %436 = vmatmul.mubr.bf16.vlgmr.msra.gmra.mxu0 %v894_v18  ;;  %444 = vmatmul.mubr.bf16.vlgmr.msra.gmra.mxu1 %v897_v19 }
 0x109   : > { %v437_v21 = vpop.f32.mrf.mxu0  ;;  %v445_v22 = vpop.f32.mrf.mxu1 }
 0x10a   : > { %v438_v23 = vadd.f32 %v719_v20, %v437_v21  ;;  %v446_v24 = vadd.f32 %v719_v20, %v445_v22 }
 0x10b   : > { %v439_v26 = vpop.f32.mrf.mxu0  ;;  %v447_v27 = vpop.f32.mrf.mxu1 }
 0x10c   : > { %v452_v28 = vmax.f32 %v438_v23, 0.0  ;;  %v454_v29 = vmax.f32 %v446_v24, 0.0 }
 0x10d   : > { %v440_v31 = vpop.f32.mrf.mxu0  ;;  %v448_v32 = vpop.f32.mrf.mxu1 }
 0x10e   : > { %v463_v33 = vmul.f32 %v740_v25, %v452_v28  ;;  %v465_v34 = vmul.f32 %v740_v25, %v454_v29  ;;  %v441_v35 = vadd.f32 %v719_v20, %v440_v31  ;;  %v449_v36 = vadd.f32 %v719_v20, %v448_v32 }
 0x10f   : > { %v442_v37 = vpop.f32.mrf.mxu0  ;;  %v450_v38 = vpop.f32.mrf.mxu1 }
 0x110   : > { %v474_v39 = vadd.f32 %v741_v30, %v463_v33  ;;  %v476_v40 = vadd.f32 %v741_v30, %v465_v34  ;;  %v453_v41 = vmax.f32 %v441_v35, 0.0  ;;  %v455_v42 = vmax.f32 %v449_v36, 0.0 }
 0x112   : > { %479 = vst.msk [vmem:[%s1142_s18] sm:$0xff] %vm478_vm2, %v474_v39  ;;  %481 = vst.msk [vmem:[%s1142_s18 + $0x10] sm:$0xff] %vm478_vm2, %v476_v40  ;;  %v464_v43 = vmul.f32 %v740_v25, %v453_v41  ;;  %v466_v44 = vmul.f32 %v740_v25, %v455_v42  ;;  %489 = sbr.rel (!%p1044_p4) target bundleno = 318 (0x13e), region = 44 }
 0x114   : > { %v475_v45 = vadd.f32 %v741_v30, %v464_v43  ;;  %v477_v46 = vadd.f32 %v741_v30, %v466_v44 }
 0x116   : > { %480 = vst.msk [vmem:[%s1142_s18 + $0x8] sm:$0xff] %vm478_vm2, %v475_v45  ;;  %482 = vst.msk [vmem:[%s1142_s18 + $0x18] sm:$0xff] %vm478_vm2, %v477_v46 }
 0x117   : > { %s1218_s8 = smov (!%p492_p8, %s491_s8), 4 }
 0x118   : > { %s744_s13 = sshll.u32 %s1218_s8, 7 }
 0x119   : > { %p747_p9 = scmp.eq.s32.totalorder %s744_s13, 0 }
 0x11a   : > { %s1161_s14 = sshrl.u32 (!%p747_p9), %s1218_s8, 2 }
 0x11b   : > { %500 = sbr.rel (%p747_p9) target bundleno = 318 (0x13e), region = 48  ;;  %p748_p10 = scmp.le.s32.totalorder (!%p747_p9), %s1161_s14, 0 }
 0x120   : > { %667 = sbr.rel (%p748_p10) target bundleno = 301 (0x12d), region = 124  ;;  %s1211_s21 = smov (!%p748_p10), %s1155_s12 }
 0x121   : > { %s1212_s26 = smov (!%p748_p10), %s1142_s18  ;;  %s1170_s6 = smov (!%p748_p10), 0  }
 0x122   : > { %s968_s16 = smov (!%p748_p10), 0  }
 0x125 LB: >> { %v569_v47 = vld [vmem:[%s962_s26] sm:$0xff]  ;;  %v571_v48 = vld [vmem:[%s962_s26 + $0x8] sm:$0xff]  ;;  %v573_v49 = vld [vmem:[%s962_s26 + $0x10] sm:$0xff]  ;;  %s577_s17 = sadd.s32 1, %s966_s6  ;;  %s563_s16 = sadd.s32 1, %s970_s16   ;;  %s970_s16 = sphi %s968_s16, %s563_s16   ;;  %s966_s6 = sphi %s1170_s6, %s1213_s6   ;;  %s962_s26 = sphi %s1212_s26, %s582_s26   ;;  %s958_s21 = sphi %s1211_s21, %s583_s21  }
 0x126   : >> { %570 = vst [vmem:[%s958_s21] sm:$0xff] %v569_v47  ;;  %572 = vst [vmem:[%s958_s21 + $0x8] sm:$0xff] %v571_v48  ;;  %v575_v50 = vld [vmem:[%s962_s26 + $0x18] sm:$0xff]  ;;  %p578_p11 = scmp.ge.s32.totalorder %s577_s17, %s1161_s14  ;;  %p562_p12 = scmp.ge.s32.totalorder %s563_s16, %s1161_s14 }
 0x127   : >> { %574 = vst [vmem:[%s958_s21 + $0x10] sm:$0xff] %v573_v49  ;;  %576 = vst [vmem:[%s958_s21 + $0x18] sm:$0xff] %v575_v50 }
 0x128   : >> { %s1220_s17 = smov (%p578_p11, %s577_s17), 0  ;;  %565 = sbr.rel (!%p562_p12) target bundleno = 293 (0x125), region = 130 }
 0x129   : >> { %s749_s20 = sshll.u32 %s1220_s17, 5  ;;  %s1213_s6 = smov %s1220_s17 }
 0x12a   : >> { %s582_s26 = scalar_lea.vmem %s1142_s18, %s749_s20 [#allocation2]   ;;  %s583_s21 = scalar_lea.vmem %s1155_s12, %s749_s20  }
 0x12d PF: > { %s1186_s23 = sand.u32 3, %s1218_s8   ;;  %s761_s24 = sshll.u32 %s1161_s14, 5 }
 0x12e   : > { %s588_s27 = scalar_lea.vmem %s1142_s18, %s761_s24 [#allocation2]   ;;  %s590_s28 = scalar_lea.vmem %s1155_s12, %s761_s24  }
 0x12f   : > { %p754_p13 = scmp.le.s32.totalorder %s1186_s23, 0 }
 0x130   : > { %s972_s29 = smov (!%p754_p13), %s590_s28   ;;  %s976_s15 = smov (!%p754_p13), %s588_s27  }
 0x131   : > { %681 = sbr.rel (%p754_p13) target bundleno = 318 (0x13e), region = 135  ;;  %s980_s30 = smov (!%p754_p13), 0  }
 0x132   : > { %s984_s7 = smov (!%p754_p13), 0  }
 0x136 LB: >> { %v600_v51 = vld [vmem:[%s978_s15] sm:$0xff]  ;;  %s602_s8 = sadd.s32 1, %s982_s30  ;;  %s594_s7 = sadd.s32 1, %s986_s7   ;;  %s986_s7 = sphi %s984_s7, %s594_s7   ;;  %s982_s30 = sphi %s980_s30, %s981_s30   ;;  %s978_s15 = sphi %s976_s15, %s607_s15   ;;  %s974_s29 = sphi %s972_s29, %s608_s29  }
 0x137   : >> { %601 = vst [vmem:[%s974_s29] sm:$0xff] %v600_v51  ;;  %p603_p0 = scmp.ge.s32.totalorder %s602_s8, %s1186_s23  ;;  %p593_p1 = scmp.ge.s32.totalorder %s594_s7, %s1186_s23 }
 0x139   : >> { %s1222_s8 = smov (%p603_p0, %s602_s8), 0  ;;  %596 = sbr.rel (!%p593_p1) target bundleno = 310 (0x136), region = 141 }
 0x13a   : >> { %s755_s18 = sshll.u32 %s1222_s8, 3  ;;  %s981_s30 = smov %s1222_s8  }
 0x13b   : >> { %s607_s15 = scalar_lea.vmem %s588_s27, %s755_s18 [#allocation2]   ;;  %s608_s29 = scalar_lea.vmem %s590_s28, %s755_s18  }
 0x13e PF: > { %p12_p2 = scmp.ge.s32.totalorder %s1034_s22, 4   ;;  %s1214_s18 = smov %s950_s19 }
 0x13f   : > { %s1215_s19 = smov %s1042_s25  ;;  %s1216_s20 = smov %s1034_s22 }
 0x140   :  { %14 = sbr.rel (!%p12_p2) target bundleno = 2 (0x2), region = 152 }

// kernel: rn_forward.9
= control target key start
LH: loop header
LB: loop body
LE: loop exit
PB: predicated region body
PF: predicated region fallthrough
CT: control target
= control target key end

     0   :  { %s7948_s0 = inlined_call_operand.vmem [shape: bf16[2,640,64], index: 0, kind: input, shape index: {}]   ;;  %s7949_s1 = inlined_call_operand.vmem [shape: bf16[64,256], index: 1, kind: input, shape index: {}]   ;;  %s7950_s2 = inlined_call_operand.vmem [shape: f32[1,256], index: 2, kind: input, shape index: {}]   ;;  %s7951_s3 = inlined_call_operand.vmem [shape: bf16[256,256], index: 3, kind: input, shape index: {}]   ;;  %s7952_s4 = inlined_call_operand.vmem [shape: f32[1,256], index: 4, kind: input, shape index: {}]   ;;  %s7953_s5 = inlined_call_operand.vmem [shape: bf16[256,256], index: 5, kind: input, shape index: {}]   ;;  %s7954_s6 = inlined_call_operand.vmem [shape: f32[1,256], index: 6, kind: input, shape index: {}]   ;;  %s7955_s7 = inlined_call_operand.vmem [shape: bf16[256,256], index: 7, kind: input, shape index: {}]   ;;  %s7956_s8 = inlined_call_operand.vmem [shape: f32[1,256], index: 8, kind: input, shape index: {}]   ;;  %s7957_s9 = inlined_call_operand.vmem [shape: bf16[256,256], index: 9, kind: input, shape index: {}]   ;;  %s7958_s10 = inlined_call_operand.vmem [shape: f32[1,256], index: 10, kind: input, shape index: {}]   ;;  %s7959_s11 = inlined_call_operand.vmem [shape: bf16[256,256], index: 11, kind: input, shape index: {}]   ;;  %s7960_s12 = inlined_call_operand.vmem [shape: f32[1,256], index: 12, kind: input, shape index: {}]   ;;  %s7961_s13 = inlined_call_operand.vmem [shape: bf16[256,10], index: 13, kind: input, shape index: {}]   ;;  %s7962_s14 = inlined_call_operand.vmem [shape: f32[1,10], index: 14, kind: input, shape index: {}]   ;;  %s7963_s15 = inlined_call_operand.hbm [shape: f32[2,1,10], index: 15, kind: output, shape index: {}]  }
   0x1   :  { %7969 = sst [smem:[#allocation10_spill]] %s7948_s0 }
   0x2   :  { %20 = vsyncpa [#allocation3], 0 }
   0x3   :  { %22 = vsyncpa [#allocation3 + $0x1], 0  ;;  %s6371_s18 = smov 0   ;;  %s6373_s19 = smov 0  }
   0x4   :  { %s6375_s20 = smov 0   ;;  %s6377_s21 = smov 0  }
   0x5 LB: > { %7970 = sst [smem:[#allocation5_spill]] %s6275_s18  ;;  %s6392_s22 = sadd.s32 4294967295, %s6287_s21   ;;  %s6287_s21 = sphi %s6377_s21, %s7980_s21   ;;  %s6283_s20 = sphi %s6375_s20, %s7982_s20   ;;  %s6279_s19 = sphi %s6373_s19, %s7984_s19   ;;  %s6275_s18 = sphi %s6371_s18, %s7983_s18  }
   0x6   : > { %7971 = sst [smem:[#allocation6_spill]] %s6283_s20  ;;  %s5580_s23 = sadd.s32 4294967294, %s6287_s21  }
   0x7   : > { %s6396_s24 = sadd.s32 1, %s6287_s21   ;;  %s355_s25 = sadd.s32 1, %s6283_s20 }
   0x8   : > { %7972 = sst [smem:[#allocation7_spill]] %s6396_s24  ;;  %s352_s26 = ssub.s32 %s6287_s21, %s6396_s24 }
   0x9   : > { %p365_p0 = scmp.ne.s32.totalorder %s6283_s20, %s6279_s19  ;;  %p353_p1 = scmp.eq.s32.totalorder %s352_s26, 0 }
   0xa   : > { %p366_p2 = scmp.eq.s32.totalorder %s6392_s22, 1  ;;  %p371_p3 = scmp.ne.s32.totalorder %s6279_s19, %s6275_s18 }
   0xb   : > { %p372_p4 = scmp.eq.s32.totalorder %s5580_s23, 1  ;;  %p5583_p7 = scmp.ge.s32.totalorder %s6287_s21, 1 }
   0xc   : > { %s6407_s27 = scalar_select %p353_p1, %s6283_s20, %s355_s25  }
   0xd   : > { %p6409_p5 = por %p366_p2, %p365_p0  ;;  %p6413_p6 = por %p372_p4, %p371_p3 }
   0xe   : > { %7973 = sst [smem:[#allocation8_spill]] %s6407_s27  ;;  %p440_p8 = scmp.lt.s32.totalorder %s6287_s21, 3 }
   0xf   : > { %s7975_s29 = scalar_select %p6413_p6, 1, 0 }
  0x10   : > { %p441_p9 = pnand %p5583_p7, %p440_p8 }
  0x11   : > { %7976 = sst [smem:[#allocation9_spill]] %s7975_s29  ;;  %p487_p10 = scmp.lt.s32.totalorder (!%p441_p9), %s6392_s22, 1 }
  0x12   : > { %444 = sbr.rel (%p441_p9) target bundleno = 2117 (0x845), region = 80  ;;  %s7977_s0 = sld [smem:[#allocation10_spill]] (!%p441_p9) }
  0x13   : > { %s485_s30 = sand.u32 (!%p441_p9), 1, %s6279_s19   ;;  %s5849_s24 = sshll.u32 (!%p441_p9), %s6392_s22, 4 }
  0x14   : > { %s5513_s23 = scalar_lea.sflag (!%p441_p9), [#allocation3], %s485_s30  ;;  %s6290_s26 = smov (!%p441_p9), [#allocation2]  }
  0x15   : > { %s6231_s20 = sshll.u32 (!%p441_p9), %s6290_s26, 4  ;;  %s6232_s20 = int_to_ptr.vmem [resolvable:$false] %s6231_s20 }
  0x17   : > { %v5915_v0 = vld [vmem:[%s7949_s1 + $0x34] ss:$8 sps:$4 sm:$0xff]   ;;  %v5917_v1 = vld [vmem:[%s7949_s1 + $0x30] ss:$8 sps:$4 sm:$0xff]   ;;  %v6289_v2 = vmov 0   ;;  %s488_s27 = scalar_select %p487_p10, %s6392_s22, 1 }
  0x18   : > { %986 = vmatprep.mubr.bf16.mxu0 %v6289_v2  ;;  %962 = vmatprep.subr.bf16.mxu0 %v5915_v0  ;;  %v5918_v3 = vld [vmem:[%s7949_s1 + $0x24] ss:$8 sps:$4 sm:$0xff]   ;;  %v5920_v4 = vld [vmem:[%s7949_s1 + $0x20] ss:$8 sps:$4 sm:$0xff]   ;;  %v5921_v5 = vld [vmem:[%s7949_s1 + $0x14] ss:$8 sps:$4 sm:$0xff]  }
  0x19   : > { %963 = vmatpush1.bf16.msra.mxu0 %v5917_v1  ;;  %s5874_s17 = smul.u32 320, %s488_s27  ;;  %v5923_v6 = vld [vmem:[%s7949_s1 + $0x10] ss:$8 sps:$4 sm:$0xff]   ;;  %v5924_v7 = vld [vmem:[%s7949_s1 + $0x4] ss:$8 sps:$4 sm:$0xff]   ;;  %vm833_vm0 = vcmask 523264  }
  0x1a   : > { %964 = vmatprep.subr.bf16.mxu0 %v5918_v3  ;;  %v5926_v8 = vld [vmem:[%s7949_s1] ss:$8 sps:$4 sm:$0xff]   ;;  %v5941_v9 = vld [vmem:[%s7953_s5 + $0x74] ss:$8 sps:$4 sm:$0xff]   ;;  %v5939_v11 = vld [vmem:[%s7953_s5 + $0x70] ss:$8 sps:$4 sm:$0xff]  }
  0x1b   : > { %s6440_s18 = scalar_lea.vmem %s7977_s0, %s5874_s17  ;;  %v5944_v12 = vld [vmem:[%s7953_s5 + $0x60] ss:$8 sps:$4 sm:$0xff]   ;;  %v5946_v13 = vld [vmem:[%s7953_s5 + $0x64] ss:$8 sps:$4 sm:$0xff]   ;;  %v5950_v15 = vld [vmem:[%s7953_s5 + $0x50] ss:$8 sps:$4 sm:$0xff]   ;;  %s5523_s17 = scalar_lea.hbm %s7963_s15, %s5849_s24 }
  0x1c   : > { %v5927_v10 = vld [vmem:[%s6440_s18] sm:$0xff]   ;;  %v5928_v14 = vld [vmem:[%s6440_s18 + $0x8] sm:$0xff]   ;;  %v5952_v16 = vld [vmem:[%s7953_s5 + $0x54] ss:$8 sps:$4 sm:$0xff]   ;;  %vm5498_vm2 = vcmask 73728   ;;  %s486_s27 = scalar_lea.vmem [#allocation2], %s485_s30 }
  0x1d   : > { %965 = vmatpush1.bf16.msra.mxu0 %v5920_v4  ;;  %v5954_v17 = vld [vmem:[%s7951_s3 + $0x74] ss:$8 sps:$4 sm:$0xff]   ;;  %v5956_v18 = vld [vmem:[%s7951_s3 + $0x70] ss:$8 sps:$4 sm:$0xff]   ;;  %v5958_v20 = vld [vmem:[%s7951_s3 + $0x64] ss:$8 sps:$4 sm:$0xff]  }
  0x1e   : > { %966 = vmatprep.subr.bf16.mxu0 %v5921_v5  ;;  %v5929_v19 = vld [vmem:[%s6440_s18 + $0x10] sm:$0xff]   ;;  %1831 = vmatprep.subr.bf16.mxu1 %v5954_v17  ;;  %v5960_v21 = vld [vmem:[%s7951_s3 + $0x60] ss:$8 sps:$4 sm:$0xff]   ;;  %v5966_v24 = vld [vmem:[%s7953_s5 + $0x44] ss:$8 sps:$4 sm:$0xff]   ;;  %s6233_s22 = scalar_lea.vmem %s6232_s20, 32 }
  0x1f   : > { %1832 = vmatpush1.bf16.msra.mxu1 %v5956_v18  ;;  %v5961_v22 = vld [vmem:[%s7951_s3 + $0x54] ss:$8 sps:$4 sm:$0xff]   ;;  %v5964_v23 = vld [vmem:[%s7953_s5 + $0x40] ss:$8 sps:$4 sm:$0xff]   ;;  %v5963_v26 = vld [vmem:[%s7951_s3 + $0x50] ss:$8 sps:$4 sm:$0xff]  }
  0x20   : > { %v5930_v25 = vld [vmem:[%s6440_s18 + $0x18] sm:$0xff]   ;;  %1833 = vmatprep.subr.bf16.mxu1 %v5958_v20  ;;  %v5968_v27 = vld [vmem:[%s7951_s3 + $0x44] ss:$8 sps:$4 sm:$0xff]   ;;  %v5970_v28 = vld [vmem:[%s7951_s3 + $0x40] ss:$8 sps:$4 sm:$0xff]  }
  0x21   : > { %967 = vmatpush1.bf16.msra.mxu0 %v5923_v6  ;;  %v5971_v29 = vld [vmem:[%s7951_s3 + $0x34] ss:$8 sps:$4 sm:$0xff]   ;;  %v5973_v30 = vld [vmem:[%s7951_s3 + $0x30] ss:$8 sps:$4 sm:$0xff]   ;;  %v5931_v31 = vld [vmem:[%s6440_s18 + $0x20] sm:$0xff]  }
  0x22   : > { %968 = vmatprep.subr.bf16.mxu0 %v5924_v7  ;;  %v5975_v32 = vld [vmem:[%s7951_s3 + $0x24] ss:$8 sps:$4 sm:$0xff]   ;;  %v5977_v33 = vld [vmem:[%s7951_s3 + $0x20] ss:$8 sps:$4 sm:$0xff]   ;;  %v5978_v34 = vld [vmem:[%s7951_s3 + $0x14] ss:$8 sps:$4 sm:$0xff]  }
  0x23   : > { %1834 = vmatpush1.bf16.msra.mxu1 %v5960_v21  ;;  %v5980_v35 = vld [vmem:[%s7951_s3 + $0x10] ss:$8 sps:$4 sm:$0xff]   ;;  %v5932_v36 = vld [vmem:[%s6440_s18 + $0x28] sm:$0xff]   ;;  %v5987_v40 = vld [vmem:[%s7953_s5 + $0x34] ss:$8 sps:$4 sm:$0xff]  }
  0x24   : > { %1835 = vmatprep.subr.bf16.mxu1 %v5961_v22  ;;  %v5982_v37 = vld [vmem:[%s7951_s3 + $0x4] ss:$8 sps:$4 sm:$0xff]   ;;  %v5984_v38 = vld [vmem:[%s7951_s3] ss:$8 sps:$4 sm:$0xff]   ;;  %v5985_v39 = vld [vmem:[%s7953_s5 + $0x30] ss:$8 sps:$4 sm:$0xff]  }
  0x25   : > { %969 = vmatpush1.bf16.msra.mxu0 %v5926_v8  ;;  %v5988_v41 = vld [vmem:[%s7951_s3 + $0xf4] ss:$8 sps:$4 sm:$0xff]   ;;  %v5990_v43 = vld [vmem:[%s7951_s3 + $0xf0] ss:$8 sps:$4 sm:$0xff]   ;;  %v5992_v44 = vld [vmem:[%s7951_s3 + $0xe4] ss:$8 sps:$4 sm:$0xff]  }
  0x26   : > { %2708 = vmatprep.subr.bf16.mxu0 %v5941_v9  ;;  %v5933_v42 = vld [vmem:[%s6440_s18 + $0x30] sm:$0xff]   ;;  %v5994_v45 = vld [vmem:[%s7951_s3 + $0xe0] ss:$8 sps:$4 sm:$0xff]   ;;  %v5934_v48 = vld [vmem:[%s6440_s18 + $0x38] sm:$0xff]  }
  0x27   : > { %1836 = vmatpush1.bf16.msra.mxu1 %v5963_v26  ;;  %v5995_v46 = vld [vmem:[%s7951_s3 + $0xd4] ss:$8 sps:$4 sm:$0xff]   ;;  %v5997_v47 = vld [vmem:[%s7951_s3 + $0xd0] ss:$8 sps:$4 sm:$0xff]   ;;  %v5999_v49 = vld [vmem:[%s7951_s3 + $0xc4] ss:$8 sps:$4 sm:$0xff]  }
  0x28   : > { %5633 = vmatmul.mubr.msk.bf16.vlgmr.msra.gmra.mxu0 %vm833_vm0, %v5927_v10  ;;  %1837 = vmatprep.subr.bf16.mxu1 %v5968_v27  ;;  %v6001_v50 = vld [vmem:[%s7951_s3 + $0xc0] ss:$8 sps:$4 sm:$0xff]   ;;  %v6002_v51 = vld [vmem:[%s7951_s3 + $0xb4] ss:$8 sps:$4 sm:$0xff]   ;;  %v6007_v53 = vld [vmem:[%s7953_s5 + $0x24] ss:$8 sps:$4 sm:$0xff]  }
  0x29   : > { %996 = vmatprep.mubr.bf16.mxu0 %v6289_v2  ;;  %2709 = vmatpush1.bf16.msra.mxu0 %v5939_v11  ;;  %v6005_v52 = vld [vmem:[%s7953_s5 + $0x20] ss:$8 sps:$4 sm:$0xff]   ;;  %v6004_v55 = vld [vmem:[%s7951_s3 + $0xb0] ss:$8 sps:$4 sm:$0xff]   ;;  %v6009_v56 = vld [vmem:[%s7951_s3 + $0xa4] ss:$8 sps:$4 sm:$0xff]  }
  0x2a   : > { %2710 = vmatprep.subr.bf16.mxu0 %v5946_v13  ;;  %v5935_v54 = vld [vmem:[%s6440_s18 + $0x40] sm:$0xff]   ;;  %v5936_v58 = vld [vmem:[%s6440_s18 + $0x48] sm:$0xff]   ;;  %v6012_v59 = vld [vmem:[%s7951_s3 + $0x94] ss:$8 sps:$4 sm:$0xff]  }
  0x2b   : > { %1838 = vmatpush1.bf16.msra.mxu1 %v5970_v28  ;;  %v6011_v57 = vld [vmem:[%s7951_s3 + $0xa0] ss:$8 sps:$4 sm:$0xff]   ;;  %v6014_v60 = vld [vmem:[%s7951_s3 + $0x90] ss:$8 sps:$4 sm:$0xff]   ;;  %v6016_v61 = vld [vmem:[%s7951_s3 + $0x84] ss:$8 sps:$4 sm:$0xff]  }
  0x2c   : > { %1839 = vmatprep.subr.bf16.mxu1 %v5971_v29  ;;  %v6018_v62 = vld [vmem:[%s7951_s3 + $0x80] ss:$8 sps:$4 sm:$0xff]   ;;  %v5937_v63 = vld [vmem:[%s6440_s18 + $0x50] sm:$0xff]   ;;  %v5938_v0 = vld [vmem:[%s6440_s18 + $0x58] sm:$0xff]  }
  0x2d   : > { %2711 = vmatpush1.bf16.msra.mxu0 %v5944_v12  ;;  %v6020_v1 = vld [vmem:[%s7953_s5 + $0x10] ss:$8 sps:$4 sm:$0xff]   ;;  %v6022_v3 = vld [vmem:[%s7953_s5 + $0x14] ss:$8 sps:$4 sm:$0xff]   ;;  %v5942_v4 = vld [vmem:[%s6440_s18 + $0x60] sm:$0xff]  }
  0x2e   : > { %2712 = vmatprep.subr.bf16.mxu0 %v5952_v16  ;;  %v5943_v5 = vld [vmem:[%s6440_s18 + $0x68] sm:$0xff]   ;;  %v5947_v8 = vld [vmem:[%s6440_s18 + $0x70] sm:$0xff]   ;;  %v5948_v9 = vld [vmem:[%s6440_s18 + $0x78] sm:$0xff]  }
  0x2f   : > { %1840 = vmatpush1.bf16.msra.mxu1 %v5973_v30  ;;  %v6025_v6 = vld [vmem:[%s7953_s5] ss:$8 sps:$4 sm:$0xff]   ;;  %v6027_v7 = vld [vmem:[%s7953_s5 + $0x4] ss:$8 sps:$4 sm:$0xff]   ;;  %v6031_v11 = vld [vmem:[%s7953_s5 + $0xf0] ss:$8 sps:$4 sm:$0xff]  }
  0x30   : > { %5634 = vmatmul.mubr.msk.bf16.gmra.mxu0 %vm833_vm0, %v5928_v14  ;;  %1841 = vmatprep.subr.bf16.mxu1 %v5975_v32  ;;  %v5949_v10 = vld [vmem:[%s6440_s18 + $0x80] sm:$0xff]   ;;  %v6033_v12 = vld [vmem:[%s7953_s5 + $0xf4] ss:$8 sps:$4 sm:$0xff]   ;;  %v5953_v13 = vld [vmem:[%s6440_s18 + $0x88] sm:$0xff]  }
  0x31   : > { %1006 = vmatprep.mubr.bf16.mxu0 %v6289_v2  ;;  %2713 = vmatpush1.bf16.msra.mxu0 %v5950_v15  ;;  %v5957_v14 = vld [vmem:[%s6440_s18 + $0x90] sm:$0xff]   ;;  %v6036_v15 = vld [vmem:[%s7953_s5 + $0xe0] ss:$8 sps:$4 sm:$0xff]   ;;  %v6038_v16 = vld [vmem:[%s7953_s5 + $0xe4] ss:$8 sps:$4 sm:$0xff]  }
  0x32   : > { %2714 = vmatprep.subr.bf16.mxu0 %v5966_v24  ;;  %v5967_v17 = vld [vmem:[%s6440_s18 + $0x98] sm:$0xff]   ;;  %v5974_v18 = vld [vmem:[%s6440_s18 + $0xa0] sm:$0xff]  }
  0x33   : > { %1842 = vmatpush1.bf16.msra.mxu1 %v5977_v33  ;;  %v6042_v20 = vld [vmem:[%s7953_s5 + $0xd0] ss:$8 sps:$4 sm:$0xff]   ;;  %v6044_v21 = vld [vmem:[%s7953_s5 + $0xd4] ss:$8 sps:$4 sm:$0xff]   ;;  %v6050_v26 = vld [vmem:[%s7953_s5 + $0xc0] ss:$8 sps:$4 sm:$0xff]  }
  0x34   : > { %1843 = vmatprep.subr.bf16.mxu1 %v5978_v34  ;;  %v6048_v22 = vld [vmem:[%s7955_s7 + $0x74] ss:$8 sps:$4 sm:$0xff]   ;;  %v6052_v27 = vld [vmem:[%s7953_s5 + $0xc4] ss:$8 sps:$4 sm:$0xff]   ;;  %v581_v32 = vld [vmem:[%s7950_s2] sm:$0x3] }
  0x35   : > { %2715 = vmatpush1.bf16.msra.mxu0 %v5964_v23  ;;  %v5991_v23 = vld [vmem:[%s6440_s18 + $0xb0] sm:$0xff]   ;;  %v5998_v24 = vld [vmem:[%s6440_s18 + $0xb8] sm:$0xff]   ;;  %v6008_v29 = vld [vmem:[%s6440_s18 + $0xc0] sm:$0xff]  }
  0x36   : > { %2716 = vmatprep.subr.bf16.mxu0 %v5987_v40 }
  0x37   : > { %1844 = vmatpush1.bf16.msra.mxu1 %v5980_v35 }
  0x38   : > { %5635 = vmatmul.mubr.msk.bf16.gmra.mxu0 %vm833_vm0, %v5929_v19  ;;  %1845 = vmatprep.subr.bf16.mxu1 %v5982_v37  ;;  %v5981_v19 = vld [vmem:[%s6440_s18 + $0xa8] sm:$0xff]  }
  0x39   : > { %1016 = vmatprep.mubr.bf16.mxu0 %v6289_v2  ;;  %2717 = vmatpush1.bf16.msra.mxu0 %v5985_v39 }
  0x3a   : > { %2718 = vmatprep.subr.bf16.mxu0 %v6007_v53 }
  0x3b   : > { %1846 = vmatpush1.bf16.msra.mxu1 %v5984_v38  ;;  %v6015_v38 = vld [vmem:[%s6440_s18 + $0xc8] sm:$0xff]  }
  0x3c   : > { %1847 = vmatprep.subr.bf16.mxu1 %v5988_v41 }
  0x3d   : > { %2719 = vmatpush1.bf16.msra.mxu0 %v6005_v52 }
  0x3e   : > { %2720 = vmatprep.subr.bf16.mxu0 %v6022_v3 }
  0x3f   : > { %1848 = vmatpush2.bf16.msra.mxu1 %v5990_v43 }
  0x40   : > { %5636 = vmatmul.mubr.msk.bf16.gmra.mxu0 %vm833_vm0, %v5930_v25  ;;  %1849 = vmatprep.subr.bf16.mxu1 %v5992_v44  ;;  %v583_v25 = vlaneseq }
  0x41   : > { %1026 = vmatprep.mubr.bf16.mxu0 %v6289_v2  ;;  %2721 = vmatpush1.bf16.msra.mxu0 %v6020_v1 }
  0x42   : > { %2722 = vmatprep.subr.bf16.mxu0 %v6027_v7  ;;  %v6694_v28 = vshrl.u32 %v583_v25, 7 }
  0x43   : > { %1850 = vmatpush2.bf16.msra.mxu1 %v5994_v45 }
  0x44   : > { %1851 = vmatprep.subr.bf16.mxu1 %v5995_v46  ;;  %v6698_v30 = vsub.s32 1, %v6694_v28 }
  0x45   : > { %2723 = vmatpush1.bf16.msra.mxu0 %v6025_v6 }
  0x46   : > { %2724 = vmatprep.subr.bf16.mxu0 %v6033_v12  ;;  %v6708_v34 = vrot.slane %v581_v32, %v6698_v30  ;;  %v6023_v12 = vld [vmem:[%s6440_s18 + $0xd8] sm:$0xff]  }
  0x47   : > { %1852 = vmatpush2.bf16.msra.mxu1 %v5997_v47 }
  0x48   : > { %5637 = vmatmul.mubr.msk.bf16.gmra.mxu0 %vm833_vm0, %v5931_v31  ;;  %1853 = vmatprep.subr.bf16.mxu1 %v5999_v49  ;;  %v6701_v31 = vsub.s32 0, %v6694_v28 }
  0x49   : > { %1036 = vmatprep.mubr.bf16.mxu0 %v6289_v2  ;;  %2725 = vmatpush2.bf16.msra.mxu0 %v6031_v11 }
  0x4a   : > { %2726 = vmatprep.subr.bf16.mxu0 %v6038_v16  ;;  %v6712_v35 = vrot.slane %v581_v32, %v6701_v31 }
  0x4b   : > { %1854 = vmatpush2.bf16.msra.mxu1 %v6001_v50 }
  0x4c   : > { %1855 = vmatprep.subr.bf16.mxu1 %v6002_v51  ;;  %v6046_v51 = vld [vmem:[%s7955_s7 + $0x70] ss:$8 sps:$4 sm:$0xff]  }
  0x4d   : > { %2727 = vmatpush2.bf16.msra.mxu0 %v6036_v15 }
  0x4e   : > { %2728 = vmatprep.subr.bf16.mxu0 %v6044_v21 }
  0x4f   : > { %1856 = vmatpush2.bf16.msra.mxu1 %v6004_v55  ;;  %v6056_v55 = vld [vmem:[%s7955_s7 + $0x64] ss:$8 sps:$4 sm:$0xff]  }
  0x50   : > { %5638 = vmatmul.mubr.msk.bf16.gmra.mxu0 %vm833_vm0, %v5932_v36  ;;  %1857 = vmatprep.subr.bf16.mxu1 %v6009_v56 }
  0x51   : > { %1046 = vmatprep.mubr.bf16.mxu0 %v6289_v2  ;;  %2729 = vmatpush2.bf16.msra.mxu0 %v6042_v20 }
  0x52   : > { %2730 = vmatprep.subr.bf16.mxu0 %v6052_v27  ;;  %v6024_v27 = vld [vmem:[%s6440_s18 + $0xe0] sm:$0xff]  }
  0x53   : > { %1858 = vmatpush2.bf16.msra.mxu1 %v6011_v57 }
  0x54   : > { %1859 = vmatprep.subr.bf16.mxu1 %v6012_v59  ;;  %v6059_v59 = vld [vmem:[%s7953_s5 + $0xb4] ss:$8 sps:$4 sm:$0xff]  }
  0x55   : > { %2731 = vmatpush2.bf16.msra.mxu0 %v6050_v26 }
  0x56   : > { %2732 = vmatprep.subr.bf16.mxu0 %v6059_v59  ;;  %v6066_v59 = vld [vmem:[%s7955_s7 + $0x40] ss:$8 sps:$4 sm:$0xff]  }
  0x57   : > { %1860 = vmatpush2.bf16.msra.mxu1 %v6014_v60 }
  0x58   : > { %5639 = vmatmul.mubr.msk.bf16.gmra.mxu0 %vm833_vm0, %v5933_v42  ;;  %1861 = vmatprep.subr.bf16.mxu1 %v6016_v61 }
  0x59   : > { %1056 = vmatprep.mubr.bf16.mxu0 %v6289_v2 }
  0x5b   : > { %1862 = vmatpush2.bf16.msra.mxu1 %v6018_v62 }
  0x5c   : > { %3585 = vmatprep.subr.bf16.mxu1 %v6048_v22 }
  0x60   : > { %5640 = vmatmul.mubr.msk.bf16.gmra.mxu0 %vm833_vm0, %v5934_v48 }
  0x61   : > { %1066 = vmatprep.mubr.bf16.mxu0 %v6289_v2 }
  0x68   : > { %5641 = vmatmul.mubr.msk.bf16.gmra.mxu0 %vm833_vm0, %v5935_v54  ;;  %v6019_v54 = vld [vmem:[%s6440_s18 + $0xd0] sm:$0xff]  }
  0x69   : > { %1076 = vmatprep.mubr.bf16.mxu0 %v6289_v2 }
  0x70   : > { %5642 = vmatmul.mubr.msk.bf16.gmra.mxu0 %vm833_vm0, %v5936_v58  ;;  %v6057_v58 = vld [vmem:[%s7953_s5 + $0xb0] ss:$8 sps:$4 sm:$0xff]  }
  0x71   : > { %1086 = vmatprep.mubr.bf16.mxu0 %v6289_v2  ;;  %2733 = vmatpush2.bf16.msra.mxu0 %v6057_v58 }
  0x78   : > { %5643 = vmatmul.mubr.msk.bf16.gmra.mxu0 %vm833_vm0, %v5937_v63  ;;  %v6054_v63 = vld [vmem:[%s7955_s7 + $0x60] ss:$8 sps:$4 sm:$0xff]  }
  0x79   : > { %1096 = vmatprep.mubr.bf16.mxu0 %v6289_v2 }
  0x80   : > { %5644 = vmatmul.mubr.msk.bf16.gmra.mxu0 %vm833_vm0, %v5938_v0 }
  0x81   : > { %1106 = vmatprep.mubr.bf16.mxu0 %v6289_v2 }
  0x88   : > { %5645 = vmatmul.mubr.msk.bf16.gmra.mxu0 %vm833_vm0, %v5942_v4 }
  0x89   : > { %1116 = vmatprep.mubr.bf16.mxu0 %v6289_v2 }
  0x90   : > { %5646 = vmatmul.mubr.msk.bf16.gmra.mxu0 %vm833_vm0, %v5943_v5 }
  0x91   : > { %1126 = vmatprep.mubr.bf16.mxu0 %v6289_v2 }
  0x98   : > { %5647 = vmatmul.mubr.msk.bf16.gmra.mxu0 %vm833_vm0, %v5947_v8  ;;  %v6060_v8 = vld [vmem:[%s7955_s7 + $0x50] ss:$8 sps:$4 sm:$0xff]  }
  0x99   : > { %1136 = vmatprep.mubr.bf16.mxu0 %v6289_v2 }
  0xa0   : > { %5648 = vmatmul.mubr.msk.bf16.gmra.mxu0 %vm833_vm0, %v5948_v9  ;;  %v6062_v9 = vld [vmem:[%s7955_s7 + $0x54] ss:$8 sps:$4 sm:$0xff]  }
  0xa1   : > { %1146 = vmatprep.mubr.bf16.mxu0 %v6289_v2 }
  0xa8   : > { %5649 = vmatmul.mubr.msk.bf16.gmra.mxu0 %vm833_vm0, %v5949_v10 }
  0xa9   : > { %1156 = vmatprep.mubr.bf16.mxu0 %v6289_v2 }
  0xb0   : > { %5650 = vmatmul.mubr.msk.bf16.gmra.mxu0 %vm833_vm0, %v5953_v13 }
  0xb1   : > { %1166 = vmatprep.mubr.bf16.mxu0 %v6289_v2 }
  0xb8   : > { %5651 = vmatmul.mubr.msk.bf16.gmra.mxu0 %vm833_vm0, %v5957_v14 }
  0xb9   : > { %1176 = vmatprep.mubr.bf16.mxu0 %v6289_v2 }
  0xc0   : > { %5652 = vmatmul.mubr.msk.bf16.gmra.mxu0 %vm833_vm0, %v5967_v17 }
  0xc1   : > { %1186 = vmatprep.mubr.bf16.mxu0 %v6289_v2 }
  0xc8   : > { %5653 = vmatmul.mubr.msk.bf16.gmra.mxu0 %vm833_vm0, %v5974_v18 }
  0xc9   : > { %1196 = vmatprep.mubr.bf16.mxu0 %v6289_v2 }
  0xd0   : > { %5654 = vmatmul.mubr.msk.bf16.gmra.mxu0 %vm833_vm0, %v5981_v19 }
  0xd1   : > { %1206 = vmatprep.mubr.bf16.mxu0 %v6289_v2 }
  0xd8   : > { %5655 = vmatmul.mubr.msk.bf16.gmra.mxu0 %vm833_vm0, %v5991_v23 }
  0xd9   : > { %1216 = vmatprep.mubr.bf16.mxu0 %v6289_v2 }
  0xe0   : > { %5656 = vmatmul.mubr.msk.bf16.gmra.mxu0 %vm833_vm0, %v5998_v24 }
  0xe1   : > { %1226 = vmatprep.mubr.bf16.mxu0 %v6289_v2 }
  0xe8   : > { %v988_v33 = vpop.f32.mrf.mxu0  ;;  %5657 = vmatmul.mubr.msk.bf16.gmra.mxu0 %vm833_vm0, %v6008_v29 }
  0xe9   : > { %1236 = vmatprep.mubr.bf16.mxu0 %v6289_v2  ;;  %v989_v41 = vadd.f32 %v988_v33, %v6712_v35 }
  0xea   : > { %v990_v36 = vpop.f32.mrf.mxu0 }
  0xeb   : > { %v991_v39 = vadd.f32 %v990_v36, %v6708_v34  ;;  %v1387_v48 = vmax.f32 %v989_v41, 0.0 }
  0xec   : > { %v992_v37 = vpop.f32.mrf.mxu0 }
  0xed   : > { %v993_v40 = vadd.f32 %v992_v37, %v6712_v35  ;;  %v1388_v46 = vmax.f32 %v991_v39, 0.0 }
  0xee   : > { %v994_v42 = vpop.f32.mrf.mxu0 }
  0xef   : > { %v995_v43 = vadd.f32 %v994_v42, %v6708_v34  ;;  %v1389_v44 = vmax.f32 %v993_v40, 0.0  ;;  %v6063_v42 = vld [vmem:[%s7953_s5 + $0xa0] ss:$8 sps:$4 sm:$0xff]  }
  0xf0   : > { %v998_v45 = vpop.f32.mrf.mxu0  ;;  %5658 = vmatmul.mubr.msk.bf16.gmra.mxu0 %vm833_vm0, %v6015_v38 }
  0xf1   : > { %v1390_v47 = vmax.f32 %v995_v43, 0.0  ;;  %1246 = vmatprep.mubr.bf16.mxu0 %v6289_v2  ;;  %v1547_v52 = vpack.c.bf16 %v1389_v44, %v1387_v48  ;;  %v999_v60 = vadd.f32 %v998_v45, %v6712_v35  ;;  %v6065_v43 = vld [vmem:[%s7953_s5 + $0xa4] ss:$8 sps:$4 sm:$0xff]  }
  0xf2   : > { %v1000_v49 = vpop.f32.mrf.mxu0  ;;  %2734 = vmatprep.subr.bf16.mxu0 %v6065_v43 }
  0xf3   : > { %v1548_v50 = vpack.c.bf16 %v1390_v47, %v1388_v46  ;;  %v1001_v56 = vadd.f32 %v1000_v49, %v6708_v34  ;;  %v1391_v5 = vmax.f32 %v999_v60, 0.0  ;;  %v6028_v49 = vld [vmem:[%s6440_s18 + $0xe8] sm:$0xff]   ;;  %2735 = vmatpush2.bf16.msra.mxu0 %v6063_v42  ;;  %v6034_v42 = vld [vmem:[%s6440_s18 + $0x100] sm:$0xff]  }
  0xf4   : > { %v1002_v53 = vpop.f32.mrf.mxu0  ;;  %v6068_v60 = vld [vmem:[%s7955_s7 + $0x44] ss:$8 sps:$4 sm:$0xff]  }
  0xf5   : > { %v1003_v57 = vadd.f32 %v1002_v53, %v6712_v35  ;;  %1863 = vmatprep.mubr.bf16.mxu1 %v1548_v50  ;;  %v1392_v3 = vmax.f32 %v1001_v56, 0.0 }
  0xf6   : > { %v1004_v61 = vpop.f32.mrf.mxu0  ;;  %1864 = vmatmul.mubr.bf16.vlgmr.msra.gmra.mxu1 %v1547_v52 }
  0xf7   : > { %v1005_v62 = vadd.f32 %v1004_v61, %v6708_v34  ;;  %3586 = vmatpush1.bf16.msra.mxu1 %v6046_v51  ;;  %v1393_v0 = vmax.f32 %v1003_v57, 0.0 }
  0xf8   : > { %v1008_v1 = vpop.f32.mrf.mxu0  ;;  %5659 = vmatmul.mubr.msk.bf16.gmra.mxu0 %vm833_vm0, %v6019_v54  ;;  %3587 = vmatprep.subr.bf16.mxu1 %v6056_v55 }
  0xf9   : > { %v1394_v4 = vmax.f32 %v1005_v62, 0.0  ;;  %1256 = vmatprep.mubr.bf16.mxu0 %v6289_v2  ;;  %v1549_v10 = vpack.c.bf16 %v1393_v0, %v1391_v5  ;;  %v1009_v15 = vadd.f32 %v1008_v1, %v6712_v35 }
  0xfa   : > { %v1010_v6 = vpop.f32.mrf.mxu0 }
  0xfb   : > { %v1550_v7 = vpack.c.bf16 %v1394_v4, %v1392_v3  ;;  %3588 = vmatpush1.bf16.msra.mxu1 %v6054_v63  ;;  %v1011_v13 = vadd.f32 %v1010_v6, %v6708_v34  ;;  %v1395_v22 = vmax.f32 %v1009_v15, 0.0  ;;  %v6029_v3 = vld [vmem:[%s6440_s18 + $0xf0] sm:$0xff]  }
  0xfc   : > { %v1012_v11 = vpop.f32.mrf.mxu0  ;;  %3589 = vmatprep.subr.bf16.mxu1 %v6062_v9 }
  0xfd   : > { %v1013_v14 = vadd.f32 %v1012_v11, %v6712_v35  ;;  %1873 = vmatprep.mubr.bf16.mxu1 %v1550_v7  ;;  %v1396_v20 = vmax.f32 %v1011_v13, 0.0 }
  0xfe   : > { %v1014_v16 = vpop.f32.mrf.mxu0  ;;  %1874 = vmatmul.mubr.bf16.gmra.mxu1 %v1549_v10 }
  0xff   : > { %v1015_v17 = vadd.f32 %v1014_v16, %v6708_v34  ;;  %3590 = vmatpush1.bf16.msra.mxu1 %v6060_v8  ;;  %v1397_v18 = vmax.f32 %v1013_v14, 0.0 }
 0x100   : > { %v1018_v19 = vpop.f32.mrf.mxu0  ;;  %5660 = vmatmul.mubr.msk.bf16.gmra.mxu0 %vm833_vm0, %v6023_v12  ;;  %3591 = vmatprep.subr.bf16.mxu1 %v6068_v60 }
 0x101   : > { %v1398_v21 = vmax.f32 %v1015_v17, 0.0  ;;  %1266 = vmatprep.mubr.bf16.mxu0 %v6289_v2  ;;  %v1551_v25 = vpack.c.bf16 %v1397_v18, %v1395_v22  ;;  %v1019_v33 = vadd.f32 %v1018_v19, %v6712_v35  ;;  %v6030_v18 = vld [vmem:[%s6440_s18 + $0xf8] sm:$0xff]  }
 0x102   : > { %v1020_v23 = vpop.f32.mrf.mxu0  ;;  %v6071_v22 = vld [vmem:[%s7953_s5 + $0x94] ss:$8 sps:$4 sm:$0xff]  }
 0x103   : > { %v1552_v24 = vpack.c.bf16 %v1398_v21, %v1396_v20  ;;  %v1021_v29 = vadd.f32 %v1020_v23, %v6708_v34  ;;  %v1399_v44 = vmax.f32 %v1019_v33, 0.0  ;;  %3592 = vmatpush1.bf16.msra.mxu1 %v6066_v59  ;;  %v6069_v21 = vld [vmem:[%s7953_s5 + $0x90] ss:$8 sps:$4 sm:$0xff]   ;;  %2736 = vmatprep.subr.bf16.mxu0 %v6071_v22  ;;  %v6080_v22 = vld [vmem:[%s7955_s7 + $0x24] ss:$8 sps:$4 sm:$0xff]  }
 0x104   : > { %v1022_v26 = vpop.f32.mrf.mxu0  ;;  %2737 = vmatpush2.bf16.msra.mxu0 %v6069_v21  ;;  %v6078_v21 = vld [vmem:[%s7955_s7 + $0x20] ss:$8 sps:$4 sm:$0xff]  }
 0x105   : > { %v1023_v32 = vadd.f32 %v1022_v26, %v6712_v35  ;;  %1883 = vmatprep.mubr.bf16.mxu1 %v1552_v24  ;;  %v1400_v40 = vmax.f32 %v1021_v29, 0.0 }
 0x106   : > { %v1024_v36 = vpop.f32.mrf.mxu0  ;;  %1884 = vmatmul.mubr.bf16.gmra.mxu1 %v1551_v25 }
 0x107   : > { %v1025_v37 = vadd.f32 %v1024_v36, %v6708_v34  ;;  %v1401_v38 = vmax.f32 %v1023_v32, 0.0 }
 0x108   : > { %v1028_v39 = vpop.f32.mrf.mxu0  ;;  %5661 = vmatmul.mubr.msk.bf16.gmra.mxu0 %vm833_vm0, %v6024_v27 }
 0x109   : > { %v1402_v41 = vmax.f32 %v1025_v37, 0.0  ;;  %1276 = vmatprep.mubr.bf16.mxu0 %v6289_v2  ;;  %v1553_v47 = vpack.c.bf16 %v1401_v38, %v1399_v44  ;;  %v1029_v52 = vadd.f32 %v1028_v39, %v6712_v35  ;;  %v6072_v38 = vld [vmem:[%s7955_s7 + $0x30] ss:$8 sps:$4 sm:$0xff]   ;;  %v6074_v39 = vld [vmem:[%s7955_s7 + $0x34] ss:$8 sps:$4 sm:$0xff]  }
 0x10a   : > { %v1030_v45 = vpop.f32.mrf.mxu0  ;;  %3593 = vmatprep.subr.bf16.mxu1 %v6074_v39 }
 0x10b   : > { %v1554_v46 = vpack.c.bf16 %v1402_v41, %v1400_v40  ;;  %v1031_v50 = vadd.f32 %v1030_v45, %v6708_v34  ;;  %v1403_v61 = vmax.f32 %v1029_v52, 0.0  ;;  %3594 = vmatpush1.bf16.msra.mxu1 %v6072_v38 }
 0x10c   : > { %v1032_v48 = vpop.f32.mrf.mxu0  ;;  %3595 = vmatprep.subr.bf16.mxu1 %v6080_v22 }
 0x10d   : > { %v1033_v51 = vadd.f32 %v1032_v48, %v6712_v35  ;;  %1893 = vmatprep.mubr.bf16.mxu1 %v1554_v46  ;;  %v1404_v57 = vmax.f32 %v1031_v50, 0.0 }
 0x10e   : > { %v1034_v53 = vpop.f32.mrf.mxu0  ;;  %1894 = vmatmul.mubr.bf16.gmra.mxu1 %v1553_v47 }
 0x10f   : > { %v1035_v54 = vadd.f32 %v1034_v53, %v6708_v34  ;;  %v1405_v55 = vmax.f32 %v1033_v51, 0.0  ;;  %3596 = vmatpush1.bf16.msra.mxu1 %v6078_v21 }
 0x110   : > { %v1038_v56 = vpop.f32.mrf.mxu0  ;;  %5662 = vmatmul.mubr.msk.bf16.gmra.mxu0 %vm833_vm0, %v6028_v49 }
 0x111   : > { %v1406_v58 = vmax.f32 %v1035_v54, 0.0  ;;  %1286 = vmatprep.mubr.bf16.mxu0 %v6289_v2  ;;  %v1555_v0 = vpack.c.bf16 %v1405_v55, %v1403_v61  ;;  %v1039_v6 = vadd.f32 %v1038_v56, %v6712_v35 }
 0x112   : > { %v1040_v62 = vpop.f32.mrf.mxu0 }
 0x113   : > { %v1556_v63 = vpack.c.bf16 %v1406_v58, %v1404_v57  ;;  %v1041_v4 = vadd.f32 %v1040_v62, %v6708_v34  ;;  %v1407_v13 = vmax.f32 %v1039_v6, 0.0  ;;  %v6035_v57 = vld [vmem:[%s6440_s18 + $0x108] sm:$0xff]  }
 0x114   : > { %v1042_v1 = vpop.f32.mrf.mxu0 }
 0x115   : > { %v1043_v5 = vadd.f32 %v1042_v1, %v6712_v35  ;;  %1903 = vmatprep.mubr.bf16.mxu1 %v1556_v63  ;;  %v1408_v11 = vmax.f32 %v1041_v4, 0.0  ;;  %v6075_v4 = vld [vmem:[%s7953_s5 + $0x80] ss:$8 sps:$4 sm:$0xff]  }
 0x116   : > { %v1044_v7 = vpop.f32.mrf.mxu0  ;;  %1904 = vmatmul.mubr.bf16.gmra.mxu1 %v1555_v0 }
 0x117   : > { %v1045_v8 = vadd.f32 %v1044_v7, %v6708_v34  ;;  %v1409_v9 = vmax.f32 %v1043_v5, 0.0  ;;  %v6077_v5 = vld [vmem:[%s7953_s5 + $0x84] ss:$8 sps:$4 sm:$0xff]  }
 0x118   : > { %v1048_v10 = vpop.f32.mrf.mxu0  ;;  %5663 = vmatmul.mubr.msk.bf16.gmra.mxu0 %vm833_vm0, %v6029_v3  ;;  %2738 = vmatprep.subr.bf16.mxu0 %v6077_v5 }
 0x119   : > { %v1410_v12 = vmax.f32 %v1045_v8, 0.0  ;;  %1296 = vmatprep.mubr.bf16.mxu0 %v6289_v2  ;;  %v1557_v16 = vpack.c.bf16 %v1409_v9, %v1407_v13  ;;  %v1049_v23 = vadd.f32 %v1048_v10, %v6712_v35  ;;  %2739 = vmatpush2.bf16.msra.mxu0 %v6075_v4 }
 0x11a   : > { %v1050_v14 = vpop.f32.mrf.mxu0 }
 0x11b   : > { %v1558_v15 = vpack.c.bf16 %v1410_v12, %v1408_v11  ;;  %v1051_v19 = vadd.f32 %v1050_v14, %v6708_v34  ;;  %v1411_v33 = vmax.f32 %v1049_v23, 0.0  ;;  %v6039_v11 = vld [vmem:[%s6440_s18 + $0x110] sm:$0xff]  }
 0x11c   : > { %v1052_v17 = vpop.f32.mrf.mxu0 }
 0x11d   : > { %v1053_v20 = vadd.f32 %v1052_v17, %v6712_v35  ;;  %1913 = vmatprep.mubr.bf16.mxu1 %v1558_v15  ;;  %v1412_v29 = vmax.f32 %v1051_v19, 0.0 }
 0x11e   : > { %v1054_v24 = vpop.f32.mrf.mxu0  ;;  %1914 = vmatmul.mubr.bf16.gmra.mxu1 %v1557_v16 }
 0x11f   : > { %v1055_v25 = vadd.f32 %v1054_v24, %v6708_v34  ;;  %v1413_v26 = vmax.f32 %v1053_v20, 0.0 }
 0x120   : > { %v1058_v27 = vpop.f32.mrf.mxu0  ;;  %5664 = vmatmul.mubr.msk.bf16.gmra.mxu0 %vm833_vm0, %v6030_v18 }
 0x121   : > { %v1414_v32 = vmax.f32 %v1055_v25, 0.0  ;;  %1306 = vmatprep.mubr.bf16.mxu0 %v6289_v2  ;;  %v1559_v40 = vpack.c.bf16 %v1413_v26, %v1411_v33  ;;  %v1059_v45 = vadd.f32 %v1058_v27, %v6712_v35 }
 0x122   : > { %v1060_v36 = vpop.f32.mrf.mxu0 }
 0x123   : > { %v1560_v37 = vpack.c.bf16 %v1414_v32, %v1412_v29  ;;  %v1061_v43 = vadd.f32 %v1060_v36, %v6708_v34  ;;  %v1415_v52 = vmax.f32 %v1059_v45, 0.0  ;;  %v6040_v29 = vld [vmem:[%s6440_s18 + $0x118] sm:$0xff]  }
 0x124   : > { %v1062_v41 = vpop.f32.mrf.mxu0 }
 0x125   : > { %v1063_v44 = vadd.f32 %v1062_v41, %v6712_v35  ;;  %1923 = vmatprep.mubr.bf16.mxu1 %v1560_v37  ;;  %v1416_v50 = vmax.f32 %v1061_v43, 0.0 }
 0x126   : > { %v1064_v46 = vpop.f32.mrf.mxu0  ;;  %1924 = vmatmul.mubr.bf16.gmra.mxu1 %v1559_v40 }
 0x127   : > { %v1065_v47 = vadd.f32 %v1064_v46, %v6708_v34  ;;  %v1417_v48 = vmax.f32 %v1063_v44, 0.0 }
 0x128   : > { %v1068_v49 = vpop.f32.mrf.mxu0  ;;  %5665 = vmatmul.mubr.msk.bf16.gmra.mxu0 %vm833_vm0, %v6034_v42 }
 0x129   : > { %v1418_v51 = vmax.f32 %v1065_v47, 0.0  ;;  %1316 = vmatprep.mubr.bf16.mxu0 %v6289_v2  ;;  %v1561_v55 = vpack.c.bf16 %v1417_v48, %v1415_v52  ;;  %v1069_v60 = vadd.f32 %v1068_v49, %v6712_v35  ;;  %v6041_v48 = vld [vmem:[%s6440_s18 + $0x120] sm:$0xff]  }
 0x12a   : > { %v1070_v53 = vpop.f32.mrf.mxu0 }
 0x12b   : > { %v1562_v54 = vpack.c.bf16 %v1418_v51, %v1416_v50  ;;  %v1071_v58 = vadd.f32 %v1070_v53, %v6708_v34  ;;  %v1419_v6 = vmax.f32 %v1069_v60, 0.0 }
 0x12c   : > { %v1072_v56 = vpop.f32.mrf.mxu0 }
 0x12d   : > { %v1073_v59 = vadd.f32 %v1072_v56, %v6712_v35  ;;  %1933 = vmatprep.mubr.bf16.mxu1 %v1562_v54  ;;  %v1420_v1 = vmax.f32 %v1071_v58, 0.0 }
 0x12e   : > { %v1074_v61 = vpop.f32.mrf.mxu0  ;;  %1934 = vmatmul.mubr.bf16.gmra.mxu1 %v1561_v55 }
 0x12f   : > { %v1075_v62 = vadd.f32 %v1074_v61, %v6708_v34  ;;  %v1421_v63 = vmax.f32 %v1073_v59, 0.0  ;;  %v6081_v61 = vld [vmem:[%s7955_s7 + $0x10] ss:$8 sps:$4 sm:$0xff]  }
 0x130   : > { %v1078_v0 = vpop.f32.mrf.mxu0  ;;  %5666 = vmatmul.mubr.msk.bf16.gmra.mxu0 %vm833_vm0, %v6035_v57 }
 0x131   : > { %v1422_v3 = vmax.f32 %v1075_v62, 0.0  ;;  %1326 = vmatprep.mubr.bf16.mxu0 %v6289_v2  ;;  %v1563_v9 = vpack.c.bf16 %v1421_v63, %v1419_v6  ;;  %v1079_v14 = vadd.f32 %v1078_v0, %v6712_v35  ;;  %v6083_v62 = vld [vmem:[%s7955_s7 + $0x14] ss:$8 sps:$4 sm:$0xff]  }
 0x132   : > { %v1080_v7 = vpop.f32.mrf.mxu0  ;;  %3597 = vmatprep.subr.bf16.mxu1 %v6083_v62 }
 0x133   : > { %v1564_v8 = vpack.c.bf16 %v1422_v3, %v1420_v1  ;;  %v1081_v12 = vadd.f32 %v1080_v7, %v6708_v34  ;;  %v1423_v23 = vmax.f32 %v1079_v14, 0.0  ;;  %v6045_v1 = vld [vmem:[%s6440_s18 + $0x128] sm:$0xff]   ;;  %3598 = vmatpush1.bf16.msra.mxu1 %v6081_v61 }
 0x134   : > { %v1082_v10 = vpop.f32.mrf.mxu0 }
 0x135   : > { %v1083_v13 = vadd.f32 %v1082_v10, %v6712_v35  ;;  %1943 = vmatprep.mubr.bf16.mxu1 %v1564_v8  ;;  %v1424_v19 = vmax.f32 %v1081_v12, 0.0 }
 0x136   : > { %v1084_v15 = vpop.f32.mrf.mxu0  ;;  %1944 = vmatmul.mubr.bf16.gmra.mxu1 %v1563_v9 }
 0x137   : > { %v1085_v16 = vadd.f32 %v1084_v15, %v6708_v34  ;;  %v1425_v17 = vmax.f32 %v1083_v13, 0.0 }
 0x138   : > { %v1088_v18 = vpop.f32.mrf.mxu0  ;;  %5667 = vmatmul.mubr.msk.bf16.gmra.mxu0 %vm833_vm0, %v6039_v11 }
 0x139   : > { %v1426_v20 = vmax.f32 %v1085_v16, 0.0  ;;  %1336 = vmatprep.mubr.bf16.mxu0 %v6289_v2  ;;  %v1565_v26 = vpack.c.bf16 %v1425_v17, %v1423_v23  ;;  %v1089_v36 = vadd.f32 %v1088_v18, %v6712_v35  ;;  %v6049_v17 = vld [vmem:[%s6440_s18 + $0x130] sm:$0xff]  }
 0x13a   : > { %v1090_v24 = vpop.f32.mrf.mxu0 }
 0x13b   : > { %v1566_v25 = vpack.c.bf16 %v1426_v20, %v1424_v19  ;;  %v1091_v32 = vadd.f32 %v1090_v24, %v6708_v34  ;;  %v1427_v43 = vmax.f32 %v1089_v36, 0.0 }
 0x13c   : > { %v1092_v27 = vpop.f32.mrf.mxu0 }
 0x13d   : > { %v1093_v33 = vadd.f32 %v1092_v27, %v6712_v35  ;;  %1953 = vmatprep.mubr.bf16.mxu1 %v1566_v25  ;;  %v1428_v41 = vmax.f32 %v1091_v32, 0.0 }
 0x13e   : > { %v1094_v37 = vpop.f32.mrf.mxu0  ;;  %1954 = vmatmul.mubr.bf16.gmra.mxu1 %v1565_v26 }
 0x13f   : > { %v1095_v38 = vadd.f32 %v1094_v37, %v6708_v34  ;;  %v1429_v39 = vmax.f32 %v1093_v33, 0.0  ;;  %v6053_v37 = vld [vmem:[%s6440_s18 + $0x138] sm:$0xff]   ;;  %s5525_s18 = sshll.u32 %s486_s27, 4  ;;  %s5526_s18 = int_to_ptr.vmem [resolvable:$true] %s5525_s18 }
 0x140   : > { %v1098_v40 = vpop.f32.mrf.mxu0  ;;  %5668 = vmatmul.mubr.msk.bf16.gmra.mxu0 %vm833_vm0, %v6040_v29  ;;  %s6227_s25 = scalar_lea.vmem %s5526_s18, 16  ;;  %p6234_p0 = scmp.lt.s32.totalorder %s5526_s18, %s6232_s20 }
 0x141   : > { %v1430_v42 = vmax.f32 %v1095_v38, 0.0  ;;  %1346 = vmatprep.mubr.bf16.mxu0 %v6289_v2  ;;  %v1567_v46 = vpack.c.bf16 %v1429_v39, %v1427_v43  ;;  %v1099_v51 = vadd.f32 %v1098_v40, %v6712_v35  ;;  %p6228_p11 = scmp.ne.s32.totalorder %s5526_s18, %s6227_s25  ;;  %p6235_p1 = scmp.lt.s32.totalorder %s6233_s22, %s6227_s25 }
 0x142   : > { %v1100_v44 = vpop.f32.mrf.mxu0 }
 0x143   : > { %v1568_v45 = vpack.c.bf16 %v1430_v42, %v1428_v41  ;;  %v1101_v49 = vadd.f32 %v1100_v44, %v6708_v34  ;;  %v1431_v58 = vmax.f32 %v1099_v51, 0.0  ;;  %p6229_p12 = pnand %p6228_p11, %p6409_p5  ;;  %p6236_p2 = por %p6235_p1, %p6234_p0 }
 0x144   : > { %v1102_v47 = vpop.f32.mrf.mxu0 }
 0x145   : > { %v1103_v50 = vadd.f32 %v1102_v47, %v6712_v35  ;;  %1963 = vmatprep.mubr.bf16.mxu1 %v1568_v45  ;;  %v1432_v56 = vmax.f32 %v1101_v49, 0.0  ;;  %v6086_v47 = vld [vmem:[%s7955_s7 + $0x4] ss:$8 sps:$4 sm:$0xff]   ;;  %p6230_p13 = pneg %p6229_p12 }
 0x146   : > { %v1104_v52 = vpop.f32.mrf.mxu0  ;;  %1964 = vmatmul.mubr.bf16.gmra.mxu1 %v1567_v46  ;;  %v6084_v46 = vld [vmem:[%s7955_s7] ss:$8 sps:$4 sm:$0xff]   ;;  %3599 = vmatprep.subr.bf16.mxu1 %v6086_v47 }
 0x147   : > { %v1105_v53 = vadd.f32 %v1104_v52, %v6708_v34  ;;  %v1433_v54 = vmax.f32 %v1103_v50, 0.0  ;;  %3600 = vmatpush1.bf16.msra.mxu1 %v6084_v46  ;;  %p6237_p3 = pnand %p6236_p2, %p6230_p13 }
 0x148   : > { %v1108_v55 = vpop.f32.mrf.mxu0  ;;  %5669 = vmatmul.mubr.msk.bf16.gmra.mxu0 %vm833_vm0, %v6041_v48 }
 0x149   : > { %v1434_v57 = vmax.f32 %v1105_v53, 0.0  ;;  %1356 = vmatprep.mubr.bf16.mxu0 %v6289_v2  ;;  %v1569_v63 = vpack.c.bf16 %v1433_v54, %v1431_v58  ;;  %v1109_v5 = vadd.f32 %v1108_v55, %v6712_v35 }
 0x14a   : > { %v1110_v59 = vpop.f32.mrf.mxu0 }
 0x14b   : > { %v1570_v60 = vpack.c.bf16 %v1434_v57, %v1432_v56  ;;  %v1111_v3 = vadd.f32 %v1110_v59, %v6708_v34  ;;  %v1435_v12 = vmax.f32 %v1109_v5, 0.0 }
 0x14c   : > { %v1112_v0 = vpop.f32.mrf.mxu0 }
 0x14d   : > { %v1113_v4 = vadd.f32 %v1112_v0, %v6712_v35  ;;  %1973 = vmatprep.mubr.bf16.mxu1 %v1570_v60  ;;  %v1436_v10 = vmax.f32 %v1111_v3, 0.0 }
 0x14e   : > { %v1114_v6 = vpop.f32.mrf.mxu0  ;;  %1974 = vmatmul.mubr.bf16.gmra.mxu1 %v1569_v63 }
 0x14f   : > { %v1115_v7 = vadd.f32 %v1114_v6, %v6708_v34  ;;  %v1437_v8 = vmax.f32 %v1113_v4, 0.0 }
 0x150   : > { %v1118_v9 = vpop.f32.mrf.mxu0  ;;  %5670 = vmatmul.mubr.msk.bf16.gmra.mxu0 %vm833_vm0, %v6045_v1 }
 0x151   : > { %v1438_v11 = vmax.f32 %v1115_v7, 0.0  ;;  %1366 = vmatprep.mubr.bf16.mxu0 %v6289_v2  ;;  %v1571_v15 = vpack.c.bf16 %v1437_v8, %v1435_v12  ;;  %v1119_v20 = vadd.f32 %v1118_v9, %v6712_v35 }
 0x152   : > { %v1120_v13 = vpop.f32.mrf.mxu0 }
 0x153   : > { %v1572_v14 = vpack.c.bf16 %v1438_v11, %v1436_v10  ;;  %v1121_v18 = vadd.f32 %v1120_v13, %v6708_v34  ;;  %v1439_v27 = vmax.f32 %v1119_v20, 0.0 }
 0x154   : > { %v1122_v16 = vpop.f32.mrf.mxu0 }
 0x155   : > { %v1123_v19 = vadd.f32 %v1122_v16, %v6712_v35  ;;  %1983 = vmatprep.mubr.bf16.mxu1 %v1572_v14  ;;  %v1440_v25 = vmax.f32 %v1121_v18, 0.0  ;;  %v6087_v16 = vld [vmem:[%s7955_s7 + $0xf0] ss:$8 sps:$4 sm:$0xff]  }
 0x156   : > { %v1124_v21 = vpop.f32.mrf.mxu0  ;;  %1984 = vmatmul.mubr.bf16.gmra.mxu1 %v1571_v15 }
 0x157   : > { %v1125_v22 = vadd.f32 %v1124_v21, %v6708_v34  ;;  %v1441_v23 = vmax.f32 %v1123_v19, 0.0 }
 0x158   : > { %v1128_v24 = vpop.f32.mrf.mxu0  ;;  %5671 = vmatmul.mubr.msk.bf16.gmra.mxu0 %vm833_vm0, %v6049_v17  ;;  %v6089_v17 = vld [vmem:[%s7955_s7 + $0xf4] ss:$8 sps:$4 sm:$0xff]  }
 0x159   : > { %v1442_v26 = vmax.f32 %v1125_v22, 0.0  ;;  %1376 = vmatprep.mubr.bf16.mxu0 %v6289_v2  ;;  %v1573_v33 = vpack.c.bf16 %v1441_v23, %v1439_v27  ;;  %v1129_v40 = vadd.f32 %v1128_v24, %v6712_v35  ;;  %3601 = vmatprep.subr.bf16.mxu1 %v6089_v17 }
 0x15a   : > { %v1130_v29 = vpop.f32.mrf.mxu0  ;;  %3602 = vmatpush2.bf16.msra.mxu1 %v6087_v16 }
 0x15b   : > { %v1574_v32 = vpack.c.bf16 %v1442_v26, %v1440_v25  ;;  %v1131_v38 = vadd.f32 %v1130_v29, %v6708_v34  ;;  %v1443_v48 = vmax.f32 %v1129_v40, 0.0 }
 0x15c   : > { %v1132_v36 = vpop.f32.mrf.mxu0 }
 0x15d   : > { %v1133_v39 = vadd.f32 %v1132_v36, %v6712_v35  ;;  %1993 = vmatprep.mubr.bf16.mxu1 %v1574_v32  ;;  %v1444_v2 = vmax.f32 %v1131_v38, 0.0 }
 0x15e   : > { %v1134_v41 = vpop.f32.mrf.mxu0  ;;  %1994 = vmatmul.mubr.bf16.gmra.mxu1 %v1573_v33 }
 0x15f   : > { %v1135_v42 = vadd.f32 %v1134_v41, %v6708_v34  ;;  %v1445_v43 = vmax.f32 %v1133_v39, 0.0 }
 0x160   : > { %v1138_v44 = vpop.f32.mrf.mxu0  ;;  %5672 = vmatmul.mubr.msk.bf16.gmra.mxu0 %vm833_vm0, %v6053_v37 }
 0x161   : > { %v1446_v45 = vmax.f32 %v1135_v42, 0.0  ;;  %v1575_v51 = vpack.c.bf16 %v1445_v43, %v1443_v48  ;;  %v1139_v55 = vadd.f32 %v1138_v44, %v6712_v35 }
 0x162   : > { %v1140_v49 = vpop.f32.mrf.mxu0 }
 0x163   : > { %v1576_v50 = vpack.c.bf16 %v1446_v45, %v1444_v2  ;;  %v1141_v53 = vadd.f32 %v1140_v49, %v6708_v34  ;;  %v1447_v62 = vmax.f32 %v1139_v55, 0.0 }
 0x164   : > { %v1142_v52 = vpop.f32.mrf.mxu0 }
 0x165   : > { %v1143_v54 = vadd.f32 %v1142_v52, %v6712_v35  ;;  %2003 = vmatprep.mubr.bf16.mxu1 %v1576_v50  ;;  %v1448_v60 = vmax.f32 %v1141_v53, 0.0 }
 0x166   : > { %v1144_v56 = vpop.f32.mrf.mxu0  ;;  %2004 = vmatmul.mubr.bf16.gmra.mxu1 %v1575_v51 }
 0x167   : > { %v1145_v57 = vadd.f32 %v1144_v56, %v6708_v34  ;;  %v1449_v58 = vmax.f32 %v1143_v54, 0.0 }
 0x168   : > { %v1148_v59 = vpop.f32.mrf.mxu0 }
 0x169   : > { %v1450_v61 = vmax.f32 %v1145_v57, 0.0  ;;  %v1577_v1 = vpack.c.bf16 %v1449_v58, %v1447_v62  ;;  %v1149_v6 = vadd.f32 %v1148_v59, %v6712_v35  ;;  %v6092_v62 = vld [vmem:[%s7955_s7 + $0xe4] ss:$8 sps:$4 sm:$0xff]  }
 0x16a   : > { %v1150_v63 = vpop.f32.mrf.mxu0  ;;  %3603 = vmatprep.subr.bf16.mxu1 %v6092_v62 }
 0x16b   : > { %v1578_v0 = vpack.c.bf16 %v1450_v61, %v1448_v60  ;;  %v1151_v4 = vadd.f32 %v1150_v63, %v6708_v34  ;;  %v1451_v13 = vmax.f32 %v1149_v6, 0.0  ;;  %v6090_v61 = vld [vmem:[%s7955_s7 + $0xe0] ss:$8 sps:$4 sm:$0xff]  }
 0x16c   : > { %v1152_v3 = vpop.f32.mrf.mxu0  ;;  %3604 = vmatpush2.bf16.msra.mxu1 %v6090_v61 }
 0x16d   : > { %v1153_v5 = vadd.f32 %v1152_v3, %v6712_v35  ;;  %2013 = vmatprep.mubr.bf16.mxu1 %v1578_v0  ;;  %v1452_v11 = vmax.f32 %v1151_v4, 0.0 }
 0x16e   : > { %v1154_v7 = vpop.f32.mrf.mxu0  ;;  %2014 = vmatmul.mubr.bf16.gmra.mxu1 %v1577_v1 }
 0x16f   : > { %v1155_v8 = vadd.f32 %v1154_v7, %v6708_v34  ;;  %v1453_v9 = vmax.f32 %v1153_v5, 0.0 }
 0x170   : > { %v1158_v10 = vpop.f32.mrf.mxu0 }
 0x171   : > { %v1454_v12 = vmax.f32 %v1155_v8, 0.0  ;;  %v1579_v18 = vpack.c.bf16 %v1453_v9, %v1451_v13  ;;  %v1159_v22 = vadd.f32 %v1158_v10, %v6712_v35 }
 0x172   : > { %v1160_v14 = vpop.f32.mrf.mxu0 }
 0x173   : > { %v1580_v15 = vpack.c.bf16 %v1454_v12, %v1452_v11  ;;  %v1161_v20 = vadd.f32 %v1160_v14, %v6708_v34  ;;  %v1455_v32 = vmax.f32 %v1159_v22, 0.0 }
 0x174   : > { %v1162_v19 = vpop.f32.mrf.mxu0 }
 0x175   : > { %v1163_v21 = vadd.f32 %v1162_v19, %v6712_v35  ;;  %2023 = vmatprep.mubr.bf16.mxu1 %v1580_v15  ;;  %v1456_v27 = vmax.f32 %v1161_v20, 0.0 }
 0x176   : > { %v1164_v23 = vpop.f32.mrf.mxu0  ;;  %2024 = vmatmul.mubr.bf16.gmra.mxu1 %v1579_v18 }
 0x177   : > { %v1165_v24 = vadd.f32 %v1164_v23, %v6708_v34  ;;  %v1457_v25 = vmax.f32 %v1163_v21, 0.0 }
 0x178   : > { %v1168_v26 = vpop.f32.mrf.mxu0 }
 0x179   : > { %v1458_v29 = vmax.f32 %v1165_v24, 0.0  ;;  %v1581_v37 = vpack.c.bf16 %v1457_v25, %v1455_v32  ;;  %v1169_v41 = vadd.f32 %v1168_v26, %v6712_v35 }
 0x17a   : > { %v1170_v33 = vpop.f32.mrf.mxu0 }
 0x17b   : > { %v1582_v36 = vpack.c.bf16 %v1458_v29, %v1456_v27  ;;  %v1171_v39 = vadd.f32 %v1170_v33, %v6708_v34  ;;  %v1459_v47 = vmax.f32 %v1169_v41, 0.0 }
 0x17c   : > { %v1172_v38 = vpop.f32.mrf.mxu0 }
 0x17d   : > { %v1173_v40 = vadd.f32 %v1172_v38, %v6712_v35  ;;  %2033 = vmatprep.mubr.bf16.mxu1 %v1582_v36  ;;  %v1460_v45 = vmax.f32 %v1171_v39, 0.0  ;;  %v6093_v36 = vld [vmem:[%s7955_s7 + $0xd0] ss:$8 sps:$4 sm:$0xff]  }
 0x17e   : > { %v1174_v42 = vpop.f32.mrf.mxu0  ;;  %2034 = vmatmul.mubr.bf16.gmra.mxu1 %v1581_v37  ;;  %v6095_v37 = vld [vmem:[%s7955_s7 + $0xd4] ss:$8 sps:$4 sm:$0xff]  }
 0x17f   : > { %v1175_v43 = vadd.f32 %v1174_v42, %v6708_v34  ;;  %v1461_v44 = vmax.f32 %v1173_v40, 0.0  ;;  %3605 = vmatprep.subr.bf16.mxu1 %v6095_v37 }
 0x180   : > { %v1178_v2 = vpop.f32.mrf.mxu0  ;;  %3606 = vmatpush2.bf16.msra.mxu1 %v6093_v36 }
 0x181   : > { %v1462_v46 = vmax.f32 %v1175_v43, 0.0  ;;  %v1583_v50 = vpack.c.bf16 %v1461_v44, %v1459_v47  ;;  %v1179_v54 = vadd.f32 %v1178_v2, %v6712_v35 }
 0x182   : > { %v1180_v48 = vpop.f32.mrf.mxu0 }
 0x183   : > { %v1584_v49 = vpack.c.bf16 %v1462_v46, %v1460_v45  ;;  %v1181_v52 = vadd.f32 %v1180_v48, %v6708_v34  ;;  %v1463_v63 = vmax.f32 %v1179_v54, 0.0 }
 0x184   : > { %v1182_v51 = vpop.f32.mrf.mxu0 }
 0x185   : > { %v1183_v53 = vadd.f32 %v1182_v51, %v6712_v35  ;;  %2043 = vmatprep.mubr.bf16.mxu1 %v1584_v49  ;;  %v1464_v59 = vmax.f32 %v1181_v52, 0.0 }
 0x186   : > { %v1184_v55 = vpop.f32.mrf.mxu0  ;;  %2044 = vmatmul.mubr.bf16.gmra.mxu1 %v1583_v50 }
 0x187   : > { %v1185_v56 = vadd.f32 %v1184_v55, %v6708_v34  ;;  %v1465_v57 = vmax.f32 %v1183_v53, 0.0 }
 0x188   : > { %v1188_v58 = vpop.f32.mrf.mxu0 }
 0x189   : > { %v1466_v60 = vmax.f32 %v1185_v56, 0.0  ;;  %v1585_v3 = vpack.c.bf16 %v1465_v57, %v1463_v63  ;;  %v1189_v7 = vadd.f32 %v1188_v58, %v6712_v35 }
 0x18a   : > { %v1190_v0 = vpop.f32.mrf.mxu0 }
 0x18b   : > { %v1586_v1 = vpack.c.bf16 %v1466_v60, %v1464_v59  ;;  %v1191_v5 = vadd.f32 %v1190_v0, %v6708_v34  ;;  %v1467_v14 = vmax.f32 %v1189_v7, 0.0 }
 0x18c   : > { %v1192_v4 = vpop.f32.mrf.mxu0 }
 0x18d   : > { %v1193_v6 = vadd.f32 %v1192_v4, %v6712_v35  ;;  %2053 = vmatprep.mubr.bf16.mxu1 %v1586_v1  ;;  %v1468_v12 = vmax.f32 %v1191_v5, 0.0 }
 0x18e   : > { %v1194_v8 = vpop.f32.mrf.mxu0  ;;  %2054 = vmatmul.mubr.bf16.gmra.mxu1 %v1585_v3 }
 0x18f   : > { %v1195_v9 = vadd.f32 %v1194_v8, %v6708_v34  ;;  %v1469_v10 = vmax.f32 %v1193_v6, 0.0 }
 0x190   : > { %v1198_v11 = vpop.f32.mrf.mxu0 }
 0x191   : > { %v1470_v13 = vmax.f32 %v1195_v9, 0.0  ;;  %v1587_v17 = vpack.c.bf16 %v1469_v10, %v1467_v14  ;;  %v1199_v21 = vadd.f32 %v1198_v11, %v6712_v35  ;;  %v6096_v9 = vld [vmem:[%s7955_s7 + $0xc0] ss:$8 sps:$4 sm:$0xff]   ;;  %v6098_v10 = vld [vmem:[%s7955_s7 + $0xc4] ss:$8 sps:$4 sm:$0xff]  }
 0x192   : > { %v1200_v15 = vpop.f32.mrf.mxu0  ;;  %3607 = vmatprep.subr.bf16.mxu1 %v6098_v10 }
 0x193   : > { %v1588_v16 = vpack.c.bf16 %v1470_v13, %v1468_v12  ;;  %v1201_v19 = vadd.f32 %v1200_v15, %v6708_v34  ;;  %v1471_v29 = vmax.f32 %v1199_v21, 0.0  ;;  %3608 = vmatpush2.bf16.msra.mxu1 %v6096_v9 }
 0x194   : > { %v1202_v18 = vpop.f32.mrf.mxu0 }
 0x195   : > { %v1203_v20 = vadd.f32 %v1202_v18, %v6712_v35  ;;  %2063 = vmatprep.mubr.bf16.mxu1 %v1588_v16  ;;  %v1472_v26 = vmax.f32 %v1201_v19, 0.0 }
 0x196   : > { %v1204_v22 = vpop.f32.mrf.mxu0  ;;  %2064 = vmatmul.mubr.bf16.gmra.mxu1 %v1587_v17 }
 0x197   : > { %v1205_v23 = vadd.f32 %v1204_v22, %v6708_v34  ;;  %v1473_v24 = vmax.f32 %v1203_v20, 0.0 }
 0x198   : > { %v1208_v25 = vpop.f32.mrf.mxu0 }
 0x199   : > { %v1474_v27 = vmax.f32 %v1205_v23, 0.0  ;;  %v1589_v38 = vpack.c.bf16 %v1473_v24, %v1471_v29  ;;  %v1209_v42 = vadd.f32 %v1208_v25, %v6712_v35  ;;  %v1659_v24 = vld [vmem:[%s7952_s4] sm:$0x3] }
 0x19a   : > { %v1210_v32 = vpop.f32.mrf.mxu0 }
 0x19b   : > { %v1590_v33 = vpack.c.bf16 %v1474_v27, %v1472_v26  ;;  %v1211_v40 = vadd.f32 %v1210_v32, %v6708_v34  ;;  %v1475_v48 = vmax.f32 %v1209_v42, 0.0  ;;  %v6959_v32 = vrot.slane %v1659_v24, %v6698_v30 }
 0x19c   : > { %v1212_v39 = vpop.f32.mrf.mxu0 }
 0x19d   : > { %v1213_v41 = vadd.f32 %v1212_v39, %v6712_v35  ;;  %2073 = vmatprep.mubr.bf16.mxu1 %v1590_v33  ;;  %v1476_v46 = vmax.f32 %v1211_v40, 0.0 }
 0x19e   : > { %v1214_v43 = vpop.f32.mrf.mxu0  ;;  %2074 = vmatmul.mubr.bf16.gmra.mxu1 %v1589_v38  ;;  %v6962_v38 = vrot.slane %v1659_v24, %v6701_v31 }
 0x19f   : > { %v1215_v44 = vadd.f32 %v1214_v43, %v6708_v34  ;;  %v1477_v2 = vmax.f32 %v1213_v41, 0.0 }
 0x1a0   : > { %v1218_v45 = vpop.f32.mrf.mxu0 }
 0x1a1   : > { %v1478_v47 = vmax.f32 %v1215_v44, 0.0  ;;  %v1591_v51 = vpack.c.bf16 %v1477_v2, %v1475_v48  ;;  %v1219_v55 = vadd.f32 %v1218_v45, %v6712_v35 }
 0x1a2   : > { %v1220_v49 = vpop.f32.mrf.mxu0 }
 0x1a3   : > { %v1592_v50 = vpack.c.bf16 %v1478_v47, %v1476_v46  ;;  %v1221_v53 = vadd.f32 %v1220_v49, %v6708_v34  ;;  %v1479_v62 = vmax.f32 %v1219_v55, 0.0 }
 0x1a4   : > { %v1222_v52 = vpop.f32.mrf.mxu0 }
 0x1a5   : > { %v1223_v54 = vadd.f32 %v1222_v52, %v6712_v35  ;;  %2083 = vmatprep.mubr.bf16.mxu1 %v1592_v50  ;;  %v1480_v60 = vmax.f32 %v1221_v53, 0.0 }
 0x1a6   : > { %v1224_v56 = vpop.f32.mrf.mxu0  ;;  %2084 = vmatmul.mubr.bf16.gmra.mxu1 %v1591_v51 }
 0x1a7   : > { %v1225_v57 = vadd.f32 %v1224_v56, %v6708_v34  ;;  %v1481_v58 = vmax.f32 %v1223_v54, 0.0 }
 0x1a8   : > { %v1228_v59 = vpop.f32.mrf.mxu0 }
 0x1a9   : > { %v1482_v61 = vmax.f32 %v1225_v57, 0.0  ;;  %v1593_v1 = vpack.c.bf16 %v1481_v58, %v1479_v62  ;;  %v1229_v6 = vadd.f32 %v1228_v59, %v6712_v35 }
 0x1aa   : > { %v1230_v63 = vpop.f32.mrf.mxu0 }
 0x1ab   : > { %v1594_v0 = vpack.c.bf16 %v1482_v61, %v1480_v60  ;;  %v1231_v4 = vadd.f32 %v1230_v63, %v6708_v34  ;;  %v1483_v15 = vmax.f32 %v1229_v6, 0.0 }
 0x1ac   : > { %v1232_v3 = vpop.f32.mrf.mxu0 }
 0x1ad   : > { %v1233_v5 = vadd.f32 %v1232_v3, %v6712_v35  ;;  %2093 = vmatprep.mubr.bf16.mxu1 %v1594_v0  ;;  %v1484_v13 = vmax.f32 %v1231_v4, 0.0 }
 0x1ae   : > { %v1234_v7 = vpop.f32.mrf.mxu0  ;;  %2094 = vmatmul.mubr.bf16.gmra.mxu1 %v1593_v1 }
 0x1af   : > { %v1235_v8 = vadd.f32 %v1234_v7, %v6708_v34  ;;  %v1485_v11 = vmax.f32 %v1233_v5, 0.0  ;;  %v6099_v7 = vld [vmem:[%s7955_s7 + $0xb0] ss:$8 sps:$4 sm:$0xff]  }
 0x1b0   : > { %v1238_v12 = vpop.f32.mrf.mxu0 }
 0x1b1   : > { %v1486_v14 = vmax.f32 %v1235_v8, 0.0  ;;  %v1595_v18 = vpack.c.bf16 %v1485_v11, %v1483_v15  ;;  %v1239_v22 = vadd.f32 %v1238_v12, %v6712_v35  ;;  %v6101_v8 = vld [vmem:[%s7955_s7 + $0xb4] ss:$8 sps:$4 sm:$0xff]  }
 0x1b2   : > { %v1240_v16 = vpop.f32.mrf.mxu0  ;;  %3609 = vmatprep.subr.bf16.mxu1 %v6101_v8 }
 0x1b3   : > { %v1596_v17 = vpack.c.bf16 %v1486_v14, %v1484_v13  ;;  %v1241_v20 = vadd.f32 %v1240_v16, %v6708_v34  ;;  %v1487_v39 = vmax.f32 %v1239_v22, 0.0  ;;  %3610 = vmatpush2.bf16.msra.mxu1 %v6099_v7 }
 0x1b4   : > { %v1242_v19 = vpop.f32.mrf.mxu0 }
 0x1b5   : > { %v1243_v21 = vadd.f32 %v1242_v19, %v6712_v35  ;;  %2103 = vmatprep.mubr.bf16.mxu1 %v1596_v17  ;;  %v1488_v36 = vmax.f32 %v1241_v20, 0.0 }
 0x1b6   : > { %v1244_v23 = vpop.f32.mrf.mxu0  ;;  %v1865_v25 = vpop.f32.mrf.mxu1  ;;  %2104 = vmatmul.mubr.bf16.gmra.mxu1 %v1595_v18 }
 0x1b7   : > { %v1245_v26 = vadd.f32 %v1244_v23, %v6708_v34  ;;  %v1489_v27 = vmax.f32 %v1243_v21, 0.0  ;;  %v1866_v47 = vadd.f32 %v1865_v25, %v6962_v38 }
 0x1b8   : > { %v1248_v29 = vpop.f32.mrf.mxu0  ;;  %v1867_v33 = vpop.f32.mrf.mxu1 }
 0x1b9   : > { %v1490_v37 = vmax.f32 %v1245_v26, 0.0  ;;  %v1597_v44 = vpack.c.bf16 %v1489_v27, %v1487_v39  ;;  %v1868_v2 = vadd.f32 %v1867_v33, %v6959_v32  ;;  %v1249_v53 = vadd.f32 %v1248_v29, %v6712_v35 }
 0x1ba   : > { %v1250_v40 = vpop.f32.mrf.mxu0  ;;  %v1869_v41 = vpop.f32.mrf.mxu1  ;;  %v2264_v60 = vmax.f32 %v1866_v47, 0.0 }
 0x1bb   : > { %v1870_v42 = vadd.f32 %v1869_v41, %v6962_v38  ;;  %v1598_v43 = vpack.c.bf16 %v1490_v37, %v1488_v36  ;;  %v1251_v50 = vadd.f32 %v1250_v40, %v6708_v34  ;;  %v2265_v57 = vmax.f32 %v1868_v2, 0.0 }
 0x1bc   : > { %v1252_v45 = vpop.f32.mrf.mxu0  ;;  %v1871_v46 = vpop.f32.mrf.mxu1  ;;  %v1491_v4 = vmax.f32 %v1249_v53, 0.0 }
 0x1bd   : > { %v1253_v48 = vadd.f32 %v1252_v45, %v6712_v35  ;;  %v1872_v49 = vadd.f32 %v1871_v46, %v6959_v32  ;;  %2113 = vmatprep.mubr.bf16.mxu1 %v1598_v43  ;;  %v2266_v54 = vmax.f32 %v1870_v42, 0.0  ;;  %v1492_v63 = vmax.f32 %v1251_v50, 0.0 }
 0x1be   : > { %v1254_v51 = vpop.f32.mrf.mxu0  ;;  %v1875_v52 = vpop.f32.mrf.mxu1  ;;  %2114 = vmatmul.mubr.bf16.gmra.mxu1 %v1597_v44 }
 0x1bf   : > { %v2267_v55 = vmax.f32 %v1872_v49, 0.0  ;;  %v1255_v56 = vadd.f32 %v1254_v51, %v6708_v34  ;;  %v1493_v61 = vmax.f32 %v1253_v48, 0.0  ;;  %v2424_v5 = vpack.c.bf16 %v2266_v54, %v2264_v60 }
 0x1c0   : > { %v1258_v58 = vpop.f32.mrf.mxu0  ;;  %v1877_v59 = vpop.f32.mrf.mxu1  ;;  %v1876_v9 = vadd.f32 %v1875_v52, %v6962_v38 }
 0x1c1   : > { %v1494_v62 = vmax.f32 %v1255_v56, 0.0  ;;  %v2425_v3 = vpack.c.bf16 %v2267_v55, %v2265_v57  ;;  %v1878_v10 = vadd.f32 %v1877_v59, %v6959_v32  ;;  %v1599_v14 = vpack.c.bf16 %v1493_v61, %v1491_v4 }
 0x1c2   : > { %v1260_v0 = vpop.f32.mrf.mxu0  ;;  %v1879_v1 = vpop.f32.mrf.mxu1  ;;  %v1259_v20 = vadd.f32 %v1258_v58, %v6712_v35  ;;  %v2268_v27 = vmax.f32 %v1876_v9, 0.0 }
 0x1c3   : > { %v1880_v6 = vadd.f32 %v1879_v1, %v6962_v38  ;;  %2740 = vmatprep.mubr.bf16.mxu0 %v2425_v3  ;;  %v1600_v13 = vpack.c.bf16 %v1494_v62, %v1492_v63  ;;  %v1261_v17 = vadd.f32 %v1260_v0, %v6708_v34  ;;  %v2269_v24 = vmax.f32 %v1878_v10, 0.0 }
 0x1c4   : > { %v1262_v11 = vpop.f32.mrf.mxu0  ;;  %v1881_v12 = vpop.f32.mrf.mxu1  ;;  %2741 = vmatmul.mubr.bf16.vlgmr.msra.gmra.mxu0 %v2424_v5  ;;  %v1495_v41 = vmax.f32 %v1259_v20, 0.0 }
 0x1c5   : > { %v1263_v15 = vadd.f32 %v1262_v11, %v6712_v35  ;;  %v1882_v16 = vadd.f32 %v1881_v12, %v6959_v32  ;;  %2123 = vmatprep.mubr.bf16.mxu1 %v1600_v13  ;;  %v2270_v21 = vmax.f32 %v1880_v6, 0.0  ;;  %v1496_v36 = vmax.f32 %v1261_v17, 0.0 }
 0x1c6   : > { %v1264_v18 = vpop.f32.mrf.mxu0  ;;  %v1885_v19 = vpop.f32.mrf.mxu1  ;;  %2124 = vmatmul.mubr.bf16.gmra.mxu1 %v1599_v14 }
 0x1c7   : > { %v2271_v22 = vmax.f32 %v1882_v16, 0.0  ;;  %v1265_v23 = vadd.f32 %v1264_v18, %v6708_v34  ;;  %v1497_v29 = vmax.f32 %v1263_v15, 0.0  ;;  %v2426_v42 = vpack.c.bf16 %v2270_v21, %v2268_v27 }
 0x1c8   : > { %v1268_v25 = vpop.f32.mrf.mxu0  ;;  %v1887_v26 = vpop.f32.mrf.mxu1  ;;  %v1886_v48 = vadd.f32 %v1885_v19, %v6962_v38 }
 0x1c9   : > { %v1498_v33 = vmax.f32 %v1265_v23, 0.0  ;;  %v2427_v40 = vpack.c.bf16 %v2271_v22, %v2269_v24  ;;  %v1888_v44 = vadd.f32 %v1887_v26, %v6959_v32  ;;  %v1601_v47 = vpack.c.bf16 %v1497_v29, %v1495_v41  ;;  %v6102_v23 = vld [vmem:[%s7955_s7 + $0xa0] ss:$8 sps:$4 sm:$0xff]   ;;  %v6104_v24 = vld [vmem:[%s7955_s7 + $0xa4] ss:$8 sps:$4 sm:$0xff]  }
 0x1ca   : > { %v1270_v37 = vpop.f32.mrf.mxu0  ;;  %v1889_v39 = vpop.f32.mrf.mxu1  ;;  %v1269_v54 = vadd.f32 %v1268_v25, %v6712_v35  ;;  %v2272_v61 = vmax.f32 %v1886_v48, 0.0  ;;  %3611 = vmatprep.subr.bf16.mxu1 %v6104_v24 }
 0x1cb   : > { %v1890_v43 = vadd.f32 %v1889_v39, %v6962_v38  ;;  %2750 = vmatprep.mubr.bf16.mxu0 %v2427_v40  ;;  %v1602_v46 = vpack.c.bf16 %v1498_v33, %v1496_v36  ;;  %v1271_v51 = vadd.f32 %v1270_v37, %v6708_v34  ;;  %v2273_v58 = vmax.f32 %v1888_v44, 0.0  ;;  %3612 = vmatpush2.bf16.msra.mxu1 %v6102_v23 }
 0x1cc   : > { %v1272_v2 = vpop.f32.mrf.mxu0  ;;  %v1891_v45 = vpop.f32.mrf.mxu1  ;;  %2751 = vmatmul.mubr.bf16.gmra.mxu0 %v2426_v42  ;;  %v1499_v5 = vmax.f32 %v1269_v54, 0.0 }
 0x1cd   : > { %v1273_v49 = vadd.f32 %v1272_v2, %v6712_v35  ;;  %v1892_v50 = vadd.f32 %v1891_v45, %v6959_v32  ;;  %2133 = vmatprep.mubr.bf16.mxu1 %v1602_v46  ;;  %v2274_v55 = vmax.f32 %v1890_v43, 0.0  ;;  %v1500_v0 = vmax.f32 %v1271_v51, 0.0 }
 0x1ce   : > { %v1274_v52 = vpop.f32.mrf.mxu0  ;;  %v1895_v53 = vpop.f32.mrf.mxu1  ;;  %2134 = vmatmul.mubr.bf16.gmra.mxu1 %v1601_v47 }
 0x1cf   : > { %v2275_v56 = vmax.f32 %v1892_v50, 0.0  ;;  %v1275_v57 = vadd.f32 %v1274_v52, %v6708_v34  ;;  %v1501_v62 = vmax.f32 %v1273_v49, 0.0  ;;  %v2428_v6 = vpack.c.bf16 %v2274_v55, %v2272_v61 }
 0x1d0   : > { %v1278_v59 = vpop.f32.mrf.mxu0  ;;  %v1897_v60 = vpop.f32.mrf.mxu1  ;;  %v1896_v13 = vadd.f32 %v1895_v53, %v6962_v38 }
 0x1d1   : > { %v1502_v63 = vmax.f32 %v1275_v57, 0.0  ;;  %v2429_v4 = vpack.c.bf16 %v2275_v56, %v2273_v58  ;;  %v1898_v8 = vadd.f32 %v1897_v60, %v6959_v32  ;;  %v1603_v12 = vpack.c.bf16 %v1501_v62, %v1499_v5 }
 0x1d2   : > { %v1280_v1 = vpop.f32.mrf.mxu0  ;;  %v1899_v3 = vpop.f32.mrf.mxu1  ;;  %v1279_v19 = vadd.f32 %v1278_v59, %v6712_v35  ;;  %v2276_v29 = vmax.f32 %v1896_v13, 0.0 }
 0x1d3   : > { %v1900_v7 = vadd.f32 %v1899_v3, %v6962_v38  ;;  %2760 = vmatprep.mubr.bf16.mxu0 %v2429_v4  ;;  %v1604_v11 = vpack.c.bf16 %v1502_v63, %v1500_v0  ;;  %v1281_v16 = vadd.f32 %v1280_v1, %v6708_v34  ;;  %v2277_v25 = vmax.f32 %v1898_v8, 0.0 }
 0x1d4   : > { %v1282_v9 = vpop.f32.mrf.mxu0  ;;  %v1901_v10 = vpop.f32.mrf.mxu1  ;;  %2761 = vmatmul.mubr.bf16.gmra.mxu0 %v2428_v6  ;;  %v1503_v42 = vmax.f32 %v1279_v19, 0.0 }
 0x1d5   : > { %v1283_v14 = vadd.f32 %v1282_v9, %v6712_v35  ;;  %v1902_v15 = vadd.f32 %v1901_v10, %v6959_v32  ;;  %2143 = vmatprep.mubr.bf16.mxu1 %v1604_v11  ;;  %v2278_v20 = vmax.f32 %v1900_v7, 0.0  ;;  %v1504_v37 = vmax.f32 %v1281_v16, 0.0 }
 0x1d6   : > { %v1284_v17 = vpop.f32.mrf.mxu0  ;;  %v1905_v18 = vpop.f32.mrf.mxu1  ;;  %2144 = vmatmul.mubr.bf16.gmra.mxu1 %v1603_v12 }
 0x1d7   : > { %v2279_v21 = vmax.f32 %v1902_v15, 0.0  ;;  %v1285_v22 = vadd.f32 %v1284_v17, %v6708_v34  ;;  %v1505_v33 = vmax.f32 %v1283_v14, 0.0  ;;  %v2430_v43 = vpack.c.bf16 %v2278_v20, %v2276_v29 }
 0x1d8   : > { %v1288_v26 = vpop.f32.mrf.mxu0  ;;  %v1907_v27 = vpop.f32.mrf.mxu1  ;;  %v1906_v49 = vadd.f32 %v1905_v18, %v6962_v38 }
 0x1d9   : > { %v1506_v36 = vmax.f32 %v1285_v22, 0.0  ;;  %v2431_v41 = vpack.c.bf16 %v2279_v21, %v2277_v25  ;;  %v1908_v2 = vadd.f32 %v1907_v27, %v6959_v32  ;;  %v1605_v48 = vpack.c.bf16 %v1505_v33, %v1503_v42 }
 0x1da   : > { %v1290_v39 = vpop.f32.mrf.mxu0  ;;  %v1909_v40 = vpop.f32.mrf.mxu1  ;;  %v1289_v55 = vadd.f32 %v1288_v26, %v6712_v35  ;;  %v2280_v62 = vmax.f32 %v1906_v49, 0.0 }
 0x1db   : > { %v1910_v44 = vadd.f32 %v1909_v40, %v6962_v38  ;;  %2770 = vmatprep.mubr.bf16.mxu0 %v2431_v41  ;;  %v1606_v47 = vpack.c.bf16 %v1506_v36, %v1504_v37  ;;  %v1291_v52 = vadd.f32 %v1290_v39, %v6708_v34  ;;  %v2281_v59 = vmax.f32 %v1908_v2, 0.0  ;;  %v6107_v2 = vld [vmem:[%s7955_s7 + $0x94] ss:$8 sps:$4 sm:$0xff]  }
 0x1dc   : > { %v1292_v45 = vpop.f32.mrf.mxu0  ;;  %v1911_v46 = vpop.f32.mrf.mxu1  ;;  %2771 = vmatmul.mubr.bf16.gmra.mxu0 %v2430_v43  ;;  %v1507_v6 = vmax.f32 %v1289_v55, 0.0  ;;  %3613 = vmatprep.subr.bf16.mxu1 %v6107_v2 }
 0x1dd   : > { %v1293_v50 = vadd.f32 %v1292_v45, %v6712_v35  ;;  %v1912_v51 = vadd.f32 %v1911_v46, %v6959_v32  ;;  %2153 = vmatprep.mubr.bf16.mxu1 %v1606_v47  ;;  %v2282_v56 = vmax.f32 %v1910_v44, 0.0  ;;  %v1508_v1 = vmax.f32 %v1291_v52, 0.0  ;;  %v6105_v44 = vld [vmem:[%s7955_s7 + $0x90] ss:$8 sps:$4 sm:$0xff]  }
 0x1de   : > { %v1294_v53 = vpop.f32.mrf.mxu0  ;;  %v1915_v54 = vpop.f32.mrf.mxu1  ;;  %2154 = vmatmul.mubr.bf16.gmra.mxu1 %v1605_v48 }
 0x1df   : > { %v2283_v57 = vmax.f32 %v1912_v51, 0.0  ;;  %v1295_v58 = vadd.f32 %v1294_v53, %v6708_v34  ;;  %v1509_v63 = vmax.f32 %v1293_v50, 0.0  ;;  %v2432_v7 = vpack.c.bf16 %v2282_v56, %v2280_v62  ;;  %3614 = vmatpush2.bf16.msra.mxu1 %v6105_v44 }
 0x1e0   : > { %v1298_v60 = vpop.f32.mrf.mxu0  ;;  %v1917_v61 = vpop.f32.mrf.mxu1  ;;  %v1916_v14 = vadd.f32 %v1915_v54, %v6962_v38 }
 0x1e1   : > { %v1510_v0 = vmax.f32 %v1295_v58, 0.0  ;;  %v2433_v5 = vpack.c.bf16 %v2283_v57, %v2281_v59  ;;  %v1918_v9 = vadd.f32 %v1917_v61, %v6959_v32  ;;  %v1607_v13 = vpack.c.bf16 %v1509_v63, %v1507_v6 }
 0x1e2   : > { %v1300_v3 = vpop.f32.mrf.mxu0  ;;  %v1919_v4 = vpop.f32.mrf.mxu1  ;;  %v1299_v20 = vadd.f32 %v1298_v60, %v6712_v35  ;;  %v2284_v27 = vmax.f32 %v1916_v14, 0.0 }
 0x1e3   : > { %v1920_v8 = vadd.f32 %v1919_v4, %v6962_v38  ;;  %2780 = vmatprep.mubr.bf16.mxu0 %v2433_v5  ;;  %v1608_v12 = vpack.c.bf16 %v1510_v0, %v1508_v1  ;;  %v1301_v17 = vadd.f32 %v1300_v3, %v6708_v34  ;;  %v2285_v24 = vmax.f32 %v1918_v9, 0.0 }
 0x1e4   : > { %v1302_v10 = vpop.f32.mrf.mxu0  ;;  %v1921_v11 = vpop.f32.mrf.mxu1  ;;  %2781 = vmatmul.mubr.bf16.gmra.mxu0 %v2432_v7  ;;  %v1511_v41 = vmax.f32 %v1299_v20, 0.0 }
 0x1e5   : > { %v1303_v15 = vadd.f32 %v1302_v10, %v6712_v35  ;;  %v1922_v16 = vadd.f32 %v1921_v11, %v6959_v32  ;;  %2163 = vmatprep.mubr.bf16.mxu1 %v1608_v12  ;;  %v2286_v21 = vmax.f32 %v1920_v8, 0.0  ;;  %v1512_v36 = vmax.f32 %v1301_v17, 0.0 }
 0x1e6   : > { %v1304_v18 = vpop.f32.mrf.mxu0  ;;  %v1925_v19 = vpop.f32.mrf.mxu1  ;;  %2164 = vmatmul.mubr.bf16.gmra.mxu1 %v1607_v13 }
 0x1e7   : > { %v2287_v22 = vmax.f32 %v1922_v16, 0.0  ;;  %v1305_v23 = vadd.f32 %v1304_v18, %v6708_v34  ;;  %v1513_v29 = vmax.f32 %v1303_v15, 0.0  ;;  %v2434_v42 = vpack.c.bf16 %v2286_v21, %v2284_v27 }
 0x1e8   : > { %v1308_v25 = vpop.f32.mrf.mxu0  ;;  %v1927_v26 = vpop.f32.mrf.mxu1  ;;  %v1926_v45 = vadd.f32 %v1925_v19, %v6962_v38 }
 0x1e9   : > { %v1514_v33 = vmax.f32 %v1305_v23, 0.0  ;;  %v2435_v40 = vpack.c.bf16 %v2287_v22, %v2285_v24  ;;  %v1928_v46 = vadd.f32 %v1927_v26, %v6959_v32  ;;  %v1609_v50 = vpack.c.bf16 %v1513_v29, %v1511_v41 }
 0x1ea   : > { %v1310_v37 = vpop.f32.mrf.mxu0  ;;  %v1929_v39 = vpop.f32.mrf.mxu1  ;;  %v1309_v56 = vadd.f32 %v1308_v25, %v6712_v35  ;;  %v2288_v63 = vmax.f32 %v1926_v45, 0.0 }
 0x1eb   : > { %v1930_v43 = vadd.f32 %v1929_v39, %v6962_v38  ;;  %2790 = vmatprep.mubr.bf16.mxu0 %v2435_v40  ;;  %v1610_v49 = vpack.c.bf16 %v1514_v33, %v1512_v36  ;;  %v1311_v53 = vadd.f32 %v1310_v37, %v6708_v34  ;;  %v2289_v60 = vmax.f32 %v1928_v46, 0.0 }
 0x1ec   : > { %v1312_v47 = vpop.f32.mrf.mxu0  ;;  %v1931_v48 = vpop.f32.mrf.mxu1  ;;  %2791 = vmatmul.mubr.bf16.gmra.mxu0 %v2434_v42  ;;  %v1515_v7 = vmax.f32 %v1309_v56, 0.0 }
 0x1ed   : > { %v1313_v51 = vadd.f32 %v1312_v47, %v6712_v35  ;;  %v1932_v52 = vadd.f32 %v1931_v48, %v6959_v32  ;;  %2173 = vmatprep.mubr.bf16.mxu1 %v1610_v49  ;;  %v2290_v57 = vmax.f32 %v1930_v43, 0.0  ;;  %v1516_v3 = vmax.f32 %v1311_v53, 0.0 }
 0x1ee   : > { %v1314_v54 = vpop.f32.mrf.mxu0  ;;  %v1935_v55 = vpop.f32.mrf.mxu1  ;;  %2174 = vmatmul.mubr.bf16.gmra.mxu1 %v1609_v50 }
 0x1ef   : > { %v2291_v58 = vmax.f32 %v1932_v52, 0.0  ;;  %v1315_v59 = vadd.f32 %v1314_v54, %v6708_v34  ;;  %v1517_v0 = vmax.f32 %v1313_v51, 0.0  ;;  %v2436_v8 = vpack.c.bf16 %v2290_v57, %v2288_v63 }
 0x1f0   : > { %v1318_v61 = vpop.f32.mrf.mxu0  ;;  %v1937_v62 = vpop.f32.mrf.mxu1  ;;  %v1936_v15 = vadd.f32 %v1935_v55, %v6962_v38 }
 0x1f1   : > { %v1518_v1 = vmax.f32 %v1315_v59, 0.0  ;;  %v2437_v6 = vpack.c.bf16 %v2291_v58, %v2289_v60  ;;  %v1938_v10 = vadd.f32 %v1937_v62, %v6959_v32  ;;  %v1611_v14 = vpack.c.bf16 %v1517_v0, %v1515_v7  ;;  %v6108_v59 = vld [vmem:[%s7955_s7 + $0x80] ss:$8 sps:$4 sm:$0xff]   ;;  %v6110_v60 = vld [vmem:[%s7955_s7 + $0x84] ss:$8 sps:$4 sm:$0xff]  }
 0x1f2   : > { %v1320_v4 = vpop.f32.mrf.mxu0  ;;  %v1939_v5 = vpop.f32.mrf.mxu1  ;;  %v1319_v21 = vadd.f32 %v1318_v61, %v6712_v35  ;;  %v2292_v29 = vmax.f32 %v1936_v15, 0.0  ;;  %3615 = vmatprep.subr.bf16.mxu1 %v6110_v60 }
 0x1f3   : > { %v1940_v9 = vadd.f32 %v1939_v5, %v6962_v38  ;;  %2800 = vmatprep.mubr.bf16.mxu0 %v2437_v6  ;;  %v1612_v13 = vpack.c.bf16 %v1518_v1, %v1516_v3  ;;  %v1321_v18 = vadd.f32 %v1320_v4, %v6708_v34  ;;  %v2293_v25 = vmax.f32 %v1938_v10, 0.0  ;;  %3616 = vmatpush2.bf16.msra.mxu1 %v6108_v59 }
 0x1f4   : > { %v1322_v11 = vpop.f32.mrf.mxu0  ;;  %v1941_v12 = vpop.f32.mrf.mxu1  ;;  %2801 = vmatmul.mubr.bf16.gmra.mxu0 %v2436_v8  ;;  %v1519_v42 = vmax.f32 %v1319_v21, 0.0 }
 0x1f5   : > { %v1323_v16 = vadd.f32 %v1322_v11, %v6712_v35  ;;  %v1942_v17 = vadd.f32 %v1941_v12, %v6959_v32  ;;  %2183 = vmatprep.mubr.bf16.mxu1 %v1612_v13  ;;  %v2294_v22 = vmax.f32 %v1940_v9, 0.0  ;;  %v1520_v37 = vmax.f32 %v1321_v18, 0.0 }
 0x1f6   : > { %v1324_v19 = vpop.f32.mrf.mxu0  ;;  %v1945_v20 = vpop.f32.mrf.mxu1  ;;  %2184 = vmatmul.mubr.bf16.gmra.mxu1 %v1611_v14 }
 0x1f7   : > { %v2295_v23 = vmax.f32 %v1942_v17, 0.0  ;;  %v1325_v24 = vadd.f32 %v1324_v19, %v6708_v34  ;;  %v1521_v33 = vmax.f32 %v1323_v16, 0.0  ;;  %v2438_v43 = vpack.c.bf16 %v2294_v22, %v2292_v29 }
 0x1f8   : > { %v1328_v26 = vpop.f32.mrf.mxu0  ;;  %v1947_v27 = vpop.f32.mrf.mxu1  ;;  %v1946_v49 = vadd.f32 %v1945_v20, %v6962_v38 }
 0x1f9   : > { %v1522_v36 = vmax.f32 %v1325_v24, 0.0  ;;  %v2439_v41 = vpack.c.bf16 %v2295_v23, %v2293_v25  ;;  %v1948_v2 = vadd.f32 %v1947_v27, %v6959_v32  ;;  %v1613_v48 = vpack.c.bf16 %v1521_v33, %v1519_v42 }
 0x1fa   : > { %v1330_v39 = vpop.f32.mrf.mxu0  ;;  %v1949_v40 = vpop.f32.mrf.mxu1  ;;  %v1329_v55 = vadd.f32 %v1328_v26, %v6712_v35  ;;  %v2296_v0 = vmax.f32 %v1946_v49, 0.0 }
 0x1fb   : > { %v1950_v44 = vadd.f32 %v1949_v40, %v6962_v38  ;;  %2810 = vmatprep.mubr.bf16.mxu0 %v2439_v41  ;;  %v1614_v47 = vpack.c.bf16 %v1522_v36, %v1520_v37  ;;  %v1331_v52 = vadd.f32 %v1330_v39, %v6708_v34  ;;  %v2297_v61 = vmax.f32 %v1948_v2, 0.0 }
 0x1fc   : > { %v1332_v45 = vpop.f32.mrf.mxu0  ;;  %v1951_v46 = vpop.f32.mrf.mxu1  ;;  %2811 = vmatmul.mubr.bf16.gmra.mxu0 %v2438_v43  ;;  %v1523_v8 = vmax.f32 %v1329_v55, 0.0 }
 0x1fd   : > { %v1333_v50 = vadd.f32 %v1332_v45, %v6712_v35  ;;  %v1952_v51 = vadd.f32 %v1951_v46, %v6959_v32  ;;  %2193 = vmatprep.mubr.bf16.mxu1 %v1614_v47  ;;  %v2298_v56 = vmax.f32 %v1950_v44, 0.0  ;;  %v1524_v4 = vmax.f32 %v1331_v52, 0.0 }
 0x1fe   : > { %v1334_v53 = vpop.f32.mrf.mxu0  ;;  %v1955_v54 = vpop.f32.mrf.mxu1  ;;  %2194 = vmatmul.mubr.bf16.gmra.mxu1 %v1613_v48 }
 0x1ff   : > { %v2299_v57 = vmax.f32 %v1952_v51, 0.0  ;;  %v1335_v58 = vadd.f32 %v1334_v53, %v6708_v34  ;;  %v1525_v1 = vmax.f32 %v1333_v50, 0.0  ;;  %v2440_v9 = vpack.c.bf16 %v2298_v56, %v2296_v0 }
 0x200   : > { %v1338_v62 = vpop.f32.mrf.mxu0  ;;  %v1957_v63 = vpop.f32.mrf.mxu1  ;;  %v1956_v16 = vadd.f32 %v1955_v54, %v6962_v38 }
 0x201   : > { %v1526_v3 = vmax.f32 %v1335_v58, 0.0  ;;  %v2441_v7 = vpack.c.bf16 %v2299_v57, %v2297_v61  ;;  %v1958_v11 = vadd.f32 %v1957_v63, %v6959_v32  ;;  %v1615_v15 = vpack.c.bf16 %v1525_v1, %v1523_v8 }
 0x202   : > { %v1340_v5 = vpop.f32.mrf.mxu0  ;;  %v1959_v6 = vpop.f32.mrf.mxu1  ;;  %v1339_v22 = vadd.f32 %v1338_v62, %v6712_v35  ;;  %v2300_v33 = vmax.f32 %v1956_v16, 0.0 }
 0x203   : > { %v1960_v10 = vadd.f32 %v1959_v6, %v6962_v38  ;;  %2820 = vmatprep.mubr.bf16.mxu0 %v2441_v7  ;;  %v1616_v14 = vpack.c.bf16 %v1526_v3, %v1524_v4  ;;  %v1341_v19 = vadd.f32 %v1340_v5, %v6708_v34  ;;  %v2301_v26 = vmax.f32 %v1958_v11, 0.0 }
 0x204   : > { %v1342_v12 = vpop.f32.mrf.mxu0  ;;  %v1961_v13 = vpop.f32.mrf.mxu1  ;;  %2821 = vmatmul.mubr.bf16.gmra.mxu0 %v2440_v9  ;;  %v1527_v43 = vmax.f32 %v1339_v22, 0.0 }
 0x205   : > { %v1343_v17 = vadd.f32 %v1342_v12, %v6712_v35  ;;  %v1962_v18 = vadd.f32 %v1961_v13, %v6959_v32  ;;  %2203 = vmatprep.mubr.bf16.mxu1 %v1616_v14  ;;  %v2302_v23 = vmax.f32 %v1960_v10, 0.0  ;;  %v1528_v39 = vmax.f32 %v1341_v19, 0.0 }
 0x206   : > { %v1344_v20 = vpop.f32.mrf.mxu0  ;;  %v1965_v21 = vpop.f32.mrf.mxu1  ;;  %2204 = vmatmul.mubr.bf16.gmra.mxu1 %v1615_v15 }
 0x207   : > { %v2303_v24 = vmax.f32 %v1962_v18, 0.0  ;;  %v1345_v25 = vadd.f32 %v1344_v20, %v6708_v34  ;;  %v1529_v36 = vmax.f32 %v1343_v17, 0.0  ;;  %v2442_v44 = vpack.c.bf16 %v2302_v23, %v2300_v33 }
 0x208   : > { %v1348_v27 = vpop.f32.mrf.mxu0  ;;  %v1967_v29 = vpop.f32.mrf.mxu1  ;;  %v1966_v50 = vadd.f32 %v1965_v21, %v6962_v38 }
 0x209   : > { %v1530_v37 = vmax.f32 %v1345_v25, 0.0  ;;  %v2443_v42 = vpack.c.bf16 %v2303_v24, %v2301_v26  ;;  %v1968_v45 = vadd.f32 %v1967_v29, %v6959_v32  ;;  %v1617_v49 = vpack.c.bf16 %v1529_v36, %v1527_v43 }
 0x20a   : > { %v1350_v40 = vpop.f32.mrf.mxu0  ;;  %v1969_v41 = vpop.f32.mrf.mxu1  ;;  %v1349_v56 = vadd.f32 %v1348_v27, %v6712_v35  ;;  %v2304_v63 = vmax.f32 %v1966_v50, 0.0 }
 0x20b   : > { %v1970_v2 = vadd.f32 %v1969_v41, %v6962_v38  ;;  %2830 = vmatprep.mubr.bf16.mxu0 %v2443_v42  ;;  %v1618_v48 = vpack.c.bf16 %v1530_v37, %v1528_v39  ;;  %v1351_v53 = vadd.f32 %v1350_v40, %v6708_v34  ;;  %v2305_v60 = vmax.f32 %v1968_v45, 0.0 }
 0x20c   : > { %v1352_v46 = vpop.f32.mrf.mxu0  ;;  %v1971_v47 = vpop.f32.mrf.mxu1  ;;  %2831 = vmatmul.mubr.bf16.gmra.mxu0 %v2442_v44  ;;  %v1531_v7 = vmax.f32 %v1349_v56, 0.0 }
 0x20d   : > { %v1353_v51 = vadd.f32 %v1352_v46, %v6712_v35  ;;  %v1972_v52 = vadd.f32 %v1971_v47, %v6959_v32  ;;  %2213 = vmatprep.mubr.bf16.mxu1 %v1618_v48  ;;  %v2306_v57 = vmax.f32 %v1970_v2, 0.0  ;;  %v1532_v3 = vmax.f32 %v1351_v53, 0.0 }
 0x20e   : > { %v1354_v54 = vpop.f32.mrf.mxu0  ;;  %v1975_v55 = vpop.f32.mrf.mxu1  ;;  %2214 = vmatmul.mubr.bf16.gmra.mxu1 %v1617_v49 }
 0x20f   : > { %v2307_v58 = vmax.f32 %v1972_v52, 0.0  ;;  %v1355_v59 = vadd.f32 %v1354_v54, %v6708_v34  ;;  %v1533_v0 = vmax.f32 %v1353_v51, 0.0  ;;  %v2444_v8 = vpack.c.bf16 %v2306_v57, %v2304_v63 }
 0x210   : > { %v1358_v61 = vpop.f32.mrf.mxu0  ;;  %v1977_v62 = vpop.f32.mrf.mxu1  ;;  %v1976_v15 = vadd.f32 %v1975_v55, %v6962_v38 }
 0x211   : > { %v1534_v1 = vmax.f32 %v1355_v59, 0.0  ;;  %v2445_v6 = vpack.c.bf16 %v2307_v58, %v2305_v60  ;;  %v1978_v10 = vadd.f32 %v1977_v62, %v6959_v32  ;;  %v1619_v14 = vpack.c.bf16 %v1533_v0, %v1531_v7 }
 0x212   : > { %v1360_v4 = vpop.f32.mrf.mxu0  ;;  %v1979_v5 = vpop.f32.mrf.mxu1  ;;  %v1359_v21 = vadd.f32 %v1358_v61, %v6712_v35  ;;  %v2308_v29 = vmax.f32 %v1976_v15, 0.0 }
 0x213   : > { %v1980_v9 = vadd.f32 %v1979_v5, %v6962_v38  ;;  %2840 = vmatprep.mubr.bf16.mxu0 %v2445_v6  ;;  %v1620_v13 = vpack.c.bf16 %v1534_v1, %v1532_v3  ;;  %v1361_v18 = vadd.f32 %v1360_v4, %v6708_v34  ;;  %v2309_v25 = vmax.f32 %v1978_v10, 0.0 }
 0x214   : > { %v1362_v11 = vpop.f32.mrf.mxu0  ;;  %v1981_v12 = vpop.f32.mrf.mxu1  ;;  %2841 = vmatmul.mubr.bf16.gmra.mxu0 %v2444_v8  ;;  %v1535_v42 = vmax.f32 %v1359_v21, 0.0 }
 0x215   : > { %v1363_v16 = vadd.f32 %v1362_v11, %v6712_v35  ;;  %v1982_v17 = vadd.f32 %v1981_v12, %v6959_v32  ;;  %2223 = vmatprep.mubr.bf16.mxu1 %v1620_v13  ;;  %v2310_v22 = vmax.f32 %v1980_v9, 0.0  ;;  %v1536_v37 = vmax.f32 %v1361_v18, 0.0 }
 0x216   : > { %v1364_v19 = vpop.f32.mrf.mxu0  ;;  %v1985_v20 = vpop.f32.mrf.mxu1  ;;  %2224 = vmatmul.mubr.bf16.gmra.mxu1 %v1619_v14 }
 0x217   : > { %v2311_v23 = vmax.f32 %v1982_v17, 0.0  ;;  %v1365_v24 = vadd.f32 %v1364_v19, %v6708_v34  ;;  %v1537_v33 = vmax.f32 %v1363_v16, 0.0  ;;  %v2446_v43 = vpack.c.bf16 %v2310_v22, %v2308_v29 }
 0x218   : > { %v1368_v26 = vpop.f32.mrf.mxu0  ;;  %v1987_v27 = vpop.f32.mrf.mxu1  ;;  %v1986_v49 = vadd.f32 %v1985_v20, %v6962_v38 }
 0x219   : > { %v1538_v36 = vmax.f32 %v1365_v24, 0.0  ;;  %v2447_v41 = vpack.c.bf16 %v2311_v23, %v2309_v25  ;;  %v1988_v2 = vadd.f32 %v1987_v27, %v6959_v32  ;;  %v1621_v48 = vpack.c.bf16 %v1537_v33, %v1535_v42 }
 0x21a   : > { %v1370_v39 = vpop.f32.mrf.mxu0  ;;  %v1989_v40 = vpop.f32.mrf.mxu1  ;;  %v1369_v55 = vadd.f32 %v1368_v26, %v6712_v35  ;;  %v2312_v62 = vmax.f32 %v1986_v49, 0.0 }
 0x21b   : > { %v1990_v44 = vadd.f32 %v1989_v40, %v6962_v38  ;;  %2850 = vmatprep.mubr.bf16.mxu0 %v2447_v41  ;;  %v1622_v47 = vpack.c.bf16 %v1538_v36, %v1536_v37  ;;  %v1371_v52 = vadd.f32 %v1370_v39, %v6708_v34  ;;  %v2313_v59 = vmax.f32 %v1988_v2, 0.0 }
 0x21c   : > { %v1372_v45 = vpop.f32.mrf.mxu0  ;;  %v1991_v46 = vpop.f32.mrf.mxu1  ;;  %2851 = vmatmul.mubr.bf16.gmra.mxu0 %v2446_v43  ;;  %v1539_v6 = vmax.f32 %v1369_v55, 0.0 }
 0x21d   : > { %v1373_v50 = vadd.f32 %v1372_v45, %v6712_v35  ;;  %v1992_v51 = vadd.f32 %v1991_v46, %v6959_v32  ;;  %2233 = vmatprep.mubr.bf16.mxu1 %v1622_v47  ;;  %v2314_v56 = vmax.f32 %v1990_v44, 0.0  ;;  %v1540_v1 = vmax.f32 %v1371_v52, 0.0 }
 0x21e   : > { %v1374_v53 = vpop.f32.mrf.mxu0  ;;  %v1995_v54 = vpop.f32.mrf.mxu1  ;;  %2234 = vmatmul.mubr.bf16.gmra.mxu1 %v1621_v48 }
 0x21f   : > { %v2315_v57 = vmax.f32 %v1992_v51, 0.0  ;;  %v1375_v58 = vadd.f32 %v1374_v53, %v6708_v34  ;;  %v1541_v63 = vmax.f32 %v1373_v50, 0.0  ;;  %v2448_v7 = vpack.c.bf16 %v2314_v56, %v2312_v62 }
 0x220   : > { %v1378_v60 = vpop.f32.mrf.mxu0  ;;  %v1997_v61 = vpop.f32.mrf.mxu1  ;;  %v1996_v10 = vadd.f32 %v1995_v54, %v6962_v38 }
 0x221   : > { %v1542_v0 = vmax.f32 %v1375_v58, 0.0  ;;  %v2449_v5 = vpack.c.bf16 %v2315_v57, %v2313_v59  ;;  %v1998_v8 = vadd.f32 %v1997_v61, %v6959_v32  ;;  %v1623_v14 = vpack.c.bf16 %v1541_v63, %v1539_v6 }
 0x222   : > { %v1380_v3 = vpop.f32.mrf.mxu0  ;;  %v1999_v4 = vpop.f32.mrf.mxu1  ;;  %v1379_v18 = vadd.f32 %v1378_v60, %v6712_v35  ;;  %v2316_v25 = vmax.f32 %v1996_v10, 0.0 }
 0x223   : > { %v2000_v9 = vadd.f32 %v1999_v4, %v6962_v38  ;;  %2860 = vmatprep.mubr.bf16.mxu0 %v2449_v5  ;;  %v1624_v13 = vpack.c.bf16 %v1542_v0, %v1540_v1  ;;  %v1381_v15 = vadd.f32 %v1380_v3, %v6708_v34  ;;  %v2317_v21 = vmax.f32 %v1998_v8, 0.0 }
 0x224   : > { %v1382_v11 = vpop.f32.mrf.mxu0  ;;  %v2001_v12 = vpop.f32.mrf.mxu1  ;;  %2861 = vmatmul.mubr.bf16.gmra.mxu0 %v2448_v7  ;;  %v1543_v37 = vmax.f32 %v1379_v18, 0.0 }
 0x225   : > { %v1383_v16 = vadd.f32 %v1382_v11, %v6712_v35  ;;  %v2002_v17 = vadd.f32 %v2001_v12, %v6959_v32  ;;  %2243 = vmatprep.mubr.bf16.mxu1 %v1624_v13  ;;  %v2318_v22 = vmax.f32 %v2000_v9, 0.0  ;;  %v1544_v27 = vmax.f32 %v1381_v15, 0.0 }
 0x226   : > { %v1384_v19 = vpop.f32.mrf.mxu0  ;;  %v2005_v20 = vpop.f32.mrf.mxu1  ;;  %2244 = vmatmul.mubr.bf16.gmra.mxu1 %v1623_v14 }
 0x227   : > { %v2319_v23 = vmax.f32 %v2002_v17, 0.0  ;;  %v1385_v24 = vadd.f32 %v1384_v19, %v6708_v34  ;;  %v1545_v29 = vmax.f32 %v1383_v16, 0.0  ;;  %v2450_v40 = vpack.c.bf16 %v2318_v22, %v2316_v25 }
 0x228   : > { %v2007_v26 = vpop.f32.mrf.mxu1  ;;  %v2006_v34 = vadd.f32 %v2005_v20, %v6962_v38 }
 0x229   : > { %v1546_v33 = vmax.f32 %v1385_v24, 0.0  ;;  %v2451_v36 = vpack.c.bf16 %v2319_v23, %v2317_v21  ;;  %v2008_v35 = vadd.f32 %v2007_v26, %v6959_v32  ;;  %v1625_v44 = vpack.c.bf16 %v1545_v29, %v1543_v37 }
 0x22a   : > { %v2009_v39 = vpop.f32.mrf.mxu1  ;;  %v2320_v50 = vmax.f32 %v2006_v34, 0.0 }
 0x22b   : > { %v2010_v41 = vadd.f32 %v2009_v39, %v6962_v38  ;;  %2870 = vmatprep.mubr.bf16.mxu0 %v2451_v36  ;;  %v1626_v42 = vpack.c.bf16 %v1546_v33, %v1544_v27  ;;  %v2321_v46 = vmax.f32 %v2008_v35, 0.0 }
 0x22c   : > { %v2011_v43 = vpop.f32.mrf.mxu1  ;;  %2871 = vmatmul.mubr.bf16.gmra.mxu0 %v2450_v40 }
 0x22d   : > { %v2012_v2 = vadd.f32 %v2011_v43, %v6959_v32  ;;  %2253 = vmatprep.mubr.bf16.mxu1 %v1626_v42  ;;  %v2322_v47 = vmax.f32 %v2010_v41, 0.0 }
 0x22e   : > { %v2015_v45 = vpop.f32.mrf.mxu1  ;;  %2254 = vmatmul.mubr.bf16.gmra.mxu1 %v1625_v44 }
 0x22f   : > { %v2323_v48 = vmax.f32 %v2012_v2, 0.0  ;;  %v2452_v53 = vpack.c.bf16 %v2322_v47, %v2320_v50  ;;  %v2016_v57 = vadd.f32 %v2015_v45, %v6962_v38 }
 0x230   : > { %v2017_v49 = vpop.f32.mrf.mxu1 }
 0x231   : > { %v2453_v51 = vpack.c.bf16 %v2323_v48, %v2321_v46  ;;  %v2018_v54 = vadd.f32 %v2017_v49, %v6959_v32  ;;  %v2324_v0 = vmax.f32 %v2016_v57, 0.0 }
 0x232   : > { %v2019_v52 = vpop.f32.mrf.mxu1 }
 0x233   : > { %v2020_v55 = vadd.f32 %v2019_v52, %v6962_v38  ;;  %2880 = vmatprep.mubr.bf16.mxu0 %v2453_v51  ;;  %v2325_v60 = vmax.f32 %v2018_v54, 0.0 }
 0x234   : > { %v2021_v56 = vpop.f32.mrf.mxu1  ;;  %2881 = vmatmul.mubr.bf16.gmra.mxu0 %v2452_v53 }
 0x235   : > { %v2022_v58 = vadd.f32 %v2021_v56, %v6959_v32  ;;  %v2326_v61 = vmax.f32 %v2020_v55, 0.0 }
 0x236   : > { %v2025_v59 = vpop.f32.mrf.mxu1 }
 0x237   : > { %v2327_v62 = vmax.f32 %v2022_v58, 0.0  ;;  %v2454_v4 = vpack.c.bf16 %v2326_v61, %v2324_v0  ;;  %v2026_v8 = vadd.f32 %v2025_v59, %v6962_v38 }
 0x238   : > { %v2027_v63 = vpop.f32.mrf.mxu1 }
 0x239   : > { %v2455_v1 = vpack.c.bf16 %v2327_v62, %v2325_v60  ;;  %v2028_v5 = vadd.f32 %v2027_v63, %v6959_v32  ;;  %v2328_v15 = vmax.f32 %v2026_v8, 0.0 }
 0x23a   : > { %v2029_v3 = vpop.f32.mrf.mxu1 }
 0x23b   : > { %v2030_v6 = vadd.f32 %v2029_v3, %v6962_v38  ;;  %2890 = vmatprep.mubr.bf16.mxu0 %v2455_v1  ;;  %v2329_v11 = vmax.f32 %v2028_v5, 0.0 }
 0x23c   : > { %v2031_v7 = vpop.f32.mrf.mxu1  ;;  %2891 = vmatmul.mubr.bf16.gmra.mxu0 %v2454_v4 }
 0x23d   : > { %v2032_v9 = vadd.f32 %v2031_v7, %v6959_v32  ;;  %v2330_v12 = vmax.f32 %v2030_v6, 0.0 }
 0x23e   : > { %v2035_v10 = vpop.f32.mrf.mxu1 }
 0x23f   : > { %v2331_v13 = vmax.f32 %v2032_v9, 0.0  ;;  %v2456_v18 = vpack.c.bf16 %v2330_v12, %v2328_v15  ;;  %v2036_v22 = vadd.f32 %v2035_v10, %v6962_v38 }
 0x240   : > { %v2037_v14 = vpop.f32.mrf.mxu1 }
 0x241   : > { %v2457_v16 = vpack.c.bf16 %v2331_v13, %v2329_v11  ;;  %v2038_v19 = vadd.f32 %v2037_v14, %v6959_v32  ;;  %v2332_v33 = vmax.f32 %v2036_v22, 0.0 }
 0x242   : > { %v2039_v17 = vpop.f32.mrf.mxu1 }
 0x243   : > { %v2040_v20 = vadd.f32 %v2039_v17, %v6962_v38  ;;  %2900 = vmatprep.mubr.bf16.mxu0 %v2457_v16  ;;  %v2333_v25 = vmax.f32 %v2038_v19, 0.0 }
 0x244   : > { %v2041_v21 = vpop.f32.mrf.mxu1  ;;  %2901 = vmatmul.mubr.bf16.gmra.mxu0 %v2456_v18 }
 0x245   : > { %v2042_v23 = vadd.f32 %v2041_v21, %v6959_v32  ;;  %v2334_v26 = vmax.f32 %v2040_v20, 0.0 }
 0x246   : > { %v2045_v24 = vpop.f32.mrf.mxu1 }
 0x247   : > { %v2335_v27 = vmax.f32 %v2042_v23, 0.0  ;;  %v2458_v39 = vpack.c.bf16 %v2334_v26, %v2332_v33  ;;  %v2046_v42 = vadd.f32 %v2045_v24, %v6962_v38 }
 0x248   : > { %v2047_v29 = vpop.f32.mrf.mxu1 }
 0x249   : > { %v2459_v36 = vpack.c.bf16 %v2335_v27, %v2333_v25  ;;  %v2048_v40 = vadd.f32 %v2047_v29, %v6959_v32  ;;  %v2336_v47 = vmax.f32 %v2046_v42, 0.0 }
 0x24a   : > { %v2049_v37 = vpop.f32.mrf.mxu1 }
 0x24b   : > { %v2050_v35 = vadd.f32 %v2049_v37, %v6962_v38  ;;  %2910 = vmatprep.mubr.bf16.mxu0 %v2459_v36  ;;  %v2337_v34 = vmax.f32 %v2048_v40, 0.0 }
 0x24c   : > { %v2051_v41 = vpop.f32.mrf.mxu1  ;;  %2911 = vmatmul.mubr.bf16.gmra.mxu0 %v2458_v39 }
 0x24d   : > { %v2052_v43 = vadd.f32 %v2051_v41, %v6959_v32  ;;  %v2338_v2 = vmax.f32 %v2050_v35, 0.0 }
 0x24e   : > { %v2055_v44 = vpop.f32.mrf.mxu1 }
 0x24f   : > { %v2339_v45 = vmax.f32 %v2052_v43, 0.0  ;;  %v2460_v50 = vpack.c.bf16 %v2338_v2, %v2336_v47  ;;  %v2056_v54 = vadd.f32 %v2055_v44, %v6962_v38 }
 0x250   : > { %v2057_v46 = vpop.f32.mrf.mxu1 }
 0x251   : > { %v2461_v48 = vpack.c.bf16 %v2339_v45, %v2337_v34  ;;  %v2058_v51 = vadd.f32 %v2057_v46, %v6959_v32  ;;  %v2340_v61 = vmax.f32 %v2056_v54, 0.0 }
 0x252   : > { %v2059_v49 = vpop.f32.mrf.mxu1 }
 0x253   : > { %v2060_v52 = vadd.f32 %v2059_v49, %v6962_v38  ;;  %2920 = vmatprep.mubr.bf16.mxu0 %v2461_v48  ;;  %v2341_v57 = vmax.f32 %v2058_v51, 0.0 }
 0x254   : > { %v2061_v53 = vpop.f32.mrf.mxu1  ;;  %2921 = vmatmul.mubr.bf16.gmra.mxu0 %v2460_v50 }
 0x255   : > { %v2062_v55 = vadd.f32 %v2061_v53, %v6959_v32  ;;  %v2342_v58 = vmax.f32 %v2060_v52, 0.0 }
 0x256   : > { %v2065_v56 = vpop.f32.mrf.mxu1 }
 0x257   : > { %v2343_v59 = vmax.f32 %v2062_v55, 0.0  ;;  %v2462_v0 = vpack.c.bf16 %v2342_v58, %v2340_v61  ;;  %v2066_v5 = vadd.f32 %v2065_v56, %v6962_v38 }
 0x258   : > { %v2067_v60 = vpop.f32.mrf.mxu1 }
 0x259   : > { %v2463_v62 = vpack.c.bf16 %v2343_v59, %v2341_v57  ;;  %v2068_v1 = vadd.f32 %v2067_v60, %v6959_v32  ;;  %v2344_v12 = vmax.f32 %v2066_v5, 0.0 }
 0x25a   : > { %v2069_v63 = vpop.f32.mrf.mxu1 }
 0x25b   : > { %v2070_v3 = vadd.f32 %v2069_v63, %v6962_v38  ;;  %2930 = vmatprep.mubr.bf16.mxu0 %v2463_v62  ;;  %v2345_v8 = vmax.f32 %v2068_v1, 0.0 }
 0x25c   : > { %v2071_v4 = vpop.f32.mrf.mxu1  ;;  %2931 = vmatmul.mubr.bf16.gmra.mxu0 %v2462_v0 }
 0x25d   : > { %v2072_v6 = vadd.f32 %v2071_v4, %v6959_v32  ;;  %v2346_v9 = vmax.f32 %v2070_v3, 0.0 }
 0x25e   : > { %v2075_v7 = vpop.f32.mrf.mxu1 }
 0x25f   : > { %v2347_v10 = vmax.f32 %v2072_v6, 0.0  ;;  %v2464_v15 = vpack.c.bf16 %v2346_v9, %v2344_v12  ;;  %v2076_v19 = vadd.f32 %v2075_v7, %v6962_v38 }
 0x260   : > { %v2077_v11 = vpop.f32.mrf.mxu1 }
 0x261   : > { %v2465_v13 = vpack.c.bf16 %v2347_v10, %v2345_v8  ;;  %v2078_v16 = vadd.f32 %v2077_v11, %v6959_v32  ;;  %v2348_v26 = vmax.f32 %v2076_v19, 0.0 }
 0x262   : > { %v2079_v14 = vpop.f32.mrf.mxu1 }
 0x263   : > { %v2080_v17 = vadd.f32 %v2079_v14, %v6962_v38  ;;  %2940 = vmatprep.mubr.bf16.mxu0 %v2465_v13  ;;  %v2349_v22 = vmax.f32 %v2078_v16, 0.0 }
 0x264   : > { %v2081_v18 = vpop.f32.mrf.mxu1  ;;  %2941 = vmatmul.mubr.bf16.gmra.mxu0 %v2464_v15 }
 0x265   : > { %v2082_v20 = vadd.f32 %v2081_v18, %v6959_v32  ;;  %v2350_v23 = vmax.f32 %v2080_v17, 0.0  ;;  %v2536_v18 = vld [vmem:[%s7954_s6] sm:$0x3] }
 0x266   : > { %v2085_v21 = vpop.f32.mrf.mxu1 }
 0x267   : > { %v2351_v24 = vmax.f32 %v2082_v20, 0.0  ;;  %v2466_v33 = vpack.c.bf16 %v2350_v23, %v2348_v26  ;;  %v2086_v40 = vadd.f32 %v2085_v21, %v6962_v38  ;;  %v7155_v26 = vrot.slane %v2536_v18, %v6701_v31 }
 0x268   : > { %v2087_v25 = vpop.f32.mrf.mxu1 }
 0x269   : > { %v2467_v27 = vpack.c.bf16 %v2351_v24, %v2349_v22  ;;  %v2088_v36 = vadd.f32 %v2087_v25, %v6959_v32  ;;  %v2352_v2 = vmax.f32 %v2086_v40, 0.0  ;;  %v7152_v24 = vrot.slane %v2536_v18, %v6698_v30 }
 0x26a   : > { %v2089_v29 = vpop.f32.mrf.mxu1 }
 0x26b   : > { %v2090_v37 = vadd.f32 %v2089_v29, %v6962_v38  ;;  %2950 = vmatprep.mubr.bf16.mxu0 %v2467_v27  ;;  %v2353_v42 = vmax.f32 %v2088_v36, 0.0 }
 0x26c   : > { %v2091_v39 = vpop.f32.mrf.mxu1  ;;  %2951 = vmatmul.mubr.bf16.gmra.mxu0 %v2466_v33 }
 0x26d   : > { %v2092_v35 = vadd.f32 %v2091_v39, %v6959_v32  ;;  %v2354_v43 = vmax.f32 %v2090_v37, 0.0 }
 0x26e   : > { %v2095_v41 = vpop.f32.mrf.mxu1 }
 0x26f   : > { %v2355_v44 = vmax.f32 %v2092_v35, 0.0  ;;  %v2468_v47 = vpack.c.bf16 %v2354_v43, %v2352_v2  ;;  %v2096_v51 = vadd.f32 %v2095_v41, %v6962_v38 }
 0x270   : > { %v2097_v34 = vpop.f32.mrf.mxu1 }
 0x271   : > { %v2469_v45 = vpack.c.bf16 %v2355_v44, %v2353_v42  ;;  %v2098_v48 = vadd.f32 %v2097_v34, %v6959_v32  ;;  %v2356_v58 = vmax.f32 %v2096_v51, 0.0 }
 0x272   : > { %v2099_v46 = vpop.f32.mrf.mxu1 }
 0x273   : > { %v2100_v49 = vadd.f32 %v2099_v46, %v6962_v38  ;;  %2960 = vmatprep.mubr.bf16.mxu0 %v2469_v45  ;;  %v2357_v54 = vmax.f32 %v2098_v48, 0.0 }
 0x274   : > { %v2101_v50 = vpop.f32.mrf.mxu1  ;;  %2961 = vmatmul.mubr.bf16.gmra.mxu0 %v2468_v47 }
 0x275   : > { %v2102_v52 = vadd.f32 %v2101_v50, %v6959_v32  ;;  %v2358_v55 = vmax.f32 %v2100_v49, 0.0 }
 0x276   : > { %v2105_v53 = vpop.f32.mrf.mxu1 }
 0x277   : > { %v2359_v56 = vmax.f32 %v2102_v52, 0.0  ;;  %v2470_v61 = vpack.c.bf16 %v2358_v55, %v2356_v58  ;;  %v2106_v1 = vadd.f32 %v2105_v53, %v6962_v38 }
 0x278   : > { %v2107_v57 = vpop.f32.mrf.mxu1 }
 0x279   : > { %v2471_v59 = vpack.c.bf16 %v2359_v56, %v2357_v54  ;;  %v2108_v62 = vadd.f32 %v2107_v57, %v6959_v32  ;;  %v2360_v9 = vmax.f32 %v2106_v1, 0.0 }
 0x27a   : > { %v2109_v60 = vpop.f32.mrf.mxu1 }
 0x27b   : > { %v2110_v63 = vadd.f32 %v2109_v60, %v6962_v38  ;;  %2970 = vmatprep.mubr.bf16.mxu0 %v2471_v59  ;;  %v2361_v5 = vmax.f32 %v2108_v62, 0.0 }
 0x27c   : > { %v2111_v0 = vpop.f32.mrf.mxu1  ;;  %2971 = vmatmul.mubr.bf16.gmra.mxu0 %v2470_v61 }
 0x27d   : > { %v2112_v3 = vadd.f32 %v2111_v0, %v6959_v32  ;;  %v2362_v6 = vmax.f32 %v2110_v63, 0.0 }
 0x27e   : > { %v2115_v4 = vpop.f32.mrf.mxu1 }
 0x27f   : > { %v2363_v7 = vmax.f32 %v2112_v3, 0.0  ;;  %v2472_v12 = vpack.c.bf16 %v2362_v6, %v2360_v9  ;;  %v2116_v16 = vadd.f32 %v2115_v4, %v6962_v38 }
 0x280   : > { %v2117_v8 = vpop.f32.mrf.mxu1 }
 0x281   : > { %v2473_v10 = vpack.c.bf16 %v2363_v7, %v2361_v5  ;;  %v2118_v13 = vadd.f32 %v2117_v8, %v6959_v32  ;;  %v2364_v27 = vmax.f32 %v2116_v16, 0.0 }
 0x282   : > { %v2119_v11 = vpop.f32.mrf.mxu1 }
 0x283   : > { %v2120_v14 = vadd.f32 %v2119_v11, %v6962_v38  ;;  %2980 = vmatprep.mubr.bf16.mxu0 %v2473_v10  ;;  %v2365_v20 = vmax.f32 %v2118_v13, 0.0 }
 0x284   : > { %v2121_v15 = vpop.f32.mrf.mxu1  ;;  %v2742_v19 = vpop.f32.mrf.mxu0  ;;  %2981 = vmatmul.mubr.bf16.gmra.mxu0 %v2472_v12 }
 0x285   : > { %v2122_v17 = vadd.f32 %v2121_v15, %v6959_v32  ;;  %v2366_v21 = vmax.f32 %v2120_v14, 0.0  ;;  %v2743_v42 = vadd.f32 %v2742_v19, %v7155_v26 }
 0x286   : > { %v2125_v23 = vpop.f32.mrf.mxu1  ;;  %v2744_v25 = vpop.f32.mrf.mxu0 }
 0x287   : > { %v2367_v22 = vmax.f32 %v2122_v17, 0.0  ;;  %v2474_v39 = vpack.c.bf16 %v2366_v21, %v2364_v27  ;;  %v2745_v40 = vadd.f32 %v2744_v25, %v7152_v24  ;;  %v2126_v46 = vadd.f32 %v2125_v23, %v6962_v38 }
 0x288   : > { %v2127_v29 = vpop.f32.mrf.mxu1  ;;  %v2746_v33 = vpop.f32.mrf.mxu0  ;;  %v3141_v53 = vmax.f32 %v2743_v42, 0.0 }
 0x289   : > { %v2475_v36 = vpack.c.bf16 %v2367_v22, %v2365_v20  ;;  %v2747_v37 = vadd.f32 %v2746_v33, %v7155_v26  ;;  %v2128_v34 = vadd.f32 %v2127_v29, %v6959_v32  ;;  %v3142_v50 = vmax.f32 %v2745_v40, 0.0 }
 0x28a   : > { %v2129_v35 = vpop.f32.mrf.mxu1  ;;  %v2748_v41 = vpop.f32.mrf.mxu0  ;;  %v2368_v60 = vmax.f32 %v2126_v46, 0.0 }
 0x28b   : > { %2990 = vmatprep.mubr.bf16.mxu0 %v2475_v36  ;;  %v2130_v43 = vadd.f32 %v2129_v35, %v6962_v38  ;;  %v2749_v44 = vadd.f32 %v2748_v41, %v7152_v24  ;;  %v3143_v47 = vmax.f32 %v2747_v37, 0.0  ;;  %v2369_v56 = vmax.f32 %v2128_v34, 0.0 }
 0x28c   : > { %v2131_v2 = vpop.f32.mrf.mxu1  ;;  %v2752_v45 = vpop.f32.mrf.mxu0  ;;  %2991 = vmatmul.mubr.bf16.gmra.mxu0 %v2474_v39 }
 0x28d   : > { %v3144_v48 = vmax.f32 %v2749_v44, 0.0  ;;  %v2132_v49 = vadd.f32 %v2131_v2, %v6959_v32  ;;  %v2370_v54 = vmax.f32 %v2130_v43, 0.0  ;;  %v3301_v61 = vpack.c.bf16 %v3143_v47, %v3141_v53 }
 0x28e   : > { %v2135_v51 = vpop.f32.mrf.mxu1  ;;  %v2754_v52 = vpop.f32.mrf.mxu0  ;;  %v2753_v5 = vadd.f32 %v2752_v45, %v7155_v26 }
 0x28f   : > { %v2371_v55 = vmax.f32 %v2132_v49, 0.0  ;;  %v3302_v59 = vpack.c.bf16 %v3144_v48, %v3142_v50  ;;  %v2755_v63 = vadd.f32 %v2754_v52, %v7152_v24  ;;  %v2476_v4 = vpack.c.bf16 %v2370_v54, %v2368_v60 }
 0x290   : > { %v2137_v57 = vpop.f32.mrf.mxu1  ;;  %v2756_v58 = vpop.f32.mrf.mxu0  ;;  %v2136_v11 = vadd.f32 %v2135_v51, %v6962_v38  ;;  %v3145_v18 = vmax.f32 %v2753_v5, 0.0 }
 0x291   : > { %v2757_v62 = vadd.f32 %v2756_v58, %v7155_v26  ;;  %3617 = vmatprep.mubr.bf16.mxu1 %v3302_v59  ;;  %v2477_v3 = vpack.c.bf16 %v2371_v55, %v2369_v56  ;;  %v2138_v8 = vadd.f32 %v2137_v57, %v6959_v32  ;;  %v3146_v15 = vmax.f32 %v2755_v63, 0.0 }
 0x292   : > { %v2139_v0 = vpop.f32.mrf.mxu1  ;;  %v2758_v1 = vpop.f32.mrf.mxu0  ;;  %3618 = vmatmul.mubr.bf16.vlgmr.msra.gmra.mxu1 %v3301_v61  ;;  %v2372_v27 = vmax.f32 %v2136_v11, 0.0 }
 0x293   : > { %v2140_v6 = vadd.f32 %v2139_v0, %v6962_v38  ;;  %v2759_v7 = vadd.f32 %v2758_v1, %v7152_v24  ;;  %3000 = vmatprep.mubr.bf16.mxu0 %v2477_v3  ;;  %v3147_v12 = vmax.f32 %v2757_v62, 0.0  ;;  %v2373_v21 = vmax.f32 %v2138_v8, 0.0 }
 0x294   : > { %v2141_v9 = vpop.f32.mrf.mxu1  ;;  %v2762_v10 = vpop.f32.mrf.mxu0  ;;  %3001 = vmatmul.mubr.bf16.gmra.mxu0 %v2476_v4 }
 0x295   : > { %v3148_v13 = vmax.f32 %v2759_v7, 0.0  ;;  %v2142_v14 = vadd.f32 %v2141_v9, %v6959_v32  ;;  %v2374_v19 = vmax.f32 %v2140_v6, 0.0  ;;  %v3303_v29 = vpack.c.bf16 %v3147_v12, %v3145_v18 }
 0x296   : > { %v2145_v16 = vpop.f32.mrf.mxu1  ;;  %v2764_v17 = vpop.f32.mrf.mxu0  ;;  %v2763_v41 = vadd.f32 %v2762_v10, %v7155_v26 }
 0x297   : > { %v2375_v20 = vmax.f32 %v2142_v14, 0.0  ;;  %v3304_v25 = vpack.c.bf16 %v3148_v13, %v3146_v15  ;;  %v2765_v36 = vadd.f32 %v2764_v17, %v7152_v24  ;;  %v2478_v35 = vpack.c.bf16 %v2374_v19, %v2372_v27 }
 0x298   : > { %v2147_v22 = vpop.f32.mrf.mxu1  ;;  %v2766_v23 = vpop.f32.mrf.mxu0  ;;  %v2146_v45 = vadd.f32 %v2145_v16, %v6962_v38  ;;  %v3149_v52 = vmax.f32 %v2763_v41, 0.0 }
 0x299   : > { %v2767_v33 = vadd.f32 %v2766_v23, %v7155_v26  ;;  %3627 = vmatprep.mubr.bf16.mxu1 %v3304_v25  ;;  %v2479_v40 = vpack.c.bf16 %v2375_v20, %v2373_v21  ;;  %v2148_v44 = vadd.f32 %v2147_v22, %v6959_v32  ;;  %v3150_v49 = vmax.f32 %v2765_v36, 0.0 }
 0x29a   : > { %v2149_v37 = vpop.f32.mrf.mxu1  ;;  %v2768_v39 = vpop.f32.mrf.mxu0  ;;  %3628 = vmatmul.mubr.bf16.gmra.mxu1 %v3303_v29  ;;  %v2376_v59 = vmax.f32 %v2146_v45, 0.0 }
 0x29b   : > { %v2150_v42 = vadd.f32 %v2149_v37, %v6962_v38  ;;  %v2769_v43 = vadd.f32 %v2768_v39, %v7152_v24  ;;  %3010 = vmatprep.mubr.bf16.mxu0 %v2479_v40  ;;  %v3151_v46 = vmax.f32 %v2767_v33, 0.0  ;;  %v2377_v55 = vmax.f32 %v2148_v44, 0.0 }
 0x29c   : > { %v2151_v34 = vpop.f32.mrf.mxu1  ;;  %v2772_v2 = vpop.f32.mrf.mxu0  ;;  %3011 = vmatmul.mubr.bf16.gmra.mxu0 %v2478_v35 }
 0x29d   : > { %v3152_v47 = vmax.f32 %v2769_v43, 0.0  ;;  %v2152_v48 = vadd.f32 %v2151_v34, %v6959_v32  ;;  %v2378_v53 = vmax.f32 %v2150_v42, 0.0  ;;  %v3305_v60 = vpack.c.bf16 %v3151_v46, %v3149_v52 }
 0x29e   : > { %v2155_v50 = vpop.f32.mrf.mxu1  ;;  %v2774_v51 = vpop.f32.mrf.mxu0  ;;  %v2773_v4 = vadd.f32 %v2772_v2, %v7155_v26 }
 0x29f   : > { %v2379_v54 = vmax.f32 %v2152_v48, 0.0  ;;  %v3306_v58 = vpack.c.bf16 %v3152_v47, %v3150_v49  ;;  %v2775_v62 = vadd.f32 %v2774_v51, %v7152_v24  ;;  %v2480_v3 = vpack.c.bf16 %v2378_v53, %v2376_v59 }
 0x2a0   : > { %v2157_v56 = vpop.f32.mrf.mxu1  ;;  %v2776_v57 = vpop.f32.mrf.mxu0  ;;  %v2156_v10 = vadd.f32 %v2155_v50, %v6962_v38  ;;  %v3153_v17 = vmax.f32 %v2773_v4, 0.0 }
 0x2a1   : > { %v2777_v61 = vadd.f32 %v2776_v57, %v7155_v26  ;;  %3637 = vmatprep.mubr.bf16.mxu1 %v3306_v58  ;;  %v2481_v1 = vpack.c.bf16 %v2379_v54, %v2377_v55  ;;  %v2158_v7 = vadd.f32 %v2157_v56, %v6959_v32  ;;  %v3154_v14 = vmax.f32 %v2775_v62, 0.0 }
 0x2a2   : > { %v2159_v63 = vpop.f32.mrf.mxu1  ;;  %v2778_v0 = vpop.f32.mrf.mxu0  ;;  %3638 = vmatmul.mubr.bf16.gmra.mxu1 %v3305_v60  ;;  %v2380_v25 = vmax.f32 %v2156_v10, 0.0 }
 0x2a3   : > { %v2160_v5 = vadd.f32 %v2159_v63, %v6962_v38  ;;  %v2779_v6 = vadd.f32 %v2778_v0, %v7152_v24  ;;  %3020 = vmatprep.mubr.bf16.mxu0 %v2481_v1  ;;  %v3155_v11 = vmax.f32 %v2777_v61, 0.0  ;;  %v2381_v20 = vmax.f32 %v2158_v7, 0.0 }
 0x2a4   : > { %v2161_v8 = vpop.f32.mrf.mxu1  ;;  %v2782_v9 = vpop.f32.mrf.mxu0  ;;  %3021 = vmatmul.mubr.bf16.gmra.mxu0 %v2480_v3 }
 0x2a5   : > { %v3156_v12 = vmax.f32 %v2779_v6, 0.0  ;;  %v2162_v13 = vadd.f32 %v2161_v8, %v6959_v32  ;;  %v2382_v18 = vmax.f32 %v2160_v5, 0.0  ;;  %v3307_v27 = vpack.c.bf16 %v3155_v11, %v3153_v17 }
 0x2a6   : > { %v2165_v15 = vpop.f32.mrf.mxu1  ;;  %v2784_v16 = vpop.f32.mrf.mxu0  ;;  %v2783_v35 = vadd.f32 %v2782_v9, %v7155_v26 }
 0x2a7   : > { %v2383_v19 = vmax.f32 %v2162_v13, 0.0  ;;  %v3308_v23 = vpack.c.bf16 %v3156_v12, %v3154_v14  ;;  %v2785_v33 = vadd.f32 %v2784_v16, %v7152_v24  ;;  %v2482_v40 = vpack.c.bf16 %v2382_v18, %v2380_v25 }
 0x2a8   : > { %v2167_v21 = vpop.f32.mrf.mxu1  ;;  %v2786_v22 = vpop.f32.mrf.mxu0  ;;  %v2166_v2 = vadd.f32 %v2165_v15, %v6962_v38  ;;  %v3157_v51 = vmax.f32 %v2783_v35, 0.0 }
 0x2a9   : > { %v2787_v29 = vadd.f32 %v2786_v22, %v7155_v26  ;;  %3647 = vmatprep.mubr.bf16.mxu1 %v3308_v23  ;;  %v2483_v39 = vpack.c.bf16 %v2383_v19, %v2381_v20  ;;  %v2168_v43 = vadd.f32 %v2167_v21, %v6959_v32  ;;  %v3158_v48 = vmax.f32 %v2785_v33, 0.0 }
 0x2aa   : > { %v2169_v36 = vpop.f32.mrf.mxu1  ;;  %v2788_v37 = vpop.f32.mrf.mxu0  ;;  %3648 = vmatmul.mubr.bf16.gmra.mxu1 %v3307_v27  ;;  %v2384_v58 = vmax.f32 %v2166_v2, 0.0 }
 0x2ab   : > { %v2170_v41 = vadd.f32 %v2169_v36, %v6962_v38  ;;  %v2789_v42 = vadd.f32 %v2788_v37, %v7152_v24  ;;  %3030 = vmatprep.mubr.bf16.mxu0 %v2483_v39  ;;  %v3159_v45 = vmax.f32 %v2787_v29, 0.0  ;;  %v2385_v54 = vmax.f32 %v2168_v43, 0.0 }
 0x2ac   : > { %v2171_v44 = vpop.f32.mrf.mxu1  ;;  %v2792_v34 = vpop.f32.mrf.mxu0  ;;  %3031 = vmatmul.mubr.bf16.gmra.mxu0 %v2482_v40 }
 0x2ad   : > { %v3160_v46 = vmax.f32 %v2789_v42, 0.0  ;;  %v2172_v47 = vadd.f32 %v2171_v44, %v6959_v32  ;;  %v2386_v52 = vmax.f32 %v2170_v41, 0.0  ;;  %v3309_v59 = vpack.c.bf16 %v3159_v45, %v3157_v51 }
 0x2ae   : > { %v2175_v49 = vpop.f32.mrf.mxu1  ;;  %v2794_v50 = vpop.f32.mrf.mxu0  ;;  %v2793_v3 = vadd.f32 %v2792_v34, %v7155_v26 }
 0x2af   : > { %v2387_v53 = vmax.f32 %v2172_v47, 0.0  ;;  %v3310_v57 = vpack.c.bf16 %v3160_v46, %v3158_v48  ;;  %v2795_v61 = vadd.f32 %v2794_v50, %v7152_v24  ;;  %v2484_v1 = vpack.c.bf16 %v2386_v52, %v2384_v58 }
 0x2b0   : > { %v2177_v55 = vpop.f32.mrf.mxu1  ;;  %v2796_v56 = vpop.f32.mrf.mxu0  ;;  %v2176_v9 = vadd.f32 %v2175_v49, %v6962_v38  ;;  %v3161_v16 = vmax.f32 %v2793_v3, 0.0 }
 0x2b1   : > { %v2797_v60 = vadd.f32 %v2796_v56, %v7155_v26  ;;  %3657 = vmatprep.mubr.bf16.mxu1 %v3310_v57  ;;  %v2485_v0 = vpack.c.bf16 %v2387_v53, %v2385_v54  ;;  %v2178_v6 = vadd.f32 %v2177_v55, %v6959_v32  ;;  %v3162_v13 = vmax.f32 %v2795_v61, 0.0 }
 0x2b2   : > { %v2179_v62 = vpop.f32.mrf.mxu1  ;;  %v2798_v63 = vpop.f32.mrf.mxu0  ;;  %3658 = vmatmul.mubr.bf16.gmra.mxu1 %v3309_v59  ;;  %v2388_v23 = vmax.f32 %v2176_v9, 0.0 }
 0x2b3   : > { %v2180_v4 = vadd.f32 %v2179_v62, %v6962_v38  ;;  %v2799_v5 = vadd.f32 %v2798_v63, %v7152_v24  ;;  %3040 = vmatprep.mubr.bf16.mxu0 %v2485_v0  ;;  %v3163_v10 = vmax.f32 %v2797_v60, 0.0  ;;  %v2389_v19 = vmax.f32 %v2178_v6, 0.0 }
 0x2b4   : > { %v2181_v7 = vpop.f32.mrf.mxu1  ;;  %v2802_v8 = vpop.f32.mrf.mxu0  ;;  %3041 = vmatmul.mubr.bf16.gmra.mxu0 %v2484_v1 }
 0x2b5   : > { %v3164_v11 = vmax.f32 %v2799_v5, 0.0  ;;  %v2182_v12 = vadd.f32 %v2181_v7, %v6959_v32  ;;  %v2390_v17 = vmax.f32 %v2180_v4, 0.0  ;;  %v3311_v25 = vpack.c.bf16 %v3163_v10, %v3161_v16 }
 0x2b6   : > { %v2185_v14 = vpop.f32.mrf.mxu1  ;;  %v2804_v15 = vpop.f32.mrf.mxu0  ;;  %v2803_v40 = vadd.f32 %v2802_v8, %v7155_v26 }
 0x2b7   : > { %v2391_v18 = vmax.f32 %v2182_v12, 0.0  ;;  %v3312_v22 = vpack.c.bf16 %v3164_v11, %v3162_v13  ;;  %v2805_v29 = vadd.f32 %v2804_v15, %v7152_v24  ;;  %v2486_v39 = vpack.c.bf16 %v2390_v17, %v2388_v23 }
 0x2b8   : > { %v2187_v20 = vpop.f32.mrf.mxu1  ;;  %v2806_v21 = vpop.f32.mrf.mxu0  ;;  %v2186_v34 = vadd.f32 %v2185_v14, %v6962_v38  ;;  %v3165_v50 = vmax.f32 %v2803_v40, 0.0 }
 0x2b9   : > { %v2807_v27 = vadd.f32 %v2806_v21, %v7155_v26  ;;  %3667 = vmatprep.mubr.bf16.mxu1 %v3312_v22  ;;  %v2487_v37 = vpack.c.bf16 %v2391_v18, %v2389_v19  ;;  %v2188_v42 = vadd.f32 %v2187_v20, %v6959_v32  ;;  %v3166_v47 = vmax.f32 %v2805_v29, 0.0 }
 0x2ba   : > { %v2189_v33 = vpop.f32.mrf.mxu1  ;;  %v2808_v36 = vpop.f32.mrf.mxu0  ;;  %3668 = vmatmul.mubr.bf16.gmra.mxu1 %v3311_v25  ;;  %v2392_v57 = vmax.f32 %v2186_v34, 0.0 }
 0x2bb   : > { %v2190_v35 = vadd.f32 %v2189_v33, %v6962_v38  ;;  %v2809_v41 = vadd.f32 %v2808_v36, %v7152_v24  ;;  %3050 = vmatprep.mubr.bf16.mxu0 %v2487_v37  ;;  %v3167_v2 = vmax.f32 %v2807_v27, 0.0  ;;  %v2393_v53 = vmax.f32 %v2188_v42, 0.0 }
 0x2bc   : > { %v2191_v43 = vpop.f32.mrf.mxu1  ;;  %v2812_v44 = vpop.f32.mrf.mxu0  ;;  %3051 = vmatmul.mubr.bf16.gmra.mxu0 %v2486_v39 }
 0x2bd   : > { %v3168_v45 = vmax.f32 %v2809_v41, 0.0  ;;  %v2192_v46 = vadd.f32 %v2191_v43, %v6959_v32  ;;  %v2394_v51 = vmax.f32 %v2190_v35, 0.0  ;;  %v3313_v58 = vpack.c.bf16 %v3167_v2, %v3165_v50 }
 0x2be   : > { %v2195_v48 = vpop.f32.mrf.mxu1  ;;  %v2814_v49 = vpop.f32.mrf.mxu0  ;;  %v2813_v1 = vadd.f32 %v2812_v44, %v7155_v26 }
 0x2bf   : > { %v2395_v52 = vmax.f32 %v2192_v46, 0.0  ;;  %v3314_v56 = vpack.c.bf16 %v3168_v45, %v3166_v47  ;;  %v2815_v60 = vadd.f32 %v2814_v49, %v7152_v24  ;;  %v2488_v0 = vpack.c.bf16 %v2394_v51, %v2392_v57 }
 0x2c0   : > { %v2197_v54 = vpop.f32.mrf.mxu1  ;;  %v2816_v55 = vpop.f32.mrf.mxu0  ;;  %v2196_v8 = vadd.f32 %v2195_v48, %v6962_v38  ;;  %v3169_v15 = vmax.f32 %v2813_v1, 0.0 }
 0x2c1   : > { %v2817_v59 = vadd.f32 %v2816_v55, %v7155_v26  ;;  %3677 = vmatprep.mubr.bf16.mxu1 %v3314_v56  ;;  %v2489_v63 = vpack.c.bf16 %v2395_v52, %v2393_v53  ;;  %v2198_v5 = vadd.f32 %v2197_v54, %v6959_v32  ;;  %v3170_v12 = vmax.f32 %v2815_v60, 0.0 }
 0x2c2   : > { %v2199_v61 = vpop.f32.mrf.mxu1  ;;  %v2818_v62 = vpop.f32.mrf.mxu0  ;;  %3678 = vmatmul.mubr.bf16.gmra.mxu1 %v3313_v58  ;;  %v2396_v22 = vmax.f32 %v2196_v8, 0.0 }
 0x2c3   : > { %v2200_v3 = vadd.f32 %v2199_v61, %v6962_v38  ;;  %v2819_v4 = vadd.f32 %v2818_v62, %v7152_v24  ;;  %3060 = vmatprep.mubr.bf16.mxu0 %v2489_v63  ;;  %v3171_v9 = vmax.f32 %v2817_v59, 0.0  ;;  %v2397_v18 = vmax.f32 %v2198_v5, 0.0 }
 0x2c4   : > { %v2201_v6 = vpop.f32.mrf.mxu1  ;;  %v2822_v7 = vpop.f32.mrf.mxu0  ;;  %3061 = vmatmul.mubr.bf16.gmra.mxu0 %v2488_v0 }
 0x2c5   : > { %v3172_v10 = vmax.f32 %v2819_v4, 0.0  ;;  %v2202_v11 = vadd.f32 %v2201_v6, %v6959_v32  ;;  %v2398_v16 = vmax.f32 %v2200_v3, 0.0  ;;  %v3315_v23 = vpack.c.bf16 %v3171_v9, %v3169_v15 }
 0x2c6   : > { %v2205_v13 = vpop.f32.mrf.mxu1  ;;  %v2824_v14 = vpop.f32.mrf.mxu0  ;;  %v2823_v39 = vadd.f32 %v2822_v7, %v7155_v26 }
 0x2c7   : > { %v2399_v17 = vmax.f32 %v2202_v11, 0.0  ;;  %v3316_v21 = vpack.c.bf16 %v3172_v10, %v3170_v12  ;;  %v2825_v27 = vadd.f32 %v2824_v14, %v7152_v24  ;;  %v2490_v37 = vpack.c.bf16 %v2398_v16, %v2396_v22 }
 0x2c8   : > { %v2207_v19 = vpop.f32.mrf.mxu1  ;;  %v2826_v20 = vpop.f32.mrf.mxu0  ;;  %v2206_v44 = vadd.f32 %v2205_v13, %v6962_v38  ;;  %v3173_v49 = vmax.f32 %v2823_v39, 0.0 }
 0x2c9   : > { %v2827_v25 = vadd.f32 %v2826_v20, %v7155_v26  ;;  %3687 = vmatprep.mubr.bf16.mxu1 %v3316_v21  ;;  %v2491_v36 = vpack.c.bf16 %v2399_v17, %v2397_v18  ;;  %v2208_v41 = vadd.f32 %v2207_v19, %v6959_v32  ;;  %v3174_v46 = vmax.f32 %v2825_v27, 0.0 }
 0x2ca   : > { %v2209_v29 = vpop.f32.mrf.mxu1  ;;  %v2828_v33 = vpop.f32.mrf.mxu0  ;;  %3688 = vmatmul.mubr.bf16.gmra.mxu1 %v3315_v23  ;;  %v2400_v56 = vmax.f32 %v2206_v44, 0.0 }
 0x2cb   : > { %v2210_v40 = vadd.f32 %v2209_v29, %v6962_v38  ;;  %v2829_v35 = vadd.f32 %v2828_v33, %v7152_v24  ;;  %3070 = vmatprep.mubr.bf16.mxu0 %v2491_v36  ;;  %v3175_v34 = vmax.f32 %v2827_v25, 0.0  ;;  %v2401_v52 = vmax.f32 %v2208_v41, 0.0 }
 0x2cc   : > { %v2211_v42 = vpop.f32.mrf.mxu1  ;;  %v2832_v43 = vpop.f32.mrf.mxu0  ;;  %3071 = vmatmul.mubr.bf16.gmra.mxu0 %v2490_v37 }
 0x2cd   : > { %v3176_v2 = vmax.f32 %v2829_v35, 0.0  ;;  %v2212_v45 = vadd.f32 %v2211_v42, %v6959_v32  ;;  %v2402_v50 = vmax.f32 %v2210_v40, 0.0  ;;  %v3317_v57 = vpack.c.bf16 %v3175_v34, %v3173_v49 }
 0x2ce   : > { %v2215_v47 = vpop.f32.mrf.mxu1  ;;  %v2834_v48 = vpop.f32.mrf.mxu0  ;;  %v2833_v0 = vadd.f32 %v2832_v43, %v7155_v26 }
 0x2cf   : > { %v2403_v51 = vmax.f32 %v2212_v45, 0.0  ;;  %v3318_v55 = vpack.c.bf16 %v3176_v2, %v3174_v46  ;;  %v2835_v59 = vadd.f32 %v2834_v48, %v7152_v24  ;;  %v2492_v63 = vpack.c.bf16 %v2402_v50, %v2400_v56 }
 0x2d0   : > { %v2217_v53 = vpop.f32.mrf.mxu1  ;;  %v2836_v54 = vpop.f32.mrf.mxu0  ;;  %v2216_v7 = vadd.f32 %v2215_v47, %v6962_v38  ;;  %v3177_v14 = vmax.f32 %v2833_v0, 0.0 }
 0x2d1   : > { %v2837_v58 = vadd.f32 %v2836_v54, %v7155_v26  ;;  %3697 = vmatprep.mubr.bf16.mxu1 %v3318_v55  ;;  %v2493_v62 = vpack.c.bf16 %v2403_v51, %v2401_v52  ;;  %v2218_v4 = vadd.f32 %v2217_v53, %v6959_v32  ;;  %v3178_v11 = vmax.f32 %v2835_v59, 0.0 }
 0x2d2   : > { %v2219_v60 = vpop.f32.mrf.mxu1  ;;  %v2838_v61 = vpop.f32.mrf.mxu0  ;;  %3698 = vmatmul.mubr.bf16.gmra.mxu1 %v3317_v57  ;;  %v2404_v21 = vmax.f32 %v2216_v7, 0.0 }
 0x2d3   : > { %v2220_v1 = vadd.f32 %v2219_v60, %v6962_v38  ;;  %v2839_v3 = vadd.f32 %v2838_v61, %v7152_v24  ;;  %3080 = vmatprep.mubr.bf16.mxu0 %v2493_v62  ;;  %v3179_v8 = vmax.f32 %v2837_v58, 0.0  ;;  %v2405_v17 = vmax.f32 %v2218_v4, 0.0 }
 0x2d4   : > { %v2221_v5 = vpop.f32.mrf.mxu1  ;;  %v2842_v6 = vpop.f32.mrf.mxu0  ;;  %3081 = vmatmul.mubr.bf16.gmra.mxu0 %v2492_v63 }
 0x2d5   : > { %v3180_v9 = vmax.f32 %v2839_v3, 0.0  ;;  %v2222_v10 = vadd.f32 %v2221_v5, %v6959_v32  ;;  %v2406_v15 = vmax.f32 %v2220_v1, 0.0  ;;  %v3319_v22 = vpack.c.bf16 %v3179_v8, %v3177_v14 }
 0x2d6   : > { %v2225_v12 = vpop.f32.mrf.mxu1  ;;  %v2844_v13 = vpop.f32.mrf.mxu0  ;;  %v2843_v37 = vadd.f32 %v2842_v6, %v7155_v26 }
 0x2d7   : > { %v2407_v16 = vmax.f32 %v2222_v10, 0.0  ;;  %v3320_v20 = vpack.c.bf16 %v3180_v9, %v3178_v11  ;;  %v2845_v25 = vadd.f32 %v2844_v13, %v7152_v24  ;;  %v2494_v36 = vpack.c.bf16 %v2406_v15, %v2404_v21 }
 0x2d8   : > { %v2227_v18 = vpop.f32.mrf.mxu1  ;;  %v2846_v19 = vpop.f32.mrf.mxu0  ;;  %v2226_v43 = vadd.f32 %v2225_v12, %v6962_v38  ;;  %v3181_v48 = vmax.f32 %v2843_v37, 0.0 }
 0x2d9   : > { %v2847_v23 = vadd.f32 %v2846_v19, %v7155_v26  ;;  %3707 = vmatprep.mubr.bf16.mxu1 %v3320_v20  ;;  %v2495_v33 = vpack.c.bf16 %v2407_v16, %v2405_v17  ;;  %v2228_v35 = vadd.f32 %v2227_v18, %v6959_v32  ;;  %v3182_v45 = vmax.f32 %v2845_v25, 0.0  ;;  %v6113_v25 = vld [vmem:[%s7957_s9 + $0x74] ss:$8 sps:$4 sm:$0xff]  }
 0x2da   : > { %v2229_v27 = vpop.f32.mrf.mxu1  ;;  %v2848_v29 = vpop.f32.mrf.mxu0  ;;  %3708 = vmatmul.mubr.bf16.gmra.mxu1 %v3319_v22  ;;  %v2408_v55 = vmax.f32 %v2226_v43, 0.0  ;;  %5035 = vmatprep.subr.bf16.mxu0 %v6113_v25 }
 0x2db   : > { %v2230_v39 = vadd.f32 %v2229_v27, %v6962_v38  ;;  %v2849_v40 = vadd.f32 %v2848_v29, %v7152_v24  ;;  %3090 = vmatprep.mubr.bf16.mxu0 %v2495_v33  ;;  %v3183_v44 = vmax.f32 %v2847_v23, 0.0  ;;  %v2409_v51 = vmax.f32 %v2228_v35, 0.0  ;;  %v6111_v23 = vld [vmem:[%s7957_s9 + $0x70] ss:$8 sps:$4 sm:$0xff]  }
 0x2dc   : > { %v2231_v41 = vpop.f32.mrf.mxu1  ;;  %v2852_v42 = vpop.f32.mrf.mxu0  ;;  %3091 = vmatmul.mubr.bf16.gmra.mxu0 %v2494_v36 }
 0x2dd   : > { %v3184_v34 = vmax.f32 %v2849_v40, 0.0  ;;  %v2232_v2 = vadd.f32 %v2231_v41, %v6959_v32  ;;  %v2410_v49 = vmax.f32 %v2230_v39, 0.0  ;;  %v3321_v56 = vpack.c.bf16 %v3183_v44, %v3181_v48  ;;  %5036 = vmatpush1.bf16.msra.mxu0 %v6111_v23 }
 0x2de   : > { %v2235_v46 = vpop.f32.mrf.mxu1  ;;  %v2854_v47 = vpop.f32.mrf.mxu0  ;;  %v2853_v63 = vadd.f32 %v2852_v42, %v7155_v26 }
 0x2df   : > { %v2411_v50 = vmax.f32 %v2232_v2, 0.0  ;;  %v3322_v54 = vpack.c.bf16 %v3184_v34, %v3182_v45  ;;  %v2855_v58 = vadd.f32 %v2854_v47, %v7152_v24  ;;  %v2496_v62 = vpack.c.bf16 %v2410_v49, %v2408_v55 }
 0x2e0   : > { %v2237_v52 = vpop.f32.mrf.mxu1  ;;  %v2856_v53 = vpop.f32.mrf.mxu0  ;;  %v2236_v6 = vadd.f32 %v2235_v46, %v6962_v38  ;;  %v3185_v13 = vmax.f32 %v2853_v63, 0.0 }
 0x2e1   : > { %v2857_v57 = vadd.f32 %v2856_v53, %v7155_v26  ;;  %3717 = vmatprep.mubr.bf16.mxu1 %v3322_v54  ;;  %v2497_v61 = vpack.c.bf16 %v2411_v50, %v2409_v51  ;;  %v2238_v3 = vadd.f32 %v2237_v52, %v6959_v32  ;;  %v3186_v10 = vmax.f32 %v2855_v58, 0.0 }
 0x2e2   : > { %v2239_v59 = vpop.f32.mrf.mxu1  ;;  %v2858_v60 = vpop.f32.mrf.mxu0  ;;  %3718 = vmatmul.mubr.bf16.gmra.mxu1 %v3321_v56  ;;  %v2412_v20 = vmax.f32 %v2236_v6, 0.0 }
 0x2e3   : > { %v2240_v0 = vadd.f32 %v2239_v59, %v6962_v38  ;;  %v2859_v1 = vadd.f32 %v2858_v60, %v7152_v24  ;;  %3100 = vmatprep.mubr.bf16.mxu0 %v2497_v61  ;;  %v3187_v7 = vmax.f32 %v2857_v57, 0.0  ;;  %v2413_v16 = vmax.f32 %v2238_v3, 0.0 }
 0x2e4   : > { %v2241_v4 = vpop.f32.mrf.mxu1  ;;  %v2862_v5 = vpop.f32.mrf.mxu0  ;;  %3101 = vmatmul.mubr.bf16.gmra.mxu0 %v2496_v62 }
 0x2e5   : > { %v3188_v8 = vmax.f32 %v2859_v1, 0.0  ;;  %v2242_v9 = vadd.f32 %v2241_v4, %v6959_v32  ;;  %v2414_v14 = vmax.f32 %v2240_v0, 0.0  ;;  %v3323_v21 = vpack.c.bf16 %v3187_v7, %v3185_v13 }
 0x2e6   : > { %v2245_v11 = vpop.f32.mrf.mxu1  ;;  %v2864_v12 = vpop.f32.mrf.mxu0  ;;  %v2863_v27 = vadd.f32 %v2862_v5, %v7155_v26 }
 0x2e7   : > { %v2415_v15 = vmax.f32 %v2242_v9, 0.0  ;;  %v3324_v19 = vpack.c.bf16 %v3188_v8, %v3186_v10  ;;  %v2865_v29 = vadd.f32 %v2864_v12, %v7152_v24  ;;  %v2498_v39 = vpack.c.bf16 %v2414_v14, %v2412_v20 }
 0x2e8   : > { %v2247_v17 = vpop.f32.mrf.mxu1  ;;  %v2866_v18 = vpop.f32.mrf.mxu0  ;;  %v2246_v44 = vadd.f32 %v2245_v11, %v6962_v38  ;;  %v3189_v49 = vmax.f32 %v2863_v27, 0.0 }
 0x2e9   : > { %v2867_v22 = vadd.f32 %v2866_v18, %v7155_v26  ;;  %3727 = vmatprep.mubr.bf16.mxu1 %v3324_v19  ;;  %v2499_v37 = vpack.c.bf16 %v2415_v15, %v2413_v16  ;;  %v2248_v41 = vadd.f32 %v2247_v17, %v6959_v32  ;;  %v3190_v46 = vmax.f32 %v2865_v29, 0.0 }
 0x2ea   : > { %v2249_v33 = vpop.f32.mrf.mxu1  ;;  %v2868_v36 = vpop.f32.mrf.mxu0  ;;  %3728 = vmatmul.mubr.bf16.gmra.mxu1 %v3323_v21  ;;  %v2416_v56 = vmax.f32 %v2246_v44, 0.0 }
 0x2eb   : > { %v2250_v40 = vadd.f32 %v2249_v33, %v6962_v38  ;;  %v2869_v35 = vadd.f32 %v2868_v36, %v7152_v24  ;;  %3110 = vmatprep.mubr.bf16.mxu0 %v2499_v37  ;;  %v3191_v34 = vmax.f32 %v2867_v22, 0.0  ;;  %v2417_v52 = vmax.f32 %v2248_v41, 0.0  ;;  %v6114_v33 = vld [vmem:[%s7957_s9 + $0x60] ss:$8 sps:$4 sm:$0xff]   ;;  %v6116_v36 = vld [vmem:[%s7957_s9 + $0x64] ss:$8 sps:$4 sm:$0xff]  }
 0x2ec   : > { %v2251_v42 = vpop.f32.mrf.mxu1  ;;  %v2872_v43 = vpop.f32.mrf.mxu0  ;;  %3111 = vmatmul.mubr.bf16.gmra.mxu0 %v2498_v39  ;;  %5037 = vmatprep.subr.bf16.mxu0 %v6116_v36 }
 0x2ed   : > { %v3192_v2 = vmax.f32 %v2869_v35, 0.0  ;;  %v2252_v45 = vadd.f32 %v2251_v42, %v6959_v32  ;;  %v2418_v50 = vmax.f32 %v2250_v40, 0.0  ;;  %v3325_v57 = vpack.c.bf16 %v3191_v34, %v3189_v49  ;;  %5038 = vmatpush1.bf16.msra.mxu0 %v6114_v33 }
 0x2ee   : > { %v2255_v47 = vpop.f32.mrf.mxu1  ;;  %v2874_v48 = vpop.f32.mrf.mxu0  ;;  %v2873_v60 = vadd.f32 %v2872_v43, %v7155_v26 }
 0x2ef   : > { %v2419_v51 = vmax.f32 %v2252_v45, 0.0  ;;  %v3326_v55 = vpack.c.bf16 %v3192_v2, %v3190_v46  ;;  %v2875_v58 = vadd.f32 %v2874_v48, %v7152_v24  ;;  %v2500_v0 = vpack.c.bf16 %v2418_v50, %v2416_v56 }
 0x2f0   : > { %v2257_v53 = vpop.f32.mrf.mxu1  ;;  %v2876_v54 = vpop.f32.mrf.mxu0  ;;  %v2256_v5 = vadd.f32 %v2255_v47, %v6962_v38  ;;  %v3193_v12 = vmax.f32 %v2873_v60, 0.0 }
 0x2f1   : > { %v2877_v59 = vadd.f32 %v2876_v54, %v7155_v26  ;;  %3737 = vmatprep.mubr.bf16.mxu1 %v3326_v55  ;;  %v2501_v63 = vpack.c.bf16 %v2419_v51, %v2417_v52  ;;  %v2258_v1 = vadd.f32 %v2257_v53, %v6959_v32  ;;  %v3194_v8 = vmax.f32 %v2875_v58, 0.0 }
 0x2f2   : > { %v2259_v61 = vpop.f32.mrf.mxu1  ;;  %v2878_v62 = vpop.f32.mrf.mxu0  ;;  %3738 = vmatmul.mubr.bf16.gmra.mxu1 %v3325_v57  ;;  %v2420_v18 = vmax.f32 %v2256_v5, 0.0 }
 0x2f3   : > { %v2260_v3 = vadd.f32 %v2259_v61, %v6962_v38  ;;  %v2879_v4 = vadd.f32 %v2878_v62, %v7152_v24  ;;  %3120 = vmatprep.mubr.bf16.mxu0 %v2501_v63  ;;  %v3195_v9 = vmax.f32 %v2877_v59, 0.0  ;;  %v2421_v14 = vmax.f32 %v2258_v1, 0.0 }
 0x2f4   : > { %v2261_v6 = vpop.f32.mrf.mxu1  ;;  %v2882_v7 = vpop.f32.mrf.mxu0  ;;  %3121 = vmatmul.mubr.bf16.gmra.mxu0 %v2500_v0 }
 0x2f5   : > { %v3196_v10 = vmax.f32 %v2879_v4, 0.0  ;;  %v2262_v11 = vadd.f32 %v2261_v6, %v6959_v32  ;;  %v2422_v15 = vmax.f32 %v2260_v3, 0.0  ;;  %v3327_v20 = vpack.c.bf16 %v3195_v9, %v3193_v12 }
 0x2f6   : > { %v2884_v13 = vpop.f32.mrf.mxu0  ;;  %v2883_v32 = vadd.f32 %v2882_v7, %v7155_v26 }
 0x2f7   : > { %v2423_v16 = vmax.f32 %v2262_v11, 0.0  ;;  %v3328_v17 = vpack.c.bf16 %v3196_v10, %v3194_v8  ;;  %v2885_v38 = vadd.f32 %v2884_v13, %v7152_v24  ;;  %v2502_v25 = vpack.c.bf16 %v2422_v15, %v2420_v18  ;;  %v6117_v10 = vld [vmem:[%s7957_s9 + $0x50] ss:$8 sps:$4 sm:$0xff]   ;;  %v6119_v11 = vld [vmem:[%s7957_s9 + $0x54] ss:$8 sps:$4 sm:$0xff]  }
 0x2f8   : > { %v2886_v19 = vpop.f32.mrf.mxu0  ;;  %v3197_v41 = vmax.f32 %v2883_v32, 0.0  ;;  %5039 = vmatprep.subr.bf16.mxu0 %v6119_v11 }
 0x2f9   : > { %v2887_v21 = vadd.f32 %v2886_v19, %v7155_v26  ;;  %3747 = vmatprep.mubr.bf16.mxu1 %v3328_v17  ;;  %v2503_v22 = vpack.c.bf16 %v2423_v16, %v2421_v14  ;;  %v3198_v37 = vmax.f32 %v2885_v38, 0.0  ;;  %5040 = vmatpush1.bf16.msra.mxu0 %v6117_v10 }
 0x2fa   : > { %v2888_v23 = vpop.f32.mrf.mxu0  ;;  %3748 = vmatmul.mubr.bf16.gmra.mxu1 %v3327_v20 }
 0x2fb   : > { %v2889_v27 = vadd.f32 %v2888_v23, %v7152_v24  ;;  %3130 = vmatprep.mubr.bf16.mxu0 %v2503_v22  ;;  %v3199_v39 = vmax.f32 %v2887_v21, 0.0 }
 0x2fc   : > { %v2892_v29 = vpop.f32.mrf.mxu0  ;;  %3131 = vmatmul.mubr.bf16.gmra.mxu0 %v2502_v25 }
 0x2fd   : > { %v3200_v40 = vmax.f32 %v2889_v27, 0.0  ;;  %v3329_v44 = vpack.c.bf16 %v3199_v39, %v3197_v41  ;;  %v2893_v46 = vadd.f32 %v2892_v29, %v7155_v26 }
 0x2fe   : > { %v2894_v35 = vpop.f32.mrf.mxu0 }
 0x2ff   : > { %v3330_v42 = vpack.c.bf16 %v3200_v40, %v3198_v37  ;;  %v2895_v34 = vadd.f32 %v2894_v35, %v7152_v24  ;;  %v3201_v53 = vmax.f32 %v2893_v46, 0.0 }
 0x300   : > { %v2896_v43 = vpop.f32.mrf.mxu0 }
 0x301   : > { %v2897_v2 = vadd.f32 %v2896_v43, %v7155_v26  ;;  %3757 = vmatprep.mubr.bf16.mxu1 %v3330_v42  ;;  %v3202_v49 = vmax.f32 %v2895_v34, 0.0 }
 0x302   : > { %v2898_v45 = vpop.f32.mrf.mxu0  ;;  %3758 = vmatmul.mubr.bf16.gmra.mxu1 %v3329_v44 }
 0x303   : > { %v2899_v47 = vadd.f32 %v2898_v45, %v7152_v24  ;;  %v3203_v50 = vmax.f32 %v2897_v2, 0.0 }
 0x304   : > { %v2902_v48 = vpop.f32.mrf.mxu0 }
 0x305   : > { %v3204_v51 = vmax.f32 %v2899_v47, 0.0  ;;  %v3331_v56 = vpack.c.bf16 %v3203_v50, %v3201_v53  ;;  %v2903_v60 = vadd.f32 %v2902_v48, %v7155_v26  ;;  %v6120_v48 = vld [vmem:[%s7957_s9 + $0x40] ss:$8 sps:$4 sm:$0xff]  }
 0x306   : > { %v2904_v52 = vpop.f32.mrf.mxu0 }
 0x307   : > { %v3332_v54 = vpack.c.bf16 %v3204_v51, %v3202_v49  ;;  %v2905_v57 = vadd.f32 %v2904_v52, %v7152_v24  ;;  %v3205_v4 = vmax.f32 %v2903_v60, 0.0  ;;  %v6122_v49 = vld [vmem:[%s7957_s9 + $0x44] ss:$8 sps:$4 sm:$0xff]  }
 0x308   : > { %v2906_v55 = vpop.f32.mrf.mxu0  ;;  %5041 = vmatprep.subr.bf16.mxu0 %v6122_v49 }
 0x309   : > { %v2907_v58 = vadd.f32 %v2906_v55, %v7155_v26  ;;  %3767 = vmatprep.mubr.bf16.mxu1 %v3332_v54  ;;  %v3206_v63 = vmax.f32 %v2905_v57, 0.0  ;;  %5042 = vmatpush1.bf16.msra.mxu0 %v6120_v48 }
 0x30a   : > { %v2908_v59 = vpop.f32.mrf.mxu0  ;;  %3768 = vmatmul.mubr.bf16.gmra.mxu1 %v3331_v56 }
 0x30b   : > { %v2909_v61 = vadd.f32 %v2908_v59, %v7152_v24  ;;  %v3207_v0 = vmax.f32 %v2907_v58, 0.0 }
 0x30c   : > { %v2912_v62 = vpop.f32.mrf.mxu0 }
 0x30d   : > { %v3208_v1 = vmax.f32 %v2909_v61, 0.0  ;;  %v3333_v7 = vpack.c.bf16 %v3207_v0, %v3205_v4  ;;  %v2913_v13 = vadd.f32 %v2912_v62, %v7155_v26 }
 0x30e   : > { %v2914_v3 = vpop.f32.mrf.mxu0 }
 0x30f   : > { %v3334_v5 = vpack.c.bf16 %v3208_v1, %v3206_v63  ;;  %v2915_v8 = vadd.f32 %v2914_v3, %v7152_v24  ;;  %v3209_v20 = vmax.f32 %v2913_v13, 0.0 }
 0x310   : > { %v2916_v6 = vpop.f32.mrf.mxu0 }
 0x311   : > { %v2917_v9 = vadd.f32 %v2916_v6, %v7155_v26  ;;  %3777 = vmatprep.mubr.bf16.mxu1 %v3334_v5  ;;  %v3210_v16 = vmax.f32 %v2915_v8, 0.0 }
 0x312   : > { %v2918_v12 = vpop.f32.mrf.mxu0  ;;  %3778 = vmatmul.mubr.bf16.gmra.mxu1 %v3333_v7 }
 0x313   : > { %v2919_v14 = vadd.f32 %v2918_v12, %v7152_v24  ;;  %v3211_v17 = vmax.f32 %v2917_v9, 0.0 }
 0x314   : > { %v2922_v15 = vpop.f32.mrf.mxu0 }
 0x315   : > { %v3212_v18 = vmax.f32 %v2919_v14, 0.0  ;;  %v3335_v22 = vpack.c.bf16 %v3211_v17, %v3209_v20  ;;  %v2923_v27 = vadd.f32 %v2922_v15, %v7155_v26 }
 0x316   : > { %v2924_v19 = vpop.f32.mrf.mxu0 }
 0x317   : > { %v3336_v38 = vpack.c.bf16 %v3212_v18, %v3210_v16  ;;  %v2925_v23 = vadd.f32 %v2924_v19, %v7152_v24  ;;  %v3213_v35 = vmax.f32 %v2923_v27, 0.0 }
 0x318   : > { %v2926_v21 = vpop.f32.mrf.mxu0 }
 0x319   : > { %v2927_v25 = vadd.f32 %v2926_v21, %v7155_v26  ;;  %3787 = vmatprep.mubr.bf16.mxu1 %v3336_v38  ;;  %v3214_v36 = vmax.f32 %v2925_v23, 0.0 }
 0x31a   : > { %v2928_v32 = vpop.f32.mrf.mxu0  ;;  %3788 = vmatmul.mubr.bf16.gmra.mxu1 %v3335_v22 }
 0x31b   : > { %v2929_v29 = vadd.f32 %v2928_v32, %v7152_v24  ;;  %v3215_v37 = vmax.f32 %v2927_v25, 0.0  ;;  %v6123_v25 = vld [vmem:[%s7957_s9 + $0x30] ss:$8 sps:$4 sm:$0xff]   ;;  %v6125_v32 = vld [vmem:[%s7957_s9 + $0x34] ss:$8 sps:$4 sm:$0xff]  }
 0x31c   : > { %v2932_v33 = vpop.f32.mrf.mxu0  ;;  %5043 = vmatprep.subr.bf16.mxu0 %v6125_v32 }
 0x31d   : > { %v3216_v39 = vmax.f32 %v2929_v29, 0.0  ;;  %v3337_v43 = vpack.c.bf16 %v3215_v37, %v3213_v35  ;;  %v2933_v45 = vadd.f32 %v2932_v33, %v7155_v26  ;;  %5044 = vmatpush1.bf16.msra.mxu0 %v6123_v25 }
 0x31e   : > { %v2934_v40 = vpop.f32.mrf.mxu0 }
 0x31f   : > { %v3338_v41 = vpack.c.bf16 %v3216_v39, %v3214_v36  ;;  %v2935_v44 = vadd.f32 %v2934_v40, %v7152_v24  ;;  %v3217_v54 = vmax.f32 %v2933_v45, 0.0 }
 0x320   : > { %v2936_v42 = vpop.f32.mrf.mxu0 }
 0x321   : > { %v2937_v34 = vadd.f32 %v2936_v42, %v7155_v26  ;;  %3797 = vmatprep.mubr.bf16.mxu1 %v3338_v41  ;;  %v3218_v50 = vmax.f32 %v2935_v44, 0.0 }
 0x322   : > { %v2938_v2 = vpop.f32.mrf.mxu0  ;;  %3798 = vmatmul.mubr.bf16.gmra.mxu1 %v3337_v43 }
 0x323   : > { %v2939_v46 = vadd.f32 %v2938_v2, %v7152_v24  ;;  %v3219_v51 = vmax.f32 %v2937_v34, 0.0 }
 0x324   : > { %v2942_v47 = vpop.f32.mrf.mxu0 }
 0x325   : > { %v3220_v52 = vmax.f32 %v2939_v46, 0.0  ;;  %v3339_v57 = vpack.c.bf16 %v3219_v51, %v3217_v54  ;;  %v2943_v61 = vadd.f32 %v2942_v47, %v7155_v26 }
 0x326   : > { %v2944_v53 = vpop.f32.mrf.mxu0 }
 0x327   : > { %v3340_v55 = vpack.c.bf16 %v3220_v52, %v3218_v50  ;;  %v2945_v58 = vadd.f32 %v2944_v53, %v7152_v24  ;;  %v3221_v5 = vmax.f32 %v2943_v61, 0.0 }
 0x328   : > { %v2946_v56 = vpop.f32.mrf.mxu0 }
 0x329   : > { %v2947_v59 = vadd.f32 %v2946_v56, %v7155_v26  ;;  %3807 = vmatprep.mubr.bf16.mxu1 %v3340_v55  ;;  %v3222_v0 = vmax.f32 %v2945_v58, 0.0 }
 0x32a   : > { %v2948_v60 = vpop.f32.mrf.mxu0  ;;  %3808 = vmatmul.mubr.bf16.gmra.mxu1 %v3339_v57 }
 0x32b   : > { %v2949_v62 = vadd.f32 %v2948_v60, %v7152_v24  ;;  %v3223_v1 = vmax.f32 %v2947_v59, 0.0 }
 0x32c   : > { %v2952_v63 = vpop.f32.mrf.mxu0 }
 0x32d   : > { %v3224_v3 = vmax.f32 %v2949_v62, 0.0  ;;  %v3341_v8 = vpack.c.bf16 %v3223_v1, %v3221_v5  ;;  %v2953_v12 = vadd.f32 %v2952_v63, %v7155_v26  ;;  %v6126_v63 = vld [vmem:[%s7957_s9 + $0x20] ss:$8 sps:$4 sm:$0xff]  }
 0x32e   : > { %v2954_v4 = vpop.f32.mrf.mxu0 }
 0x32f   : > { %v3342_v6 = vpack.c.bf16 %v3224_v3, %v3222_v0  ;;  %v2955_v9 = vadd.f32 %v2954_v4, %v7152_v24  ;;  %v3225_v19 = vmax.f32 %v2953_v12, 0.0  ;;  %v6128_v0 = vld [vmem:[%s7957_s9 + $0x24] ss:$8 sps:$4 sm:$0xff]  }
 0x330   : > { %v2956_v7 = vpop.f32.mrf.mxu0  ;;  %5045 = vmatprep.subr.bf16.mxu0 %v6128_v0  ;;  %v6129_v0 = vld [vmem:[%s7957_s9 + $0x10] ss:$8 sps:$4 sm:$0xff]  }
 0x331   : > { %v2957_v10 = vadd.f32 %v2956_v7, %v7155_v26  ;;  %3817 = vmatprep.mubr.bf16.mxu1 %v3342_v6  ;;  %v3226_v15 = vmax.f32 %v2955_v9, 0.0  ;;  %v3413_v6 = vld [vmem:[%s7956_s8] sm:$0x3]  ;;  %5046 = vmatpush1.bf16.msra.mxu0 %v6126_v63 }
 0x332   : > { %v2958_v11 = vpop.f32.mrf.mxu0  ;;  %3818 = vmatmul.mubr.bf16.gmra.mxu1 %v3341_v8 }
 0x333   : > { %v2959_v13 = vadd.f32 %v2958_v11, %v7152_v24  ;;  %v3227_v16 = vmax.f32 %v2957_v10, 0.0 }
 0x334   : > { %v2962_v14 = vpop.f32.mrf.mxu0 }
 0x335   : > { %v3228_v17 = vmax.f32 %v2959_v13, 0.0  ;;  %v3343_v21 = vpack.c.bf16 %v3227_v16, %v3225_v19  ;;  %v2963_v29 = vadd.f32 %v2962_v14, %v7155_v26  ;;  %v7355_v13 = vrot.slane %v3413_v6, %v6701_v31 }
 0x336   : > { %v2964_v18 = vpop.f32.mrf.mxu0 }
 0x337   : > { %v3344_v20 = vpack.c.bf16 %v3228_v17, %v3226_v15  ;;  %v2965_v22 = vadd.f32 %v2964_v18, %v7152_v24  ;;  %v3229_v41 = vmax.f32 %v2963_v29, 0.0  ;;  %v7360_v18 = vrot.slane %v3413_v6, %v6698_v30 }
 0x338   : > { %v2966_v38 = vpop.f32.mrf.mxu0 }
 0x339   : > { %v2967_v23 = vadd.f32 %v2966_v38, %v7155_v26  ;;  %3827 = vmatprep.mubr.bf16.mxu1 %v3344_v20  ;;  %v3230_v37 = vmax.f32 %v2965_v22, 0.0 }
 0x33a   : > { %v2968_v27 = vpop.f32.mrf.mxu0  ;;  %3828 = vmatmul.mubr.bf16.gmra.mxu1 %v3343_v21 }
 0x33b   : > { %v2969_v33 = vadd.f32 %v2968_v27, %v7152_v24  ;;  %v3231_v39 = vmax.f32 %v2967_v23, 0.0 }
 0x33c   : > { %v2972_v36 = vpop.f32.mrf.mxu0 }
 0x33d   : > { %v3232_v40 = vmax.f32 %v2969_v33, 0.0  ;;  %v3345_v44 = vpack.c.bf16 %v3231_v39, %v3229_v41  ;;  %v2973_v46 = vadd.f32 %v2972_v36, %v7155_v26 }
 0x33e   : > { %v2974_v35 = vpop.f32.mrf.mxu0 }
 0x33f   : > { %v3346_v42 = vpack.c.bf16 %v3232_v40, %v3230_v37  ;;  %v2975_v34 = vadd.f32 %v2974_v35, %v7152_v24  ;;  %v3233_v53 = vmax.f32 %v2973_v46, 0.0 }
 0x340   : > { %v2976_v43 = vpop.f32.mrf.mxu0 }
 0x341   : > { %v2977_v2 = vadd.f32 %v2976_v43, %v7155_v26  ;;  %3837 = vmatprep.mubr.bf16.mxu1 %v3346_v42  ;;  %v3234_v49 = vmax.f32 %v2975_v34, 0.0 }
 0x342   : > { %v2978_v45 = vpop.f32.mrf.mxu0  ;;  %3838 = vmatmul.mubr.bf16.gmra.mxu1 %v3345_v44 }
 0x343   : > { %v2979_v47 = vadd.f32 %v2978_v45, %v7152_v24  ;;  %v3235_v50 = vmax.f32 %v2977_v2, 0.0 }
 0x344   : > { %v2982_v48 = vpop.f32.mrf.mxu0 }
 0x345   : > { %v3236_v51 = vmax.f32 %v2979_v47, 0.0  ;;  %v3347_v56 = vpack.c.bf16 %v3235_v50, %v3233_v53  ;;  %v2983_v60 = vadd.f32 %v2982_v48, %v7155_v26 }
 0x346   : > { %v2984_v52 = vpop.f32.mrf.mxu0 }
 0x347   : > { %v3348_v54 = vpack.c.bf16 %v3236_v51, %v3234_v49  ;;  %v2985_v57 = vadd.f32 %v2984_v52, %v7152_v24  ;;  %v3237_v7 = vmax.f32 %v2983_v60, 0.0 }
 0x348   : > { %v2986_v55 = vpop.f32.mrf.mxu0 }
 0x349   : > { %v2987_v58 = vadd.f32 %v2986_v55, %v7155_v26  ;;  %3847 = vmatprep.mubr.bf16.mxu1 %v3348_v54  ;;  %v3238_v1 = vmax.f32 %v2985_v57, 0.0 }
 0x34a   : > { %v2988_v59 = vpop.f32.mrf.mxu0  ;;  %3848 = vmatmul.mubr.bf16.gmra.mxu1 %v3347_v56 }
 0x34b   : > { %v2989_v61 = vadd.f32 %v2988_v59, %v7152_v24  ;;  %v3239_v3 = vmax.f32 %v2987_v58, 0.0 }
 0x34c   : > { %v2992_v62 = vpop.f32.mrf.mxu0 }
 0x34d   : > { %v3240_v4 = vmax.f32 %v2989_v61, 0.0  ;;  %v3349_v10 = vpack.c.bf16 %v3239_v3, %v3237_v7  ;;  %v2993_v15 = vadd.f32 %v2992_v62, %v7155_v26 }
 0x34e   : > { %v2994_v5 = vpop.f32.mrf.mxu0 }
 0x34f   : > { %v3350_v8 = vpack.c.bf16 %v3240_v4, %v3238_v1  ;;  %v2995_v11 = vadd.f32 %v2994_v5, %v7152_v24  ;;  %v3241_v25 = vmax.f32 %v2993_v15, 0.0  ;;  %v6131_v1 = vld [vmem:[%s7957_s9 + $0x14] ss:$8 sps:$4 sm:$0xff]  }
 0x350   : > { %v2996_v9 = vpop.f32.mrf.mxu0  ;;  %5047 = vmatprep.subr.bf16.mxu0 %v6131_v1 }
 0x351   : > { %v2997_v12 = vadd.f32 %v2996_v9, %v7155_v26  ;;  %3857 = vmatprep.mubr.bf16.mxu1 %v3350_v8  ;;  %v3242_v19 = vmax.f32 %v2995_v11, 0.0  ;;  %5048 = vmatpush1.bf16.msra.mxu0 %v6129_v0 }
 0x352   : > { %v2998_v14 = vpop.f32.mrf.mxu0  ;;  %v3619_v17 = vpop.f32.mrf.mxu1  ;;  %3858 = vmatmul.mubr.bf16.gmra.mxu1 %v3349_v10 }
 0x353   : > { %v2999_v16 = vadd.f32 %v2998_v14, %v7152_v24  ;;  %v3243_v20 = vmax.f32 %v2997_v12, 0.0  ;;  %v3620_v21 = vadd.f32 %v3619_v17, %v7355_v13 }
 0x354   : > { %v3002_v22 = vpop.f32.mrf.mxu0  ;;  %v3621_v23 = vpop.f32.mrf.mxu1 }
 0x355   : > { %v3244_v38 = vmax.f32 %v2999_v16, 0.0  ;;  %v3622_v33 = vadd.f32 %v3621_v23, %v7360_v18  ;;  %v3351_v37 = vpack.c.bf16 %v3243_v20, %v3241_v25  ;;  %v4018_v39 = vmax.f32 %v3620_v21, 0.0 }
 0x356   : > { %v3004_v27 = vpop.f32.mrf.mxu0  ;;  %v3623_v29 = vpop.f32.mrf.mxu1  ;;  %v3003_v34 = vadd.f32 %v3002_v22, %v7155_v26 }
 0x357   : > { %v3352_v32 = vpack.c.bf16 %v3244_v38, %v3242_v19  ;;  %v3624_v36 = vadd.f32 %v3623_v29, %v7355_v13  ;;  %v3005_v41 = vadd.f32 %v3004_v27, %v7152_v24  ;;  %v4019_v46 = vmax.f32 %v3622_v33, 0.0 }
 0x358   : > { %v3006_v40 = vpop.f32.mrf.mxu0  ;;  %v3625_v35 = vpop.f32.mrf.mxu1  ;;  %v3245_v57 = vmax.f32 %v3003_v34, 0.0 }
 0x359   : > { %3867 = vmatprep.mubr.bf16.mxu1 %v3352_v32  ;;  %v4020_v42 = vmax.f32 %v3624_v36, 0.0  ;;  %v3007_v43 = vadd.f32 %v3006_v40, %v7155_v26  ;;  %v3626_v44 = vadd.f32 %v3625_v35, %v7360_v18  ;;  %v3246_v54 = vmax.f32 %v3005_v41, 0.0 }
 0x35a   : > { %v3008_v2 = vpop.f32.mrf.mxu0  ;;  %v3629_v45 = vpop.f32.mrf.mxu1  ;;  %3868 = vmatmul.mubr.bf16.gmra.mxu1 %v3351_v37 }
 0x35b   : > { %v4659_v47 = vadd.f32 %v4020_v42, %v4018_v39  ;;  %v4021_v48 = vmax.f32 %v3626_v44, 0.0  ;;  %v3009_v49 = vadd.f32 %v3008_v2, %v7152_v24  ;;  %v3247_v50 = vmax.f32 %v3007_v43, 0.0 }
 0x35c   : > { %v3630_v51 = vadd.f32 %v3629_v45, %v7355_v13  ;;  %v3012_v52 = vpop.f32.mrf.mxu0  ;;  %v3631_v53 = vpop.f32.mrf.mxu1 }
 0x35d   : > { %v4744_v55 = vadd.f32 %v4021_v48, %v4019_v46  ;;  %v3248_v56 = vmax.f32 %v3009_v49, 0.0  ;;  %v3632_v59 = vadd.f32 %v3631_v53, %v7360_v18  ;;  %v3353_v3 = vpack.c.bf16 %v3247_v50, %v3245_v57 }
 0x35e   : > { %v4022_v58 = vmax.f32 %v3630_v51, 0.0  ;;  %v3014_v60 = vpop.f32.mrf.mxu0  ;;  %v3633_v61 = vpop.f32.mrf.mxu1  ;;  %v3013_v12 = vadd.f32 %v3012_v52, %v7155_v26 }
 0x35f   : > { %v3354_v62 = vpack.c.bf16 %v3248_v56, %v3246_v54  ;;  %v3634_v63 = vadd.f32 %v3633_v61, %v7355_v13  ;;  %v4023_v5 = vmax.f32 %v3632_v59, 0.0  ;;  %v3015_v8 = vadd.f32 %v3014_v60, %v7152_v24 }
 0x360   : > { %v4660_v4 = vadd.f32 %v4659_v47, %v4022_v58  ;;  %v3016_v6 = vpop.f32.mrf.mxu0  ;;  %v3635_v7 = vpop.f32.mrf.mxu1  ;;  %v3249_v29 = vmax.f32 %v3013_v12, 0.0 }
 0x361   : > { %v4024_v9 = vmax.f32 %v3634_v63, 0.0  ;;  %v3017_v10 = vadd.f32 %v3016_v6, %v7155_v26  ;;  %v3636_v11 = vadd.f32 %v3635_v7, %v7360_v18  ;;  %3877 = vmatprep.mubr.bf16.mxu1 %v3354_v62  ;;  %v4745_v14 = vadd.f32 %v4744_v55, %v4023_v5 }
 0x362   : > { %v3018_v15 = vpop.f32.mrf.mxu0  ;;  %v3639_v16 = vpop.f32.mrf.mxu1  ;;  %3878 = vmatmul.mubr.bf16.gmra.mxu1 %v3353_v3  ;;  %v3250_v25 = vmax.f32 %v3015_v8, 0.0 }
 0x363   : > { %v4661_v17 = vadd.f32 %v4660_v4, %v4024_v9  ;;  %v4025_v19 = vmax.f32 %v3636_v11, 0.0  ;;  %v3019_v20 = vadd.f32 %v3018_v15, %v7152_v24  ;;  %v3251_v38 = vmax.f32 %v3017_v10, 0.0 }
 0x364   : > { %v3640_v21 = vadd.f32 %v3639_v16, %v7355_v13  ;;  %v3022_v22 = vpop.f32.mrf.mxu0  ;;  %v3641_v23 = vpop.f32.mrf.mxu1 }
 0x365   : > { %v4746_v32 = vadd.f32 %v4745_v14, %v4025_v19  ;;  %v3252_v27 = vmax.f32 %v3019_v20, 0.0  ;;  %v3642_v36 = vadd.f32 %v3641_v23, %v7360_v18  ;;  %v3355_v41 = vpack.c.bf16 %v3251_v38, %v3249_v29  ;;  %v6132_v23 = vld [vmem:[%s7957_s9] ss:$8 sps:$4 sm:$0xff]  }
 0x366   : > { %v4026_v33 = vmax.f32 %v3640_v21, 0.0  ;;  %v3024_v37 = vpop.f32.mrf.mxu0  ;;  %v3643_v39 = vpop.f32.mrf.mxu1  ;;  %v3023_v48 = vadd.f32 %v3022_v22, %v7155_v26 }
 0x367   : > { %v3356_v40 = vpack.c.bf16 %v3252_v27, %v3250_v25  ;;  %v3644_v35 = vadd.f32 %v3643_v39, %v7355_v13  ;;  %v4027_v43 = vmax.f32 %v3642_v36, 0.0  ;;  %v3025_v2 = vadd.f32 %v3024_v37, %v7152_v24  ;;  %v6134_v25 = vld [vmem:[%s7957_s9 + $0x4] ss:$8 sps:$4 sm:$0xff]  }
 0x368   : > { %v4662_v42 = vadd.f32 %v4661_v17, %v4026_v33  ;;  %v3026_v44 = vpop.f32.mrf.mxu0  ;;  %v3645_v34 = vpop.f32.mrf.mxu1  ;;  %v3253_v62 = vmax.f32 %v3023_v48, 0.0  ;;  %5049 = vmatprep.subr.bf16.mxu0 %v6134_v25 }
 0x369   : > { %v4028_v45 = vmax.f32 %v3644_v35, 0.0  ;;  %v3027_v46 = vadd.f32 %v3026_v44, %v7155_v26  ;;  %v3646_v47 = vadd.f32 %v3645_v34, %v7360_v18  ;;  %3887 = vmatprep.mubr.bf16.mxu1 %v3356_v40  ;;  %v4747_v49 = vadd.f32 %v4746_v32, %v4027_v43  ;;  %5050 = vmatpush1.bf16.msra.mxu0 %v6132_v23 }
 0x36a   : > { %v3028_v50 = vpop.f32.mrf.mxu0  ;;  %v3649_v51 = vpop.f32.mrf.mxu1  ;;  %3888 = vmatmul.mubr.bf16.gmra.mxu1 %v3355_v41  ;;  %v3254_v59 = vmax.f32 %v3025_v2, 0.0 }
 0x36b   : > { %v4663_v52 = vadd.f32 %v4662_v42, %v4028_v45  ;;  %v4029_v53 = vmax.f32 %v3646_v47, 0.0  ;;  %v3029_v54 = vadd.f32 %v3028_v50, %v7152_v24  ;;  %v3255_v55 = vmax.f32 %v3027_v46, 0.0 }
 0x36c   : > { %v3650_v56 = vadd.f32 %v3649_v51, %v7355_v13  ;;  %v3032_v57 = vpop.f32.mrf.mxu0  ;;  %v3651_v58 = vpop.f32.mrf.mxu1 }
 0x36d   : > { %v4748_v60 = vadd.f32 %v4747_v49, %v4029_v53  ;;  %v3256_v61 = vmax.f32 %v3029_v54, 0.0  ;;  %v3652_v0 = vadd.f32 %v3651_v58, %v7360_v18  ;;  %v3357_v6 = vpack.c.bf16 %v3255_v55, %v3253_v62 }
 0x36e   : > { %v4030_v63 = vmax.f32 %v3650_v56, 0.0  ;;  %v3034_v1 = vpop.f32.mrf.mxu0  ;;  %v3653_v3 = vpop.f32.mrf.mxu1  ;;  %v3033_v16 = vadd.f32 %v3032_v57, %v7155_v26 }
 0x36f   : > { %v3358_v4 = vpack.c.bf16 %v3256_v61, %v3254_v59  ;;  %v3654_v5 = vadd.f32 %v3653_v3, %v7355_v13  ;;  %v4031_v8 = vmax.f32 %v3652_v0, 0.0  ;;  %v3035_v11 = vadd.f32 %v3034_v1, %v7152_v24 }
 0x370   : > { %v4664_v7 = vadd.f32 %v4663_v52, %v4030_v63  ;;  %v3036_v9 = vpop.f32.mrf.mxu0  ;;  %v3655_v10 = vpop.f32.mrf.mxu1  ;;  %v3257_v40 = vmax.f32 %v3033_v16, 0.0 }
 0x371   : > { %v4032_v12 = vmax.f32 %v3654_v5, 0.0  ;;  %v3037_v14 = vadd.f32 %v3036_v9, %v7155_v26  ;;  %v3656_v15 = vadd.f32 %v3655_v10, %v7360_v18  ;;  %3897 = vmatprep.mubr.bf16.mxu1 %v3358_v4  ;;  %v4749_v17 = vadd.f32 %v4748_v60, %v4031_v8 }
 0x372   : > { %v3038_v19 = vpop.f32.mrf.mxu0  ;;  %v3659_v20 = vpop.f32.mrf.mxu1  ;;  %3898 = vmatmul.mubr.bf16.gmra.mxu1 %v3357_v6  ;;  %v3258_v36 = vmax.f32 %v3035_v11, 0.0 }
 0x373   : > { %v4665_v38 = vadd.f32 %v4664_v7, %v4032_v12  ;;  %v4033_v21 = vmax.f32 %v3656_v15, 0.0  ;;  %v3039_v22 = vadd.f32 %v3038_v19, %v7152_v24  ;;  %v3259_v32 = vmax.f32 %v3037_v14, 0.0 }
 0x374   : > { %v3660_v27 = vadd.f32 %v3659_v20, %v7355_v13  ;;  %v3042_v29 = vpop.f32.mrf.mxu0  ;;  %v3661_v33 = vpop.f32.mrf.mxu1 }
 0x375   : > { %v4750_v37 = vadd.f32 %v4749_v17, %v4033_v21  ;;  %v3260_v39 = vmax.f32 %v3039_v22, 0.0  ;;  %v3662_v41 = vadd.f32 %v3661_v33, %v7360_v18  ;;  %v3359_v2 = vpack.c.bf16 %v3259_v32, %v3257_v40 }
 0x376   : > { %v4034_v35 = vmax.f32 %v3660_v27, 0.0  ;;  %v3044_v42 = vpop.f32.mrf.mxu0  ;;  %v3663_v43 = vpop.f32.mrf.mxu1  ;;  %v3043_v53 = vadd.f32 %v3042_v29, %v7155_v26 }
 0x377   : > { %v3360_v44 = vpack.c.bf16 %v3260_v39, %v3258_v36  ;;  %v3664_v34 = vadd.f32 %v3663_v43, %v7355_v13  ;;  %v4035_v46 = vmax.f32 %v3662_v41, 0.0  ;;  %v3045_v49 = vadd.f32 %v3044_v42, %v7152_v24 }
 0x378   : > { %v4666_v45 = vadd.f32 %v4665_v38, %v4034_v35  ;;  %v3046_v47 = vpop.f32.mrf.mxu0  ;;  %v3665_v48 = vpop.f32.mrf.mxu1  ;;  %v3261_v4 = vmax.f32 %v3043_v53, 0.0 }
 0x379   : > { %v4036_v50 = vmax.f32 %v3664_v34, 0.0  ;;  %v3047_v51 = vadd.f32 %v3046_v47, %v7155_v26  ;;  %v3666_v52 = vadd.f32 %v3665_v48, %v7360_v18  ;;  %3907 = vmatprep.mubr.bf16.mxu1 %v3360_v44  ;;  %v4751_v54 = vadd.f32 %v4750_v37, %v4035_v46  ;;  %v6135_v47 = vld [vmem:[%s7957_s9 + $0xf0] ss:$8 sps:$4 sm:$0xff]   ;;  %v6137_v48 = vld [vmem:[%s7957_s9 + $0xf4] ss:$8 sps:$4 sm:$0xff]  }
 0x37a   : > { %v3048_v55 = vpop.f32.mrf.mxu0  ;;  %v3669_v56 = vpop.f32.mrf.mxu1  ;;  %3908 = vmatmul.mubr.bf16.gmra.mxu1 %v3359_v2  ;;  %v3262_v0 = vmax.f32 %v3045_v49, 0.0  ;;  %5051 = vmatprep.subr.bf16.mxu0 %v6137_v48 }
 0x37b   : > { %v4667_v57 = vadd.f32 %v4666_v45, %v4036_v50  ;;  %v4037_v58 = vmax.f32 %v3666_v52, 0.0  ;;  %v3049_v59 = vadd.f32 %v3048_v55, %v7152_v24  ;;  %v3263_v60 = vmax.f32 %v3047_v51, 0.0  ;;  %5052 = vmatpush2.bf16.msra.mxu0 %v6135_v47 }
 0x37c   : > { %v3670_v61 = vadd.f32 %v3669_v56, %v7355_v13  ;;  %v3052_v62 = vpop.f32.mrf.mxu0  ;;  %v3671_v63 = vpop.f32.mrf.mxu1 }
 0x37d   : > { %v4752_v1 = vadd.f32 %v4751_v54, %v4037_v58  ;;  %v3264_v3 = vmax.f32 %v3049_v59, 0.0  ;;  %v3672_v6 = vadd.f32 %v3671_v63, %v7360_v18  ;;  %v3361_v11 = vpack.c.bf16 %v3263_v60, %v3261_v4 }
 0x37e   : > { %v4038_v5 = vmax.f32 %v3670_v61, 0.0  ;;  %v3054_v7 = vpop.f32.mrf.mxu0  ;;  %v3673_v8 = vpop.f32.mrf.mxu1  ;;  %v3053_v21 = vadd.f32 %v3052_v62, %v7155_v26 }
 0x37f   : > { %v3362_v9 = vpack.c.bf16 %v3264_v3, %v3262_v0  ;;  %v3674_v10 = vadd.f32 %v3673_v8, %v7355_v13  ;;  %v4039_v14 = vmax.f32 %v3672_v6, 0.0  ;;  %v3055_v17 = vadd.f32 %v3054_v7, %v7152_v24 }
 0x380   : > { %v4668_v12 = vadd.f32 %v4667_v57, %v4038_v5  ;;  %v3056_v15 = vpop.f32.mrf.mxu0  ;;  %v3675_v16 = vpop.f32.mrf.mxu1  ;;  %v3265_v42 = vmax.f32 %v3053_v21, 0.0 }
 0x381   : > { %v4040_v19 = vmax.f32 %v3674_v10, 0.0  ;;  %v3057_v20 = vadd.f32 %v3056_v15, %v7155_v26  ;;  %v3676_v38 = vadd.f32 %v3675_v16, %v7360_v18  ;;  %3917 = vmatprep.mubr.bf16.mxu1 %v3362_v9  ;;  %v4753_v22 = vadd.f32 %v4752_v1, %v4039_v14 }
 0x382   : > { %v3058_v23 = vpop.f32.mrf.mxu0  ;;  %v3679_v25 = vpop.f32.mrf.mxu1  ;;  %3918 = vmatmul.mubr.bf16.gmra.mxu1 %v3361_v11  ;;  %v3266_v40 = vmax.f32 %v3055_v17, 0.0 }
 0x383   : > { %v4669_v32 = vadd.f32 %v4668_v12, %v4040_v19  ;;  %v4041_v27 = vmax.f32 %v3676_v38, 0.0  ;;  %v3059_v29 = vadd.f32 %v3058_v23, %v7152_v24  ;;  %v3267_v33 = vmax.f32 %v3057_v20, 0.0 }
 0x384   : > { %v3680_v36 = vadd.f32 %v3679_v25, %v7355_v13  ;;  %v3062_v37 = vpop.f32.mrf.mxu0  ;;  %v3681_v39 = vpop.f32.mrf.mxu1 }
 0x385   : > { %v4754_v35 = vadd.f32 %v4753_v22, %v4041_v27  ;;  %v3268_v41 = vmax.f32 %v3059_v29, 0.0  ;;  %v3682_v44 = vadd.f32 %v3681_v39, %v7360_v18  ;;  %v3363_v49 = vpack.c.bf16 %v3267_v33, %v3265_v42 }
 0x386   : > { %v4042_v43 = vmax.f32 %v3680_v36, 0.0  ;;  %v3064_v34 = vpop.f32.mrf.mxu0  ;;  %v3683_v2 = vpop.f32.mrf.mxu1  ;;  %v3063_v58 = vadd.f32 %v3062_v37, %v7155_v26 }
 0x387   : > { %v3364_v45 = vpack.c.bf16 %v3268_v41, %v3266_v40  ;;  %v3684_v46 = vadd.f32 %v3683_v2, %v7355_v13  ;;  %v4043_v51 = vmax.f32 %v3682_v44, 0.0  ;;  %v3065_v54 = vadd.f32 %v3064_v34, %v7152_v24 }
 0x388   : > { %v4670_v50 = vadd.f32 %v4669_v32, %v4042_v43  ;;  %v3066_v52 = vpop.f32.mrf.mxu0  ;;  %v3685_v53 = vpop.f32.mrf.mxu1  ;;  %v3269_v9 = vmax.f32 %v3063_v58, 0.0 }
 0x389   : > { %v4044_v55 = vmax.f32 %v3684_v46, 0.0  ;;  %v3067_v56 = vadd.f32 %v3066_v52, %v7155_v26  ;;  %v3686_v57 = vadd.f32 %v3685_v53, %v7360_v18  ;;  %3927 = vmatprep.mubr.bf16.mxu1 %v3364_v45  ;;  %v4755_v59 = vadd.f32 %v4754_v35, %v4043_v51 }
 0x38a   : > { %v3068_v60 = vpop.f32.mrf.mxu0  ;;  %v3689_v61 = vpop.f32.mrf.mxu1  ;;  %3928 = vmatmul.mubr.bf16.gmra.mxu1 %v3363_v49  ;;  %v3270_v6 = vmax.f32 %v3065_v54, 0.0 }
 0x38b   : > { %v4671_v62 = vadd.f32 %v4670_v50, %v4044_v55  ;;  %v4045_v63 = vmax.f32 %v3686_v57, 0.0  ;;  %v3069_v0 = vadd.f32 %v3068_v60, %v7152_v24  ;;  %v3271_v1 = vmax.f32 %v3067_v56, 0.0 }
 0x38c   : > { %v3690_v3 = vadd.f32 %v3689_v61, %v7355_v13  ;;  %v3072_v4 = vpop.f32.mrf.mxu0  ;;  %v3691_v5 = vpop.f32.mrf.mxu1 }
 0x38d   : > { %v4756_v7 = vadd.f32 %v4755_v59, %v4045_v63  ;;  %v3272_v8 = vmax.f32 %v3069_v0, 0.0  ;;  %v3692_v11 = vadd.f32 %v3691_v5, %v7360_v18  ;;  %v3365_v17 = vpack.c.bf16 %v3271_v1, %v3269_v9  ;;  %v6138_v5 = vld [vmem:[%s7957_s9 + $0xe0] ss:$8 sps:$4 sm:$0xff]  }
 0x38e   : > { %v4046_v10 = vmax.f32 %v3690_v3, 0.0  ;;  %v3074_v12 = vpop.f32.mrf.mxu0  ;;  %v3693_v14 = vpop.f32.mrf.mxu1  ;;  %v3073_v27 = vadd.f32 %v3072_v4, %v7155_v26 }
 0x38f   : > { %v3366_v15 = vpack.c.bf16 %v3272_v8, %v3270_v6  ;;  %v3694_v16 = vadd.f32 %v3693_v14, %v7355_v13  ;;  %v4047_v20 = vmax.f32 %v3692_v11, 0.0  ;;  %v3075_v22 = vadd.f32 %v3074_v12, %v7152_v24  ;;  %v6140_v6 = vld [vmem:[%s7957_s9 + $0xe4] ss:$8 sps:$4 sm:$0xff]  }
 0x390   : > { %v4672_v19 = vadd.f32 %v4671_v62, %v4046_v10  ;;  %v3076_v38 = vpop.f32.mrf.mxu0  ;;  %v3695_v21 = vpop.f32.mrf.mxu1  ;;  %v3273_v45 = vmax.f32 %v3073_v27, 0.0  ;;  %5053 = vmatprep.subr.bf16.mxu0 %v6140_v6 }
 0x391   : > { %v4048_v23 = vmax.f32 %v3694_v16, 0.0  ;;  %v3077_v25 = vadd.f32 %v3076_v38, %v7155_v26  ;;  %v3696_v32 = vadd.f32 %v3695_v21, %v7360_v18  ;;  %3937 = vmatprep.mubr.bf16.mxu1 %v3366_v15  ;;  %v4757_v29 = vadd.f32 %v4756_v7, %v4047_v20  ;;  %5054 = vmatpush2.bf16.msra.mxu0 %v6138_v5 }
 0x392   : > { %v3078_v33 = vpop.f32.mrf.mxu0  ;;  %v3699_v36 = vpop.f32.mrf.mxu1  ;;  %3938 = vmatmul.mubr.bf16.gmra.mxu1 %v3365_v17  ;;  %v3274_v44 = vmax.f32 %v3075_v22, 0.0 }
 0x393   : > { %v4673_v37 = vadd.f32 %v4672_v19, %v4048_v23  ;;  %v4049_v39 = vmax.f32 %v3696_v32, 0.0  ;;  %v3079_v40 = vadd.f32 %v3078_v33, %v7152_v24  ;;  %v3275_v35 = vmax.f32 %v3077_v25, 0.0 }
 0x394   : > { %v3700_v41 = vadd.f32 %v3699_v36, %v7355_v13  ;;  %v3082_v42 = vpop.f32.mrf.mxu0  ;;  %v3701_v43 = vpop.f32.mrf.mxu1 }
 0x395   : > { %v4758_v34 = vadd.f32 %v4757_v29, %v4049_v39  ;;  %v3276_v2 = vmax.f32 %v3079_v40, 0.0  ;;  %v3702_v47 = vadd.f32 %v3701_v43, %v7360_v18  ;;  %v3367_v52 = vpack.c.bf16 %v3275_v35, %v3273_v45 }
 0x396   : > { %v4050_v46 = vmax.f32 %v3700_v41, 0.0  ;;  %v3084_v48 = vpop.f32.mrf.mxu0  ;;  %v3703_v49 = vpop.f32.mrf.mxu1  ;;  %v3083_v61 = vadd.f32 %v3082_v42, %v7155_v26 }
 0x397   : > { %v3368_v50 = vpack.c.bf16 %v3276_v2, %v3274_v44  ;;  %v3704_v51 = vadd.f32 %v3703_v49, %v7355_v13  ;;  %v4051_v54 = vmax.f32 %v3702_v47, 0.0  ;;  %v3085_v57 = vadd.f32 %v3084_v48, %v7152_v24 }
 0x398   : > { %v4674_v53 = vadd.f32 %v4673_v37, %v4050_v46  ;;  %v3086_v55 = vpop.f32.mrf.mxu0  ;;  %v3705_v56 = vpop.f32.mrf.mxu1  ;;  %v3277_v15 = vmax.f32 %v3083_v61, 0.0 }
 0x399   : > { %v4052_v58 = vmax.f32 %v3704_v51, 0.0  ;;  %v3087_v59 = vadd.f32 %v3086_v55, %v7155_v26  ;;  %v3706_v60 = vadd.f32 %v3705_v56, %v7360_v18  ;;  %3947 = vmatprep.mubr.bf16.mxu1 %v3368_v50  ;;  %v4759_v62 = vadd.f32 %v4758_v34, %v4051_v54 }
 0x39a   : > { %v3088_v63 = vpop.f32.mrf.mxu0  ;;  %v3709_v0 = vpop.f32.mrf.mxu1  ;;  %3948 = vmatmul.mubr.bf16.gmra.mxu1 %v3367_v52  ;;  %v3278_v11 = vmax.f32 %v3085_v57, 0.0 }
 0x39b   : > { %v4675_v1 = vadd.f32 %v4674_v53, %v4052_v58  ;;  %v4053_v3 = vmax.f32 %v3706_v60, 0.0  ;;  %v3089_v4 = vadd.f32 %v3088_v63, %v7152_v24  ;;  %v3279_v7 = vmax.f32 %v3087_v59, 0.0 }
 0x39c   : > { %v3710_v8 = vadd.f32 %v3709_v0, %v7355_v13  ;;  %v3092_v9 = vpop.f32.mrf.mxu0  ;;  %v3711_v10 = vpop.f32.mrf.mxu1 }
 0x39d   : > { %v4760_v12 = vadd.f32 %v4759_v62, %v4053_v3  ;;  %v3280_v14 = vmax.f32 %v3089_v4, 0.0  ;;  %v3712_v17 = vadd.f32 %v3711_v10, %v7360_v18  ;;  %v3369_v22 = vpack.c.bf16 %v3279_v7, %v3277_v15 }
 0x39e   : > { %v4054_v16 = vmax.f32 %v3710_v8, 0.0  ;;  %v3094_v19 = vpop.f32.mrf.mxu0  ;;  %v3713_v20 = vpop.f32.mrf.mxu1  ;;  %v3093_v39 = vadd.f32 %v3092_v9, %v7155_v26 }
 0x39f   : > { %v3370_v38 = vpack.c.bf16 %v3280_v14, %v3278_v11  ;;  %v3714_v21 = vadd.f32 %v3713_v20, %v7355_v13  ;;  %v4055_v25 = vmax.f32 %v3712_v17, 0.0  ;;  %v3095_v29 = vadd.f32 %v3094_v19, %v7152_v24 }
 0x3a0   : > { %v4676_v23 = vadd.f32 %v4675_v1, %v4054_v16  ;;  %v3096_v32 = vpop.f32.mrf.mxu0  ;;  %v3715_v27 = vpop.f32.mrf.mxu1  ;;  %v3281_v50 = vmax.f32 %v3093_v39, 0.0 }
 0x3a1   : > { %v4056_v33 = vmax.f32 %v3714_v21, 0.0  ;;  %v3097_v36 = vadd.f32 %v3096_v32, %v7155_v26  ;;  %v3716_v37 = vadd.f32 %v3715_v27, %v7360_v18  ;;  %3957 = vmatprep.mubr.bf16.mxu1 %v3370_v38  ;;  %v4761_v40 = vadd.f32 %v4760_v12, %v4055_v25  ;;  %v6141_v32 = vld [vmem:[%s7957_s9 + $0xd0] ss:$8 sps:$4 sm:$0xff]   ;;  %v6143_v27 = vld [vmem:[%s7957_s9 + $0xd4] ss:$8 sps:$4 sm:$0xff]  }
 0x3a2   : > { %v3098_v35 = vpop.f32.mrf.mxu0  ;;  %v3719_v41 = vpop.f32.mrf.mxu1  ;;  %3958 = vmatmul.mubr.bf16.gmra.mxu1 %v3369_v22  ;;  %v3282_v47 = vmax.f32 %v3095_v29, 0.0  ;;  %5055 = vmatprep.subr.bf16.mxu0 %v6143_v27 }
 0x3a3   : > { %v4677_v42 = vadd.f32 %v4676_v23, %v4056_v33  ;;  %v4057_v43 = vmax.f32 %v3716_v37, 0.0  ;;  %v3099_v44 = vadd.f32 %v3098_v35, %v7152_v24  ;;  %v3283_v34 = vmax.f32 %v3097_v36, 0.0  ;;  %5056 = vmatpush2.bf16.msra.mxu0 %v6141_v32 }
 0x3a4   : > { %v3720_v2 = vadd.f32 %v3719_v41, %v7355_v13  ;;  %v3102_v45 = vpop.f32.mrf.mxu0  ;;  %v3721_v46 = vpop.f32.mrf.mxu1 }
 0x3a5   : > { %v4762_v48 = vadd.f32 %v4761_v40, %v4057_v43  ;;  %v3284_v49 = vmax.f32 %v3099_v44, 0.0  ;;  %v3722_v52 = vadd.f32 %v3721_v46, %v7360_v18  ;;  %v3371_v57 = vpack.c.bf16 %v3283_v34, %v3281_v50  ;;  %v6144_v43 = vld [vmem:[%s7959_s11 + $0x70] ss:$8 sps:$4 sm:$0xff]   ;;  %v6146_v44 = vld [vmem:[%s7959_s11 + $0x74] ss:$8 sps:$4 sm:$0xff]  }
 0x3a6   : > { %v4058_v51 = vmax.f32 %v3720_v2, 0.0  ;;  %v3104_v53 = vpop.f32.mrf.mxu0  ;;  %v3723_v54 = vpop.f32.mrf.mxu1  ;;  %v3103_v3 = vadd.f32 %v3102_v45, %v7155_v26  ;;  %5284 = vmatprep.subr.bf16.mxu1 %v6146_v44 }
 0x3a7   : > { %v3372_v55 = vpack.c.bf16 %v3284_v49, %v3282_v47  ;;  %v3724_v56 = vadd.f32 %v3723_v54, %v7355_v13  ;;  %v4059_v59 = vmax.f32 %v3722_v52, 0.0  ;;  %v3105_v62 = vadd.f32 %v3104_v53, %v7152_v24  ;;  %5285 = vmatpush1.bf16.msra.mxu1 %v6144_v43 }
 0x3a8   : > { %v4678_v58 = vadd.f32 %v4677_v42, %v4058_v51  ;;  %v3106_v60 = vpop.f32.mrf.mxu0  ;;  %v3725_v61 = vpop.f32.mrf.mxu1  ;;  %v3285_v19 = vmax.f32 %v3103_v3, 0.0 }
 0x3a9   : > { %v4060_v63 = vmax.f32 %v3724_v56, 0.0  ;;  %v3107_v0 = vadd.f32 %v3106_v60, %v7155_v26  ;;  %v3726_v1 = vadd.f32 %v3725_v61, %v7360_v18  ;;  %3967 = vmatprep.mubr.bf16.mxu1 %v3372_v55  ;;  %v4763_v4 = vadd.f32 %v4762_v48, %v4059_v59 }
 0x3aa   : > { %v3108_v5 = vpop.f32.mrf.mxu0  ;;  %v3729_v6 = vpop.f32.mrf.mxu1  ;;  %3968 = vmatmul.mubr.bf16.gmra.mxu1 %v3371_v57  ;;  %v3286_v15 = vmax.f32 %v3105_v62, 0.0 }
 0x3ab   : > { %v4679_v7 = vadd.f32 %v4678_v58, %v4060_v63  ;;  %v4061_v8 = vmax.f32 %v3726_v1, 0.0  ;;  %v3109_v9 = vadd.f32 %v3108_v5, %v7152_v24  ;;  %v3287_v10 = vmax.f32 %v3107_v0, 0.0 }
 0x3ac   : > { %v3730_v11 = vadd.f32 %v3729_v6, %v7355_v13  ;;  %v3112_v12 = vpop.f32.mrf.mxu0  ;;  %v3731_v14 = vpop.f32.mrf.mxu1 }
 0x3ad   : > { %v4764_v16 = vadd.f32 %v4763_v4, %v4061_v8  ;;  %v3288_v17 = vmax.f32 %v3109_v9, 0.0  ;;  %v3732_v38 = vadd.f32 %v3731_v14, %v7360_v18  ;;  %v3373_v29 = vpack.c.bf16 %v3287_v10, %v3285_v19 }
 0x3ae   : > { %v4062_v20 = vmax.f32 %v3730_v11, 0.0  ;;  %v3114_v21 = vpop.f32.mrf.mxu0  ;;  %v3733_v22 = vpop.f32.mrf.mxu1  ;;  %v3113_v34 = vadd.f32 %v3112_v12, %v7155_v26 }
 0x3af   : > { %v3374_v23 = vpack.c.bf16 %v3288_v17, %v3286_v15  ;;  %v3734_v25 = vadd.f32 %v3733_v22, %v7355_v13  ;;  %v4063_v36 = vmax.f32 %v3732_v38, 0.0  ;;  %v3115_v40 = vadd.f32 %v3114_v21, %v7152_v24 }
 0x3b0   : > { %v4680_v33 = vadd.f32 %v4679_v7, %v4062_v20  ;;  %v3116_v37 = vpop.f32.mrf.mxu0  ;;  %v3735_v39 = vpop.f32.mrf.mxu1  ;;  %v3289_v57 = vmax.f32 %v3113_v34, 0.0 }
 0x3b1   : > { %v4064_v35 = vmax.f32 %v3734_v25, 0.0  ;;  %v3117_v41 = vadd.f32 %v3116_v37, %v7155_v26  ;;  %v3736_v42 = vadd.f32 %v3735_v39, %v7360_v18  ;;  %3977 = vmatprep.mubr.bf16.mxu1 %v3374_v23  ;;  %v4765_v2 = vadd.f32 %v4764_v16, %v4063_v36 }
 0x3b2   : > { %v3118_v45 = vpop.f32.mrf.mxu0  ;;  %v3739_v46 = vpop.f32.mrf.mxu1  ;;  %3978 = vmatmul.mubr.bf16.gmra.mxu1 %v3373_v29  ;;  %v3290_v54 = vmax.f32 %v3115_v40, 0.0 }
 0x3b3   : > { %v4681_v47 = vadd.f32 %v4680_v33, %v4064_v35  ;;  %v4065_v48 = vmax.f32 %v3736_v42, 0.0  ;;  %v3119_v49 = vadd.f32 %v3118_v45, %v7152_v24  ;;  %v3291_v50 = vmax.f32 %v3117_v41, 0.0 }
 0x3b4   : > { %v3740_v51 = vadd.f32 %v3739_v46, %v7355_v13  ;;  %v3122_v52 = vpop.f32.mrf.mxu0  ;;  %v3741_v53 = vpop.f32.mrf.mxu1 }
 0x3b5   : > { %v4766_v55 = vadd.f32 %v4765_v2, %v4065_v48  ;;  %v3292_v56 = vmax.f32 %v3119_v49, 0.0  ;;  %v3742_v59 = vadd.f32 %v3741_v53, %v7360_v18  ;;  %v3375_v0 = vpack.c.bf16 %v3291_v50, %v3289_v57  ;;  %v6147_v53 = vld [vmem:[%s7957_s9 + $0xc0] ss:$8 sps:$4 sm:$0xff]  }
 0x3b6   : > { %v4066_v58 = vmax.f32 %v3740_v51, 0.0  ;;  %v3124_v60 = vpop.f32.mrf.mxu0  ;;  %v3743_v61 = vpop.f32.mrf.mxu1  ;;  %v3123_v10 = vadd.f32 %v3122_v52, %v7155_v26 }
 0x3b7   : > { %v3376_v62 = vpack.c.bf16 %v3292_v56, %v3290_v54  ;;  %v3744_v63 = vadd.f32 %v3743_v61, %v7355_v13  ;;  %v4067_v3 = vmax.f32 %v3742_v59, 0.0  ;;  %v3125_v6 = vadd.f32 %v3124_v60, %v7152_v24  ;;  %v6149_v54 = vld [vmem:[%s7957_s9 + $0xc4] ss:$8 sps:$4 sm:$0xff]  }
 0x3b8   : > { %v4682_v1 = vadd.f32 %v4681_v47, %v4066_v58  ;;  %v3126_v4 = vpop.f32.mrf.mxu0  ;;  %v3745_v5 = vpop.f32.mrf.mxu1  ;;  %v3293_v25 = vmax.f32 %v3123_v10, 0.0  ;;  %5057 = vmatprep.subr.bf16.mxu0 %v6149_v54  ;;  %v6152_v61 = vld [vmem:[%s7959_s11 + $0x64] ss:$8 sps:$4 sm:$0xff]  }
 0x3b9   : > { %v4068_v7 = vmax.f32 %v3744_v63, 0.0  ;;  %v3127_v8 = vadd.f32 %v3126_v4, %v7155_v26  ;;  %v3746_v9 = vadd.f32 %v3745_v5, %v7360_v18  ;;  %3987 = vmatprep.mubr.bf16.mxu1 %v3376_v62  ;;  %v4767_v11 = vadd.f32 %v4766_v55, %v4067_v3  ;;  %5058 = vmatpush2.bf16.msra.mxu0 %v6147_v53 }
 0x3ba   : > { %v3128_v12 = vpop.f32.mrf.mxu0  ;;  %v3749_v14 = vpop.f32.mrf.mxu1  ;;  %3988 = vmatmul.mubr.bf16.gmra.mxu1 %v3375_v0  ;;  %v3294_v22 = vmax.f32 %v3125_v6, 0.0  ;;  %5286 = vmatprep.subr.bf16.mxu1 %v6152_v61 }
 0x3bb   : > { %v4683_v15 = vadd.f32 %v4682_v1, %v4068_v7  ;;  %v3129_v16 = vadd.f32 %v3128_v12, %v7152_v24  ;;  %v3295_v17 = vmax.f32 %v3127_v8, 0.0  ;;  %v4069_v19 = vmax.f32 %v3746_v9, 0.0 }
 0x3bc   : > { %v3750_v20 = vadd.f32 %v3749_v14, %v7355_v13  ;;  %v3132_v38 = vpop.f32.mrf.mxu0  ;;  %v3751_v21 = vpop.f32.mrf.mxu1 }
 0x3bd   : > { %v3296_v23 = vmax.f32 %v3129_v16, 0.0  ;;  %v3752_v27 = vadd.f32 %v3751_v21, %v7360_v18  ;;  %v3377_v39 = vpack.c.bf16 %v3295_v17, %v3293_v25  ;;  %v4768_v40 = vadd.f32 %v4767_v11, %v4069_v19 }
 0x3be   : > { %v4070_v32 = vmax.f32 %v3750_v20, 0.0  ;;  %v3134_v29 = vpop.f32.mrf.mxu0  ;;  %v3753_v33 = vpop.f32.mrf.mxu1  ;;  %v3133_v46 = vadd.f32 %v3132_v38, %v7155_v26 }
 0x3bf   : > { %v3378_v36 = vpack.c.bf16 %v3296_v23, %v3294_v22  ;;  %v3754_v37 = vadd.f32 %v3753_v33, %v7355_v13  ;;  %v4071_v41 = vmax.f32 %v3752_v27, 0.0  ;;  %v3135_v44 = vadd.f32 %v3134_v29, %v7152_v24 }
 0x3c0   : > { %v4684_v35 = vadd.f32 %v4683_v15, %v4070_v32  ;;  %v3136_v42 = vpop.f32.mrf.mxu0  ;;  %v3755_v43 = vpop.f32.mrf.mxu1  ;;  %v3297_v62 = vmax.f32 %v3133_v46, 0.0  ;;  %v6155_v46 = vld [vmem:[%s7957_s9 + $0xb4] ss:$8 sps:$4 sm:$0xff]  }
 0x3c1   : > { %v4072_v34 = vmax.f32 %v3754_v37, 0.0  ;;  %v3137_v2 = vadd.f32 %v3136_v42, %v7155_v26  ;;  %v3756_v45 = vadd.f32 %v3755_v43, %v7360_v18  ;;  %3997 = vmatprep.mubr.bf16.mxu1 %v3378_v36  ;;  %v4769_v47 = vadd.f32 %v4768_v40, %v4071_v41  ;;  %5059 = vmatprep.subr.bf16.mxu0 %v6155_v46 }
 0x3c2   : > { %v3138_v48 = vpop.f32.mrf.mxu0  ;;  %v3759_v49 = vpop.f32.mrf.mxu1  ;;  %3998 = vmatmul.mubr.bf16.gmra.mxu1 %v3377_v39  ;;  %v3298_v57 = vmax.f32 %v3135_v44, 0.0 }
 0x3c3   : > { %v4685_v50 = vadd.f32 %v4684_v35, %v4072_v34  ;;  %v4073_v51 = vmax.f32 %v3756_v45, 0.0  ;;  %v3139_v52 = vadd.f32 %v3138_v48, %v7152_v24  ;;  %v3299_v55 = vmax.f32 %v3137_v2, 0.0  ;;  %v6150_v24 = vld [vmem:[%s7959_s11 + $0x60] ss:$8 sps:$4 sm:$0xff]   ;;  %v6153_v45 = vld [vmem:[%s7957_s9 + $0xb0] ss:$8 sps:$4 sm:$0xff]  }
 0x3c4   : > { %v3760_v56 = vadd.f32 %v3759_v49, %v7355_v13  ;;  %v3761_v26 = vpop.f32.mrf.mxu1  ;;  %5287 = vmatpush1.bf16.msra.mxu1 %v6150_v24  ;;  %5060 = vmatpush2.bf16.msra.mxu0 %v6153_v45 }
 0x3c5   : > { %v4770_v58 = vadd.f32 %v4769_v47, %v4073_v51  ;;  %v3300_v59 = vmax.f32 %v3139_v52, 0.0  ;;  %v3762_v60 = vadd.f32 %v3761_v26, %v7360_v18  ;;  %v3379_v5 = vpack.c.bf16 %v3299_v55, %v3297_v62  ;;  %v6156_v51 = vld [vmem:[%s7959_s11 + $0x50] ss:$8 sps:$4 sm:$0xff]   ;;  %v6158_v52 = vld [vmem:[%s7959_s11 + $0x54] ss:$8 sps:$4 sm:$0xff]  }
 0x3c6   : > { %v4074_v63 = vmax.f32 %v3760_v56, 0.0  ;;  %v3763_v0 = vpop.f32.mrf.mxu1  ;;  %5288 = vmatprep.subr.bf16.mxu1 %v6158_v52 }
 0x3c7   : > { %v3380_v1 = vpack.c.bf16 %v3300_v59, %v3298_v57  ;;  %v4075_v3 = vmax.f32 %v3762_v60, 0.0  ;;  %v3764_v4 = vadd.f32 %v3763_v0, %v7355_v13 }
 0x3c8   : > { %v4686_v6 = vadd.f32 %v4685_v50, %v4074_v63  ;;  %v3765_v7 = vpop.f32.mrf.mxu1  ;;  %5289 = vmatpush1.bf16.msra.mxu1 %v6156_v51 }
 0x3c9   : > { %v4771_v8 = vadd.f32 %v4770_v58, %v4075_v3  ;;  %v4076_v9 = vmax.f32 %v3764_v4, 0.0  ;;  %v3766_v10 = vadd.f32 %v3765_v7, %v7360_v18  ;;  %4007 = vmatprep.mubr.bf16.mxu1 %v3380_v1 }
 0x3ca   : > { %v3769_v11 = vpop.f32.mrf.mxu1  ;;  %4008 = vmatmul.mubr.bf16.gmra.mxu1 %v3379_v5 }
 0x3cb   : > { %v4687_v12 = vadd.f32 %v4686_v6, %v4076_v9  ;;  %v4077_v14 = vmax.f32 %v3766_v10, 0.0  ;;  %v3770_v15 = vadd.f32 %v3769_v11, %v7355_v13 }
 0x3cc   : > { %v3771_v16 = vpop.f32.mrf.mxu1 }
 0x3cd   : > { %v4772_v17 = vadd.f32 %v4771_v8, %v4077_v14  ;;  %v4078_v19 = vmax.f32 %v3770_v15, 0.0  ;;  %v3772_v20 = vadd.f32 %v3771_v16, %v7360_v18 }
 0x3ce   : > { %v3773_v38 = vpop.f32.mrf.mxu1 }
 0x3cf   : > { %v4688_v21 = vadd.f32 %v4687_v12, %v4078_v19  ;;  %v4079_v22 = vmax.f32 %v3772_v20, 0.0  ;;  %v3774_v23 = vadd.f32 %v3773_v38, %v7355_v13 }
 0x3d0   : > { %v3775_v25 = vpop.f32.mrf.mxu1 }
 0x3d1   : > { %v4773_v32 = vadd.f32 %v4772_v17, %v4079_v22  ;;  %v4080_v27 = vmax.f32 %v3774_v23, 0.0  ;;  %v3776_v29 = vadd.f32 %v3775_v25, %v7360_v18 }
 0x3d2   : > { %v3779_v33 = vpop.f32.mrf.mxu1 }
 0x3d3   : > { %v4689_v36 = vadd.f32 %v4688_v21, %v4080_v27  ;;  %v4081_v37 = vmax.f32 %v3776_v29, 0.0  ;;  %v3780_v39 = vadd.f32 %v3779_v33, %v7355_v13  ;;  %v6161_v27 = vld [vmem:[%s7957_s9 + $0xa4] ss:$8 sps:$4 sm:$0xff]  }
 0x3d4   : > { %v3781_v40 = vpop.f32.mrf.mxu1  ;;  %5061 = vmatprep.subr.bf16.mxu0 %v6161_v27 }
 0x3d5   : > { %v4774_v35 = vadd.f32 %v4773_v32, %v4081_v37  ;;  %v4082_v41 = vmax.f32 %v3780_v39, 0.0  ;;  %v3782_v42 = vadd.f32 %v3781_v40, %v7360_v18  ;;  %v6159_v32 = vld [vmem:[%s7957_s9 + $0xa0] ss:$8 sps:$4 sm:$0xff]   ;;  %v6164_v40 = vld [vmem:[%s7959_s11 + $0x44] ss:$8 sps:$4 sm:$0xff]  }
 0x3d6   : > { %v3783_v43 = vpop.f32.mrf.mxu1  ;;  %v6162_v39 = vld [vmem:[%s7959_s11 + $0x40] ss:$8 sps:$4 sm:$0xff]   ;;  %5062 = vmatpush2.bf16.msra.mxu0 %v6159_v32  ;;  %5290 = vmatprep.subr.bf16.mxu1 %v6164_v40 }
 0x3d7   : > { %v4690_v44 = vadd.f32 %v4689_v36, %v4082_v41  ;;  %v4083_v34 = vmax.f32 %v3782_v42, 0.0  ;;  %v3784_v2 = vadd.f32 %v3783_v43, %v7355_v13  ;;  %5291 = vmatpush1.bf16.msra.mxu1 %v6162_v39 }
 0x3d8   : > { %v3785_v47 = vpop.f32.mrf.mxu1 }
 0x3d9   : > { %v4775_v48 = vadd.f32 %v4774_v35, %v4083_v34  ;;  %v4084_v49 = vmax.f32 %v3784_v2, 0.0  ;;  %v3786_v50 = vadd.f32 %v3785_v47, %v7360_v18 }
 0x3da   : > { %v3789_v53 = vpop.f32.mrf.mxu1 }
 0x3db   : > { %v4691_v54 = vadd.f32 %v4690_v44, %v4084_v49  ;;  %v4085_v55 = vmax.f32 %v3786_v50, 0.0  ;;  %v3790_v56 = vadd.f32 %v3789_v53, %v7355_v13 }
 0x3dc   : > { %v3791_v26 = vpop.f32.mrf.mxu1 }
 0x3dd   : > { %v4776_v57 = vadd.f32 %v4775_v48, %v4085_v55  ;;  %v4086_v58 = vmax.f32 %v3790_v56, 0.0  ;;  %v3792_v59 = vadd.f32 %v3791_v26, %v7360_v18 }
 0x3de   : > { %v3793_v60 = vpop.f32.mrf.mxu1 }
 0x3df   : > { %v4692_v24 = vadd.f32 %v4691_v54, %v4086_v58  ;;  %v4087_v61 = vmax.f32 %v3792_v59, 0.0  ;;  %v3794_v62 = vadd.f32 %v3793_v60, %v7355_v13 }
 0x3e0   : > { %v3795_v63 = vpop.f32.mrf.mxu1 }
 0x3e1   : > { %v4777_v0 = vadd.f32 %v4776_v57, %v4087_v61  ;;  %v4088_v1 = vmax.f32 %v3794_v62, 0.0  ;;  %v3796_v3 = vadd.f32 %v3795_v63, %v7360_v18 }
 0x3e2   : > { %v3799_v4 = vpop.f32.mrf.mxu1 }
 0x3e3   : > { %v4693_v5 = vadd.f32 %v4692_v24, %v4088_v1  ;;  %v4089_v6 = vmax.f32 %v3796_v3, 0.0  ;;  %v3800_v7 = vadd.f32 %v3799_v4, %v7355_v13 }
 0x3e4   : > { %v3801_v8 = vpop.f32.mrf.mxu1 }
 0x3e5   : > { %v4778_v9 = vadd.f32 %v4777_v0, %v4089_v6  ;;  %v4090_v10 = vmax.f32 %v3800_v7, 0.0  ;;  %v3802_v11 = vadd.f32 %v3801_v8, %v7360_v18 }
 0x3e6   : > { %v3803_v12 = vpop.f32.mrf.mxu1 }
 0x3e7   : > { %v4694_v14 = vadd.f32 %v4693_v5, %v4090_v10  ;;  %v4091_v15 = vmax.f32 %v3802_v11, 0.0  ;;  %v3804_v16 = vadd.f32 %v3803_v12, %v7355_v13  ;;  %v6167_v10 = vld [vmem:[%s7957_s9 + $0x94] ss:$8 sps:$4 sm:$0xff]  }
 0x3e8   : > { %v3805_v17 = vpop.f32.mrf.mxu1  ;;  %5063 = vmatprep.subr.bf16.mxu0 %v6167_v10 }
 0x3e9   : > { %v4779_v19 = vadd.f32 %v4778_v9, %v4091_v15  ;;  %v4092_v20 = vmax.f32 %v3804_v16, 0.0  ;;  %v3806_v38 = vadd.f32 %v3805_v17, %v7360_v18  ;;  %v6165_v9 = vld [vmem:[%s7957_s9 + $0x90] ss:$8 sps:$4 sm:$0xff]   ;;  %v6170_v17 = vld [vmem:[%s7959_s11 + $0x34] ss:$8 sps:$4 sm:$0xff]  }
 0x3ea   : > { %v3809_v21 = vpop.f32.mrf.mxu1  ;;  %v6168_v16 = vld [vmem:[%s7959_s11 + $0x30] ss:$8 sps:$4 sm:$0xff]   ;;  %5064 = vmatpush2.bf16.msra.mxu0 %v6165_v9  ;;  %5292 = vmatprep.subr.bf16.mxu1 %v6170_v17  ;;  %v6182_v9 = vld [vmem:[%s7959_s11 + $0x4] ss:$8 sps:$4 sm:$0xff]  }
 0x3eb   : > { %v4695_v22 = vadd.f32 %v4694_v14, %v4092_v20  ;;  %v4093_v23 = vmax.f32 %v3806_v38, 0.0  ;;  %v3810_v25 = vadd.f32 %v3809_v21, %v7355_v13  ;;  %5293 = vmatpush1.bf16.msra.mxu1 %v6168_v16  ;;  %v6183_v16 = vld [vmem:[%s7959_s11 + $0xf0] ss:$8 sps:$4 sm:$0xff]   ;;  %v6188_v17 = vld [vmem:[%s7959_s11 + $0xe4] ss:$8 sps:$4 sm:$0xff]  }
 0x3ec   : > { %v3811_v29 = vpop.f32.mrf.mxu1 }
 0x3ed   : > { %v4780_v33 = vadd.f32 %v4779_v19, %v4093_v23  ;;  %v4094_v36 = vmax.f32 %v3810_v25, 0.0  ;;  %v3812_v37 = vadd.f32 %v3811_v29, %v7360_v18 }
 0x3ee   : > { %v3813_v35 = vpop.f32.mrf.mxu1 }
 0x3ef   : > { %v4696_v41 = vadd.f32 %v4695_v22, %v4094_v36  ;;  %v4095_v42 = vmax.f32 %v3812_v37, 0.0  ;;  %v3814_v43 = vadd.f32 %v3813_v35, %v7355_v13 }
 0x3f0   : > { %v3815_v44 = vpop.f32.mrf.mxu1 }
 0x3f1   : > { %v4781_v34 = vadd.f32 %v4780_v33, %v4095_v42  ;;  %v4096_v2 = vmax.f32 %v3814_v43, 0.0  ;;  %v3816_v45 = vadd.f32 %v3815_v44, %v7360_v18 }
 0x3f2   : > { %v3819_v46 = vpop.f32.mrf.mxu1 }
 0x3f3   : > { %v4697_v47 = vadd.f32 %v4696_v41, %v4096_v2  ;;  %v4097_v48 = vmax.f32 %v3816_v45, 0.0  ;;  %v3820_v49 = vadd.f32 %v3819_v46, %v7355_v13 }
 0x3f4   : > { %v3821_v50 = vpop.f32.mrf.mxu1 }
 0x3f5   : > { %v4782_v51 = vadd.f32 %v4781_v34, %v4097_v48  ;;  %v4098_v52 = vmax.f32 %v3820_v49, 0.0  ;;  %v3822_v53 = vadd.f32 %v3821_v50, %v7360_v18 }
 0x3f6   : > { %v3823_v54 = vpop.f32.mrf.mxu1 }
 0x3f7   : > { %v4698_v55 = vadd.f32 %v4697_v47, %v4098_v52  ;;  %v4099_v56 = vmax.f32 %v3822_v53, 0.0  ;;  %v3824_v26 = vadd.f32 %v3823_v54, %v7355_v13 }
 0x3f8   : > { %v3825_v57 = vpop.f32.mrf.mxu1 }
 0x3f9   : > { %v4783_v58 = vadd.f32 %v4782_v51, %v4099_v56  ;;  %v4100_v59 = vmax.f32 %v3824_v26, 0.0  ;;  %v3826_v60 = vadd.f32 %v3825_v57, %v7360_v18 }
 0x3fa   : > { %v3829_v24 = vpop.f32.mrf.mxu1 }
 0x3fb   : > { %v4699_v61 = vadd.f32 %v4698_v55, %v4100_v59  ;;  %v4101_v62 = vmax.f32 %v3826_v60, 0.0  ;;  %v3830_v63 = vadd.f32 %v3829_v24, %v7355_v13 }
 0x3fc   : > { %v3831_v0 = vpop.f32.mrf.mxu1 }
 0x3fd   : > { %v4784_v1 = vadd.f32 %v4783_v58, %v4101_v62  ;;  %v4102_v3 = vmax.f32 %v3830_v63, 0.0  ;;  %v3832_v4 = vadd.f32 %v3831_v0, %v7360_v18  ;;  %v6171_v63 = vld [vmem:[%s7957_s9 + $0x80] ss:$8 sps:$4 sm:$0xff]   ;;  %v6173_v0 = vld [vmem:[%s7957_s9 + $0x84] ss:$8 sps:$4 sm:$0xff]  }
 0x3fe   : > { %v3833_v5 = vpop.f32.mrf.mxu1  ;;  %5065 = vmatprep.subr.bf16.mxu0 %v6173_v0 }
 0x3ff   : > { %v4700_v6 = vadd.f32 %v4699_v61, %v4102_v3  ;;  %v4103_v7 = vmax.f32 %v3832_v4, 0.0  ;;  %v3834_v8 = vadd.f32 %v3833_v5, %v7355_v13  ;;  %v6176_v3 = vld [vmem:[%s7959_s11 + $0x24] ss:$8 sps:$4 sm:$0xff]   ;;  %5066 = vmatpush2.bf16.msra.mxu0 %v6171_v63 }
 0x400   : > { %v3835_v11 = vpop.f32.mrf.mxu1  ;;  %5294 = vmatprep.subr.bf16.mxu1 %v6176_v3 }
 0x401   : > { %v4785_v12 = vadd.f32 %v4784_v1, %v4103_v7  ;;  %v4104_v14 = vmax.f32 %v3834_v8, 0.0  ;;  %v3836_v15 = vadd.f32 %v3835_v11, %v7360_v18  ;;  %v6174_v1 = vld [vmem:[%s7959_s11 + $0x20] ss:$8 sps:$4 sm:$0xff]   ;;  %v6179_v7 = vld [vmem:[%s7959_s11 + $0x14] ss:$8 sps:$4 sm:$0xff]  }
 0x402   : > { %v3839_v19 = vpop.f32.mrf.mxu1  ;;  %5295 = vmatpush1.bf16.msra.mxu1 %v6174_v1  ;;  %v6180_v11 = vld [vmem:[%s7959_s11] ss:$8 sps:$4 sm:$0xff]  }
 0x403   : > { %v4701_v20 = vadd.f32 %v4700_v6, %v4104_v14  ;;  %v4105_v38 = vmax.f32 %v3836_v15, 0.0  ;;  %v3840_v21 = vadd.f32 %v3839_v19, %v7355_v13  ;;  %v6177_v6 = vld [vmem:[%s7959_s11 + $0x10] ss:$8 sps:$4 sm:$0xff]   ;;  %5296 = vmatprep.subr.bf16.mxu1 %v6179_v7 }
 0x404   : > { %v3841_v22 = vpop.f32.mrf.mxu1 }
 0x405   : > { %v4786_v23 = vadd.f32 %v4785_v12, %v4105_v38  ;;  %v4106_v25 = vmax.f32 %v3840_v21, 0.0  ;;  %v3842_v32 = vadd.f32 %v3841_v22, %v7360_v18  ;;  %v6185_v12 = vld [vmem:[%s7959_s11 + $0xf4] ss:$8 sps:$4 sm:$0xff]   ;;  %v6186_v38 = vld [vmem:[%s7959_s11 + $0xe0] ss:$8 sps:$4 sm:$0xff]  }
 0x406   : > { %v3843_v27 = vpop.f32.mrf.mxu1  ;;  %5297 = vmatpush1.bf16.msra.mxu1 %v6177_v6  ;;  %v6191_v21 = vld [vmem:[%s7959_s11 + $0xd4] ss:$8 sps:$4 sm:$0xff]  }
 0x407   : > { %v4702_v29 = vadd.f32 %v4701_v20, %v4106_v25  ;;  %v4107_v33 = vmax.f32 %v3842_v32, 0.0  ;;  %v3844_v36 = vadd.f32 %v3843_v27, %v7355_v13  ;;  %5298 = vmatprep.subr.bf16.mxu1 %v6182_v9  ;;  %v6189_v25 = vld [vmem:[%s7959_s11 + $0xd0] ss:$8 sps:$4 sm:$0xff]   ;;  %v6194_v32 = vld [vmem:[%s7959_s11 + $0xc4] ss:$8 sps:$4 sm:$0xff]  }
 0x408   : > { %v3845_v37 = vpop.f32.mrf.mxu1 }
 0x409   : > { %v4787_v39 = vadd.f32 %v4786_v23, %v4107_v33  ;;  %v4108_v40 = vmax.f32 %v3844_v36, 0.0  ;;  %v3846_v35 = vadd.f32 %v3845_v37, %v7360_v18  ;;  %v6192_v33 = vld [vmem:[%s7959_s11 + $0xc0] ss:$8 sps:$4 sm:$0xff]   ;;  %v6197_v36 = vld [vmem:[%s7959_s11 + $0xb4] ss:$8 sps:$4 sm:$0xff]  }
 0x40a   : > { %v3849_v41 = vpop.f32.mrf.mxu1  ;;  %5299 = vmatpush1.bf16.msra.mxu1 %v6180_v11 }
 0x40b   : > { %v4703_v42 = vadd.f32 %v4702_v29, %v4108_v40  ;;  %v4109_v43 = vmax.f32 %v3846_v35, 0.0  ;;  %v3850_v44 = vadd.f32 %v3849_v41, %v7355_v13  ;;  %5300 = vmatprep.subr.bf16.mxu1 %v6185_v12  ;;  %v6195_v40 = vld [vmem:[%s7959_s11 + $0xb0] ss:$8 sps:$4 sm:$0xff]   ;;  %v6200_v35 = vld [vmem:[%s7959_s11 + $0xa4] ss:$8 sps:$4 sm:$0xff]  }
 0x40c   : > { %v3851_v34 = vpop.f32.mrf.mxu1 }
 0x40d   : > { %v4788_v2 = vadd.f32 %v4787_v39, %v4109_v43  ;;  %v4110_v45 = vmax.f32 %v3850_v44, 0.0  ;;  %v3852_v46 = vadd.f32 %v3851_v34, %v7360_v18  ;;  %v6198_v43 = vld [vmem:[%s7959_s11 + $0xa0] ss:$8 sps:$4 sm:$0xff]   ;;  %v6203_v44 = vld [vmem:[%s7959_s11 + $0x94] ss:$8 sps:$4 sm:$0xff]  }
 0x40e   : > { %v3853_v47 = vpop.f32.mrf.mxu1  ;;  %5301 = vmatpush2.bf16.msra.mxu1 %v6183_v16 }
 0x40f   : > { %v4704_v48 = vadd.f32 %v4703_v42, %v4110_v45  ;;  %v4111_v49 = vmax.f32 %v3852_v46, 0.0  ;;  %v3854_v50 = vadd.f32 %v3853_v47, %v7355_v13  ;;  %5302 = vmatprep.subr.bf16.mxu1 %v6188_v17  ;;  %v6201_v45 = vld [vmem:[%s7959_s11 + $0x90] ss:$8 sps:$4 sm:$0xff]   ;;  %v6206_v46 = vld [vmem:[%s7959_s11 + $0x84] ss:$8 sps:$4 sm:$0xff]  }
 0x410   : > { %v7597_v51 = vpop.f32.mrf.mxu1 }
 0x411   : > { %v7599_v52 = vadd.f32 %v4788_v2, %v4111_v49  ;;  %v4112_v53 = vmax.f32 %v3854_v50, 0.0  ;;  %v6204_v50 = vld [vmem:[%s7959_s11 + $0x80] ss:$8 sps:$4 sm:$0xff]  }
 0x412   : > { %v3859_v54 = vpop.f32.mrf.mxu1  ;;  %5303 = vmatpush2.bf16.msra.mxu1 %v6186_v38 }
 0x413   : > { %v4705_v55 = vadd.f32 %v4704_v48, %v4112_v53  ;;  %v3860_v56 = vadd.f32 %v3859_v54, %v7355_v13  ;;  %5304 = vmatprep.subr.bf16.mxu1 %v6191_v21  ;;  %v3856_v48 = vadd.f32 %v7597_v51, %v7360_v18 }
 0x414   : > { %v7602_v26 = vpop.f32.mrf.mxu1 }
 0x415   : > { %v4114_v57 = vmax.f32 %v3860_v56, 0.0  ;;  %v3862_v53 = vadd.f32 %v7602_v26, %v7360_v18  ;;  %v4113_v56 = vmax.f32 %v3856_v48, 0.0 }
 0x416   : > { %v7604_v58 = vpop.f32.mrf.mxu1  ;;  %5305 = vmatpush2.bf16.msra.mxu1 %v6189_v25 }
 0x417   : > { %v7606_v59 = vadd.f32 %v4705_v55, %v4114_v57  ;;  %5306 = vmatprep.subr.bf16.mxu1 %v6194_v32  ;;  %v3864_v54 = vadd.f32 %v7604_v58, %v7355_v13  ;;  %v4115_v0 = vmax.f32 %v3862_v53, 0.0  ;;  %v4790_v6 = vadd.f32 %v7599_v52, %v4113_v56 }
 0x418   : > { %v7608_v60 = vpop.f32.mrf.mxu1 }
 0x419   : > { %v3866_v51 = vadd.f32 %v7608_v60, %v7360_v18  ;;  %v4116_v1 = vmax.f32 %v3864_v54, 0.0  ;;  %v4791_v12 = vadd.f32 %v4790_v6, %v4115_v0 }
 0x41a   : > { %v7610_v24 = vpop.f32.mrf.mxu1  ;;  %5307 = vmatpush2.bf16.msra.mxu1 %v6192_v33 }
 0x41b   : > { %5308 = vmatprep.subr.bf16.mxu1 %v6197_v36  ;;  %v3870_v57 = vadd.f32 %v7610_v24, %v7355_v13  ;;  %v4117_v7 = vmax.f32 %v3866_v51, 0.0 }
 0x41c   : > { %v7612_v61 = vpop.f32.mrf.mxu1 }
 0x41d   : > { %v3872_v26 = vadd.f32 %v7612_v61, %v7360_v18  ;;  %v4118_v60 = vmax.f32 %v3870_v57, 0.0  ;;  %v4707_v61 = vadd.f32 %v7606_v59, %v4116_v1  ;;  %v4792_v21 = vadd.f32 %v4791_v12, %v4117_v7 }
 0x41e   : > { %v7614_v62 = vpop.f32.mrf.mxu1  ;;  %5309 = vmatpush2.bf16.msra.mxu1 %v6195_v40 }
 0x41f   : > { %5310 = vmatprep.subr.bf16.mxu1 %v6200_v35  ;;  %v3874_v58 = vadd.f32 %v7614_v62, %v7355_v13  ;;  %v4119_v16 = vmax.f32 %v3872_v26, 0.0 }
 0x420   : > { %v7628_v4 = vpop.f32.mrf.mxu1 }
 0x421   : > { %v3876_v24 = vadd.f32 %v7628_v4, %v7360_v18  ;;  %v4120_v17 = vmax.f32 %v3874_v58, 0.0  ;;  %v4708_v4 = vadd.f32 %v4707_v61, %v4118_v60  ;;  %v4793_v36 = vadd.f32 %v4792_v21, %v4119_v16 }
 0x422   : > { %v7630_v5 = vpop.f32.mrf.mxu1  ;;  %5311 = vmatpush2.bf16.msra.mxu1 %v6198_v43 }
 0x423   : > { %5312 = vmatprep.subr.bf16.mxu1 %v6203_v44  ;;  %v3880_v9 = vadd.f32 %v7630_v5, %v7355_v13  ;;  %v4121_v25 = vmax.f32 %v3876_v24, 0.0  ;;  %v4709_v40 = vadd.f32 %v4708_v4, %v4120_v17 }
 0x424   : > { %v7638_v8 = vpop.f32.mrf.mxu1 }
 0x425   : > { %v3882_v62 = vadd.f32 %v7638_v8, %v7360_v18  ;;  %v4122_v32 = vmax.f32 %v3880_v9, 0.0 }
 0x426   : > { %v7643_v10 = vpop.f32.mrf.mxu1  ;;  %5313 = vmatpush2.bf16.msra.mxu1 %v6201_v45  ;;  %v4794_v45 = vadd.f32 %v4793_v36, %v4121_v25 }
 0x427   : > { %5314 = vmatprep.subr.bf16.mxu1 %v6206_v46  ;;  %v3884_v52 = vadd.f32 %v7643_v10, %v7355_v13  ;;  %v4123_v8 = vmax.f32 %v3882_v62, 0.0  ;;  %v4710_v46 = vadd.f32 %v4709_v40, %v4122_v32 }
 0x428   : > { %v7651_v14 = vpop.f32.mrf.mxu1 }
 0x429   : > { %v3886_v33 = vadd.f32 %v7651_v14, %v7360_v18  ;;  %v4124_v43 = vmax.f32 %v3884_v52, 0.0  ;;  %v4795_v54 = vadd.f32 %v4794_v45, %v4123_v8 }
 0x42a   : > { %v7653_v15 = vpop.f32.mrf.mxu1  ;;  %5315 = vmatpush2.bf16.msra.mxu1 %v6204_v50 }
 0x42b   : > { %v3890_v59 = vadd.f32 %v7653_v15, %v7355_v13  ;;  %v4125_v14 = vmax.f32 %v3886_v33, 0.0  ;;  %v4711_v51 = vadd.f32 %v4710_v46, %v4124_v43 }
 0x42c   : > { %v7661_v19 = vpop.f32.mrf.mxu1 }
 0x42d   : > { %v3892_v10 = vadd.f32 %v7661_v19, %v7360_v18  ;;  %v4126_v50 = vmax.f32 %v3890_v59, 0.0  ;;  %v4796_v26 = vadd.f32 %v4795_v54, %v4125_v14 }
 0x42e   : > { %v7663_v20 = vpop.f32.mrf.mxu1 }
 0x42f   : > { %v3894_v44 = vadd.f32 %v7663_v20, %v7355_v13  ;;  %v4127_v19 = vmax.f32 %v3892_v10, 0.0  ;;  %v4712_v58 = vadd.f32 %v4711_v51, %v4126_v50 }
 0x430   : > { %v7671_v22 = vpop.f32.mrf.mxu1 }
 0x431   : > { %v3896_v15 = vadd.f32 %v7671_v22, %v7360_v18  ;;  %v4128_v57 = vmax.f32 %v3894_v44, 0.0  ;;  %v4797_v24 = vadd.f32 %v4796_v26, %v4127_v19 }
 0x432   : > { %v7673_v23 = vpop.f32.mrf.mxu1 }
 0x433   : > { %v3900_v53 = vadd.f32 %v7673_v23, %v7355_v13  ;;  %v4129_v22 = vmax.f32 %v3896_v15, 0.0  ;;  %v4713_v9 = vadd.f32 %v4712_v58, %v4128_v57 }
 0x434   : > { %v7681_v27 = vpop.f32.mrf.mxu1 }
 0x435   : > { %v3902_v20 = vadd.f32 %v7681_v27, %v7360_v18  ;;  %v4130_v6 = vmax.f32 %v3900_v53, 0.0  ;;  %v4798_v17 = vadd.f32 %v4797_v24, %v4129_v22 }
 0x436   : > { %v7683_v29 = vpop.f32.mrf.mxu1 }
 0x437   : > { %v3904_v0 = vadd.f32 %v7683_v29, %v7355_v13  ;;  %v4131_v12 = vmax.f32 %v3902_v20, 0.0  ;;  %v4714_v62 = vadd.f32 %v4713_v9, %v4130_v6 }
 0x438   : > { %v7691_v37 = vpop.f32.mrf.mxu1 }
 0x439   : > { %v3906_v23 = vadd.f32 %v7691_v37, %v7360_v18  ;;  %v4132_v27 = vmax.f32 %v3904_v0, 0.0  ;;  %v4799_v25 = vadd.f32 %v4798_v17, %v4131_v12 }
 0x43a   : > { %v7693_v39 = vpop.f32.mrf.mxu1 }
 0x43b   : > { %v3910_v7 = vadd.f32 %v7693_v39, %v7355_v13  ;;  %v4133_v52 = vmax.f32 %v3906_v23, 0.0  ;;  %v4715_v32 = vadd.f32 %v4714_v62, %v4132_v27 }
 0x43c   : > { %v7701_v41 = vpop.f32.mrf.mxu1 }
 0x43d   : > { %v3912_v29 = vadd.f32 %v7701_v41, %v7360_v18  ;;  %v4134_v21 = vmax.f32 %v3910_v7, 0.0  ;;  %v4800_v40 = vadd.f32 %v4799_v25, %v4133_v52 }
 0x43e   : > { %v7703_v42 = vpop.f32.mrf.mxu1 }
 0x43f   : > { %v3914_v61 = vadd.f32 %v7703_v42, %v7355_v13  ;;  %v4135_v33 = vmax.f32 %v3912_v29, 0.0  ;;  %v4716_v8 = vadd.f32 %v4715_v32, %v4134_v21 }
 0x440   : > { %v7711_v34 = vpop.f32.mrf.mxu1 }
 0x441   : > { %v3916_v37 = vadd.f32 %v7711_v34, %v7360_v18  ;;  %v4136_v59 = vmax.f32 %v3914_v61, 0.0  ;;  %v4801_v45 = vadd.f32 %v4800_v40, %v4135_v33 }
 0x442   : > { %v7713_v2 = vpop.f32.mrf.mxu1 }
 0x443   : > { %v3920_v39 = vadd.f32 %v7713_v2, %v7355_v13  ;;  %v4137_v43 = vmax.f32 %v3916_v37, 0.0  ;;  %v4717_v46 = vadd.f32 %v4716_v8, %v4136_v59 }
 0x444   : > { %v7721_v47 = vpop.f32.mrf.mxu1 }
 0x445   : > { %v3922_v41 = vadd.f32 %v7721_v47, %v7360_v18  ;;  %v4138_v10 = vmax.f32 %v3920_v39, 0.0  ;;  %v4802_v53 = vadd.f32 %v4801_v45, %v4137_v43 }
 0x446   : > { %v7725_v49 = vpop.f32.mrf.mxu1 }
 0x447   : > { %v3924_v36 = vadd.f32 %v7725_v49, %v7355_v13  ;;  %v4139_v14 = vmax.f32 %v3922_v41, 0.0  ;;  %v4718_v54 = vadd.f32 %v4717_v46, %v4138_v10 }
 0x448   : > { %v7734_v55 = vpop.f32.mrf.mxu1 }
 0x449   : > { %v3926_v2 = vadd.f32 %v7734_v55, %v7360_v18  ;;  %v4140_v47 = vmax.f32 %v3924_v36, 0.0  ;;  %v4803_v20 = vadd.f32 %v4802_v53, %v4139_v14 }
 0x44a   : > { %v7740_v63 = vpop.f32.mrf.mxu1 }
 0x44b   : > { %v3930_v44 = vadd.f32 %v7740_v63, %v7355_v13  ;;  %v4141_v19 = vmax.f32 %v3926_v2, 0.0  ;;  %v4719_v26 = vadd.f32 %v4718_v54, %v4140_v47 }
 0x44c   : > { %v7746_v3 = vpop.f32.mrf.mxu1 }
 0x44d   : > { %v3932_v15 = vadd.f32 %v7746_v3, %v7360_v18  ;;  %v4142_v57 = vmax.f32 %v3930_v44, 0.0  ;;  %v4804_v23 = vadd.f32 %v4803_v20, %v4141_v19 }
 0x44e   : > { %v7753_v11 = vpop.f32.mrf.mxu1 }
 0x44f   : > { %v3934_v49 = vadd.f32 %v7753_v11, %v7355_v13  ;;  %v4143_v58 = vmax.f32 %v3932_v15, 0.0  ;;  %v4720_v7 = vadd.f32 %v4719_v26, %v4142_v57 }
 0x450   : > { %v7758_v38 = vpop.f32.mrf.mxu1 }
 0x451   : > { %v3936_v55 = vadd.f32 %v7758_v38, %v7360_v18  ;;  %v4144_v22 = vmax.f32 %v3934_v49, 0.0  ;;  %v4805_v27 = vadd.f32 %v4804_v23, %v4143_v58 }
 0x452   : > { %v7762_v5 = vpop.f32.mrf.mxu1 }
 0x453   : > { %v3940_v63 = vadd.f32 %v7762_v5, %v7355_v13  ;;  %v4145_v24 = vmax.f32 %v3936_v55, 0.0  ;;  %v4721_v29 = vadd.f32 %v4720_v7, %v4144_v22 }
 0x454   : > { %v7768_v35 = vpop.f32.mrf.mxu1 }
 0x455   : > { %v3942_v3 = vadd.f32 %v7768_v35, %v7360_v18  ;;  %v4146_v9 = vmax.f32 %v3940_v63, 0.0  ;;  %v4806_v52 = vadd.f32 %v4805_v27, %v4145_v24 }
 0x456   : > { %v7774_v48 = vpop.f32.mrf.mxu1 }
 0x457   : > { %v3944_v11 = vadd.f32 %v7774_v48, %v7355_v13  ;;  %v4147_v61 = vmax.f32 %v3942_v3, 0.0  ;;  %v4722_v21 = vadd.f32 %v4721_v29, %v4146_v9 }
 0x458   : > { %v7780_v56 = vpop.f32.mrf.mxu1 }
 0x459   : > { %v3946_v38 = vadd.f32 %v7780_v56, %v7360_v18  ;;  %v4148_v17 = vmax.f32 %v3944_v11, 0.0 }
 0x45a   : > { %v7786_v1 = vpop.f32.mrf.mxu1 }
 0x45b   : > { %v3950_v5 = vadd.f32 %v7786_v1, %v7355_v13  ;;  %v4149_v37 = vmax.f32 %v3946_v38, 0.0  ;;  %v4807_v1 = vadd.f32 %v4806_v52, %v4147_v61  ;;  %v4723_v33 = vadd.f32 %v4722_v21, %v4148_v17 }
 0x45c   : > { %v3951_v60 = vpop.f32.mrf.mxu1 }
 0x45d   : > { %v3952_v35 = vadd.f32 %v3951_v60, %v7360_v18  ;;  %v4150_v39 = vmax.f32 %v3950_v5, 0.0 }
 0x45e   : > { %v3953_v16 = vpop.f32.mrf.mxu1 }
 0x45f   : > { %v3954_v48 = vadd.f32 %v3953_v16, %v7355_v13  ;;  %v4151_v59 = vmax.f32 %v3952_v35, 0.0  ;;  %v4808_v16 = vadd.f32 %v4807_v1, %v4149_v37  ;;  %v4724_v8 = vadd.f32 %v4723_v33, %v4150_v39 }
 0x460   : > { %v3955_v4 = vpop.f32.mrf.mxu1 }
 0x461   : > { %v3956_v25 = vadd.f32 %v3955_v4, %v7360_v18  ;;  %v4152_v41 = vmax.f32 %v3954_v48, 0.0 }
 0x462   : > { %v3959_v42 = vpop.f32.mrf.mxu1 }
 0x463   : > { %v3960_v56 = vadd.f32 %v3959_v42, %v7355_v13  ;;  %v4153_v43 = vmax.f32 %v3956_v25, 0.0  ;;  %v4809_v42 = vadd.f32 %v4808_v16, %v4151_v59  ;;  %v4725_v45 = vadd.f32 %v4724_v8, %v4152_v41 }
 0x464   : > { %v3961_v34 = vpop.f32.mrf.mxu1 }
 0x465   : > { %v3962_v36 = vadd.f32 %v3961_v34, %v7360_v18  ;;  %v4154_v10 = vmax.f32 %v3960_v56, 0.0  ;;  %v4810_v49 = vadd.f32 %v4809_v42, %v4153_v43 }
 0x466   : > { %v3963_v50 = vpop.f32.mrf.mxu1 }
 0x467   : > { %v3964_v60 = vadd.f32 %v3963_v50, %v7355_v13  ;;  %v4155_v46 = vmax.f32 %v3962_v36, 0.0  ;;  %v4726_v50 = vadd.f32 %v4725_v45, %v4154_v10 }
 0x468   : > { %v3965_v51 = vpop.f32.mrf.mxu1 }
 0x469   : > { %v3966_v44 = vadd.f32 %v3965_v51, %v7360_v18  ;;  %v4156_v47 = vmax.f32 %v3964_v60, 0.0  ;;  %v4811_v55 = vadd.f32 %v4810_v49, %v4155_v46 }
 0x46a   : > { %v3969_v0 = vpop.f32.mrf.mxu1 }
 0x46b   : > { %v3970_v4 = vadd.f32 %v3969_v0, %v7355_v13  ;;  %v4157_v54 = vmax.f32 %v3966_v44, 0.0  ;;  %v4727_v20 = vadd.f32 %v4726_v50, %v4156_v47 }
 0x46c   : > { %v3971_v6 = vpop.f32.mrf.mxu1 }
 0x46d   : > { %v3972_v15 = vadd.f32 %v3971_v6, %v7360_v18  ;;  %v4158_v19 = vmax.f32 %v3970_v4, 0.0  ;;  %v4812_v11 = vadd.f32 %v4811_v55, %v4157_v54 }
 0x46e   : > { %v3973_v12 = vpop.f32.mrf.mxu1 }
 0x46f   : > { %v3974_v34 = vadd.f32 %v3973_v12, %v7355_v13  ;;  %v4159_v0 = vmax.f32 %v3972_v15, 0.0  ;;  %v4728_v6 = vadd.f32 %v4727_v20, %v4158_v19 }
 0x470   : > { %v3975_v62 = vpop.f32.mrf.mxu1 }
 0x471   : > { %v3976_v57 = vadd.f32 %v3975_v62, %v7360_v18  ;;  %v4160_v26 = vmax.f32 %v3974_v34, 0.0  ;;  %v4813_v5 = vadd.f32 %v4812_v11, %v4159_v0 }
 0x472   : > { %v3979_v32 = vpop.f32.mrf.mxu1 }
 0x473   : > { %v3980_v51 = vadd.f32 %v3979_v32, %v7355_v13  ;;  %v4161_v23 = vmax.f32 %v3976_v57, 0.0  ;;  %v4729_v12 = vadd.f32 %v4728_v6, %v4160_v26 }
 0x474   : > { %v3981_v40 = vpop.f32.mrf.mxu1 }
 0x475   : > { %v3982_v58 = vadd.f32 %v3981_v40, %v7360_v18  ;;  %v4162_v7 = vmax.f32 %v3980_v51, 0.0  ;;  %v4814_v48 = vadd.f32 %v4813_v5, %v4161_v23  ;;  %v4257_v40 = vadd.s32 624, %v6694_v28 }
 0x476   : > { %v3983_v2 = vpop.f32.mrf.mxu1 }
 0x477   : > { %v3984_v22 = vadd.f32 %v3983_v2, %v7355_v13  ;;  %v4163_v27 = vmax.f32 %v3982_v58, 0.0  ;;  %v4730_v62 = vadd.f32 %v4729_v12, %v4162_v7  ;;  %vm4337_vm1 = vcmp.lt.s32.totalorder %v4257_v40, 625 }
 0x478   : > { %v3985_v14 = vpop.f32.mrf.mxu1 }
 0x479   : > { %v3986_v24 = vadd.f32 %v3985_v14, %v7360_v18  ;;  %v4164_v29 = vmax.f32 %v3984_v22, 0.0  ;;  %v4815_v56 = vadd.f32 %v4814_v48, %v4163_v27  ;;  %v6207_v27 = vld [vmem:[%s7961_s13 + $0x78] sm:$0xff]   ;;  %v6212_v48 = vld [vmem:[%s7961_s13 + $0x28] sm:$0xff]  }
 0x47a   : > { %v3989_v53 = vpop.f32.mrf.mxu1  ;;  %5852 = vmatprep.subr.bf16.mxu0 %v6207_v27 }
 0x47b   : > { %v3990_v9 = vadd.f32 %v3989_v53, %v7355_v13  ;;  %v4165_v52 = vmax.f32 %v3986_v24, 0.0  ;;  %v4731_v32 = vadd.f32 %v4730_v62, %v4164_v29  ;;  %v6208_v29 = vld [vmem:[%s7961_s13 + $0x38] sm:$0xff]   ;;  %v6213_v62 = vld [vmem:[%s7961_s13 + $0x60] sm:$0xff]  }
 0x47c   : > { %v3991_v63 = vpop.f32.mrf.mxu1 }
 0x47d   : > { %v3992_v61 = vadd.f32 %v3991_v63, %v7360_v18  ;;  %v4166_v21 = vmax.f32 %v3990_v9, 0.0  ;;  %v4816_v60 = vadd.f32 %v4815_v56, %v4165_v52  ;;  %v6214_v52 = vld [vmem:[%s7961_s13 + $0x20] sm:$0xff]  }
 0x47e   : > { %v3993_v3 = vpop.f32.mrf.mxu1  ;;  %v4863_v56 = vld [vmem:[%s7958_s10] sm:$0x3] }
 0x47f   : > { %v3994_v17 = vadd.f32 %v3993_v3, %v7355_v13  ;;  %v4167_v1 = vmax.f32 %v3992_v61, 0.0  ;;  %v4732_v16 = vadd.f32 %v4731_v32, %v4166_v21  ;;  %v6209_v61 = vld [vmem:[%s7961_s13 + $0x70] sm:$0xff]   ;;  %v6215_v21 = vld [vmem:[%s7961_s13 + $0x58] sm:$0xff]   ;;  %v5028_v32 = vrot.slane %v4863_v56, %v6701_v31 }
 0x480   : > { %v3995_v38 = vpop.f32.mrf.mxu1 }
 0x481   : > { %v3996_v37 = vadd.f32 %v3995_v38, %v7360_v18  ;;  %v4168_v33 = vmax.f32 %v3994_v17, 0.0  ;;  %v4817_v44 = vadd.f32 %v4816_v60, %v4167_v1  ;;  %v6210_v17 = vld [vmem:[%s7961_s13 + $0x30] sm:$0xff]   ;;  %v5032_v1 = vrot.slane %v4863_v56, %v6698_v30 }
 0x482   : > { %v3999_v35 = vpop.f32.mrf.mxu1 }
 0x483   : > { %v4000_v39 = vadd.f32 %v3999_v35, %v7355_v13  ;;  %v4169_v8 = vmax.f32 %v3996_v37, 0.0  ;;  %v4733_v4 = vadd.f32 %v4732_v16, %v4168_v33  ;;  %v6211_v35 = vld [vmem:[%s7961_s13 + $0x68] sm:$0xff]   ;;  %v6216_v37 = vld [vmem:[%s7961_s13 + $0x18] sm:$0xff]  }
 0x484   : > { %v4001_v25 = vpop.f32.mrf.mxu1 }
 0x485   : > { %v4002_v59 = vadd.f32 %v4001_v25, %v7360_v18  ;;  %v4170_v43 = vmax.f32 %v4000_v39, 0.0  ;;  %v4818_v47 = vadd.f32 %v4817_v44, %v4169_v8  ;;  %v6217_v39 = vld [vmem:[%s7961_s13 + $0x50] sm:$0xff]   ;;  %v6220_v44 = vld [vmem:[%s7961_s13 + $0x8] sm:$0xff]  }
 0x486   : > { %v4003_v41 = vpop.f32.mrf.mxu1  ;;  %v6218_v25 = vld [vmem:[%s7961_s13 + $0x10] sm:$0xff]  }
 0x487   : > { %v4004_v36 = vadd.f32 %v4003_v41, %v7355_v13  ;;  %v4171_v42 = vmax.f32 %v4002_v59, 0.0  ;;  %v4734_v15 = vadd.f32 %v4733_v4, %v4170_v43  ;;  %v6221_v4 = vld [vmem:[%s7961_s13 + $0x40] sm:$0xff]  }
 0x488   : > { %v4005_v10 = vpop.f32.mrf.mxu1 }
 0x489   : > { %v4006_v2 = vadd.f32 %v4005_v10, %v7360_v18  ;;  %v4172_v45 = vmax.f32 %v4004_v36, 0.0  ;;  %v4819_v53 = vadd.f32 %v4818_v47, %v4171_v42  ;;  %v6222_v42 = vld [vmem:[%s7961_s13] sm:$0xff]  }
 0x48a   : > { %v4009_v46 = vpop.f32.mrf.mxu1 }
 0x48b   : > { %v4010_v14 = vadd.f32 %v4009_v46, %v7355_v13  ;;  %v4173_v34 = vmax.f32 %v4006_v2, 0.0  ;;  %v4735_v54 = vadd.f32 %v4734_v15, %v4172_v45  ;;  %v6219_v2 = vld [vmem:[%s7961_s13 + $0x48] sm:$0xff]   ;;  %v5112_v45 = vld [vmem:[%s7960_s12] sm:$0x3] }
 0x48c   : > { %v4011_v49 = vpop.f32.mrf.mxu1  ;;  %v5277_v46 = vrot.slane %v5112_v45, %v6701_v31  ;;  %v5361_v31 = vld [vmem:[%s7962_s14] sm:$0x1] }
 0x48d   : > { %v4174_v28 = vmax.f32 %v4010_v14, 0.0  ;;  %v4012_v50 = vadd.f32 %v4011_v49, %v7360_v18  ;;  %v4820_v55 = vadd.f32 %v4819_v53, %v4173_v34  ;;  %v5281_v14 = vrot.slane %v5112_v45, %v6698_v30 }
 0x48e   : > { %v4013_v19 = vpop.f32.mrf.mxu1 }
 0x48f   : > { %v4655_v57 = vsel %vm4337_vm1, %v4174_v28, 0.0  ;;  %v4175_v51 = vmax.f32 %v4012_v50, 0.0 }
 0x490   : > { %v4736_v63 = vadd.f32 %v4735_v54, %v4655_v57  ;;  %v4015_v20 = vpop.f32.mrf.mxu1 }
 0x491   : > { %v4656_v0 = vsel %vm4337_vm1, %v4175_v51, 0.0 }
 0x492   : > { %v4738_v26 = vrot.slane %v4736_v63, 4  ;;  %v4821_v58 = vadd.f32 %v4820_v55, %v4656_v0 }
 0x494   : > { %v4739_v13 = vadd.f32 %v4738_v26, %v4736_v63  ;;  %v4823_v22 = vrot.slane %v4821_v58, 4 }
 0x496   : > { %v4740_v3 = vrot.slane %v4739_v13, 2  ;;  %v4824_v11 = vadd.f32 %v4823_v22, %v4821_v58 }
 0x498   : > { %v4741_v6 = vadd.f32 %v4740_v3, %v4739_v13  ;;  %v4825_v23 = vrot.slane %v4824_v11, 2 }
 0x49a   : > { %v4742_v7 = vrot.slane %v4741_v6, 1  ;;  %v4826_v24 = vadd.f32 %v4825_v23, %v4824_v11 }
 0x49c   : > { %v4827_v18 = vrot.slane %v4826_v24, 1  ;;  %v4743_v9 = vadd.f32 %v4742_v7, %v4741_v6 }
 0x49e   : > { %v4828_v38 = vadd.f32 %v4827_v18, %v4826_v24  ;;  %v4829_v12 = vpack.c.bf16 %v4743_v9, %v4743_v9 }
 0x4a0   : > { %v4830_v5 = vpack.c.bf16 %v4828_v38, %v4828_v38 }
 0x4a2   : > { %5067 = vmatprep.mubr.bf16.mxu0 %v4830_v5 }
 0x4a3   : > { %5068 = vmatmul.mubr.bf16.vlgmr.msra.gmra.mxu0 %v4829_v12 }
 0x4a4   : > { %5853 = vmatpush3.bf16.msra.mxu0 %v6208_v29 }
 0x4a5   : > { %5854 = vmatprep.subr.bf16.mxu0 %v6209_v61 }
 0x4a8   : > { %5855 = vmatpush3.bf16.msra.mxu0 %v6210_v17 }
 0x4a9   : > { %5856 = vmatprep.subr.bf16.mxu0 %v6211_v35 }
 0x4ac   : > { %5857 = vmatpush3.bf16.msra.mxu0 %v6212_v48 }
 0x4ad   : > { %5858 = vmatprep.subr.bf16.mxu0 %v6213_v62 }
 0x4b0   : > { %5859 = vmatpush3.bf16.msra.mxu0 %v6214_v52 }
 0x4b1   : > { %5860 = vmatprep.subr.bf16.mxu0 %v6215_v21 }
 0x4b4   : > { %5861 = vmatpush3.bf16.msra.mxu0 %v6216_v37 }
 0x4b5   : > { %5862 = vmatprep.subr.bf16.mxu0 %v6217_v39 }
 0x4b8   : > { %5863 = vmatpush3.bf16.msra.mxu0 %v6218_v25 }
 0x4b9   : > { %5864 = vmatprep.subr.bf16.mxu0 %v6219_v2 }
 0x4bc   : > { %5865 = vmatpush3.bf16.msra.mxu0 %v6220_v44 }
 0x4bd   : > { %5866 = vmatprep.subr.bf16.mxu0 %v6221_v4 }
 0x4c0   : > { %5867 = vmatpush3.bf16.msra.mxu0 %v6222_v42 }
 0x563   : > { %v5069_v33 = vpop.f32.mrf.mxu0 }
 0x564   : > { %v5070_v59 = vadd.f32 %v5069_v33, %v5028_v32 }
 0x565   : > { %v5071_v41 = vpop.f32.mrf.mxu0 }
 0x566   : > { %v5072_v36 = vadd.f32 %v5071_v41, %v5032_v1  ;;  %v5076_v40 = vmax.f32 %v5070_v59, 0.0 }
 0x567   : > { %v5073_v60 = vpop.f32.mrf.mxu0 }
 0x568   : > { %v5077_v16 = vmax.f32 %v5072_v36, 0.0  ;;  %v5078_v10 = vpack.c.bf16 %v5076_v40, %v5076_v40 }
 0x569   : > { %v5074_v8 = vpop.f32.mrf.mxu0 }
 0x56a   : > { %v5079_v43 = vpack.c.bf16 %v5077_v16, %v5077_v16 }
 0x56c   : > { %5316 = vmatprep.mubr.bf16.mxu1 %v5079_v43 }
 0x56d   : > { %5317 = vmatmul.mubr.bf16.vlgmr.msra.gmra.mxu1 %v5078_v10 }
 0x62d   : > { %v5318_v47 = vpop.f32.mrf.mxu1 }
 0x62e   : > { %v5319_v15 = vadd.f32 %v5318_v47, %v5277_v46 }
 0x62f   : > { %v5320_v34 = vpop.f32.mrf.mxu1 }
 0x630   : > { %v5321_v49 = vadd.f32 %v5320_v34, %v5281_v14  ;;  %v5325_v28 = vmax.f32 %v5319_v15, 0.0 }
 0x631   : > { %v5322_v50 = vpop.f32.mrf.mxu1 }
 0x632   : > { %v5326_v53 = vmax.f32 %v5321_v49, 0.0  ;;  %v5327_v57 = vpack.c.bf16 %v5325_v28, %v5325_v28 }
 0x633   : > { %v5323_v54 = vpop.f32.mrf.mxu1 }
 0x634   : > { %v5328_v19 = vpack.c.bf16 %v5326_v53, %v5326_v53 }
 0x636   : > { %5490 = vmatprep.mubr.bf16.mxu0 %v5328_v19 }
 0x637   : > { %5491 = vmatmul.mubr.bf16.vlgmr.msra.gmra.mxu0 %v5327_v57 }
 0x6f7   : > { %v5868_v51 = vpop.f32.mrf.mxu0 }
 0x6f9   : > { %v5869_v55 = vpop.f32.mrf.mxu0 }
 0x6fa   : > { %v5870_v63 = vadd.f32 %v5869_v55, %v5868_v51 }
 0x6fb   : > { %v5871_v30 = vpop.f32.mrf.mxu0 }
 0x6fc   : > { %v5493_v20 = vadd.f32 %v5870_v63, %v5361_v31 }
 0x6fd   : > { %v5872_v0 = vpop.f32.mrf.mxu0 }
 0x6fe   : > { %v5499_v26 = vsel %vm5498_vm2, %v5493_v20, -inf }
 0x6ff   : > { %5500 = vmax.xlane.f32.xlu0 %v5499_v26 }
 0x788   : > { %v5501_v58 = vpop.xlane.xlu0 %5500 }
 0x789   : > { %v5502_v13 = vsub.f32 %v5493_v20, %v5501_v58 }
 0x78b   : > { %v5503_v22 = vmul.f32 1.442695, %v5502_v13 }
 0x78d   : > { %6223 = vpow2.f32 %v5503_v22 }
 0x79a   : > { %v6224_v3 = vpop.eup %6223 }
 0x79b   : > { %v5505_v11 = vsel %vm5498_vm2, %v6224_v3, 0.0 }
 0x79c   : > { %5506 = vadd.xlane.f32.xlu0 %v5505_v11 }
 0x825   : > { %v5507_v6 = vpop.xlane.xlu0 %5506 }
 0x826   : > { %6225 = vlog2.f32 %v5507_v6 }
 0x833   : > { %v6226_v23 = vpop.eup %6225 }
 0x834   : > { %v5509_v7 = vmul.f32 0.6931472, %v6226_v23 }
 0x836   : > { %v5510_v24 = vsub.f32 %v5502_v13, %v5509_v7 }
 0x838   : > { %5511 = vst.msk [vmem:[%s486_s27] sm:$0x1] %vm5498_vm2, %v5510_v24 }
 0x839   : > { %6240 = shalt.err (!%p6237_p3)
}
 0x83a   : > { %s6241_s29 = scalar_lea.hbm %s5523_s17, 16  ;;  %s6245_s27 = scalar_lea.hbm %s7963_s15, 32 }
 0x83b   : > { %p6242_p4 = scmp.ne.s32.totalorder %s5523_s17, %s6241_s29  ;;  %p6246_p9 = scmp.lt.s32.totalorder %s5523_s17, %s7963_s15 }
 0x83c   : > { %p6247_p10 = scmp.lt.s32.totalorder %s6245_s27, %s6241_s29 }
 0x83d   : > { %p6243_p7 = pnand %p6242_p4, %p6409_p5 }
 0x83e   : > { %p6248_p11 = por %p6247_p10, %p6246_p9 }
 0x83f   : > { %p6244_p8 = pneg %p6243_p7 }
 0x841   : > { %p6249_p12 = pnand %p6248_p11, %p6244_p8 }
 0x843   : > { %6252 = shalt.err (!%p6249_p12)
}
 0x844   : > { %5875 = dma.vmem_to_hbm [thread:$0]  (%p6409_p5), %s5526_s18, 16, %s5523_s17, %s5513_s23  }
 0x845 PF: > { %s7978_s25 = sld [smem:[#allocation5_spill]]  ;;  %p5881_p13 = scmp.ge.s32.totalorder %s6287_s21, 2 }
 0x847   : > { %p5878_p0 = pnand %p5881_p13, %p6413_p6 }
 0x849   : > { %p5879_p1 = pneg %p5878_p0 }
 0x84b   : > { %s5537_s20 = sand.u32 1, %s7978_s25  }
 0x84c   : > { %s5538_s22 = scalar_lea.sflag [#allocation3], %s5537_s20 }
 0x84d   : > { %6270 = dma.done.wait (%p5879_p1), %s5538_s22, 16  }
 0x84e   : > { %6272 = vsyncadd (%p5879_p1), %s5538_s22, 4294967280  ;;  %s7980_s21 = sld [smem:[#allocation7_spill]]  ;;  %s7983_s18 = smov %s6279_s19 }
 0x84f   : > { %s7981_s0 = sld [smem:[#allocation6_spill]] }
 0x850   : > { %s7982_s20 = sld [smem:[#allocation8_spill]] }
 0x854   : > { %p25_p2 = scmp.ge.s32.totalorder %s7980_s21, 4  }
 0x855   : > { %s7984_s19 = smov %s7981_s0 }
 0x856   :  { %27 = sbr.rel (!%p25_p2) target bundleno = 5 (0x5), region = 115 }
 0x85b   :  { %5542 = vsyncpa [#allocation3], 1 }
 0x85c   :  { %5544 = vsyncpa [#allocation3 + $0x1], 1 }

</bundles_post_ra>
